<compile_context>
chip_gen: v7x
topology: tpu7x:2x2x1
jax: 0.10.0
libtpu: 0.0.40
codegen_flags: <defaults>
</compile_context>

<pallas_src>
import jax
import jax.numpy as jnp
from jax.experimental import pallas as pl
from jax.experimental.pallas import tpu as pltpu

# ----- structural constants (match Net(...) defaults) -----
MID_CHANNEL = 32          # restormerdim / mid_channel
HIDDEN_DIM = 256          # hidden_dim (text / cross-attention embed dim)
I2T_DIM = 32              # image2text_dim
NUM_HEADS = 8             # heads for both Restormer blocks and MultiheadAttention
TEXT_IN_DIM = 768
INTERP_H, INTERP_W = 288, 384


def _round_up(x, m):
    return (x + m - 1) // m * m


# ======================= Pallas matmul(+bias) kernel =======================

def _matmul_bias_kernel(a_ref, b_ref, bias_ref, o_ref):
    acc = jnp.dot(a_ref[...], b_ref[...], preferred_element_type=jnp.float32)
    o_ref[...] = acc + bias_ref[...]


def matmul_bias(a, b, bias=None):
    """a: (M, K), b: (K, N), bias: (N,) or None -> (M, N) float32.

    bf16 operands on the MXU, f32 accumulation.  Padding / output slicing only
    happens when a dimension is genuinely ragged.  For N <= 512 the whole
    weight is one block (index map constant over the grid) so it is DMA'd into
    VMEM once and stays resident while the M blocks stream past it.
    """
    M, K = a.shape
    K2, N = b.shape
    assert K == K2

    if M > 256:
        TM = 256                       # fills the 256x256 MXU on v6e/v7x
        Mp = _round_up(M, TM)
    else:
        Mp = _round_up(M, 8)
        TM = Mp
    Kp = _round_up(K, 128)
    if N <= 512:
        Np = _round_up(N, 128)
        TN = Np                        # single resident weight block
    else:
        Np = _round_up(N, 256)
        TN = 256

    a_bf = a.astype(jnp.bfloat16)
    b_bf = b.astype(jnp.bfloat16)
    if (Mp, Kp) != (M, K):
        a_bf = jnp.zeros((Mp, Kp), jnp.bfloat16).at[:M, :K].set(a_bf)
    if (Kp, Np) != (K, N):
        b_bf = jnp.zeros((Kp, Np), jnp.bfloat16).at[:K, :N].set(b_bf)
    if bias is None:
        bias_p = jnp.zeros((1, Np), jnp.float32)
    else:
        bias_p = bias.astype(jnp.float32).reshape(1, N)
        if Np != N:
            bias_p = jnp.zeros((1, Np), jnp.float32).at[:, :N].set(bias_p)

    out = pl.pallas_call(
        _matmul_bias_kernel,
        out_shape=jax.ShapeDtypeStruct((Mp, Np), jnp.float32),
        grid_spec=pltpu.PrefetchScalarGridSpec(
            num_scalar_prefetch=0,
            grid=(Mp // TM, Np // TN),
            in_specs=[
                pl.BlockSpec((TM, Kp), lambda i, j: (i, 0)),
                pl.BlockSpec((Kp, TN), lambda i, j: (0, j)),
                pl.BlockSpec((1, TN), lambda i, j: (0, j)),
            ],
            out_specs=pl.BlockSpec((TM, TN), lambda i, j: (i, j)),
        ),
        compiler_params=pltpu.CompilerParams(
            dimension_semantics=("parallel", "parallel")),
    )(a_bf, b_bf, bias_p)
    if (Mp, Np) != (M, N):
        out = out[:M, :N]
    return out


# ======================= fused cross attention =======================

def fused_cross_attention(query, it_tok, p):
    """nn.MultiheadAttention(E=256, 8 heads): query = text (B, L, E),
    key = value = it_tok (B, S, E) (the raw image-token slab, bf16).

    Algebraic hoists so the kernel streams `it_tok` exactly once:
      * q . (Wk it)      == (q Wk) . it       -> Wk folded into the tiny query,
      * sum_k p (it Wv)  == (sum_k p it) Wv   -> Wv applied after the weighted sum,
      * the key bias shifts every score of a query row by the same constant, so
        softmax is exactly invariant to it and it is dropped,
      * the value bias contributes exactly +bv (sum p = 1) and is added afterwards.
    Heads are packed as rows (row = l*heads + h holds head h's folded query), so
    every in-kernel matmul is a dense 256-lane MXU op with no per-head slicing.
    """
    B, L, E = query.shape
    S = it_tok.shape[1]
    hd = E // NUM_HEADS
    R = L * NUM_HEADS
    w_in, b_in = p['in_w'], p['in_b']
    wq, wk, wv = w_in[:E], w_in[E:2 * E], w_in[2 * E:]
    bq, bv = b_in[:E], b_in[2 * E:]

    q = matmul_bias(query.reshape(-1, E), wq.T, bq).reshape(B, L, E)
    q = q * (float(hd) ** -0.5)
    qh = q.reshape(B, L, NUM_HEADS, hd)
    # fold the K projection: row (l, h) uses the head-h rows of Wk
    qk = jnp.einsum('blhd,hdi->blhi', qh, wk.reshape(NUM_HEADS, hd, E))
    qk_big = qk.reshape(B, R, E).astype(jnp.bfloat16)

    TS = 1536                                # divides 32*288*384/256 = 13824 exactly
    Sp = _round_up(S, TS)
    nkv = Sp // TS
    it_p = it_tok if Sp == S else (
        jnp.zeros((B, Sp, E), it_tok.dtype).at[:, :S].set(it_tok))
    masked = Sp != S                         # compiled out in this network

    def kernel(q_ref, it_ref, o_ref, m_sc, l_sc, acc_sc):
        kv = pl.program_id(1)

        @pl.when(kv == 0)
        def _():
            m_sc[...] = jnp.full_like(m_sc, -jnp.inf)
            l_sc[...] = jnp.zeros_like(l_sc)
            acc_sc[...] = jnp.zeros_like(acc_sc)

        it_c = it_ref[0]                                           # (TS, E) bf16
        s = jnp.einsum('re,ke->rk', q_ref[0], it_c,
                       preferred_element_type=jnp.float32)         # (R, TS)
        if masked:  # statically removed when S is a multiple of TS
            pos = kv * TS + jax.lax.broadcasted_iota(jnp.int32, s.shape, 1)
            s = jnp.where(pos < S, s, -jnp.inf)
        m_new = jnp.maximum(m_sc[...], s.max(axis=-1, keepdims=True))
        alpha = jnp.exp(m_sc[...] - m_new)
        pmat = jnp.exp(s - m_new)
        l_sc[...] = alpha * l_sc[...] + pmat.sum(axis=-1, keepdims=True)
        acc_sc[...] = alpha * acc_sc[...] + jnp.dot(
            pmat.astype(jnp.bfloat16), it_c, preferred_element_type=jnp.float32)
        m_sc[...] = m_new

        @pl.when(kv == nkv - 1)
        def _():
            o_ref[0] = acc_sc[...] * pl.reciprocal(l_sc[...], approx=True)

    a_norm = pl.pallas_call(
        kernel,
        out_shape=jax.ShapeDtypeStruct((B, R, E), jnp.float32),
        grid_spec=pltpu.PrefetchScalarGridSpec(
            num_scalar_prefetch=0,
            grid=(B, nkv),
            in_specs=[
                pl.BlockSpec((1, R, E), lambda b, kv: (b, 0, 0)),
                pl.BlockSpec((1, TS, E), lambda b, kv: (b, kv, 0)),
            ],
            out_specs=pl.BlockSpec((1, R, E), lambda b, kv: (b, 0, 0)),
            scratch_shapes=[
                pltpu.VMEM((R, 1), jnp.float32),
                pltpu.VMEM((R, 1), jnp.float32),
                pltpu.VMEM((R, E), jnp.float32),
            ],
        ),
        compiler_params=pltpu.CompilerParams(
            dimension_semantics=("parallel", "arbitrary")),
    )(qk_big, it_p)

    # V projection (+ bias) on the softmax-weighted raw rows, then keep each
    # row's own head block: row (l, h) -> columns [h*hd, (h+1)*hd), concat heads.
    v_proj = matmul_bias(a_norm.reshape(B * R, E), wv.T, bv)
    v_proj = v_proj.reshape(B, L, NUM_HEADS, NUM_HEADS, hd)
    eye = jnp.eye(NUM_HEADS, dtype=jnp.float32)
    o = jnp.einsum('blhgd,hg->blhd', v_proj, eye).reshape(B, L, E)
    o = matmul_bias(o.reshape(-1, E), p['out_w'].T, p['out_b']).reshape(B, L, E)
    return o


# ======================= conv / elementwise glue (plain JAX feeding Pallas matmuls) =======================

def conv1x1(x, w, bias=None):
    b, C, H, W = x.shape
    cout = w.shape[0]
    y = matmul_bias(x.transpose(0, 2, 3, 1).reshape(-1, C), w.reshape(cout, C).T, bias)
    return y.reshape(b, H, W, cout).transpose(0, 3, 1, 2)


def conv3x3(x, w, bias=None):
    # 3x3 conv, stride 1, pad 1 -> im2col (JAX glue) + Pallas matmul
    b, cin, H, W = x.shape
    cout = w.shape[0]
    xp = jnp.pad(x, ((0, 0), (0, 0), (1, 1), (1, 1)))
    patches = [xp[:, :, dy:dy + H, dx:dx + W] for dy in range(3) for dx in range(3)]
    col = jnp.stack(patches, axis=2)                         # (b, cin, 9, H, W)
    col = col.transpose(0, 3, 4, 1, 2).reshape(b * H * W, cin * 9)
    y = matmul_bias(col, w.reshape(cout, cin * 9).T, bias)
    return y.reshape(b, H, W, cout).transpose(0, 3, 1, 2)


def dwconv3x3(x, w):
    # depthwise 3x3 (groups=C), no bias; w: (C, 1, 3, 3)
    b, C, H, W = x.shape
    xp = jnp.pad(x, ((0, 0), (0, 0), (1, 1), (1, 1)))
    out = jnp.zeros_like(x)
    for dy in range(3):
        for dx in range(3):
            out = out + xp[:, :, dy:dy + H, dx:dx + W] * w[:, 0, dy, dx].reshape(1, C, 1, 1)
    return out


def prelu(x, a):
    return jnp.where(x >= 0, x, a * x)


def interp_nearest(x, oh, ow):
    # PyTorch F.interpolate(mode='nearest'): src = floor(dst * in/out)
    b, C, H, W = x.shape
    hi = jnp.clip(jnp.floor(jnp.arange(oh) * (H / oh)).astype(jnp.int32), 0, H - 1)
    wi = jnp.clip(jnp.floor(jnp.arange(ow) * (W / ow)).astype(jnp.int32), 0, W - 1)
    return x[:, :, hi][:, :, :, wi]


def layernorm_channel(x, w, bias):
    # Restormer 'WithBias' LayerNorm over the channel dim, per spatial location
    mu = jnp.mean(x, axis=1, keepdims=True)
    var = jnp.mean((x - mu) ** 2, axis=1, keepdims=True)
    return (x - mu) / jnp.sqrt(var + 1e-5) * w[None, :, None, None] + bias[None, :, None, None]


def _l2norm(t, eps=1e-12):
    n = jnp.sqrt(jnp.sum(t * t, axis=-1, keepdims=True))
    return t / jnp.maximum(n, eps)


# ======================= model blocks =======================

def restormer_fwd(x, p):
    # TODO(synk): the `Restormer` class is imported but not defined in net/Film.py;
    # this implements the canonical Restormer TransformerBlock (LN -> MDTA -> LN -> GDFN, bias=False).
    b, C, H, W = x.shape
    ch = C // NUM_HEADS
    # --- MDTA attention ---
    y = layernorm_channel(x, p['n1_w'], p['n1_b'])
    qkv = dwconv3x3(conv1x1(y, p['qkv_w']), p['qkv_dw'])
    q, k, v = jnp.split(qkv, 3, axis=1)

    def heads(t):
        return t.reshape(b, NUM_HEADS, ch, H * W)

    q, k, v = _l2norm(heads(q)), _l2norm(heads(k)), heads(v)
    attn = jnp.einsum('bhcd,bhed->bhce', q, k) * p['temp'][None]   # tiny CxC attention (plain jnp)
    attn = jax.nn.softmax(attn, axis=-1)
    out = jnp.einsum('bhce,bhed->bhcd', attn, v).reshape(b, C, H, W)
    x = x + conv1x1(out, p['attn_out_w'])
    # --- GDFN ---
    y = layernorm_channel(x, p['n2_w'], p['n2_b'])
    y = dwconv3x3(conv1x1(y, p['ffn_in_w']), p['ffn_dw'])
    x1, x2 = jnp.split(y, 2, axis=1)
    y = jax.nn.gelu(x1, approximate=False) * x2
    return x + conv1x1(y, p['ffn_out_w'])


def cablock_fwd(imageA, imageB, text, p):
    b, _, H, W = imageA.shape

    def branch(img, bp):
        f = prelu(conv3x3(img, bp['conv1_w']), bp['prelu1'])
        f = restormer_fwd(f, bp['restormer'])
        # imagefeature2textfeature: 1x1 conv -> nearest resize to 288x384 -> view (b, S, hidden)
        it_small = conv1x1(f, bp['i2t_w'], bp['i2t_b'])                       # (b, 32, H, W) f32
        it_big = interp_nearest(it_small, INTERP_H, INTERP_W)                 # (b, 32, 288, 384)
        it_tok = it_big.reshape(b, -1, HIDDEN_DIM).astype(jnp.bfloat16)       # (b, 13824, 256) K/V stream
        ca = fused_cross_attention(text, it_tok, bp['mha'])                   # (b, L, 256)
        ca = jnp.mean(ca, axis=1, keepdims=True)                              # adaptive_avg_pool1d(.,1)
        ca = ca / jnp.maximum(jnp.sum(jnp.abs(ca), axis=2, keepdims=True), 1e-12)  # F.normalize p=1
        ca_vec = ca[:, 0, :]                                                  # (b, 256)

        # (it * ca).view(b, 32, 288, 384) followed by nearest-downsample to (H, W):
        # gather straight from it_small (nearest up/down-sampling is an exact index map)
        # and from the length-256 ca pattern -> the 14 MB product is never materialised.
        sh = jnp.clip(jnp.floor(jnp.arange(H) * (INTERP_H / H)).astype(jnp.int32), 0, INTERP_H - 1)
        sw = jnp.clip(jnp.floor(jnp.arange(W) * (INTERP_W / W)).astype(jnp.int32), 0, INTERP_W - 1)
        uy = jnp.clip(jnp.floor(sh * (H / INTERP_H)).astype(jnp.int32), 0, H - 1)
        ux = jnp.clip(jnp.floor(sw * (W / INTERP_W)).astype(jnp.int32), 0, W - 1)
        it_ds = it_small[:, :, uy][:, :, :, ux]                               # (b, 32, H, W)
        flat = (jnp.arange(I2T_DIM)[:, None, None] * INTERP_H
                + sh[None, :, None]) * INTERP_W + sw[None, None, :]           # (32, H, W)
        ca_pat = ca_vec[:, flat % HIDDEN_DIM]                                 # (b, 32, H, W)
        ca_ds = it_ds * ca_pat

        # F.interpolate(f, [H, W]) on an HxW tensor is the identity -> dropped.
        t2 = prelu(conv1x1(ca_ds, bp['conv2_w'], bp['conv2_b']), bp['prelu2']) + f
        cat = jnp.concatenate([f, t2], axis=1)
        return prelu(conv1x1(cat, bp['conv3_w'], bp['conv3_b']), bp['prelu3'])

    return branch(imageA, p['A']), branch(imageB, p['B'])


def net_forward(params, imageA, imageB, text):
    b, L = text.shape[0], text.shape[1]
    # text_preprocess: Conv1d(768 -> hidden, k=1) == per-token linear
    text = matmul_bias(text.reshape(-1, TEXT_IN_DIM), params['text_w'].T,
                       params['text_b']).reshape(b, L, HIDDEN_DIM)
    fA, fB = cablock_fwd(imageA, imageB, text, params['ca1'])
    fA, fB = cablock_fwd(fA, fB, text, params['ca2'])
    fA, fB = cablock_fwd(fA, fB, text, params['ca3'])
    fusion = jnp.concatenate([fA, fB], axis=1)
    fusion = restormer_fwd(fusion, params['r1'])
    fusion = conv1x1(fusion, params['conv1_w'], params['conv1_b'])
    fusion = restormer_fwd(fusion, params['r2'])
    fusion = restormer_fwd(fusion, params['r3'])
    fusion = conv1x1(fusion, params['conv2_w'], params['conv2_b'])
    return jax.nn.sigmoid(fusion)


# ======================= deterministic parameter init =======================

def _init(key, shape, scale=0.05):
    return (scale * jax.random.normal(key, shape)).astype(jnp.float32)


class KeyGen:
    def __init__(self, seed):
        self._key = jax.random.PRNGKey(seed)

    def __call__(self):
        self._key, k = jax.random.split(self._key)
        return k


def make_restormer_params(kg, dim, ffn_factor=4):
    hidden = dim * ffn_factor
    return dict(
        n1_w=jnp.ones((dim,), jnp.float32), n1_b=jnp.zeros((dim,), jnp.float32),
        qkv_w=_init(kg(), (3 * dim, dim)),
        qkv_dw=_init(kg(), (3 * dim, 1, 3, 3)),
        temp=jnp.ones((NUM_HEADS, 1, 1), jnp.float32),
        attn_out_w=_init(kg(), (dim, dim)),
        n2_w=jnp.ones((dim,), jnp.float32), n2_b=jnp.zeros((dim,), jnp.float32),
        ffn_in_w=_init(kg(), (2 * hidden, dim)),
        ffn_dw=_init(kg(), (2 * hidden, 1, 3, 3)),
        ffn_out_w=_init(kg(), (dim, hidden)),
    )


def make_branch_params(kg, in_ch, rdim=MID_CHANNEL):
    return dict(
        conv1_w=_init(kg(), (rdim, in_ch, 3, 3)),            # bias=False
        prelu1=jnp.float32(0.25),
        restormer=make_restormer_params(kg, rdim),
        i2t_w=_init(kg(), (I2T_DIM, rdim)), i2t_b=_init(kg(), (I2T_DIM,)),
        conv2_w=_init(kg(), (rdim, I2T_DIM)), conv2_b=_init(kg(), (rdim,)),
        prelu2=jnp.float32(0.25),
        conv3_w=_init(kg(), (rdim, 2 * rdim)), conv3_b=_init(kg(), (rdim,)),
        prelu3=jnp.float32(0.25),
        mha=dict(in_w=_init(kg(), (3 * HIDDEN_DIM, HIDDEN_DIM)),
                 in_b=_init(kg(), (3 * HIDDEN_DIM,)),
                 out_w=_init(kg(), (HIDDEN_DIM, HIDDEN_DIM)),
                 out_b=_init(kg(), (HIDDEN_DIM,))),
    )


def make_cablock_params(kg, in_ch):
    return dict(A=make_branch_params(kg, in_ch), B=make_branch_params(kg, in_ch))


def make_net_params(seed=0):
    kg = KeyGen(seed)
    return dict(
        text_w=_init(kg(), (HIDDEN_DIM, TEXT_IN_DIM)), text_b=_init(kg(), (HIDDEN_DIM,)),
        ca1=make_cablock_params(kg, 1),
        ca2=make_cablock_params(kg, MID_CHANNEL),
        ca3=make_cablock_params(kg, MID_CHANNEL),
        r1=make_restormer_params(kg, 2 * MID_CHANNEL),
        r2=make_restormer_params(kg, MID_CHANNEL),
        r3=make_restormer_params(kg, MID_CHANNEL),
        conv1_w=_init(kg(), (MID_CHANNEL, 2 * MID_CHANNEL)), conv1_b=_init(kg(), (MID_CHANNEL,)),
        conv2_w=_init(kg(), (1, MID_CHANNEL)), conv2_b=_init(kg(), (1,)),
    )


# ======================= main =======================

if __name__ == "__main__":
    key = jax.random.PRNGKey(0)
    kA, kB, kT = jax.random.split(key, 3)
    B, H, W, L = 1, 16, 16, 8
    imageA = jax.random.normal(kA, (B, 1, H, W), dtype=jnp.float32)
    imageB = jax.random.normal(kB, (B, 1, H, W), dtype=jnp.float32)
    text = jax.random.normal(kT, (B, L, TEXT_IN_DIM), dtype=jnp.float32)

    params = make_net_params(seed=0)

    out = jax.jit(net_forward)(params, imageA, imageB, text)
    out = jax.block_until_ready(out)
    assert out.shape == (B, 1, H, W), out.shape
    assert bool(jnp.all(jnp.isfinite(out)))
    print("KERNEL_OK")
</pallas_src>

<mosaic_0001>
module attributes {stable_mosaic.version = 11 : i64} {
  func.func @_matmul_bias_kernel(%arg0: i32, %arg1: i32, %arg2: memref<256x128xbf16, #tpu.memory_space<vmem>>, %arg3: memref<128x128xbf16, #tpu.memory_space<vmem>>, %arg4: memref<1x128xf32, #tpu.memory_space<vmem>>, %arg5: memref<256x128xf32, #tpu.memory_space<vmem>>) attributes {dimension_semantics = [#tpu.dimension_semantics<parallel>, #tpu.dimension_semantics<parallel>], iteration_bounds = array<i64: 1, 1>, scalar_prefetch = 0 : i64, scratch_operands = 0 : i64, tpu.core_type = #tpu.core_type<tc>, window_params = [{transform_indices = @transform_0, window_bounds = array<i64: 256, 128>}, {transform_indices = @transform_1, window_bounds = array<i64: 128, 128>}, {transform_indices = @transform_2, window_bounds = array<i64: 1, 128>}, {transform_indices = @transform_3, window_bounds = array<i64: 256, 128>}]} {
    %c0 = arith.constant 0 : index
    %c0_0 = arith.constant 0 : index
    %0 = vector.load %arg2[%c0, %c0_0] : memref<256x128xbf16, #tpu.memory_space<vmem>>, vector<256x128xbf16>
    %c0_1 = arith.constant 0 : index
    %c0_2 = arith.constant 0 : index
    %1 = vector.load %arg3[%c0_1, %c0_2] : memref<128x128xbf16, #tpu.memory_space<vmem>>, vector<128x128xbf16>
    %cst = arith.constant dense<0.000000e+00> : vector<256x128xf32>
    %2 = tpu.matmul %0, %1, %cst {dimension_numbers = #tpu.dot_dimension_numbers<[1], [0], [0], [1], [0, 0, 1, 1], [], []>} : vector<256x128xbf16>, vector<128x128xbf16>, vector<256x128xf32> -> vector<256x128xf32>
    %c0_3 = arith.constant 0 : index
    %c0_4 = arith.constant 0 : index
    %3 = vector.load %arg4[%c0_3, %c0_4] : memref<1x128xf32, #tpu.memory_space<vmem>>, vector<1x128xf32>
    %4 = vector.broadcast %3 : vector<1x128xf32> to vector<256x128xf32>
    %5 = arith.addf %2, %4 : vector<256x128xf32>
    %c0_5 = arith.constant 0 : index
    %c0_6 = arith.constant 0 : index
    %6 = vector.load %arg5[%c0_5, %c0_6] : memref<256x128xf32, #tpu.memory_space<vmem>>, vector<256x128xf32>
    tpu.vector_store %arg5[%c0_5, %c0_6], %5 {strides = array<i32>} : memref<256x128xf32, #tpu.memory_space<vmem>>, vector<256x128xf32>,
    return
  }
  func.func @transform_0(%arg0: i32, %arg1: i32) -> (i32, i32) {
    %c0_i32 = arith.constant 0 : i32
    %c0_i32_0 = arith.constant 0 : i32
    return %arg0, %c0_i32 : i32, i32
  }
  func.func @transform_1(%arg0: i32, %arg1: i32) -> (i32, i32) {
    %c0_i32 = arith.constant 0 : i32
    %c0_i32_0 = arith.constant 0 : i32
    return %c0_i32, %arg1 : i32, i32
  }
  func.func @transform_2(%arg0: i32, %arg1: i32) -> (i32, i32) {
    %c0_i32 = arith.constant 0 : i32
    %c0_i32_0 = arith.constant 0 : i32
    return %c0_i32, %arg1 : i32, i32
  }
  func.func @transform_3(%arg0: i32, %arg1: i32) -> (i32, i32) {
    %c0_i32 = arith.constant 0 : i32
    return %arg0, %arg1 : i32, i32
  }
}

module attributes {stable_mosaic.version = 11 : i64} {
  func.func @_matmul_bias_kernel(%arg0: i32, %arg1: i32, %arg2: memref<256x128xbf16, #tpu.memory_space<vmem>>, %arg3: memref<128x256xbf16, #tpu.memory_space<vmem>>, %arg4: memref<1x256xf32, #tpu.memory_space<vmem>>, %arg5: memref<256x256xf32, #tpu.memory_space<vmem>>) attributes {dimension_semantics = [#tpu.dimension_semantics<parallel>, #tpu.dimension_semantics<parallel>], iteration_bounds = array<i64: 1, 1>, scalar_prefetch = 0 : i64, scratch_operands = 0 : i64, tpu.core_type = #tpu.core_type<tc>, window_params = [{transform_indices = @transform_0, window_bounds = array<i64: 256, 128>}, {transform_indices = @transform_1, window_bounds = array<i64: 128, 256>}, {transform_indices = @transform_2, window_bounds = array<i64: 1, 256>}, {transform_indices = @transform_3, window_bounds = array<i64: 256, 256>}]} {
    %c0 = arith.constant 0 : index
    %c0_0 = arith.constant 0 : index
    %0 = vector.load %arg2[%c0, %c0_0] : memref<256x128xbf16, #tpu.memory_space<vmem>>, vector<256x128xbf16>
    %c0_1 = arith.constant 0 : index
    %c0_2 = arith.constant 0 : index
    %1 = vector.load %arg3[%c0_1, %c0_2] : memref<128x256xbf16, #tpu.memory_space<vmem>>, vector<128x256xbf16>
    %cst = arith.constant dense<0.000000e+00> : vector<256x256xf32>
    %2 = tpu.matmul %0, %1, %cst {dimension_numbers = #tpu.dot_dimension_numbers<[1], [0], [0], [1], [0, 0, 1, 1], [], []>} : vector<256x128xbf16>, vector<128x256xbf16>, vector<256x256xf32> -> vector<256x256xf32>
    %c0_3 = arith.constant 0 : index
    %c0_4 = arith.constant 0 : index
    %3 = vector.load %arg4[%c0_3, %c0_4] : memref<1x256xf32, #tpu.memory_space<vmem>>, vector<1x256xf32>
    %4 = vector.broadcast %3 : vector<1x256xf32> to vector<256x256xf32>
    %5 = arith.addf %2, %4 : vector<256x256xf32>
    %c0_5 = arith.constant 0 : index
    %c0_6 = arith.constant 0 : index
    %6 = vector.load %arg5[%c0_5, %c0_6] : memref<256x256xf32, #tpu.memory_space<vmem>>, vector<256x256xf32>
    tpu.vector_store %arg5[%c0_5, %c0_6], %5 {strides = array<i32>} : memref<256x256xf32, #tpu.memory_space<vmem>>, vector<256x256xf32>,
    return
  }
  func.func @transform_0(%arg0: i32, %arg1: i32) -> (i32, i32) {
    %c0_i32 = arith.constant 0 : i32
    %c0_i32_0 = arith.constant 0 : i32
    return %arg0, %c0_i32 : i32, i32
  }
  func.func @transform_1(%arg0: i32, %arg1: i32) -> (i32, i32) {
    %c0_i32 = arith.constant 0 : i32
    %c0_i32_0 = arith.constant 0 : i32
    return %c0_i32, %arg1 : i32, i32
  }
  func.func @transform_2(%arg0: i32, %arg1: i32) -> (i32, i32) {
    %c0_i32 = arith.constant 0 : i32
    %c0_i32_0 = arith.constant 0 : i32
    return %c0_i32, %arg1 : i32, i32
  }
  func.func @transform_3(%arg0: i32, %arg1: i32) -> (i32, i32) {
    %c0_i32 = arith.constant 0 : i32
    return %arg0, %arg1 : i32, i32
  }
}

module attributes {stable_mosaic.version = 11 : i64} {
  func.func @_matmul_bias_kernel(%arg0: i32, %arg1: i32, %arg2: memref<8x768xbf16, #tpu.memory_space<vmem>>, %arg3: memref<768x256xbf16, #tpu.memory_space<vmem>>, %arg4: memref<1x256xf32, #tpu.memory_space<vmem>>, %arg5: memref<8x256xf32, #tpu.memory_space<vmem>>) attributes {dimension_semantics = [#tpu.dimension_semantics<parallel>, #tpu.dimension_semantics<parallel>], iteration_bounds = array<i64: 1, 1>, scalar_prefetch = 0 : i64, scratch_operands = 0 : i64, tpu.core_type = #tpu.core_type<tc>, window_params = [{transform_indices = @transform_0, window_bounds = array<i64: 8, 768>}, {transform_indices = @transform_1, window_bounds = array<i64: 768, 256>}, {transform_indices = @transform_2, window_bounds = array<i64: 1, 256>}, {transform_indices = @transform_3, window_bounds = array<i64: 8, 256>}]} {
    %c0 = arith.constant 0 : index
    %c0_0 = arith.constant 0 : index
    %0 = vector.load %arg2[%c0, %c0_0] : memref<8x768xbf16, #tpu.memory_space<vmem>>, vector<8x768xbf16>
    %c0_1 = arith.constant 0 : index
    %c0_2 = arith.constant 0 : index
    %1 = vector.load %arg3[%c0_1, %c0_2] : memref<768x256xbf16, #tpu.memory_space<vmem>>, vector<768x256xbf16>
    %cst = arith.constant dense<0.000000e+00> : vector<8x256xf32>
    %2 = tpu.matmul %0, %1, %cst {dimension_numbers = #tpu.dot_dimension_numbers<[1], [0], [0], [1], [0, 0, 1, 1], [], []>} : vector<8x768xbf16>, vector<768x256xbf16>, vector<8x256xf32> -> vector<8x256xf32>
    %c0_3 = arith.constant 0 : index
    %c0_4 = arith.constant 0 : index
    %3 = vector.load %arg4[%c0_3, %c0_4] : memref<1x256xf32, #tpu.memory_space<vmem>>, vector<1x256xf32>
    %4 = vector.broadcast %3 : vector<1x256xf32> to vector<8x256xf32>
    %5 = arith.addf %2, %4 : vector<8x256xf32>
    %c0_5 = arith.constant 0 : index
    %c0_6 = arith.constant 0 : index
    %6 = vector.load %arg5[%c0_5, %c0_6] : memref<8x256xf32, #tpu.memory_space<vmem>>, vector<8x256xf32>
    tpu.vector_store %arg5[%c0_5, %c0_6], %5 {strides = array<i32>} : memref<8x256xf32, #tpu.memory_space<vmem>>, vector<8x256xf32>,
    return
  }
  func.func @transform_0(%arg0: i32, %arg1: i32) -> (i32, i32) {
    %c0_i32 = arith.constant 0 : i32
    %c0_i32_0 = arith.constant 0 : i32
    return %arg0, %c0_i32 : i32, i32
  }
  func.func @transform_1(%arg0: i32, %arg1: i32) -> (i32, i32) {
    %c0_i32 = arith.constant 0 : i32
    %c0_i32_0 = arith.constant 0 : i32
    return %c0_i32, %arg1 : i32, i32
  }
  func.func @transform_2(%arg0: i32, %arg1: i32) -> (i32, i32) {
    %c0_i32 = arith.constant 0 : i32
    %c0_i32_0 = arith.constant 0 : i32
    return %c0_i32, %arg1 : i32, i32
  }
  func.func @transform_3(%arg0: i32, %arg1: i32) -> (i32, i32) {
    %c0_i32 = arith.constant 0 : i32
    return %arg0, %arg1 : i32, i32
  }
}

module attributes {stable_mosaic.version = 11 : i64} {
  func.func @_matmul_bias_kernel(%arg0: i32, %arg1: i32, %arg2: memref<8x256xbf16, #tpu.memory_space<vmem>>, %arg3: memref<256x256xbf16, #tpu.memory_space<vmem>>, %arg4: memref<1x256xf32, #tpu.memory_space<vmem>>, %arg5: memref<8x256xf32, #tpu.memory_space<vmem>>) attributes {dimension_semantics = [#tpu.dimension_semantics<parallel>, #tpu.dimension_semantics<parallel>], iteration_bounds = array<i64: 1, 1>, scalar_prefetch = 0 : i64, scratch_operands = 0 : i64, tpu.core_type = #tpu.core_type<tc>, window_params = [{transform_indices = @transform_0, window_bounds = array<i64: 8, 256>}, {transform_indices = @transform_1, window_bounds = array<i64: 256, 256>}, {transform_indices = @transform_2, window_bounds = array<i64: 1, 256>}, {transform_indices = @transform_3, window_bounds = array<i64: 8, 256>}]} {
    %c0 = arith.constant 0 : index
    %c0_0 = arith.constant 0 : index
    %0 = vector.load %arg2[%c0, %c0_0] : memref<8x256xbf16, #tpu.memory_space<vmem>>, vector<8x256xbf16>
    %c0_1 = arith.constant 0 : index
    %c0_2 = arith.constant 0 : index
    %1 = vector.load %arg3[%c0_1, %c0_2] : memref<256x256xbf16, #tpu.memory_space<vmem>>, vector<256x256xbf16>
    %cst = arith.constant dense<0.000000e+00> : vector<8x256xf32>
    %2 = tpu.matmul %0, %1, %cst {dimension_numbers = #tpu.dot_dimension_numbers<[1], [0], [0], [1], [0, 0, 1, 1], [], []>} : vector<8x256xbf16>, vector<256x256xbf16>, vector<8x256xf32> -> vector<8x256xf32>
    %c0_3 = arith.constant 0 : index
    %c0_4 = arith.constant 0 : index
    %3 = vector.load %arg4[%c0_3, %c0_4] : memref<1x256xf32, #tpu.memory_space<vmem>>, vector<1x256xf32>
    %4 = vector.broadcast %3 : vector<1x256xf32> to vector<8x256xf32>
    %5 = arith.addf %2, %4 : vector<8x256xf32>
    %c0_5 = arith.constant 0 : index
    %c0_6 = arith.constant 0 : index
    %6 = vector.load %arg5[%c0_5, %c0_6] : memref<8x256xf32, #tpu.memory_space<vmem>>, vector<8x256xf32>
    tpu.vector_store %arg5[%c0_5, %c0_6], %5 {strides = array<i32>} : memref<8x256xf32, #tpu.memory_space<vmem>>, vector<8x256xf32>,
    return
  }
  func.func @transform_0(%arg0: i32, %arg1: i32) -> (i32, i32) {
    %c0_i32 = arith.constant 0 : i32
    %c0_i32_0 = arith.constant 0 : i32
    return %arg0, %c0_i32 : i32, i32
  }
  func.func @transform_1(%arg0: i32, %arg1: i32) -> (i32, i32) {
    %c0_i32 = arith.constant 0 : i32
    %c0_i32_0 = arith.constant 0 : i32
    return %c0_i32, %arg1 : i32, i32
  }
  func.func @transform_2(%arg0: i32, %arg1: i32) -> (i32, i32) {
    %c0_i32 = arith.constant 0 : i32
    %c0_i32_0 = arith.constant 0 : i32
    return %c0_i32, %arg1 : i32, i32
  }
  func.func @transform_3(%arg0: i32, %arg1: i32) -> (i32, i32) {
    %c0_i32 = arith.constant 0 : i32
    return %arg0, %arg1 : i32, i32
  }
}

module attributes {stable_mosaic.version = 11 : i64} {
  func.func @_matmul_bias_kernel(%arg0: i32, %arg1: i32, %arg2: memref<64x256xbf16, #tpu.memory_space<vmem>>, %arg3: memref<256x256xbf16, #tpu.memory_space<vmem>>, %arg4: memref<1x256xf32, #tpu.memory_space<vmem>>, %arg5: memref<64x256xf32, #tpu.memory_space<vmem>>) attributes {dimension_semantics = [#tpu.dimension_semantics<parallel>, #tpu.dimension_semantics<parallel>], iteration_bounds = array<i64: 1, 1>, scalar_prefetch = 0 : i64, scratch_operands = 0 : i64, tpu.core_type = #tpu.core_type<tc>, window_params = [{transform_indices = @transform_0, window_bounds = array<i64: 64, 256>}, {transform_indices = @transform_1, window_bounds = array<i64: 256, 256>}, {transform_indices = @transform_2, window_bounds = array<i64: 1, 256>}, {transform_indices = @transform_3, window_bounds = array<i64: 64, 256>}]} {
    %c0 = arith.constant 0 : index
    %c0_0 = arith.constant 0 : index
    %0 = vector.load %arg2[%c0, %c0_0] : memref<64x256xbf16, #tpu.memory_space<vmem>>, vector<64x256xbf16>
    %c0_1 = arith.constant 0 : index
    %c0_2 = arith.constant 0 : index
    %1 = vector.load %arg3[%c0_1, %c0_2] : memref<256x256xbf16, #tpu.memory_space<vmem>>, vector<256x256xbf16>
    %cst = arith.constant dense<0.000000e+00> : vector<64x256xf32>
    %2 = tpu.matmul %0, %1, %cst {dimension_numbers = #tpu.dot_dimension_numbers<[1], [0], [0], [1], [0, 0, 1, 1], [], []>} : vector<64x256xbf16>, vector<256x256xbf16>, vector<64x256xf32> -> vector<64x256xf32>
    %c0_3 = arith.constant 0 : index
    %c0_4 = arith.constant 0 : index
    %3 = vector.load %arg4[%c0_3, %c0_4] : memref<1x256xf32, #tpu.memory_space<vmem>>, vector<1x256xf32>
    %4 = vector.broadcast %3 : vector<1x256xf32> to vector<64x256xf32>
    %5 = arith.addf %2, %4 : vector<64x256xf32>
    %c0_5 = arith.constant 0 : index
    %c0_6 = arith.constant 0 : index
    %6 = vector.load %arg5[%c0_5, %c0_6] : memref<64x256xf32, #tpu.memory_space<vmem>>, vector<64x256xf32>
    tpu.vector_store %arg5[%c0_5, %c0_6], %5 {strides = array<i32>} : memref<64x256xf32, #tpu.memory_space<vmem>>, vector<64x256xf32>,
    return
  }
  func.func @transform_0(%arg0: i32, %arg1: i32) -> (i32, i32) {
    %c0_i32 = arith.constant 0 : i32
    %c0_i32_0 = arith.constant 0 : i32
    return %arg0, %c0_i32 : i32, i32
  }
  func.func @transform_1(%arg0: i32, %arg1: i32) -> (i32, i32) {
    %c0_i32 = arith.constant 0 : i32
    %c0_i32_0 = arith.constant 0 : i32
    return %c0_i32, %arg1 : i32, i32
  }
  func.func @transform_2(%arg0: i32, %arg1: i32) -> (i32, i32) {
    %c0_i32 = arith.constant 0 : i32
    %c0_i32_0 = arith.constant 0 : i32
    return %c0_i32, %arg1 : i32, i32
  }
  func.func @transform_3(%arg0: i32, %arg1: i32) -> (i32, i32) {
    %c0_i32 = arith.constant 0 : i32
    return %arg0, %arg1 : i32, i32
  }
}

module attributes {stable_mosaic.version = 11 : i64} {
  func.func @kernel(%arg0: i32, %arg1: i32, %arg2: memref<1x64x256xbf16, #tpu.memory_space<vmem>>, %arg3: memref<1x1536x256xbf16, #tpu.memory_space<vmem>>, %arg4: memref<1x64x256xf32, #tpu.memory_space<vmem>>, %arg5: memref<64x1xf32, #tpu.memory_space<vmem>>, %arg6: memref<64x1xf32, #tpu.memory_space<vmem>>, %arg7: memref<64x256xf32, #tpu.memory_space<vmem>>) attributes {dimension_semantics = [#tpu.dimension_semantics<parallel>, #tpu.dimension_semantics<arbitrary>], iteration_bounds = array<i64: 1, 9>, scalar_prefetch = 0 : i64, scratch_operands = 3 : i64, tpu.core_type = #tpu.core_type<tc>, window_params = [{transform_indices = @transform_0, window_bounds = array<i64: 1, 64, 256>}, {transform_indices = @transform_1, window_bounds = array<i64: 1, 1536, 256>}, {transform_indices = @transform_2, window_bounds = array<i64: 1, 64, 256>}]} {
    %c0_i32 = arith.constant 0 : i32
    %0 = arith.cmpi eq, %arg1, %c0_i32 : i32
    %1 = arith.extui %0 : i1 to i32
    %c0_i32_0 = arith.constant 0 : i32
    %2 = arith.cmpi ne, %1, %c0_i32_0 : i32
    scf.if %2 {
      %cst_24 = arith.constant 0xFF800000 : f32
      %35 = vector.broadcast %cst_24 : f32 to vector<64x1xf32>
      %c0_25 = arith.constant 0 : index
      %c0_26 = arith.constant 0 : index
      %36 = vector.load %arg5[%c0_25, %c0_26] : memref<64x1xf32, #tpu.memory_space<vmem>>, vector<64x1xf32>
      tpu.vector_store %arg5[%c0_25, %c0_26], %35 {strides = array<i32>} : memref<64x1xf32, #tpu.memory_space<vmem>>, vector<64x1xf32>,
      %cst_27 = arith.constant 0.000000e+00 : f32
      %37 = vector.broadcast %cst_27 : f32 to vector<64x1xf32>
      %c0_28 = arith.constant 0 : index
      %c0_29 = arith.constant 0 : index
      %38 = vector.load %arg6[%c0_28, %c0_29] : memref<64x1xf32, #tpu.memory_space<vmem>>, vector<64x1xf32>
      tpu.vector_store %arg6[%c0_28, %c0_29], %37 {strides = array<i32>} : memref<64x1xf32, #tpu.memory_space<vmem>>, vector<64x1xf32>,
      %cst_30 = arith.constant 0.000000e+00 : f32
      %39 = vector.broadcast %cst_30 : f32 to vector<64x256xf32>
      %c0_31 = arith.constant 0 : index
      %c0_32 = arith.constant 0 : index
      %40 = vector.load %arg7[%c0_31, %c0_32] : memref<64x256xf32, #tpu.memory_space<vmem>>, vector<64x256xf32>
      tpu.vector_store %arg7[%c0_31, %c0_32], %39 {strides = array<i32>} : memref<64x256xf32, #tpu.memory_space<vmem>>, vector<64x256xf32>,
    } else {
    }
    %c0 = arith.constant 0 : index
    %c0_1 = arith.constant 0 : index
    %c0_2 = arith.constant 0 : index
    %3 = vector.load %arg3[%c0, %c0_1, %c0_2] : memref<1x1536x256xbf16, #tpu.memory_space<vmem>>, vector<1x1536x256xbf16>
    %4 = vector.shape_cast %3 : vector<1x1536x256xbf16> to vector<1536x256xbf16>
    %c0_3 = arith.constant 0 : index
    %c0_4 = arith.constant 0 : index
    %c0_5 = arith.constant 0 : index
    %5 = vector.load %arg2[%c0_3, %c0_4, %c0_5] : memref<1x64x256xbf16, #tpu.memory_space<vmem>>, vector<1x64x256xbf16>
    %6 = vector.shape_cast %5 : vector<1x64x256xbf16> to vector<64x256xbf16>
    "tpu.trace_start"() <{level = 10 : i32, message = "re,ke->rk"}> : () -> ()
    %cst = arith.constant dense<0.000000e+00> : vector<64x1536xf32>
    %7 = tpu.matmul %6, %4, %cst {dimension_numbers = #tpu.dot_dimension_numbers<[1], [1], [0], [0], [0, 0, 1, 0], [], []>} : vector<64x256xbf16>, vector<1536x256xbf16>, vector<64x1536xf32> -> vector<64x1536xf32>
    "tpu.trace_stop"() : () -> ()
    %c0_6 = arith.constant 0 : index
    %c0_7 = arith.constant 0 : index
    %8 = vector.load %arg5[%c0_6, %c0_7] : memref<64x1xf32, #tpu.memory_space<vmem>>, vector<64x1xf32>
    %cst_8 = arith.constant dense<0xFF800000> : vector<64xf32>
    %9 = vector.multi_reduction <maximumf>, %7, %cst_8 [1] : vector<64x1536xf32> to vector<64xf32>
    %10 = vector.shape_cast %9 : vector<64xf32> to vector<64x1xf32>
    %11 = arith.maximumf %8, %10 : vector<64x1xf32>
    %c0_9 = arith.constant 0 : index
    %c0_10 = arith.constant 0 : index
    %12 = vector.load %arg5[%c0_9, %c0_10] : memref<64x1xf32, #tpu.memory_space<vmem>>, vector<64x1xf32>
    %13 = arith.subf %12, %11 : vector<64x1xf32>
    %14 = math.exp %13 : vector<64x1xf32>
    %15 = vector.broadcast %11 : vector<64x1xf32> to vector<64x1536xf32>
    %16 = arith.subf %7, %15 : vector<64x1536xf32>
    %17 = math.exp %16 : vector<64x1536xf32>
    %c0_11 = arith.constant 0 : index
    %c0_12 = arith.constant 0 : index
    %18 = vector.load %arg6[%c0_11, %c0_12] : memref<64x1xf32, #tpu.memory_space<vmem>>, vector<64x1xf32>
    %19 = arith.mulf %14, %18 : vector<64x1xf32>
    %cst_13 = arith.constant dense<0.000000e+00> : vector<64xf32>
    %20 = vector.multi_reduction <add>, %17, %cst_13 [1] : vector<64x1536xf32> to vector<64xf32>
    %21 = vector.shape_cast %20 : vector<64xf32> to vector<64x1xf32>
    %22 = arith.addf %19, %21 : vector<64x1xf32>
    %c0_14 = arith.constant 0 : index
    %c0_15 = arith.constant 0 : index
    %23 = vector.load %arg6[%c0_14, %c0_15] : memref<64x1xf32, #tpu.memory_space<vmem>>, vector<64x1xf32>
    tpu.vector_store %arg6[%c0_14, %c0_15], %22 {strides = array<i32>} : memref<64x1xf32, #tpu.memory_space<vmem>>, vector<64x1xf32>,
    %c0_16 = arith.constant 0 : index
    %c0_17 = arith.constant 0 : index
    %24 = vector.load %arg7[%c0_16, %c0_17] : memref<64x256xf32, #tpu.memory_space<vmem>>, vector<64x256xf32>
    %25 = vector.broadcast %14 : vector<64x1xf32> to vector<64x256xf32>
    %26 = arith.mulf %25, %24 : vector<64x256xf32>
    %27 = arith.truncf %17 : vector<64x1536xf32> to vector<64x1536xbf16>
    %cst_18 = arith.constant dense<0.000000e+00> : vector<64x256xf32>
    %28 = tpu.matmul %27, %4, %cst_18 {dimension_numbers = #tpu.dot_dimension_numbers<[1], [0], [0], [1], [0, 0, 1, 1], [], []>} : vector<64x1536xbf16>, vector<1536x256xbf16>, vector<64x256xf32> -> vector<64x256xf32>
    %29 = arith.addf %26, %28 : vector<64x256xf32>
    %c0_19 = arith.constant 0 : index
    %c0_20 = arith.constant 0 : index
    %30 = vector.load %arg7[%c0_19, %c0_20] : memref<64x256xf32, #tpu.memory_space<vmem>>, vector<64x256xf32>
    tpu.vector_store %arg7[%c0_19, %c0_20], %29 {strides = array<i32>} : memref<64x256xf32, #tpu.memory_space<vmem>>, vector<64x256xf32>,
    %c0_21 = arith.constant 0 : index
    %c0_22 = arith.constant 0 : index
    %31 = vector.load %arg5[%c0_21, %c0_22] : memref<64x1xf32, #tpu.memory_space<vmem>>, vector<64x1xf32>
    tpu.vector_store %arg5[%c0_21, %c0_22], %11 {strides = array<i32>} : memref<64x1xf32, #tpu.memory_space<vmem>>, vector<64x1xf32>,
    %c8_i32 = arith.constant 8 : i32
    %32 = arith.cmpi eq, %arg1, %c8_i32 : i32
    %33 = arith.extui %32 : i1 to i32
    %c0_i32_23 = arith.constant 0 : i32
    %34 = arith.cmpi ne, %33, %c0_i32_23 : i32
    scf.if %34 {
      %c0_24 = arith.constant 0 : index
      %c0_25 = arith.constant 0 : index
      %35 = vector.load %arg7[%c0_24, %c0_25] : memref<64x256xf32, #tpu.memory_space<vmem>>, vector<64x256xf32>
      %c0_26 = arith.constant 0 : index
      %c0_27 = arith.constant 0 : index
      %36 = vector.load %arg6[%c0_26, %c0_27] : memref<64x1xf32, #tpu.memory_space<vmem>>, vector<64x1xf32>
      %37 = tpu.reciprocal %36 {approx = true} : vector<64x1xf32> -> vector<64x1xf32>
      %38 = vector.broadcast %37 : vector<64x1xf32> to vector<64x256xf32>
      %39 = arith.mulf %35, %38 : vector<64x256xf32>
      %c0_28 = arith.constant 0 : index
      %c0_29 = arith.constant 0 : index
      %c0_30 = arith.constant 0 : index
      %40 = vector.load %arg4[%c0_28, %c0_29, %c0_30] : memref<1x64x256xf32, #tpu.memory_space<vmem>>, vector<1x64x256xf32>
      %41 = vector.shape_cast %40 : vector<1x64x256xf32> to vector<64x256xf32>
      %42 = vector.shape_cast %39 : vector<64x256xf32> to vector<1x64x256xf32>
      tpu.vector_store %arg4[%c0_28, %c0_29, %c0_30], %42 {strides = array<i32>} : memref<1x64x256xf32, #tpu.memory_space<vmem>>, vector<1x64x256xf32>,
    } else {
    }
    return
  }
  func.func @transform_0(%arg0: i32, %arg1: i32) -> (i32, i32, i32) {
    %c0_i32 = arith.constant 0 : i32
    %c0_i32_0 = arith.constant 0 : i32
    %c0_i32_1 = arith.constant 0 : i32
    return %arg0, %c0_i32, %c0_i32_0 : i32, i32, i32
  }
  func.func @transform_1(%arg0: i32, %arg1: i32) -> (i32, i32, i32) {
    %c0_i32 = arith.constant 0 : i32
    %c0_i32_0 = arith.constant 0 : i32
    return %arg0, %arg1, %c0_i32 : i32, i32, i32
  }
  func.func @transform_2(%arg0: i32, %arg1: i32) -> (i32, i32, i32) {
    %c0_i32 = arith.constant 0 : i32
    %c0_i32_0 = arith.constant 0 : i32
    %c0_i32_1 = arith.constant 0 : i32
    return %arg0, %c0_i32, %c0_i32_0 : i32, i32, i32
  }
}

module attributes {stable_mosaic.version = 11 : i64} {
  func.func @_matmul_bias_kernel(%arg0: i32, %arg1: i32, %arg2: memref<256x384xbf16, #tpu.memory_space<vmem>>, %arg3: memref<384x128xbf16, #tpu.memory_space<vmem>>, %arg4: memref<1x128xf32, #tpu.memory_space<vmem>>, %arg5: memref<256x128xf32, #tpu.memory_space<vmem>>) attributes {dimension_semantics = [#tpu.dimension_semantics<parallel>, #tpu.dimension_semantics<parallel>], iteration_bounds = array<i64: 1, 1>, scalar_prefetch = 0 : i64, scratch_operands = 0 : i64, tpu.core_type = #tpu.core_type<tc>, window_params = [{transform_indices = @transform_0, window_bounds = array<i64: 256, 384>}, {transform_indices = @transform_1, window_bounds = array<i64: 384, 128>}, {transform_indices = @transform_2, window_bounds = array<i64: 1, 128>}, {transform_indices = @transform_3, window_bounds = array<i64: 256, 128>}]} {
    %c0 = arith.constant 0 : index
    %c0_0 = arith.constant 0 : index
    %0 = vector.load %arg2[%c0, %c0_0] : memref<256x384xbf16, #tpu.memory_space<vmem>>, vector<256x384xbf16>
    %c0_1 = arith.constant 0 : index
    %c0_2 = arith.constant 0 : index
    %1 = vector.load %arg3[%c0_1, %c0_2] : memref<384x128xbf16, #tpu.memory_space<vmem>>, vector<384x128xbf16>
    %cst = arith.constant dense<0.000000e+00> : vector<256x128xf32>
    %2 = tpu.matmul %0, %1, %cst {dimension_numbers = #tpu.dot_dimension_numbers<[1], [0], [0], [1], [0, 0, 1, 1], [], []>} : vector<256x384xbf16>, vector<384x128xbf16>, vector<256x128xf32> -> vector<256x128xf32>
    %c0_3 = arith.constant 0 : index
    %c0_4 = arith.constant 0 : index
    %3 = vector.load %arg4[%c0_3, %c0_4] : memref<1x128xf32, #tpu.memory_space<vmem>>, vector<1x128xf32>
    %4 = vector.broadcast %3 : vector<1x128xf32> to vector<256x128xf32>
    %5 = arith.addf %2, %4 : vector<256x128xf32>
    %c0_5 = arith.constant 0 : index
    %c0_6 = arith.constant 0 : index
    %6 = vector.load %arg5[%c0_5, %c0_6] : memref<256x128xf32, #tpu.memory_space<vmem>>, vector<256x128xf32>
    tpu.vector_store %arg5[%c0_5, %c0_6], %5 {strides = array<i32>} : memref<256x128xf32, #tpu.memory_space<vmem>>, vector<256x128xf32>,
    return
  }
  func.func @transform_0(%arg0: i32, %arg1: i32) -> (i32, i32) {
    %c0_i32 = arith.constant 0 : i32
    %c0_i32_0 = arith.constant 0 : i32
    return %arg0, %c0_i32 : i32, i32
  }
  func.func @transform_1(%arg0: i32, %arg1: i32) -> (i32, i32) {
    %c0_i32 = arith.constant 0 : i32
    %c0_i32_0 = arith.constant 0 : i32
    return %c0_i32, %arg1 : i32, i32
  }
  func.func @transform_2(%arg0: i32, %arg1: i32) -> (i32, i32) {
    %c0_i32 = arith.constant 0 : i32
    %c0_i32_0 = arith.constant 0 : i32
    return %c0_i32, %arg1 : i32, i32
  }
  func.func @transform_3(%arg0: i32, %arg1: i32) -> (i32, i32) {
    %c0_i32 = arith.constant 0 : i32
    return %arg0, %arg1 : i32, i32
  }
}

module attributes {stable_mosaic.version = 11 : i64} {
  func.func @_matmul_bias_kernel(%arg0: i32, %arg1: i32, %arg2: memref<256x128xbf16, #tpu.memory_space<vmem>>, %arg3: memref<128x512xbf16, #tpu.memory_space<vmem>>, %arg4: memref<1x512xf32, #tpu.memory_space<vmem>>, %arg5: memref<256x512xf32, #tpu.memory_space<vmem>>) attributes {dimension_semantics = [#tpu.dimension_semantics<parallel>, #tpu.dimension_semantics<parallel>], iteration_bounds = array<i64: 1, 1>, scalar_prefetch = 0 : i64, scratch_operands = 0 : i64, tpu.core_type = #tpu.core_type<tc>, window_params = [{transform_indices = @transform_0, window_bounds = array<i64: 256, 128>}, {transform_indices = @transform_1, window_bounds = array<i64: 128, 512>}, {transform_indices = @transform_2, window_bounds = array<i64: 1, 512>}, {transform_indices = @transform_3, window_bounds = array<i64: 256, 512>}]} {
    %c0 = arith.constant 0 : index
    %c0_0 = arith.constant 0 : index
    %0 = vector.load %arg2[%c0, %c0_0] : memref<256x128xbf16, #tpu.memory_space<vmem>>, vector<256x128xbf16>
    %c0_1 = arith.constant 0 : index
    %c0_2 = arith.constant 0 : index
    %1 = vector.load %arg3[%c0_1, %c0_2] : memref<128x512xbf16, #tpu.memory_space<vmem>>, vector<128x512xbf16>
    %cst = arith.constant dense<0.000000e+00> : vector<256x512xf32>
    %2 = tpu.matmul %0, %1, %cst {dimension_numbers = #tpu.dot_dimension_numbers<[1], [0], [0], [1], [0, 0, 1, 1], [], []>} : vector<256x128xbf16>, vector<128x512xbf16>, vector<256x512xf32> -> vector<256x512xf32>
    %c0_3 = arith.constant 0 : index
    %c0_4 = arith.constant 0 : index
    %3 = vector.load %arg4[%c0_3, %c0_4] : memref<1x512xf32, #tpu.memory_space<vmem>>, vector<1x512xf32>
    %4 = vector.broadcast %3 : vector<1x512xf32> to vector<256x512xf32>
    %5 = arith.addf %2, %4 : vector<256x512xf32>
    %c0_5 = arith.constant 0 : index
    %c0_6 = arith.constant 0 : index
    %6 = vector.load %arg5[%c0_5, %c0_6] : memref<256x512xf32, #tpu.memory_space<vmem>>, vector<256x512xf32>
    tpu.vector_store %arg5[%c0_5, %c0_6], %5 {strides = array<i32>} : memref<256x512xf32, #tpu.memory_space<vmem>>, vector<256x512xf32>,
    return
  }
  func.func @transform_0(%arg0: i32, %arg1: i32) -> (i32, i32) {
    %c0_i32 = arith.constant 0 : i32
    %c0_i32_0 = arith.constant 0 : i32
    return %arg0, %c0_i32 : i32, i32
  }
  func.func @transform_1(%arg0: i32, %arg1: i32) -> (i32, i32) {
    %c0_i32 = arith.constant 0 : i32
    %c0_i32_0 = arith.constant 0 : i32
    return %c0_i32, %arg1 : i32, i32
  }
  func.func @transform_2(%arg0: i32, %arg1: i32) -> (i32, i32) {
    %c0_i32 = arith.constant 0 : i32
    %c0_i32_0 = arith.constant 0 : i32
    return %c0_i32, %arg1 : i32, i32
  }
  func.func @transform_3(%arg0: i32, %arg1: i32) -> (i32, i32) {
    %c0_i32 = arith.constant 0 : i32
    return %arg0, %arg1 : i32, i32
  }
}

module attributes {stable_mosaic.version = 11 : i64} {
  func.func @_matmul_bias_kernel(%arg0: i32, %arg1: i32, %arg2: memref<256x256xbf16, #tpu.memory_space<vmem>>, %arg3: memref<256x128xbf16, #tpu.memory_space<vmem>>, %arg4: memref<1x128xf32, #tpu.memory_space<vmem>>, %arg5: memref<256x128xf32, #tpu.memory_space<vmem>>) attributes {dimension_semantics = [#tpu.dimension_semantics<parallel>, #tpu.dimension_semantics<parallel>], iteration_bounds = array<i64: 1, 1>, scalar_prefetch = 0 : i64, scratch_operands = 0 : i64, tpu.core_type = #tpu.core_type<tc>, window_params = [{transform_indices = @transform_0, window_bounds = array<i64: 256, 256>}, {transform_indices = @transform_1, window_bounds = array<i64: 256, 128>}, {transform_indices = @transform_2, window_bounds = array<i64: 1, 128>}, {transform_indices = @transform_3, window_bounds = array<i64: 256, 128>}]} {
    %c0 = arith.constant 0 : index
    %c0_0 = arith.constant 0 : index
    %0 = vector.load %arg2[%c0, %c0_0] : memref<256x256xbf16, #tpu.memory_space<vmem>>, vector<256x256xbf16>
    %c0_1 = arith.constant 0 : index
    %c0_2 = arith.constant 0 : index
    %1 = vector.load %arg3[%c0_1, %c0_2] : memref<256x128xbf16, #tpu.memory_space<vmem>>, vector<256x128xbf16>
    %cst = arith.constant dense<0.000000e+00> : vector<256x128xf32>
    %2 = tpu.matmul %0, %1, %cst {dimension_numbers = #tpu.dot_dimension_numbers<[1], [0], [0], [1], [0, 0, 1, 1], [], []>} : vector<256x256xbf16>, vector<256x128xbf16>, vector<256x128xf32> -> vector<256x128xf32>
    %c0_3 = arith.constant 0 : index
    %c0_4 = arith.constant 0 : index
    %3 = vector.load %arg4[%c0_3, %c0_4] : memref<1x128xf32, #tpu.memory_space<vmem>>, vector<1x128xf32>
    %4 = vector.broadcast %3 : vector<1x128xf32> to vector<256x128xf32>
    %5 = arith.addf %2, %4 : vector<256x128xf32>
    %c0_5 = arith.constant 0 : index
    %c0_6 = arith.constant 0 : index
    %6 = vector.load %arg5[%c0_5, %c0_6] : memref<256x128xf32, #tpu.memory_space<vmem>>, vector<256x128xf32>
    tpu.vector_store %arg5[%c0_5, %c0_6], %5 {strides = array<i32>} : memref<256x128xf32, #tpu.memory_space<vmem>>, vector<256x128xf32>,
    return
  }
  func.func @transform_0(%arg0: i32, %arg1: i32) -> (i32, i32) {
    %c0_i32 = arith.constant 0 : i32
    %c0_i32_0 = arith.constant 0 : i32
    return %arg0, %c0_i32 : i32, i32
  }
  func.func @transform_1(%arg0: i32, %arg1: i32) -> (i32, i32) {
    %c0_i32 = arith.constant 0 : i32
    %c0_i32_0 = arith.constant 0 : i32
    return %c0_i32, %arg1 : i32, i32
  }
  func.func @transform_2(%arg0: i32, %arg1: i32) -> (i32, i32) {
    %c0_i32 = arith.constant 0 : i32
    %c0_i32_0 = arith.constant 0 : i32
    return %c0_i32, %arg1 : i32, i32
  }
  func.func @transform_3(%arg0: i32, %arg1: i32) -> (i32, i32) {
    %c0_i32 = arith.constant 0 : i32
    return %arg0, %arg1 : i32, i32
  }
}

</mosaic_0001>

<bundles_post_ra>
// kernel: split.2
= control target key start
LH: loop header
LB: loop body
LE: loop exit
PB: predicated region body
PF: predicated region fallthrough
CT: control target
= control target key end

     0   :  { %v3_v0 = vlaneseq  ;;  %s528_s30 = smov 64   ;;  %s847_s0 = inlined_call_operand.vmem [shape: f32[1,96,16,16], index: 0, kind: input, shape index: {}]   ;;  %s848_s1 = inlined_call_operand.vmem [shape: bf16[1,32,16,16], index: 1, kind: output, shape index: {}]  }
   0x1   :  { %v390_v1 = vld [vmem:[%s847_s0 + $0x40] sm:$0xff]  ;;  %v392_v3 = vld [vmem:[%s847_s0 + $0x50] sm:$0xff]  ;;  %v418_v40 = vld [vmem:[%s847_s0 + $0x28] sm:$0xff] }
   0x2   :  { %v543_v2 = vand.u32 127, %v3_v0  ;;  %v2_v4 = vld [vmem:[%s847_s0] sm:$0xff]  ;;  %v384_v5 = vld [vmem:[%s847_s0 + $0x10] sm:$0xff]  ;;  %v420_v41 = vld [vmem:[%s847_s0 + $0x38] sm:$0xff] }
   0x3   :  { %v394_v6 = vld [vmem:[%s847_s0 + $0x60] sm:$0xff]  ;;  %v396_v7 = vld [vmem:[%s847_s0 + $0x70] sm:$0xff]  ;;  %v414_v42 = vld [vmem:[%s847_s0 + $0x8] sm:$0xff] }
   0x4   :  { %vm5_vm0 = vcmp.lt.s32.totalorder %v543_v2, 64  ;;  %v386_v8 = vld [vmem:[%s847_s0 + $0x20] sm:$0xff]  ;;  %v388_v9 = vld [vmem:[%s847_s0 + $0x30] sm:$0xff]  ;;  %v416_v43 = vld [vmem:[%s847_s0 + $0x18] sm:$0xff] }
   0x5   :  { %v53_v10 = vsel %vm5_vm0, 0, %v390_v1  ;;  %v65_v11 = vsel %vm5_vm0, 0, %v392_v3  ;;  %v6_v12 = vsel %vm5_vm0, 0, %v2_v4  ;;  %v17_v13 = vsel %vm5_vm0, 0, %v384_v5  ;;  %v402_v14 = vld [vmem:[%s847_s0 + $0xa0] sm:$0xff]  ;;  %v404_v19 = vld [vmem:[%s847_s0 + $0xb0] sm:$0xff] }
   0x6   :  { %v458_v15 = vpack.i.bf16 %v65_v11, %v53_v10  ;;  %v448_v16 = vpack.i.bf16 %v17_v13, %v6_v12  ;;  %v77_v17 = vsel %vm5_vm0, 0, %v394_v6  ;;  %v89_v18 = vsel %vm5_vm0, 0, %v396_v7  ;;  %v398_v20 = vld [vmem:[%s847_s0 + $0x80] sm:$0xff]  ;;  %v400_v21 = vld [vmem:[%s847_s0 + $0x90] sm:$0xff]  ;;  %v426_v50 = vld [vmem:[%s847_s0 + $0x68] sm:$0xff] }
   0x7   :  { %v29_v22 = vsel %vm5_vm0, 0, %v386_v8  ;;  %v41_v23 = vsel %vm5_vm0, 0, %v388_v9  ;;  %v463_v24 = vpack.i.bf16 %v89_v18, %v77_v17  ;;  %v125_v26 = vsel %vm5_vm0, 0, %v402_v14  ;;  %v410_v30 = vld [vmem:[%s847_s0 + $0xe0] sm:$0xff]  ;;  %v412_v31 = vld [vmem:[%s847_s0 + $0xf0] sm:$0xff]  ;;  %v428_v51 = vld [vmem:[%s847_s0 + $0x78] sm:$0xff] }
   0x8   :  { %459 = vrot.lane.b32.xlu1 %v458_v15, %s528_s30  ;;  %449 = vrot.lane.b32.xlu0 %v448_v16, %s528_s30  ;;  %v453_v25 = vpack.i.bf16 %v41_v23, %v29_v22  ;;  %v137_v27 = vsel %vm5_vm0, 0, %v404_v19  ;;  %v101_v28 = vsel %vm5_vm0, 0, %v398_v20  ;;  %v113_v29 = vsel %vm5_vm0, 0, %v400_v21  ;;  %v406_v32 = vld [vmem:[%s847_s0 + $0xc0] sm:$0xff]  ;;  %v408_v33 = vld [vmem:[%s847_s0 + $0xd0] sm:$0xff] }
   0x9   :  { %v473_v34 = vpack.i.bf16 %v137_v27, %v125_v26  ;;  %v468_v35 = vpack.i.bf16 %v113_v29, %v101_v28  ;;  %v173_v36 = vsel %vm5_vm0, 0, %v410_v30  ;;  %v185_v37 = vsel %vm5_vm0, 0, %v412_v31  ;;  %v422_v52 = vld [vmem:[%s847_s0 + $0x48] sm:$0xff]  ;;  %v424_v53 = vld [vmem:[%s847_s0 + $0x58] sm:$0xff] }
   0xa   :  { %v149_v38 = vsel %vm5_vm0, 0, %v406_v32  ;;  %v161_v39 = vsel %vm5_vm0, 0, %v408_v33  ;;  %v483_v44 = vpack.i.bf16 %v185_v37, %v173_v36  ;;  %v221_v46 = vsel %vm5_vm0, 0, %v418_v40  ;;  %v434_v60 = vld [vmem:[%s847_s0 + $0xa8] sm:$0xff]  ;;  %v436_v61 = vld [vmem:[%s847_s0 + $0xb8] sm:$0xff] }
   0xb   :  { %v478_v45 = vpack.i.bf16 %v161_v39, %v149_v38  ;;  %v233_v47 = vsel %vm5_vm0, 0, %v420_v41  ;;  %v197_v48 = vsel %vm5_vm0, 0, %v414_v42  ;;  %v209_v49 = vsel %vm5_vm0, 0, %v416_v43  ;;  %v430_v62 = vld [vmem:[%s847_s0 + $0x88] sm:$0xff]  ;;  %v432_v63 = vld [vmem:[%s847_s0 + $0x98] sm:$0xff] }
   0xc   :  { %464 = vrot.lane.b32.xlu1 %v463_v24, %s528_s30  ;;  %454 = vrot.lane.b32.xlu0 %v453_v25, %s528_s30  ;;  %v493_v54 = vpack.i.bf16 %v233_v47, %v221_v46  ;;  %v488_v55 = vpack.i.bf16 %v209_v49, %v197_v48  ;;  %v269_v56 = vsel %vm5_vm0, 0, %v426_v50  ;;  %v281_v57 = vsel %vm5_vm0, 0, %v428_v51  ;;  %v442_v7 = vld [vmem:[%s847_s0 + $0xe8] sm:$0xff]  ;;  %v444_v8 = vld [vmem:[%s847_s0 + $0xf8] sm:$0xff] }
   0xd   :  { %v245_v58 = vsel %vm5_vm0, 0, %v422_v52  ;;  %v257_v59 = vsel %vm5_vm0, 0, %v424_v53  ;;  %v503_v0 = vpack.i.bf16 %v281_v57, %v269_v56  ;;  %v317_v3 = vsel %vm5_vm0, 0, %v434_v60  ;;  %v438_v9 = vld [vmem:[%s847_s0 + $0xc8] sm:$0xff]  ;;  %v440_v10 = vld [vmem:[%s847_s0 + $0xd8] sm:$0xff] }
   0xe   :  { %v498_v1 = vpack.i.bf16 %v257_v59, %v245_v58  ;;  %v329_v4 = vsel %vm5_vm0, 0, %v436_v61  ;;  %v293_v5 = vsel %vm5_vm0, 0, %v430_v62  ;;  %v305_v6 = vsel %vm5_vm0, 0, %v432_v63 }
   0xf   :  { %v513_v11 = vpack.i.bf16 %v329_v4, %v317_v3  ;;  %v508_v12 = vpack.i.bf16 %v305_v6, %v293_v5  ;;  %v365_v13 = vsel %vm5_vm0, 0, %v442_v7  ;;  %v377_v14 = vsel %vm5_vm0, 0, %v444_v8 }
  0x10   :  { %474 = vrot.lane.b32.xlu1 %v473_v34, %s528_s30  ;;  %469 = vrot.lane.b32.xlu0 %v468_v35, %s528_s30  ;;  %v341_v15 = vsel %vm5_vm0, 0, %v438_v9  ;;  %v353_v2 = vsel %vm5_vm0, 0, %v440_v10  ;;  %v523_v16 = vpack.i.bf16 %v377_v14, %v365_v13  ;;  %v529_v24 = vmov 0.0  }
  0x11   :  { %v518_v17 = vpack.i.bf16 %v353_v2, %v341_v15 }
  0x14   :  { %484 = vrot.lane.b32.xlu1 %v483_v44, %s528_s30  ;;  %479 = vrot.lane.b32.xlu0 %v478_v45, %s528_s30 }
  0x18   :  { %494 = vrot.lane.b32.xlu1 %v493_v54, %s528_s30  ;;  %489 = vrot.lane.b32.xlu0 %v488_v55, %s528_s30 }
  0x1c   :  { %504 = vrot.lane.b32.xlu1 %v503_v0, %s528_s30  ;;  %499 = vrot.lane.b32.xlu0 %v498_v1, %s528_s30 }
  0x20   :  { %514 = vrot.lane.b32.xlu1 %v513_v11, %s528_s30  ;;  %509 = vrot.lane.b32.xlu0 %v508_v12, %s528_s30 }
  0x24   :  { %524 = vrot.lane.b32.xlu1 %v523_v16, %s528_s30  ;;  %519 = vrot.lane.b32.xlu0 %v518_v17, %s528_s30 }
  0x7a   :  { %v460_v18 = vpop.permute.xlu1 %459  ;;  %v450_v19 = vpop.permute.xlu0 %449 }
  0x7b   :  { %v462_v20 = vunpack.i.h.bf16 %v460_v18  ;;  %v461_v21 = vunpack.i.l.bf16 %v460_v18  ;;  %v452_v22 = vunpack.i.h.bf16 %v450_v19  ;;  %v451_v23 = vunpack.i.l.bf16 %v450_v19 }
  0x7d   :  { %v70_v25 = vpack.c.bf16 %v529_v24, %v462_v20  ;;  %v58_v26 = vpack.c.bf16 %v529_v24, %v461_v21  ;;  %v22_v27 = vpack.c.bf16 %v529_v24, %v452_v22  ;;  %v10_v28 = vpack.c.bf16 %v529_v24, %v451_v23 }
  0x7e   :  { %v465_v29 = vpop.permute.xlu1 %464  ;;  %v455_v30 = vpop.permute.xlu0 %454 }
  0x7f   :  { %393 = vst [vmem:[%s848_s1 + $0x28] sm:$0xf] %v70_v25  ;;  %391 = vst [vmem:[%s848_s1 + $0x20] sm:$0xf] %v58_v26  ;;  %v467_v31 = vunpack.i.h.bf16 %v465_v29  ;;  %v466_v32 = vunpack.i.l.bf16 %v465_v29  ;;  %v457_v33 = vunpack.i.h.bf16 %v455_v30  ;;  %v456_v34 = vunpack.i.l.bf16 %v455_v30 }
  0x80   :  { %385 = vst [vmem:[%s848_s1 + $0x8] sm:$0xf] %v22_v27  ;;  %11 = vst [vmem:[%s848_s1] sm:$0xf] %v10_v28 }
  0x81   :  { %v94_v35 = vpack.c.bf16 %v529_v24, %v467_v31  ;;  %v82_v36 = vpack.c.bf16 %v529_v24, %v466_v32  ;;  %v46_v37 = vpack.c.bf16 %v529_v24, %v457_v33  ;;  %v34_v38 = vpack.c.bf16 %v529_v24, %v456_v34 }
  0x82   :  { %v475_v39 = vpop.permute.xlu1 %474  ;;  %v470_v40 = vpop.permute.xlu0 %469 }
  0x83   :  { %397 = vst [vmem:[%s848_s1 + $0x38] sm:$0xf] %v94_v35  ;;  %395 = vst [vmem:[%s848_s1 + $0x30] sm:$0xf] %v82_v36  ;;  %v477_v41 = vunpack.i.h.bf16 %v475_v39  ;;  %v476_v42 = vunpack.i.l.bf16 %v475_v39  ;;  %v472_v43 = vunpack.i.h.bf16 %v470_v40  ;;  %v471_v44 = vunpack.i.l.bf16 %v470_v40 }
  0x84   :  { %389 = vst [vmem:[%s848_s1 + $0x18] sm:$0xf] %v46_v37  ;;  %387 = vst [vmem:[%s848_s1 + $0x10] sm:$0xf] %v34_v38 }
  0x85   :  { %v142_v45 = vpack.c.bf16 %v529_v24, %v477_v41  ;;  %v130_v46 = vpack.c.bf16 %v529_v24, %v476_v42  ;;  %v118_v47 = vpack.c.bf16 %v529_v24, %v472_v43  ;;  %v106_v48 = vpack.c.bf16 %v529_v24, %v471_v44 }
  0x86   :  { %v485_v49 = vpop.permute.xlu1 %484  ;;  %v480_v50 = vpop.permute.xlu0 %479 }
  0x87   :  { %405 = vst [vmem:[%s848_s1 + $0x58] sm:$0xf] %v142_v45  ;;  %403 = vst [vmem:[%s848_s1 + $0x50] sm:$0xf] %v130_v46  ;;  %v487_v51 = vunpack.i.h.bf16 %v485_v49  ;;  %v486_v52 = vunpack.i.l.bf16 %v485_v49  ;;  %v482_v53 = vunpack.i.h.bf16 %v480_v50  ;;  %v481_v54 = vunpack.i.l.bf16 %v480_v50 }
  0x88   :  { %401 = vst [vmem:[%s848_s1 + $0x48] sm:$0xf] %v118_v47  ;;  %399 = vst [vmem:[%s848_s1 + $0x40] sm:$0xf] %v106_v48 }
  0x89   :  { %v190_v55 = vpack.c.bf16 %v529_v24, %v487_v51  ;;  %v178_v56 = vpack.c.bf16 %v529_v24, %v486_v52  ;;  %v166_v57 = vpack.c.bf16 %v529_v24, %v482_v53  ;;  %v154_v58 = vpack.c.bf16 %v529_v24, %v481_v54 }
  0x8a   :  { %v495_v59 = vpop.permute.xlu1 %494  ;;  %v490_v60 = vpop.permute.xlu0 %489 }
  0x8b   :  { %413 = vst [vmem:[%s848_s1 + $0x78] sm:$0xf] %v190_v55  ;;  %411 = vst [vmem:[%s848_s1 + $0x70] sm:$0xf] %v178_v56  ;;  %v497_v61 = vunpack.i.h.bf16 %v495_v59  ;;  %v496_v62 = vunpack.i.l.bf16 %v495_v59  ;;  %v492_v63 = vunpack.i.h.bf16 %v490_v60  ;;  %v491_v0 = vunpack.i.l.bf16 %v490_v60 }
  0x8c   :  { %409 = vst [vmem:[%s848_s1 + $0x68] sm:$0xf] %v166_v57  ;;  %407 = vst [vmem:[%s848_s1 + $0x60] sm:$0xf] %v154_v58 }
  0x8d   :  { %v238_v1 = vpack.c.bf16 %v529_v24, %v497_v61  ;;  %v226_v3 = vpack.c.bf16 %v529_v24, %v496_v62  ;;  %v214_v4 = vpack.c.bf16 %v529_v24, %v492_v63  ;;  %v202_v5 = vpack.c.bf16 %v529_v24, %v491_v0 }
  0x8e   :  { %v505_v6 = vpop.permute.xlu1 %504  ;;  %v500_v7 = vpop.permute.xlu0 %499 }
  0x8f   :  { %421 = vst [vmem:[%s848_s1 + $0x1c] sm:$0xf] %v238_v1  ;;  %419 = vst [vmem:[%s848_s1 + $0x14] sm:$0xf] %v226_v3  ;;  %v507_v8 = vunpack.i.h.bf16 %v505_v6  ;;  %v506_v9 = vunpack.i.l.bf16 %v505_v6  ;;  %v502_v10 = vunpack.i.h.bf16 %v500_v7  ;;  %v501_v11 = vunpack.i.l.bf16 %v500_v7 }
  0x90   :  { %417 = vst [vmem:[%s848_s1 + $0xc] sm:$0xf] %v214_v4  ;;  %415 = vst [vmem:[%s848_s1 + $0x4] sm:$0xf] %v202_v5 }
  0x91   :  { %v286_v12 = vpack.c.bf16 %v529_v24, %v507_v8  ;;  %v274_v13 = vpack.c.bf16 %v529_v24, %v506_v9  ;;  %v262_v14 = vpack.c.bf16 %v529_v24, %v502_v10  ;;  %v250_v15 = vpack.c.bf16 %v529_v24, %v501_v11 }
  0x92   :  { %v515_v2 = vpop.permute.xlu1 %514  ;;  %v510_v16 = vpop.permute.xlu0 %509 }
  0x93   :  { %429 = vst [vmem:[%s848_s1 + $0x3c] sm:$0xf] %v286_v12  ;;  %427 = vst [vmem:[%s848_s1 + $0x34] sm:$0xf] %v274_v13  ;;  %v517_v17 = vunpack.i.h.bf16 %v515_v2  ;;  %v516_v18 = vunpack.i.l.bf16 %v515_v2  ;;  %v512_v19 = vunpack.i.h.bf16 %v510_v16  ;;  %v511_v20 = vunpack.i.l.bf16 %v510_v16 }
  0x94   :  { %425 = vst [vmem:[%s848_s1 + $0x2c] sm:$0xf] %v262_v14  ;;  %423 = vst [vmem:[%s848_s1 + $0x24] sm:$0xf] %v250_v15 }
  0x95   :  { %v334_v21 = vpack.c.bf16 %v529_v24, %v517_v17  ;;  %v322_v22 = vpack.c.bf16 %v529_v24, %v516_v18  ;;  %v310_v23 = vpack.c.bf16 %v529_v24, %v512_v19  ;;  %v298_v25 = vpack.c.bf16 %v529_v24, %v511_v20 }
  0x96   :  { %v525_v26 = vpop.permute.xlu1 %524  ;;  %v520_v27 = vpop.permute.xlu0 %519 }
  0x97   :  { %437 = vst [vmem:[%s848_s1 + $0x5c] sm:$0xf] %v334_v21  ;;  %435 = vst [vmem:[%s848_s1 + $0x54] sm:$0xf] %v322_v22  ;;  %v527_v28 = vunpack.i.h.bf16 %v525_v26  ;;  %v526_v29 = vunpack.i.l.bf16 %v525_v26  ;;  %v522_v30 = vunpack.i.h.bf16 %v520_v27  ;;  %v521_v31 = vunpack.i.l.bf16 %v520_v27 }
  0x98   :  { %433 = vst [vmem:[%s848_s1 + $0x4c] sm:$0xf] %v310_v23  ;;  %431 = vst [vmem:[%s848_s1 + $0x44] sm:$0xf] %v298_v25 }
  0x99   :  { %v382_v32 = vpack.c.bf16 %v529_v24, %v527_v28  ;;  %v370_v33 = vpack.c.bf16 %v529_v24, %v526_v29  ;;  %v358_v34 = vpack.c.bf16 %v529_v24, %v522_v30  ;;  %v346_v24 = vpack.c.bf16 %v529_v24, %v521_v31 }
  0x9b   :  { %445 = vst [vmem:[%s848_s1 + $0x7c] sm:$0xf] %v382_v32  ;;  %443 = vst [vmem:[%s848_s1 + $0x74] sm:$0xf] %v370_v33 }
  0x9c   :  { %441 = vst [vmem:[%s848_s1 + $0x6c] sm:$0xf] %v358_v34  ;;  %439 = vst [vmem:[%s848_s1 + $0x64] sm:$0xf] %v346_v24 }

// kernel: net_forward.88
= control target key start
LH: loop header
LB: loop body
LE: loop exit
PB: predicated region body
PF: predicated region fallthrough
CT: control target
= control target key end

     0   :  { %s773_s1 = inlined_call_operand.vmem [shape: bf16[128,128], index: 1, kind: input, shape index: {}]   ;;  %s774_s0 = inlined_call_operand.vmem [shape: bf16[256,128], index: 0, kind: input, shape index: {}]   ;;  %s775_s2 = inlined_call_operand.vmem [shape: f32[1,128], index: 2, kind: input, shape index: {}]   ;;  %s776_s3 = inlined_call_operand.vmem [shape: f32[256,128], index: 3, kind: output, shape index: {}]  }
   0x1   :  { %v524_v0 = vld [vmem:[%s773_s1] sm:$0xff]   ;;  %v525_v1 = vld [vmem:[%s773_s1 + $0x8] sm:$0xff]   ;;  %v526_v2 = vld [vmem:[%s773_s1 + $0x10] sm:$0xff]  }
   0x2   :  { %460 = vmatprep.subr.bf16.mxu0 %v524_v0  ;;  %508 = vmatprep.subr.bf16.mxu1 %v524_v0  ;;  %v527_v3 = vld [vmem:[%s773_s1 + $0x18] sm:$0xff]   ;;  %v532_v4 = vld [vmem:[%s774_s0] sm:$0xff]   ;;  %v529_v7 = vld [vmem:[%s773_s1 + $0x28] sm:$0xff]  }
   0x3   :  { %461 = vmatpush3.bf16.msra.mxu0 %v524_v0  ;;  %516 = vmatpush3.bf16.msra.mxu1 %v524_v0  ;;  %v533_v5 = vld [vmem:[%s774_s0 + $0x40] sm:$0xff]   ;;  %v530_v8 = vld [vmem:[%s773_s1 + $0x30] sm:$0xff]   ;;  %v531_v9 = vld [vmem:[%s773_s1 + $0x38] sm:$0xff]  }
   0x4   :  { %462 = vmatprep.subr.bf16.mxu0 %v525_v1  ;;  %509 = vmatprep.subr.bf16.mxu1 %v525_v1  ;;  %v528_v6 = vld [vmem:[%s773_s1 + $0x20] sm:$0xff]   ;;  %v534_v10 = vld [vmem:[%s774_s0 + $0x8] sm:$0xff]   ;;  %v536_v12 = vld [vmem:[%s774_s0 + $0x10] sm:$0xff]  }
   0x5   :  { %476 = vmatprep.mubr.bf16.mxu0 %v532_v4  ;;  %492 = vmatprep.mubr.bf16.mxu1 %v533_v5  ;;  %v535_v11 = vld [vmem:[%s774_s0 + $0x48] sm:$0xff]   ;;  %v537_v13 = vld [vmem:[%s774_s0 + $0x50] sm:$0xff]   ;;  %v538_v14 = vld [vmem:[%s774_s0 + $0x18] sm:$0xff]  }
   0x6   :  { %v539_v15 = vld [vmem:[%s774_s0 + $0x58] sm:$0xff]   ;;  %v540_v16 = vld [vmem:[%s774_s0 + $0x20] sm:$0xff]   ;;  %v542_v18 = vld [vmem:[%s774_s0 + $0x28] sm:$0xff]  }
   0x7   :  { %463 = vmatpush3.bf16.msra.mxu0 %v525_v1  ;;  %517 = vmatpush3.bf16.msra.mxu1 %v525_v1  ;;  %v541_v17 = vld [vmem:[%s774_s0 + $0x60] sm:$0xff]   ;;  %v543_v19 = vld [vmem:[%s774_s0 + $0x68] sm:$0xff]   ;;  %v544_v20 = vld [vmem:[%s774_s0 + $0x30] sm:$0xff]  }
   0x8   :  { %464 = vmatprep.subr.bf16.mxu0 %v526_v2  ;;  %510 = vmatprep.subr.bf16.mxu1 %v526_v2  ;;  %v545_v21 = vld [vmem:[%s774_s0 + $0x70] sm:$0xff]   ;;  %v546_v22 = vld [vmem:[%s774_s0 + $0x38] sm:$0xff]   ;;  %v643_v24 = vld [vmem:[%s775_s2] ss:$0 sm:$0xff] }
   0x9   :  { %v547_v23 = vld [vmem:[%s774_s0 + $0x78] sm:$0xff]  }
   0xb   :  { %465 = vmatpush3.bf16.msra.mxu0 %v526_v2  ;;  %518 = vmatpush3.bf16.msra.mxu1 %v526_v2 }
   0xc   :  { %466 = vmatprep.subr.bf16.mxu0 %v527_v3  ;;  %511 = vmatprep.subr.bf16.mxu1 %v527_v3 }
   0xf   :  { %467 = vmatpush3.bf16.msra.mxu0 %v527_v3  ;;  %519 = vmatpush3.bf16.msra.mxu1 %v527_v3 }
  0x10   :  { %468 = vmatprep.subr.bf16.mxu0 %v528_v6  ;;  %512 = vmatprep.subr.bf16.mxu1 %v528_v6 }
  0x13   :  { %469 = vmatpush3.bf16.msra.mxu0 %v528_v6  ;;  %520 = vmatpush3.bf16.msra.mxu1 %v528_v6 }
  0x14   :  { %470 = vmatprep.subr.bf16.mxu0 %v529_v7  ;;  %513 = vmatprep.subr.bf16.mxu1 %v529_v7 }
  0x17   :  { %471 = vmatpush3.bf16.msra.mxu0 %v529_v7  ;;  %521 = vmatpush3.bf16.msra.mxu1 %v529_v7 }
  0x18   :  { %472 = vmatprep.subr.bf16.mxu0 %v530_v8  ;;  %514 = vmatprep.subr.bf16.mxu1 %v530_v8 }
  0x1b   :  { %473 = vmatpush3.bf16.msra.mxu0 %v530_v8  ;;  %522 = vmatpush3.bf16.msra.mxu1 %v530_v8 }
  0x1c   :  { %474 = vmatprep.subr.bf16.mxu0 %v531_v9  ;;  %515 = vmatprep.subr.bf16.mxu1 %v531_v9 }
  0x1f   :  { %475 = vmatpush3.bf16.msra.mxu0 %v531_v9  ;;  %523 = vmatpush3.bf16.msra.mxu1 %v531_v9 }
  0x22   :  { %477 = vmatmul.mubr.bf16.vlgmr.msra.gmra.mrb[0].mxu0 %v534_v10  ;;  %493 = vmatmul.mubr.bf16.vlgmr.msra.gmra.mrb[0].mxu1 %v535_v11 }
  0x23   :  { %480 = vmatprep.mubr.bf16.mxu0 %v536_v12  ;;  %496 = vmatprep.mubr.bf16.mxu1 %v537_v13 }
  0x2a   :  { %481 = vmatmul.mubr.bf16.gmra.mrb[4].mxu0 %v538_v14  ;;  %497 = vmatmul.mubr.bf16.gmra.mrb[4].mxu1 %v539_v15 }
  0x2b   :  { %484 = vmatprep.mubr.bf16.mxu0 %v540_v16  ;;  %500 = vmatprep.mubr.bf16.mxu1 %v541_v17 }
  0x32   :  { %485 = vmatmul.mubr.bf16.gmra.mrb[8].mxu0 %v542_v18  ;;  %501 = vmatmul.mubr.bf16.gmra.mrb[8].mxu1 %v543_v19 }
  0x33   :  { %488 = vmatprep.mubr.bf16.mxu0 %v544_v20  ;;  %504 = vmatprep.mubr.bf16.mxu1 %v545_v21 }
  0x3a   :  { %489 = vmatmul.mubr.bf16.gmra.mrb[12].mxu0 %v546_v22  ;;  %505 = vmatmul.mubr.bf16.gmra.mrb[12].mxu1 %v547_v23 }
  0xf5   :  { %v478_v25 = vpop.f32.mrb[0].mxu0  ;;  %v494_v26 = vpop.f32.mrb[0].mxu1 }
  0xf6   :  { %v257_v27 = vadd.f32 %v478_v25, %v643_v24  ;;  %v321_v28 = vadd.f32 %v494_v26, %v643_v24  ;;  %v248_v29 = vpop.f32.mrb[1].mxu0  ;;  %v312_v30 = vpop.f32.mrb[1].mxu1 }
  0xf7   :  { %v249_v31 = vadd.f32 %v643_v24, %v248_v29  ;;  %v313_v32 = vadd.f32 %v643_v24, %v312_v30  ;;  %v479_v33 = vpop.f32.mrb[2].mxu0  ;;  %v495_v34 = vpop.f32.mrb[2].mxu1 }
  0xf8   :  { %377 = vst [vmem:[%s776_s3 + $0x10] sm:$0xff] %v257_v27  ;;  %393 = vst [vmem:[%s776_s3 + $0x90] sm:$0xff] %v321_v28  ;;  %v260_v35 = vadd.f32 %v479_v33, %v643_v24  ;;  %v324_v36 = vadd.f32 %v495_v34, %v643_v24  ;;  %v251_v37 = vpop.f32.mrb[3].mxu0  ;;  %v315_v38 = vpop.f32.mrb[3].mxu1 }
  0xf9   :  { %375 = vst [vmem:[%s776_s3] sm:$0xff] %v249_v31  ;;  %391 = vst [vmem:[%s776_s3 + $0x80] sm:$0xff] %v313_v32  ;;  %v252_v39 = vadd.f32 %v643_v24, %v251_v37  ;;  %v316_v40 = vadd.f32 %v643_v24, %v315_v38 }
  0xfa   :  { %378 = vst [vmem:[%s776_s3 + $0x18] sm:$0xff] %v260_v35  ;;  %394 = vst [vmem:[%s776_s3 + $0x98] sm:$0xff] %v324_v36 }
  0xfb   :  { %376 = vst [vmem:[%s776_s3 + $0x8] sm:$0xff] %v252_v39  ;;  %392 = vst [vmem:[%s776_s3 + $0x88] sm:$0xff] %v316_v40 }
  0xfd   :  { %v482_v41 = vpop.f32.mrb[4].mxu0  ;;  %v498_v42 = vpop.f32.mrb[4].mxu1 }
  0xfe   :  { %v273_v43 = vadd.f32 %v482_v41, %v643_v24  ;;  %v337_v44 = vadd.f32 %v498_v42, %v643_v24  ;;  %v264_v45 = vpop.f32.mrb[5].mxu0  ;;  %v328_v46 = vpop.f32.mrb[5].mxu1 }
  0xff   :  { %v265_v47 = vadd.f32 %v643_v24, %v264_v45  ;;  %v329_v48 = vadd.f32 %v643_v24, %v328_v46  ;;  %v483_v49 = vpop.f32.mrb[6].mxu0  ;;  %v499_v50 = vpop.f32.mrb[6].mxu1 }
 0x100   :  { %381 = vst [vmem:[%s776_s3 + $0x30] sm:$0xff] %v273_v43  ;;  %397 = vst [vmem:[%s776_s3 + $0xb0] sm:$0xff] %v337_v44  ;;  %v276_v51 = vadd.f32 %v483_v49, %v643_v24  ;;  %v340_v52 = vadd.f32 %v499_v50, %v643_v24  ;;  %v267_v53 = vpop.f32.mrb[7].mxu0  ;;  %v331_v54 = vpop.f32.mrb[7].mxu1 }
 0x101   :  { %379 = vst [vmem:[%s776_s3 + $0x20] sm:$0xff] %v265_v47  ;;  %395 = vst [vmem:[%s776_s3 + $0xa0] sm:$0xff] %v329_v48  ;;  %v268_v55 = vadd.f32 %v643_v24, %v267_v53  ;;  %v332_v56 = vadd.f32 %v643_v24, %v331_v54 }
 0x102   :  { %382 = vst [vmem:[%s776_s3 + $0x38] sm:$0xff] %v276_v51  ;;  %398 = vst [vmem:[%s776_s3 + $0xb8] sm:$0xff] %v340_v52 }
 0x103   :  { %380 = vst [vmem:[%s776_s3 + $0x28] sm:$0xff] %v268_v55  ;;  %396 = vst [vmem:[%s776_s3 + $0xa8] sm:$0xff] %v332_v56 }
 0x105   :  { %v486_v57 = vpop.f32.mrb[8].mxu0  ;;  %v502_v58 = vpop.f32.mrb[8].mxu1 }
 0x106   :  { %v289_v59 = vadd.f32 %v486_v57, %v643_v24  ;;  %v353_v60 = vadd.f32 %v502_v58, %v643_v24  ;;  %v280_v61 = vpop.f32.mrb[9].mxu0  ;;  %v344_v62 = vpop.f32.mrb[9].mxu1 }
 0x107   :  { %v281_v63 = vadd.f32 %v643_v24, %v280_v61  ;;  %v345_v0 = vadd.f32 %v643_v24, %v344_v62  ;;  %v487_v1 = vpop.f32.mrb[10].mxu0  ;;  %v503_v2 = vpop.f32.mrb[10].mxu1 }
 0x108   :  { %385 = vst [vmem:[%s776_s3 + $0x50] sm:$0xff] %v289_v59  ;;  %401 = vst [vmem:[%s776_s3 + $0xd0] sm:$0xff] %v353_v60  ;;  %v292_v3 = vadd.f32 %v487_v1, %v643_v24  ;;  %v356_v4 = vadd.f32 %v503_v2, %v643_v24  ;;  %v283_v5 = vpop.f32.mrb[11].mxu0  ;;  %v347_v6 = vpop.f32.mrb[11].mxu1 }
 0x109   :  { %383 = vst [vmem:[%s776_s3 + $0x40] sm:$0xff] %v281_v63  ;;  %399 = vst [vmem:[%s776_s3 + $0xc0] sm:$0xff] %v345_v0  ;;  %v284_v7 = vadd.f32 %v643_v24, %v283_v5  ;;  %v348_v8 = vadd.f32 %v643_v24, %v347_v6 }
 0x10a   :  { %386 = vst [vmem:[%s776_s3 + $0x58] sm:$0xff] %v292_v3  ;;  %402 = vst [vmem:[%s776_s3 + $0xd8] sm:$0xff] %v356_v4 }
 0x10b   :  { %384 = vst [vmem:[%s776_s3 + $0x48] sm:$0xff] %v284_v7  ;;  %400 = vst [vmem:[%s776_s3 + $0xc8] sm:$0xff] %v348_v8 }
 0x10d   :  { %v490_v9 = vpop.f32.mrb[12].mxu0  ;;  %v506_v10 = vpop.f32.mrb[12].mxu1 }
 0x10e   :  { %v305_v11 = vadd.f32 %v490_v9, %v643_v24  ;;  %v369_v12 = vadd.f32 %v506_v10, %v643_v24  ;;  %v296_v13 = vpop.f32.mrb[13].mxu0  ;;  %v360_v14 = vpop.f32.mrb[13].mxu1 }
 0x10f   :  { %v297_v15 = vadd.f32 %v643_v24, %v296_v13  ;;  %v361_v16 = vadd.f32 %v643_v24, %v360_v14  ;;  %v491_v17 = vpop.f32.mrb[14].mxu0  ;;  %v507_v18 = vpop.f32.mrb[14].mxu1 }
 0x110   :  { %389 = vst [vmem:[%s776_s3 + $0x70] sm:$0xff] %v305_v11  ;;  %405 = vst [vmem:[%s776_s3 + $0xf0] sm:$0xff] %v369_v12  ;;  %v308_v19 = vadd.f32 %v491_v17, %v643_v24  ;;  %v372_v20 = vadd.f32 %v507_v18, %v643_v24  ;;  %v299_v21 = vpop.f32.mrb[15].mxu0  ;;  %v363_v22 = vpop.f32.mrb[15].mxu1 }
 0x111   :  { %387 = vst [vmem:[%s776_s3 + $0x60] sm:$0xff] %v297_v15  ;;  %403 = vst [vmem:[%s776_s3 + $0xe0] sm:$0xff] %v361_v16  ;;  %v300_v23 = vadd.f32 %v643_v24, %v299_v21  ;;  %v364_v25 = vadd.f32 %v643_v24, %v363_v22 }
 0x112   :  { %390 = vst [vmem:[%s776_s3 + $0x78] sm:$0xff] %v308_v19  ;;  %406 = vst [vmem:[%s776_s3 + $0xf8] sm:$0xff] %v372_v20 }
 0x113   :  { %388 = vst [vmem:[%s776_s3 + $0x68] sm:$0xff] %v300_v23  ;;  %404 = vst [vmem:[%s776_s3 + $0xe8] sm:$0xff] %v364_v25 }

// kernel: net_forward.91
= control target key start
LH: loop header
LB: loop body
LE: loop exit
PB: predicated region body
PF: predicated region fallthrough
CT: control target
= control target key end

     0   :  { %v601_v1 = vmov 0   ;;  %v65_v33 = vlaneseq  ;;  %s997_s1 = inlined_call_operand.vmem [shape: bf16[128,256], index: 1, kind: input, shape index: {}]   ;;  %s998_s0 = inlined_call_operand.vmem [shape: bf16[256,128], index: 0, kind: input, shape index: {}]   ;;  %s999_s2 = inlined_call_operand.vmem [shape: f32[1,256], index: 2, kind: input, shape index: {}]   ;;  %s1000_s3 = inlined_call_operand.vmem [shape: f32[256,256], index: 3, kind: output, shape index: {}]  }
   0x1   :  { %v561_v0 = vld [vmem:[%s997_s1 + $0x4] ss:$8 sps:$4 sm:$0xff]   ;;  %283 = vmatprep.mubr.bf16.mxu0 %v601_v1  ;;  %363 = vmatprep.mubr.bf16.mxu1 %v601_v1  ;;  %v563_v2 = vld [vmem:[%s997_s1] ss:$8 sps:$4 sm:$0xff]   ;;  %v564_v3 = vld [vmem:[%s997_s1 + $0x14] ss:$8 sps:$4 sm:$0xff]  }
   0x2   :  { %251 = vmatprep.subr.bf16.mxu0 %v561_v0  ;;  %544 = vmatprep.subr.bf16.mxu1 %v561_v0  ;;  %v566_v4 = vld [vmem:[%s997_s1 + $0x10] ss:$8 sps:$4 sm:$0xff]   ;;  %v567_v5 = vld [vmem:[%s997_s1 + $0x24] ss:$8 sps:$4 sm:$0xff]   ;;  %v569_v6 = vld [vmem:[%s997_s1 + $0x20] ss:$8 sps:$4 sm:$0xff]  }
   0x3   :  { %252 = vmatpush1.bf16.msra.mxu0 %v563_v2  ;;  %552 = vmatpush1.bf16.msra.mxu1 %v563_v2  ;;  %v570_v7 = vld [vmem:[%s997_s1 + $0x34] ss:$8 sps:$4 sm:$0xff]   ;;  %v572_v8 = vld [vmem:[%s997_s1 + $0x30] ss:$8 sps:$4 sm:$0xff]   ;;  %v573_v9 = vld [vmem:[%s997_s1 + $0x44] ss:$8 sps:$4 sm:$0xff]  }
   0x4   :  { %253 = vmatprep.subr.bf16.mxu0 %v564_v3  ;;  %545 = vmatprep.subr.bf16.mxu1 %v564_v3  ;;  %v575_v10 = vld [vmem:[%s997_s1 + $0x40] ss:$8 sps:$4 sm:$0xff]   ;;  %v576_v11 = vld [vmem:[%s997_s1 + $0x54] ss:$8 sps:$4 sm:$0xff]   ;;  %v578_v12 = vld [vmem:[%s997_s1 + $0x50] ss:$8 sps:$4 sm:$0xff]  }
   0x5   :  { %v579_v13 = vld [vmem:[%s997_s1 + $0x64] ss:$8 sps:$4 sm:$0xff]   ;;  %v581_v14 = vld [vmem:[%s997_s1 + $0x60] ss:$8 sps:$4 sm:$0xff]   ;;  %v582_v15 = vld [vmem:[%s997_s1 + $0x74] ss:$8 sps:$4 sm:$0xff]  }
   0x6   :  { %v584_v16 = vld [vmem:[%s997_s1 + $0x70] ss:$8 sps:$4 sm:$0xff]   ;;  %v585_v17 = vld [vmem:[%s998_s0] sm:$0xff]   ;;  %v587_v19 = vld [vmem:[%s998_s0 + $0x8] sm:$0xff]   ;;  %v66_v34 = vshrl.u32 %v65_v33, 7 }
   0x7   :  { %254 = vmatpush1.bf16.msra.mxu0 %v566_v4  ;;  %553 = vmatpush1.bf16.msra.mxu1 %v566_v4  ;;  %v586_v18 = vld [vmem:[%s998_s0 + $0x40] sm:$0xff]   ;;  %v588_v20 = vld [vmem:[%s998_s0 + $0x48] sm:$0xff]   ;;  %v589_v21 = vld [vmem:[%s998_s0 + $0x10] sm:$0xff]  }
   0x8   :  { %255 = vmatprep.subr.bf16.mxu0 %v567_v5  ;;  %546 = vmatprep.subr.bf16.mxu1 %v567_v5  ;;  %v590_v22 = vld [vmem:[%s998_s0 + $0x50] sm:$0xff]   ;;  %v591_v23 = vld [vmem:[%s998_s0 + $0x18] sm:$0xff]   ;;  %v593_v25 = vld [vmem:[%s998_s0 + $0x20] sm:$0xff]   ;;  %v67_v35 = vsub.s32 0, %v66_v34  ;;  %v71_v37 = vsub.s32 1, %v66_v34 }
   0x9   :  { %v592_v24 = vld [vmem:[%s998_s0 + $0x58] sm:$0xff]   ;;  %v594_v26 = vld [vmem:[%s998_s0 + $0x60] sm:$0xff]   ;;  %v595_v27 = vld [vmem:[%s998_s0 + $0x28] sm:$0xff]  }
   0xa   :  { %v596_v28 = vld [vmem:[%s998_s0 + $0x68] sm:$0xff]   ;;  %v597_v29 = vld [vmem:[%s998_s0 + $0x30] sm:$0xff]   ;;  %v599_v31 = vld [vmem:[%s998_s0 + $0x38] sm:$0xff]  }
   0xb   :  { %256 = vmatpush1.bf16.msra.mxu0 %v569_v6  ;;  %554 = vmatpush1.bf16.msra.mxu1 %v569_v6  ;;  %v598_v30 = vld [vmem:[%s998_s0 + $0x70] sm:$0xff]   ;;  %v600_v32 = vld [vmem:[%s998_s0 + $0x78] sm:$0xff]   ;;  %v63_v36 = vld [vmem:[%s999_s2] sm:$0x3] }
   0xc   :  { %257 = vmatprep.subr.bf16.mxu0 %v570_v7  ;;  %547 = vmatprep.subr.bf16.mxu1 %v570_v7  ;;  %v737_v38 = vrot.slane %v63_v36, %v67_v35  ;;  %v739_v39 = vrot.slane %v63_v36, %v71_v37 }
   0xf   :  { %258 = vmatpush1.bf16.msra.mxu0 %v572_v8  ;;  %555 = vmatpush1.bf16.msra.mxu1 %v572_v8 }
  0x10   :  { %259 = vmatprep.subr.bf16.mxu0 %v573_v9  ;;  %548 = vmatprep.subr.bf16.mxu1 %v573_v9 }
  0x13   :  { %260 = vmatpush1.bf16.msra.mxu0 %v575_v10  ;;  %556 = vmatpush1.bf16.msra.mxu1 %v575_v10 }
  0x14   :  { %261 = vmatprep.subr.bf16.mxu0 %v576_v11  ;;  %549 = vmatprep.subr.bf16.mxu1 %v576_v11 }
  0x17   :  { %262 = vmatpush1.bf16.msra.mxu0 %v578_v12  ;;  %557 = vmatpush1.bf16.msra.mxu1 %v578_v12 }
  0x18   :  { %263 = vmatprep.subr.bf16.mxu0 %v579_v13  ;;  %550 = vmatprep.subr.bf16.mxu1 %v579_v13 }
  0x1b   :  { %264 = vmatpush1.bf16.msra.mxu0 %v581_v14  ;;  %558 = vmatpush1.bf16.msra.mxu1 %v581_v14 }
  0x1c   :  { %265 = vmatprep.subr.bf16.mxu0 %v582_v15  ;;  %551 = vmatprep.subr.bf16.mxu1 %v582_v15 }
  0x1f   :  { %266 = vmatpush1.bf16.msra.mxu0 %v584_v16  ;;  %559 = vmatpush1.bf16.msra.mxu1 %v584_v16 }
  0x22   :  { %284 = vmatmul.mubr.bf16.vlgmr.msra.gmra.mrb[0].mxu0 %v585_v17  ;;  %364 = vmatmul.mubr.bf16.vlgmr.msra.gmra.mrb[0].mxu1 %v586_v18 }
  0x23   :  { %293 = vmatprep.mubr.bf16.mxu0 %v601_v1  ;;  %373 = vmatprep.mubr.bf16.mxu1 %v601_v1 }
  0x2a   :  { %294 = vmatmul.mubr.bf16.gmra.mrb[4].mxu0 %v587_v19  ;;  %374 = vmatmul.mubr.bf16.gmra.mrb[4].mxu1 %v588_v20 }
  0x2b   :  { %303 = vmatprep.mubr.bf16.mxu0 %v601_v1  ;;  %383 = vmatprep.mubr.bf16.mxu1 %v601_v1 }
  0x32   :  { %304 = vmatmul.mubr.bf16.gmra.mrb[8].mxu0 %v589_v21  ;;  %384 = vmatmul.mubr.bf16.gmra.mrb[8].mxu1 %v590_v22 }
  0x33   :  { %313 = vmatprep.mubr.bf16.mxu0 %v601_v1  ;;  %393 = vmatprep.mubr.bf16.mxu1 %v601_v1 }
  0x3a   :  { %314 = vmatmul.mubr.bf16.gmra.mrb[12].mxu0 %v591_v23  ;;  %394 = vmatmul.mubr.bf16.gmra.mrb[12].mxu1 %v592_v24 }
  0x3b   :  { %323 = vmatprep.mubr.bf16.mxu0 %v601_v1  ;;  %403 = vmatprep.mubr.bf16.mxu1 %v601_v1 }
  0x42   :  { %324 = vmatmul.mubr.bf16.gmra.mrb[16].mxu0 %v593_v25  ;;  %404 = vmatmul.mubr.bf16.gmra.mrb[16].mxu1 %v594_v26 }
  0x43   :  { %333 = vmatprep.mubr.bf16.mxu0 %v601_v1  ;;  %413 = vmatprep.mubr.bf16.mxu1 %v601_v1 }
  0x4a   :  { %334 = vmatmul.mubr.bf16.gmra.mrb[20].mxu0 %v595_v27  ;;  %414 = vmatmul.mubr.bf16.gmra.mrb[20].mxu1 %v596_v28 }
  0x4b   :  { %343 = vmatprep.mubr.bf16.mxu0 %v601_v1  ;;  %423 = vmatprep.mubr.bf16.mxu1 %v601_v1 }
  0x52   :  { %344 = vmatmul.mubr.bf16.gmra.mrb[24].mxu0 %v597_v29  ;;  %424 = vmatmul.mubr.bf16.gmra.mrb[24].mxu1 %v598_v30 }
  0x53   :  { %353 = vmatprep.mubr.bf16.mxu0 %v601_v1  ;;  %433 = vmatprep.mubr.bf16.mxu1 %v601_v1 }
  0x5a   :  { %354 = vmatmul.mubr.bf16.gmra.mrb[28].mxu0 %v599_v31  ;;  %434 = vmatmul.mubr.bf16.gmra.mrb[28].mxu1 %v600_v32 }
  0xf5   :  { %v285_v40 = vpop.f32.mrb[0].mxu0  ;;  %v365_v41 = vpop.f32.mrb[0].mxu1 }
  0xf6   :  { %v286_v42 = vadd.f32 %v285_v40, %v737_v38  ;;  %v366_v43 = vadd.f32 %v365_v41, %v737_v38  ;;  %v287_v44 = vpop.f32.mrb[1].mxu0  ;;  %v367_v45 = vpop.f32.mrb[1].mxu1 }
  0xf7   :  { %v288_v46 = vadd.f32 %v287_v44, %v739_v39  ;;  %v368_v47 = vadd.f32 %v367_v45, %v739_v39  ;;  %v289_v48 = vpop.f32.mrb[2].mxu0  ;;  %v369_v49 = vpop.f32.mrb[2].mxu1 }
  0xf8   :  { %444 = vst [vmem:[%s1000_s3] sm:$0xff] %v286_v42  ;;  %476 = vst [vmem:[%s1000_s3 + $0x100] sm:$0xff] %v366_v43  ;;  %v290_v50 = vadd.f32 %v289_v48, %v737_v38  ;;  %v370_v51 = vadd.f32 %v369_v49, %v737_v38  ;;  %v291_v52 = vpop.f32.mrb[3].mxu0  ;;  %v371_v53 = vpop.f32.mrb[3].mxu1 }
  0xf9   :  { %445 = vst [vmem:[%s1000_s3 + $0x8] sm:$0xff] %v288_v46  ;;  %477 = vst [vmem:[%s1000_s3 + $0x108] sm:$0xff] %v368_v47  ;;  %v292_v54 = vadd.f32 %v291_v52, %v739_v39  ;;  %v372_v55 = vadd.f32 %v371_v53, %v739_v39 }
  0xfa   :  { %446 = vst [vmem:[%s1000_s3 + $0x10] sm:$0xff] %v290_v50  ;;  %478 = vst [vmem:[%s1000_s3 + $0x110] sm:$0xff] %v370_v51 }
  0xfb   :  { %447 = vst [vmem:[%s1000_s3 + $0x18] sm:$0xff] %v292_v54  ;;  %479 = vst [vmem:[%s1000_s3 + $0x118] sm:$0xff] %v372_v55 }
  0xfd   :  { %v295_v56 = vpop.f32.mrb[4].mxu0  ;;  %v375_v57 = vpop.f32.mrb[4].mxu1 }
  0xfe   :  { %v296_v58 = vadd.f32 %v295_v56, %v737_v38  ;;  %v376_v59 = vadd.f32 %v375_v57, %v737_v38  ;;  %v297_v60 = vpop.f32.mrb[5].mxu0  ;;  %v377_v61 = vpop.f32.mrb[5].mxu1 }
  0xff   :  { %v298_v62 = vadd.f32 %v297_v60, %v739_v39  ;;  %v378_v63 = vadd.f32 %v377_v61, %v739_v39  ;;  %v299_v0 = vpop.f32.mrb[6].mxu0  ;;  %v379_v1 = vpop.f32.mrb[6].mxu1 }
 0x100   :  { %448 = vst [vmem:[%s1000_s3 + $0x20] sm:$0xff] %v296_v58  ;;  %480 = vst [vmem:[%s1000_s3 + $0x120] sm:$0xff] %v376_v59  ;;  %v300_v2 = vadd.f32 %v299_v0, %v737_v38  ;;  %v380_v3 = vadd.f32 %v379_v1, %v737_v38  ;;  %v301_v4 = vpop.f32.mrb[7].mxu0  ;;  %v381_v5 = vpop.f32.mrb[7].mxu1 }
 0x101   :  { %449 = vst [vmem:[%s1000_s3 + $0x28] sm:$0xff] %v298_v62  ;;  %481 = vst [vmem:[%s1000_s3 + $0x128] sm:$0xff] %v378_v63  ;;  %v302_v6 = vadd.f32 %v301_v4, %v739_v39  ;;  %v382_v7 = vadd.f32 %v381_v5, %v739_v39 }
 0x102   :  { %450 = vst [vmem:[%s1000_s3 + $0x30] sm:$0xff] %v300_v2  ;;  %482 = vst [vmem:[%s1000_s3 + $0x130] sm:$0xff] %v380_v3 }
 0x103   :  { %451 = vst [vmem:[%s1000_s3 + $0x38] sm:$0xff] %v302_v6  ;;  %483 = vst [vmem:[%s1000_s3 + $0x138] sm:$0xff] %v382_v7 }
 0x105   :  { %v305_v8 = vpop.f32.mrb[8].mxu0  ;;  %v385_v9 = vpop.f32.mrb[8].mxu1 }
 0x106   :  { %v306_v10 = vadd.f32 %v305_v8, %v737_v38  ;;  %v386_v11 = vadd.f32 %v385_v9, %v737_v38  ;;  %v307_v12 = vpop.f32.mrb[9].mxu0  ;;  %v387_v13 = vpop.f32.mrb[9].mxu1 }
 0x107   :  { %v308_v14 = vadd.f32 %v307_v12, %v739_v39  ;;  %v388_v15 = vadd.f32 %v387_v13, %v739_v39  ;;  %v309_v16 = vpop.f32.mrb[10].mxu0  ;;  %v389_v17 = vpop.f32.mrb[10].mxu1 }
 0x108   :  { %452 = vst [vmem:[%s1000_s3 + $0x40] sm:$0xff] %v306_v10  ;;  %484 = vst [vmem:[%s1000_s3 + $0x140] sm:$0xff] %v386_v11  ;;  %v310_v18 = vadd.f32 %v309_v16, %v737_v38  ;;  %v390_v19 = vadd.f32 %v389_v17, %v737_v38  ;;  %v311_v20 = vpop.f32.mrb[11].mxu0  ;;  %v391_v21 = vpop.f32.mrb[11].mxu1 }
 0x109   :  { %453 = vst [vmem:[%s1000_s3 + $0x48] sm:$0xff] %v308_v14  ;;  %485 = vst [vmem:[%s1000_s3 + $0x148] sm:$0xff] %v388_v15  ;;  %v312_v22 = vadd.f32 %v311_v20, %v739_v39  ;;  %v392_v23 = vadd.f32 %v391_v21, %v739_v39 }
 0x10a   :  { %454 = vst [vmem:[%s1000_s3 + $0x50] sm:$0xff] %v310_v18  ;;  %486 = vst [vmem:[%s1000_s3 + $0x150] sm:$0xff] %v390_v19 }
 0x10b   :  { %455 = vst [vmem:[%s1000_s3 + $0x58] sm:$0xff] %v312_v22  ;;  %487 = vst [vmem:[%s1000_s3 + $0x158] sm:$0xff] %v392_v23 }
 0x10d   :  { %v315_v24 = vpop.f32.mrb[12].mxu0  ;;  %v395_v25 = vpop.f32.mrb[12].mxu1 }
 0x10e   :  { %v316_v26 = vadd.f32 %v315_v24, %v737_v38  ;;  %v396_v27 = vadd.f32 %v395_v25, %v737_v38  ;;  %v317_v28 = vpop.f32.mrb[13].mxu0  ;;  %v397_v29 = vpop.f32.mrb[13].mxu1 }
 0x10f   :  { %v318_v30 = vadd.f32 %v317_v28, %v739_v39  ;;  %v398_v31 = vadd.f32 %v397_v29, %v739_v39  ;;  %v319_v32 = vpop.f32.mrb[14].mxu0  ;;  %v399_v33 = vpop.f32.mrb[14].mxu1 }
 0x110   :  { %456 = vst [vmem:[%s1000_s3 + $0x60] sm:$0xff] %v316_v26  ;;  %488 = vst [vmem:[%s1000_s3 + $0x160] sm:$0xff] %v396_v27  ;;  %v320_v34 = vadd.f32 %v319_v32, %v737_v38  ;;  %v400_v35 = vadd.f32 %v399_v33, %v737_v38  ;;  %v321_v36 = vpop.f32.mrb[15].mxu0  ;;  %v401_v37 = vpop.f32.mrb[15].mxu1 }
 0x111   :  { %457 = vst [vmem:[%s1000_s3 + $0x68] sm:$0xff] %v318_v30  ;;  %489 = vst [vmem:[%s1000_s3 + $0x168] sm:$0xff] %v398_v31  ;;  %v322_v40 = vadd.f32 %v321_v36, %v739_v39  ;;  %v402_v41 = vadd.f32 %v401_v37, %v739_v39 }
 0x112   :  { %458 = vst [vmem:[%s1000_s3 + $0x70] sm:$0xff] %v320_v34  ;;  %490 = vst [vmem:[%s1000_s3 + $0x170] sm:$0xff] %v400_v35 }
 0x113   :  { %459 = vst [vmem:[%s1000_s3 + $0x78] sm:$0xff] %v322_v40  ;;  %491 = vst [vmem:[%s1000_s3 + $0x178] sm:$0xff] %v402_v41 }
 0x115   :  { %v325_v42 = vpop.f32.mrb[16].mxu0  ;;  %v405_v43 = vpop.f32.mrb[16].mxu1 }
 0x116   :  { %v326_v44 = vadd.f32 %v325_v42, %v737_v38  ;;  %v406_v45 = vadd.f32 %v405_v43, %v737_v38  ;;  %v327_v46 = vpop.f32.mrb[17].mxu0  ;;  %v407_v47 = vpop.f32.mrb[17].mxu1 }
 0x117   :  { %v328_v48 = vadd.f32 %v327_v46, %v739_v39  ;;  %v408_v49 = vadd.f32 %v407_v47, %v739_v39  ;;  %v329_v50 = vpop.f32.mrb[18].mxu0  ;;  %v409_v51 = vpop.f32.mrb[18].mxu1 }
 0x118   :  { %460 = vst [vmem:[%s1000_s3 + $0x80] sm:$0xff] %v326_v44  ;;  %492 = vst [vmem:[%s1000_s3 + $0x180] sm:$0xff] %v406_v45  ;;  %v330_v52 = vadd.f32 %v329_v50, %v737_v38  ;;  %v410_v53 = vadd.f32 %v409_v51, %v737_v38  ;;  %v331_v54 = vpop.f32.mrb[19].mxu0  ;;  %v411_v55 = vpop.f32.mrb[19].mxu1 }
 0x119   :  { %461 = vst [vmem:[%s1000_s3 + $0x88] sm:$0xff] %v328_v48  ;;  %493 = vst [vmem:[%s1000_s3 + $0x188] sm:$0xff] %v408_v49  ;;  %v332_v56 = vadd.f32 %v331_v54, %v739_v39  ;;  %v412_v57 = vadd.f32 %v411_v55, %v739_v39 }
 0x11a   :  { %462 = vst [vmem:[%s1000_s3 + $0x90] sm:$0xff] %v330_v52  ;;  %494 = vst [vmem:[%s1000_s3 + $0x190] sm:$0xff] %v410_v53 }
 0x11b   :  { %463 = vst [vmem:[%s1000_s3 + $0x98] sm:$0xff] %v332_v56  ;;  %495 = vst [vmem:[%s1000_s3 + $0x198] sm:$0xff] %v412_v57 }
 0x11d   :  { %v335_v58 = vpop.f32.mrb[20].mxu0  ;;  %v415_v59 = vpop.f32.mrb[20].mxu1 }
 0x11e   :  { %v336_v60 = vadd.f32 %v335_v58, %v737_v38  ;;  %v416_v61 = vadd.f32 %v415_v59, %v737_v38  ;;  %v337_v62 = vpop.f32.mrb[21].mxu0  ;;  %v417_v63 = vpop.f32.mrb[21].mxu1 }
 0x11f   :  { %v338_v0 = vadd.f32 %v337_v62, %v739_v39  ;;  %v418_v1 = vadd.f32 %v417_v63, %v739_v39  ;;  %v339_v2 = vpop.f32.mrb[22].mxu0  ;;  %v419_v3 = vpop.f32.mrb[22].mxu1 }
 0x120   :  { %464 = vst [vmem:[%s1000_s3 + $0xa0] sm:$0xff] %v336_v60  ;;  %496 = vst [vmem:[%s1000_s3 + $0x1a0] sm:$0xff] %v416_v61  ;;  %v340_v4 = vadd.f32 %v339_v2, %v737_v38  ;;  %v420_v5 = vadd.f32 %v419_v3, %v737_v38  ;;  %v341_v6 = vpop.f32.mrb[23].mxu0  ;;  %v421_v7 = vpop.f32.mrb[23].mxu1 }
 0x121   :  { %465 = vst [vmem:[%s1000_s3 + $0xa8] sm:$0xff] %v338_v0  ;;  %497 = vst [vmem:[%s1000_s3 + $0x1a8] sm:$0xff] %v418_v1  ;;  %v342_v8 = vadd.f32 %v341_v6, %v739_v39  ;;  %v422_v9 = vadd.f32 %v421_v7, %v739_v39 }
 0x122   :  { %466 = vst [vmem:[%s1000_s3 + $0xb0] sm:$0xff] %v340_v4  ;;  %498 = vst [vmem:[%s1000_s3 + $0x1b0] sm:$0xff] %v420_v5 }
 0x123   :  { %467 = vst [vmem:[%s1000_s3 + $0xb8] sm:$0xff] %v342_v8  ;;  %499 = vst [vmem:[%s1000_s3 + $0x1b8] sm:$0xff] %v422_v9 }
 0x125   :  { %v345_v10 = vpop.f32.mrb[24].mxu0  ;;  %v425_v11 = vpop.f32.mrb[24].mxu1 }
 0x126   :  { %v346_v12 = vadd.f32 %v345_v10, %v737_v38  ;;  %v426_v13 = vadd.f32 %v425_v11, %v737_v38  ;;  %v347_v14 = vpop.f32.mrb[25].mxu0  ;;  %v427_v15 = vpop.f32.mrb[25].mxu1 }
 0x127   :  { %v348_v16 = vadd.f32 %v347_v14, %v739_v39  ;;  %v428_v17 = vadd.f32 %v427_v15, %v739_v39  ;;  %v349_v18 = vpop.f32.mrb[26].mxu0  ;;  %v429_v19 = vpop.f32.mrb[26].mxu1 }
 0x128   :  { %468 = vst [vmem:[%s1000_s3 + $0xc0] sm:$0xff] %v346_v12  ;;  %500 = vst [vmem:[%s1000_s3 + $0x1c0] sm:$0xff] %v426_v13  ;;  %v350_v20 = vadd.f32 %v349_v18, %v737_v38  ;;  %v430_v21 = vadd.f32 %v429_v19, %v737_v38  ;;  %v351_v22 = vpop.f32.mrb[27].mxu0  ;;  %v431_v23 = vpop.f32.mrb[27].mxu1 }
 0x129   :  { %469 = vst [vmem:[%s1000_s3 + $0xc8] sm:$0xff] %v348_v16  ;;  %501 = vst [vmem:[%s1000_s3 + $0x1c8] sm:$0xff] %v428_v17  ;;  %v352_v24 = vadd.f32 %v351_v22, %v739_v39  ;;  %v432_v25 = vadd.f32 %v431_v23, %v739_v39 }
 0x12a   :  { %470 = vst [vmem:[%s1000_s3 + $0xd0] sm:$0xff] %v350_v20  ;;  %502 = vst [vmem:[%s1000_s3 + $0x1d0] sm:$0xff] %v430_v21 }
 0x12b   :  { %471 = vst [vmem:[%s1000_s3 + $0xd8] sm:$0xff] %v352_v24  ;;  %503 = vst [vmem:[%s1000_s3 + $0x1d8] sm:$0xff] %v432_v25 }
 0x12d   :  { %v355_v26 = vpop.f32.mrb[28].mxu0  ;;  %v435_v27 = vpop.f32.mrb[28].mxu1 }
 0x12e   :  { %v356_v28 = vadd.f32 %v355_v26, %v737_v38  ;;  %v436_v29 = vadd.f32 %v435_v27, %v737_v38  ;;  %v357_v30 = vpop.f32.mrb[29].mxu0  ;;  %v437_v31 = vpop.f32.mrb[29].mxu1 }
 0x12f   :  { %v358_v32 = vadd.f32 %v357_v30, %v739_v39  ;;  %v438_v33 = vadd.f32 %v437_v31, %v739_v39  ;;  %v359_v34 = vpop.f32.mrb[30].mxu0  ;;  %v439_v35 = vpop.f32.mrb[30].mxu1 }
 0x130   :  { %472 = vst [vmem:[%s1000_s3 + $0xe0] sm:$0xff] %v356_v28  ;;  %504 = vst [vmem:[%s1000_s3 + $0x1e0] sm:$0xff] %v436_v29  ;;  %v360_v36 = vadd.f32 %v359_v34, %v737_v38  ;;  %v440_v37 = vadd.f32 %v439_v35, %v737_v38  ;;  %v361_v40 = vpop.f32.mrb[31].mxu0  ;;  %v441_v41 = vpop.f32.mrb[31].mxu1 }
 0x131   :  { %473 = vst [vmem:[%s1000_s3 + $0xe8] sm:$0xff] %v358_v32  ;;  %505 = vst [vmem:[%s1000_s3 + $0x1e8] sm:$0xff] %v438_v33  ;;  %v362_v42 = vadd.f32 %v361_v40, %v739_v39  ;;  %v442_v43 = vadd.f32 %v441_v41, %v739_v39 }
 0x132   :  { %474 = vst [vmem:[%s1000_s3 + $0xf0] sm:$0xff] %v360_v36  ;;  %506 = vst [vmem:[%s1000_s3 + $0x1f0] sm:$0xff] %v440_v37 }
 0x133   :  { %475 = vst [vmem:[%s1000_s3 + $0xf8] sm:$0xff] %v362_v42  ;;  %507 = vst [vmem:[%s1000_s3 + $0x1f8] sm:$0xff] %v442_v43 }

// kernel: net_forward.87
= control target key start
LH: loop header
LB: loop body
LE: loop exit
PB: predicated region body
PF: predicated region fallthrough
CT: control target
= control target key end

     0   :  { %s1353_s1 = inlined_call_operand.vmem [shape: bf16[768,256], index: 1, kind: input, shape index: {}]   ;;  %s1354_s0 = inlined_call_operand.vmem [shape: bf16[8,768], index: 0, kind: input, shape index: {}]   ;;  %s1355_s2 = inlined_call_operand.vmem [shape: f32[1,256], index: 2, kind: input, shape index: {}]   ;;  %s1356_s3 = inlined_call_operand.vmem [shape: f32[8,256], index: 3, kind: output, shape index: {}]  }
   0x1   :  { %v865_v0 = vld [vmem:[%s1353_s1 + $0x104] ss:$8 sps:$4 sm:$0xff]   ;;  %v867_v1 = vld [vmem:[%s1353_s1 + $0x100] ss:$8 sps:$4 sm:$0xff]   ;;  %v868_v2 = vld [vmem:[%s1353_s1 + $0x114] ss:$8 sps:$4 sm:$0xff]  }
   0x2   :  { %667 = vmatprep.subr.bf16.mxu0 %v865_v0  ;;  %v870_v3 = vld [vmem:[%s1353_s1 + $0x110] ss:$8 sps:$4 sm:$0xff]   ;;  %v871_v4 = vld [vmem:[%s1353_s1 + $0x124] ss:$8 sps:$4 sm:$0xff]   ;;  %v873_v5 = vld [vmem:[%s1353_s1 + $0x120] ss:$8 sps:$4 sm:$0xff]  }
   0x3   :  { %668 = vmatpush1.bf16.msra.mxu0 %v867_v1  ;;  %v874_v6 = vld [vmem:[%s1353_s1 + $0x134] ss:$8 sps:$4 sm:$0xff]   ;;  %v876_v7 = vld [vmem:[%s1353_s1 + $0x130] ss:$8 sps:$4 sm:$0xff]   ;;  %v877_v8 = vld [vmem:[%s1353_s1 + $0x144] ss:$8 sps:$4 sm:$0xff]  }
   0x4   :  { %669 = vmatprep.subr.bf16.mxu0 %v868_v2  ;;  %v879_v9 = vld [vmem:[%s1353_s1 + $0x140] ss:$8 sps:$4 sm:$0xff]   ;;  %v880_v10 = vld [vmem:[%s1353_s1 + $0x154] ss:$8 sps:$4 sm:$0xff]   ;;  %v882_v11 = vld [vmem:[%s1353_s1 + $0x150] ss:$8 sps:$4 sm:$0xff]  }
   0x5   :  { %v883_v12 = vld [vmem:[%s1353_s1 + $0x164] ss:$8 sps:$4 sm:$0xff]   ;;  %v912_v14 = vld [vmem:[%s1353_s1] ss:$8 sps:$4 sm:$0xff]   ;;  %v886_v16 = vld [vmem:[%s1353_s1 + $0x174] ss:$8 sps:$4 sm:$0xff]  }
   0x6   :  { %v910_v13 = vld [vmem:[%s1353_s1 + $0x4] ss:$8 sps:$4 sm:$0xff]   ;;  %v885_v15 = vld [vmem:[%s1353_s1 + $0x160] ss:$8 sps:$4 sm:$0xff]   ;;  %v916_v17 = vld [vmem:[%s1353_s1 + $0x14] ss:$8 sps:$4 sm:$0xff]  }
   0x7   :  { %670 = vmatpush1.bf16.msra.mxu0 %v870_v3  ;;  %626 = vmatprep.subr.bf16.mxu1 %v910_v13  ;;  %v918_v18 = vld [vmem:[%s1353_s1 + $0x10] ss:$8 sps:$4 sm:$0xff]   ;;  %v1095_v19 = vld [vmem:[%s1354_s0 + $0x8] sm:$0xff]  ;;  %v930_v25 = vld [vmem:[%s1353_s1 + $0x34] ss:$8 sps:$4 sm:$0xff]  }
   0x8   :  { %671 = vmatprep.subr.bf16.mxu0 %v871_v4  ;;  %627 = vmatpush1.bf16.msra.mxu1 %v912_v14  ;;  %v758_v20 = vcombine.high %v1095_v19, %v1095_v19  ;;  %v888_v21 = vld [vmem:[%s1353_s1 + $0x170] ss:$8 sps:$4 sm:$0xff]   ;;  %v924_v22 = vld [vmem:[%s1353_s1 + $0x24] ss:$8 sps:$4 sm:$0xff]   ;;  %v926_v23 = vld [vmem:[%s1353_s1 + $0x20] ss:$8 sps:$4 sm:$0xff]   ;;  %v757_v58 = vcombine.low %v1095_v19, %v1095_v19 }
   0x9   :  { %628 = vmatprep.subr.bf16.mxu1 %v916_v17  ;;  %v889_v24 = vld [vmem:[%s1353_s1 + $0x184] ss:$8 sps:$4 sm:$0xff]   ;;  %v891_v26 = vld [vmem:[%s1353_s1 + $0x180] ss:$8 sps:$4 sm:$0xff]   ;;  %v892_v27 = vld [vmem:[%s1353_s1 + $0x194] ss:$8 sps:$4 sm:$0xff]  }
   0xa   :  { %699 = vmatprep.mubr.bf16.mxu0 %v758_v20  ;;  %v932_v28 = vld [vmem:[%s1353_s1 + $0x30] ss:$8 sps:$4 sm:$0xff]   ;;  %v936_v29 = vld [vmem:[%s1353_s1 + $0x44] ss:$8 sps:$4 sm:$0xff]   ;;  %v938_v32 = vld [vmem:[%s1353_s1 + $0x40] ss:$8 sps:$4 sm:$0xff]  }
   0xb   :  { %672 = vmatpush1.bf16.msra.mxu0 %v873_v5  ;;  %v894_v30 = vld [vmem:[%s1353_s1 + $0x190] ss:$8 sps:$4 sm:$0xff]   ;;  %v895_v31 = vld [vmem:[%s1353_s1 + $0x1a4] ss:$8 sps:$4 sm:$0xff]   ;;  %v942_v33 = vld [vmem:[%s1353_s1 + $0x54] ss:$8 sps:$4 sm:$0xff]  }
   0xc   :  { %673 = vmatprep.subr.bf16.mxu0 %v874_v6  ;;  %629 = vmatpush1.bf16.msra.mxu1 %v918_v18  ;;  %v897_v34 = vld [vmem:[%s1353_s1 + $0x1a0] ss:$8 sps:$4 sm:$0xff]   ;;  %v898_v35 = vld [vmem:[%s1353_s1 + $0x1b4] ss:$8 sps:$4 sm:$0xff]   ;;  %v944_v36 = vld [vmem:[%s1353_s1 + $0x50] ss:$8 sps:$4 sm:$0xff]  }
   0xd   :  { %630 = vmatprep.subr.bf16.mxu1 %v924_v22  ;;  %v948_v37 = vld [vmem:[%s1353_s1 + $0x64] ss:$8 sps:$4 sm:$0xff]   ;;  %v900_v38 = vld [vmem:[%s1353_s1 + $0x1b0] ss:$8 sps:$4 sm:$0xff]   ;;  %v950_v40 = vld [vmem:[%s1353_s1 + $0x60] ss:$8 sps:$4 sm:$0xff]  }
   0xe   :  { %v901_v39 = vld [vmem:[%s1353_s1 + $0x1c4] ss:$8 sps:$4 sm:$0xff]   ;;  %v954_v41 = vld [vmem:[%s1353_s1 + $0x74] ss:$8 sps:$4 sm:$0xff]   ;;  %v903_v42 = vld [vmem:[%s1353_s1 + $0x1c0] ss:$8 sps:$4 sm:$0xff]  }
   0xf   :  { %674 = vmatpush1.bf16.msra.mxu0 %v876_v7  ;;  %v904_v43 = vld [vmem:[%s1353_s1 + $0x1d4] ss:$8 sps:$4 sm:$0xff]   ;;  %v956_v44 = vld [vmem:[%s1353_s1 + $0x70] ss:$8 sps:$4 sm:$0xff]   ;;  %v960_v45 = vld [vmem:[%s1353_s1 + $0x84] ss:$8 sps:$4 sm:$0xff]  }
  0x10   :  { %675 = vmatprep.subr.bf16.mxu0 %v877_v8  ;;  %631 = vmatpush1.bf16.msra.mxu1 %v926_v23  ;;  %v906_v46 = vld [vmem:[%s1353_s1 + $0x1d0] ss:$8 sps:$4 sm:$0xff]   ;;  %v907_v47 = vld [vmem:[%s1353_s1 + $0x1e4] ss:$8 sps:$4 sm:$0xff]   ;;  %v962_v48 = vld [vmem:[%s1353_s1 + $0x80] ss:$8 sps:$4 sm:$0xff]  }
  0x11   :  { %632 = vmatprep.subr.bf16.mxu1 %v930_v25  ;;  %v966_v49 = vld [vmem:[%s1353_s1 + $0x94] ss:$8 sps:$4 sm:$0xff]   ;;  %v909_v50 = vld [vmem:[%s1353_s1 + $0x1e0] ss:$8 sps:$4 sm:$0xff]   ;;  %v968_v52 = vld [vmem:[%s1353_s1 + $0x90] ss:$8 sps:$4 sm:$0xff]  }
  0x12   :  { %v913_v51 = vld [vmem:[%s1353_s1 + $0x1f4] ss:$8 sps:$4 sm:$0xff]   ;;  %v972_v53 = vld [vmem:[%s1353_s1 + $0xa4] ss:$8 sps:$4 sm:$0xff]   ;;  %v915_v54 = vld [vmem:[%s1353_s1 + $0x1f0] ss:$8 sps:$4 sm:$0xff]  }
  0x13   :  { %676 = vmatpush1.bf16.msra.mxu0 %v879_v9  ;;  %v923_v55 = vld [vmem:[%s1353_s1 + $0x204] ss:$8 sps:$4 sm:$0xff]   ;;  %v974_v56 = vld [vmem:[%s1353_s1 + $0xa0] ss:$8 sps:$4 sm:$0xff]   ;;  %v978_v57 = vld [vmem:[%s1353_s1 + $0xb4] ss:$8 sps:$4 sm:$0xff]  }
  0x14   :  { %677 = vmatprep.subr.bf16.mxu0 %v880_v10  ;;  %633 = vmatpush1.bf16.msra.mxu1 %v932_v28  ;;  %v921_v59 = vld [vmem:[%s1353_s1 + $0x200] ss:$8 sps:$4 sm:$0xff]   ;;  %v980_v60 = vld [vmem:[%s1353_s1 + $0xb0] ss:$8 sps:$4 sm:$0xff]   ;;  %v929_v62 = vld [vmem:[%s1353_s1 + $0x214] ss:$8 sps:$4 sm:$0xff]  }
  0x15   :  { %634 = vmatprep.subr.bf16.mxu1 %v936_v29  ;;  %v14_v61 = vld [vmem:[%s1354_s0] sm:$0xff]  ;;  %v1230_v1 = vld [vmem:[%s1354_s0 + $0x10] sm:$0xff] }
  0x16   :  { %v984_v63 = vld [vmem:[%s1353_s1 + $0xc4] ss:$8 sps:$4 sm:$0xff]   ;;  %v756_v0 = vcombine.high %v14_v61, %v14_v61  ;;  %v760_v2 = vcombine.high %v1230_v1, %v1230_v1  ;;  %v927_v3 = vld [vmem:[%s1353_s1 + $0x210] ss:$8 sps:$4 sm:$0xff]   ;;  %v986_v4 = vld [vmem:[%s1353_s1 + $0xc0] ss:$8 sps:$4 sm:$0xff]   ;;  %v755_v18 = vcombine.low %v14_v61, %v14_v61 }
  0x17   :  { %678 = vmatpush1.bf16.msra.mxu0 %v882_v11  ;;  %v935_v5 = vld [vmem:[%s1353_s1 + $0x224] ss:$8 sps:$4 sm:$0xff]   ;;  %v990_v6 = vld [vmem:[%s1353_s1 + $0xd4] ss:$8 sps:$4 sm:$0xff]   ;;  %v933_v7 = vld [vmem:[%s1353_s1 + $0x220] ss:$8 sps:$4 sm:$0xff]  }
  0x18   :  { %679 = vmatprep.subr.bf16.mxu0 %v883_v12  ;;  %635 = vmatpush1.bf16.msra.mxu1 %v938_v32  ;;  %v992_v8 = vld [vmem:[%s1353_s1 + $0xd0] ss:$8 sps:$4 sm:$0xff]   ;;  %v941_v9 = vld [vmem:[%s1353_s1 + $0x234] ss:$8 sps:$4 sm:$0xff]   ;;  %v996_v10 = vld [vmem:[%s1353_s1 + $0xe4] ss:$8 sps:$4 sm:$0xff]  }
  0x19   :  { %636 = vmatprep.subr.bf16.mxu1 %v942_v33  ;;  %658 = vmatprep.mubr.bf16.mxu1 %v756_v0  ;;  %v939_v11 = vld [vmem:[%s1353_s1 + $0x230] ss:$8 sps:$4 sm:$0xff]   ;;  %v998_v12 = vld [vmem:[%s1353_s1 + $0xe0] ss:$8 sps:$4 sm:$0xff]   ;;  %v947_v13 = vld [vmem:[%s1353_s1 + $0x244] ss:$8 sps:$4 sm:$0xff]  }
  0x1a   :  { %v1002_v14 = vld [vmem:[%s1353_s1 + $0xf4] ss:$8 sps:$4 sm:$0xff]   ;;  %v951_v19 = vld [vmem:[%s1353_s1 + $0x250] ss:$8 sps:$4 sm:$0xff]   ;;  %v959_v20 = vld [vmem:[%s1353_s1 + $0x264] ss:$8 sps:$4 sm:$0xff]  }
  0x1b   :  { %680 = vmatpush1.bf16.msra.mxu0 %v885_v15  ;;  %v945_v15 = vld [vmem:[%s1353_s1 + $0x240] ss:$8 sps:$4 sm:$0xff]   ;;  %v953_v17 = vld [vmem:[%s1353_s1 + $0x254] ss:$8 sps:$4 sm:$0xff]   ;;  %v963_v23 = vld [vmem:[%s1353_s1 + $0x270] ss:$8 sps:$4 sm:$0xff]  }
  0x1c   :  { %681 = vmatprep.subr.bf16.mxu0 %v886_v16  ;;  %637 = vmatpush1.bf16.msra.mxu1 %v944_v36  ;;  %v1004_v16 = vld [vmem:[%s1353_s1 + $0xf0] ss:$8 sps:$4 sm:$0xff]   ;;  %v965_v22 = vld [vmem:[%s1353_s1 + $0x274] ss:$8 sps:$4 sm:$0xff]   ;;  %v969_v25 = vld [vmem:[%s1353_s1 + $0x280] ss:$8 sps:$4 sm:$0xff]  }
  0x1d   :  { %638 = vmatprep.subr.bf16.mxu1 %v948_v37  ;;  %v983_v28 = vld [vmem:[%s1353_s1 + $0x2a4] ss:$8 sps:$4 sm:$0xff]   ;;  %v981_v29 = vld [vmem:[%s1353_s1 + $0x2a0] ss:$8 sps:$4 sm:$0xff]  }
  0x1e   :  { %v995_v32 = vld [vmem:[%s1353_s1 + $0x2c4] ss:$8 sps:$4 sm:$0xff]   ;;  %v993_v33 = vld [vmem:[%s1353_s1 + $0x2c0] ss:$8 sps:$4 sm:$0xff]  }
  0x1f   :  { %682 = vmatpush1.bf16.msra.mxu0 %v888_v21  ;;  %v957_v21 = vld [vmem:[%s1353_s1 + $0x260] ss:$8 sps:$4 sm:$0xff]   ;;  %v1007_v36 = vld [vmem:[%s1353_s1 + $0x2e4] ss:$8 sps:$4 sm:$0xff]  }
  0x20   :  { %683 = vmatprep.subr.bf16.mxu0 %v889_v24  ;;  %639 = vmatpush1.bf16.msra.mxu1 %v950_v40  ;;  %v971_v24 = vld [vmem:[%s1353_s1 + $0x284] ss:$8 sps:$4 sm:$0xff]   ;;  %v1005_v37 = vld [vmem:[%s1353_s1 + $0x2e0] ss:$8 sps:$4 sm:$0xff]   ;;  %v759_v40 = vcombine.low %v1230_v1, %v1230_v1 }
  0x21   :  { %640 = vmatprep.subr.bf16.mxu1 %v954_v41 }
  0x23   :  { %684 = vmatpush1.bf16.msra.mxu0 %v891_v26  ;;  %v977_v26 = vld [vmem:[%s1353_s1 + $0x294] ss:$8 sps:$4 sm:$0xff]  }
  0x24   :  { %685 = vmatprep.subr.bf16.mxu0 %v892_v27  ;;  %641 = vmatpush1.bf16.msra.mxu1 %v956_v44  ;;  %v975_v27 = vld [vmem:[%s1353_s1 + $0x290] ss:$8 sps:$4 sm:$0xff]  }
  0x25   :  { %642 = vmatprep.subr.bf16.mxu1 %v960_v45  ;;  %v115_v45 = vlaneseq }
  0x27   :  { %686 = vmatpush1.bf16.msra.mxu0 %v894_v30  ;;  %v989_v30 = vld [vmem:[%s1353_s1 + $0x2b4] ss:$8 sps:$4 sm:$0xff]  }
  0x28   :  { %687 = vmatprep.subr.bf16.mxu0 %v895_v31  ;;  %643 = vmatpush1.bf16.msra.mxu1 %v962_v48  ;;  %v987_v31 = vld [vmem:[%s1353_s1 + $0x2b0] ss:$8 sps:$4 sm:$0xff]   ;;  %v113_v48 = vld [vmem:[%s1355_s2] sm:$0x3] }
  0x29   :  { %644 = vmatprep.subr.bf16.mxu1 %v966_v49 }
  0x2b   :  { %688 = vmatpush1.bf16.msra.mxu0 %v897_v34  ;;  %v1001_v34 = vld [vmem:[%s1353_s1 + $0x2d4] ss:$8 sps:$4 sm:$0xff]  }
  0x2c   :  { %689 = vmatprep.subr.bf16.mxu0 %v898_v35  ;;  %645 = vmatpush1.bf16.msra.mxu1 %v968_v52  ;;  %v999_v35 = vld [vmem:[%s1353_s1 + $0x2d0] ss:$8 sps:$4 sm:$0xff]  }
  0x2d   :  { %646 = vmatprep.subr.bf16.mxu1 %v972_v53 }
  0x2f   :  { %690 = vmatpush1.bf16.msra.mxu0 %v900_v38  ;;  %v1012_v38 = vld [vmem:[%s1353_s1 + $0x2f4] ss:$8 sps:$4 sm:$0xff]  }
  0x30   :  { %691 = vmatprep.subr.bf16.mxu0 %v901_v39  ;;  %647 = vmatpush1.bf16.msra.mxu1 %v974_v56  ;;  %v1010_v39 = vld [vmem:[%s1353_s1 + $0x2f0] ss:$8 sps:$4 sm:$0xff]  }
  0x31   :  { %648 = vmatprep.subr.bf16.mxu1 %v978_v57 }
  0x33   :  { %692 = vmatpush1.bf16.msra.mxu0 %v903_v42 }
  0x34   :  { %693 = vmatprep.subr.bf16.mxu0 %v904_v43  ;;  %649 = vmatpush1.bf16.msra.mxu1 %v980_v60 }
  0x35   :  { %650 = vmatprep.subr.bf16.mxu1 %v984_v63 }
  0x37   :  { %694 = vmatpush1.bf16.msra.mxu0 %v906_v46  ;;  %v116_v46 = vshrl.u32 %v115_v45, 7 }
  0x38   :  { %695 = vmatprep.subr.bf16.mxu0 %v907_v47  ;;  %651 = vmatpush1.bf16.msra.mxu1 %v986_v4 }
  0x39   :  { %652 = vmatprep.subr.bf16.mxu1 %v990_v6  ;;  %v117_v47 = vsub.s32 0, %v116_v46  ;;  %v121_v49 = vsub.s32 1, %v116_v46 }
  0x3b   :  { %696 = vmatpush1.bf16.msra.mxu0 %v909_v50  ;;  %v118_v50 = vrot.slane %v113_v48, %v117_v47 }
  0x3c   :  { %697 = vmatprep.subr.bf16.mxu0 %v913_v51  ;;  %653 = vmatpush1.bf16.msra.mxu1 %v992_v8  ;;  %v122_v51 = vrot.slane %v113_v48, %v121_v49 }
  0x3d   :  { %654 = vmatprep.subr.bf16.mxu1 %v996_v10 }
  0x3f   :  { %698 = vmatpush1.bf16.msra.mxu0 %v915_v54 }
  0x40   :  { %708 = vmatprep.subr.bf16.mxu0 %v923_v55  ;;  %655 = vmatpush1.bf16.msra.mxu1 %v998_v12 }
  0x41   :  { %656 = vmatprep.subr.bf16.mxu1 %v1002_v14 }
  0x42   :  { %700 = vmatmul.mubr.bf16.vlgmr.msra.gmra.mrb[0].mxu0 %v757_v58 }
  0x43   :  { %709 = vmatpush1.bf16.msra.mxu0 %v921_v59  ;;  %740 = vmatprep.mubr.bf16.mxu0 %v760_v2 }
  0x44   :  { %710 = vmatprep.subr.bf16.mxu0 %v929_v62  ;;  %657 = vmatpush1.bf16.msra.mxu1 %v1004_v16 }
  0x47   :  { %711 = vmatpush1.bf16.msra.mxu0 %v927_v3  ;;  %659 = vmatmul.mubr.bf16.vlgmr.msra.gmra.mrb[0].mxu1 %v755_v18 }
  0x48   :  { %712 = vmatprep.subr.bf16.mxu0 %v935_v5 }
  0x4b   :  { %713 = vmatpush1.bf16.msra.mxu0 %v933_v7 }
  0x4c   :  { %714 = vmatprep.subr.bf16.mxu0 %v941_v9 }
  0x4f   :  { %715 = vmatpush1.bf16.msra.mxu0 %v939_v11 }
  0x50   :  { %716 = vmatprep.subr.bf16.mxu0 %v947_v13 }
  0x53   :  { %717 = vmatpush1.bf16.msra.mxu0 %v945_v15 }
  0x54   :  { %718 = vmatprep.subr.bf16.mxu0 %v953_v17 }
  0x57   :  { %719 = vmatpush1.bf16.msra.mxu0 %v951_v19 }
  0x58   :  { %720 = vmatprep.subr.bf16.mxu0 %v959_v20 }
  0x5b   :  { %721 = vmatpush1.bf16.msra.mxu0 %v957_v21 }
  0x5c   :  { %722 = vmatprep.subr.bf16.mxu0 %v965_v22 }
  0x5f   :  { %723 = vmatpush1.bf16.msra.mxu0 %v963_v23 }
  0x60   :  { %724 = vmatprep.subr.bf16.mxu0 %v971_v24 }
  0x63   :  { %725 = vmatpush1.bf16.msra.mxu0 %v969_v25 }
  0x64   :  { %726 = vmatprep.subr.bf16.mxu0 %v977_v26 }
  0x67   :  { %727 = vmatpush1.bf16.msra.mxu0 %v975_v27 }
  0x68   :  { %728 = vmatprep.subr.bf16.mxu0 %v983_v28 }
  0x6b   :  { %729 = vmatpush1.bf16.msra.mxu0 %v981_v29 }
  0x6c   :  { %730 = vmatprep.subr.bf16.mxu0 %v989_v30 }
  0x6f   :  { %731 = vmatpush1.bf16.msra.mxu0 %v987_v31 }
  0x70   :  { %732 = vmatprep.subr.bf16.mxu0 %v995_v32 }
  0x73   :  { %733 = vmatpush1.bf16.msra.mxu0 %v993_v33 }
  0x74   :  { %734 = vmatprep.subr.bf16.mxu0 %v1001_v34 }
  0x77   :  { %735 = vmatpush1.bf16.msra.mxu0 %v999_v35 }
  0x78   :  { %736 = vmatprep.subr.bf16.mxu0 %v1007_v36 }
  0x7b   :  { %737 = vmatpush1.bf16.msra.mxu0 %v1005_v37 }
  0x7c   :  { %738 = vmatprep.subr.bf16.mxu0 %v1012_v38 }
  0x7f   :  { %739 = vmatpush1.bf16.msra.mxu0 %v1010_v39 }
  0x82   :  { %741 = vmatmul.mubr.bf16.vlgmr.msra.gmra.mrb[0].mxu0 %v759_v40 }
 0x11a   :  { %v660_v41 = vpop.f32.mrb[0].mxu1 }
 0x11b   :  { %v662_v42 = vpop.f32.mrb[1].mxu1  ;;  %v661_v52 = vadd.f32 %v660_v41, %v118_v50 }
 0x11c   :  { %v664_v43 = vpop.f32.mrb[2].mxu1  ;;  %v663_v53 = vadd.f32 %v662_v42, %v122_v51 }
 0x11d   :  { %v665_v44 = vpop.f32.mrb[3].mxu1 }
 0x155   :  { %v742_v54 = vpop.f32.mrb[0].mxu0 }
 0x156   :  { %v858_v55 = vadd.f32 %v742_v54, %v661_v52  ;;  %v744_v56 = vpop.f32.mrb[1].mxu0 }
 0x157   :  { %v860_v57 = vadd.f32 %v744_v56, %v663_v53  ;;  %v746_v58 = vpop.f32.mrb[2].mxu0 }
 0x158   :  { %749 = vst [vmem:[%s1356_s3] sm:$0xff] %v858_v55  ;;  %v747_v59 = vpop.f32.mrb[3].mxu0 }
 0x159   :  { %750 = vst [vmem:[%s1356_s3 + $0x8] sm:$0xff] %v860_v57 }

// kernel: net_forward.94
= control target key start
LH: loop header
LB: loop body
LE: loop exit
PB: predicated region body
PF: predicated region fallthrough
CT: control target
= control target key end

     0   :  { %v49_v35 = vlaneseq  ;;  %s485_s1 = inlined_call_operand.vmem [shape: bf16[256,256], index: 1, kind: input, shape index: {}]   ;;  %s486_s0 = inlined_call_operand.vmem [shape: bf16[8,256], index: 0, kind: input, shape index: {}]   ;;  %s487_s2 = inlined_call_operand.vmem [shape: f32[1,256], index: 2, kind: input, shape index: {}]   ;;  %s488_s3 = inlined_call_operand.vmem [shape: f32[8,256], index: 3, kind: output, shape index: {}]  }
   0x1   :  { %v307_v0 = vld [vmem:[%s485_s1 + $0x4] ss:$8 sps:$4 sm:$0xff]   ;;  %v309_v1 = vld [vmem:[%s485_s1] ss:$8 sps:$4 sm:$0xff]   ;;  %v310_v2 = vld [vmem:[%s485_s1 + $0x14] ss:$8 sps:$4 sm:$0xff]  }
   0x2   :  { %226 = vmatprep.subr.bf16.mxu0 %v307_v0  ;;  %v312_v3 = vld [vmem:[%s485_s1 + $0x10] ss:$8 sps:$4 sm:$0xff]   ;;  %v313_v4 = vld [vmem:[%s485_s1 + $0x24] ss:$8 sps:$4 sm:$0xff]   ;;  %v315_v5 = vld [vmem:[%s485_s1 + $0x20] ss:$8 sps:$4 sm:$0xff]  }
   0x3   :  { %227 = vmatpush1.bf16.msra.mxu0 %v309_v1  ;;  %v316_v6 = vld [vmem:[%s485_s1 + $0x34] ss:$8 sps:$4 sm:$0xff]   ;;  %v318_v7 = vld [vmem:[%s485_s1 + $0x30] ss:$8 sps:$4 sm:$0xff]   ;;  %v319_v8 = vld [vmem:[%s485_s1 + $0x44] ss:$8 sps:$4 sm:$0xff]  }
   0x4   :  { %228 = vmatprep.subr.bf16.mxu0 %v310_v2  ;;  %v321_v9 = vld [vmem:[%s485_s1 + $0x40] ss:$8 sps:$4 sm:$0xff]   ;;  %v322_v10 = vld [vmem:[%s485_s1 + $0x54] ss:$8 sps:$4 sm:$0xff]   ;;  %v324_v11 = vld [vmem:[%s485_s1 + $0x50] ss:$8 sps:$4 sm:$0xff]  }
   0x5   :  { %v325_v12 = vld [vmem:[%s485_s1 + $0x64] ss:$8 sps:$4 sm:$0xff]   ;;  %v327_v15 = vld [vmem:[%s485_s1 + $0x60] ss:$8 sps:$4 sm:$0xff]   ;;  %v328_v16 = vld [vmem:[%s485_s1 + $0x74] ss:$8 sps:$4 sm:$0xff]  }
   0x6   :  { %v14_v13 = vld [vmem:[%s486_s0] sm:$0xff]  ;;  %v330_v17 = vld [vmem:[%s485_s1 + $0x70] ss:$8 sps:$4 sm:$0xff]   ;;  %v334_v20 = vld [vmem:[%s485_s1 + $0x94] ss:$8 sps:$4 sm:$0xff]   ;;  %v50_v36 = vshrl.u32 %v49_v35, 7 }
   0x7   :  { %229 = vmatpush1.bf16.msra.mxu0 %v312_v3  ;;  %v274_v14 = vcombine.high %v14_v13, %v14_v13  ;;  %v331_v18 = vld [vmem:[%s485_s1 + $0x84] ss:$8 sps:$4 sm:$0xff]   ;;  %v333_v19 = vld [vmem:[%s485_s1 + $0x80] ss:$8 sps:$4 sm:$0xff]   ;;  %v336_v21 = vld [vmem:[%s485_s1 + $0x90] ss:$8 sps:$4 sm:$0xff]   ;;  %v273_v34 = vcombine.low %v14_v13, %v14_v13 }
   0x8   :  { %230 = vmatprep.subr.bf16.mxu0 %v313_v4  ;;  %v337_v22 = vld [vmem:[%s485_s1 + $0xa4] ss:$8 sps:$4 sm:$0xff]   ;;  %v339_v23 = vld [vmem:[%s485_s1 + $0xa0] ss:$8 sps:$4 sm:$0xff]   ;;  %v340_v24 = vld [vmem:[%s485_s1 + $0xb4] ss:$8 sps:$4 sm:$0xff]  }
   0x9   :  { %258 = vmatprep.mubr.bf16.mxu0 %v274_v14  ;;  %v342_v25 = vld [vmem:[%s485_s1 + $0xb0] ss:$8 sps:$4 sm:$0xff]   ;;  %v343_v26 = vld [vmem:[%s485_s1 + $0xc4] ss:$8 sps:$4 sm:$0xff]   ;;  %v345_v27 = vld [vmem:[%s485_s1 + $0xc0] ss:$8 sps:$4 sm:$0xff]  }
   0xa   :  { %v346_v28 = vld [vmem:[%s485_s1 + $0xd4] ss:$8 sps:$4 sm:$0xff]   ;;  %v348_v29 = vld [vmem:[%s485_s1 + $0xd0] ss:$8 sps:$4 sm:$0xff]   ;;  %v349_v30 = vld [vmem:[%s485_s1 + $0xe4] ss:$8 sps:$4 sm:$0xff]  }
   0xb   :  { %231 = vmatpush1.bf16.msra.mxu0 %v315_v5  ;;  %v351_v31 = vld [vmem:[%s485_s1 + $0xe0] ss:$8 sps:$4 sm:$0xff]   ;;  %v352_v32 = vld [vmem:[%s485_s1 + $0xf4] ss:$8 sps:$4 sm:$0xff]   ;;  %v354_v33 = vld [vmem:[%s485_s1 + $0xf0] ss:$8 sps:$4 sm:$0xff]  }
   0xc   :  { %232 = vmatprep.subr.bf16.mxu0 %v316_v6  ;;  %v51_v37 = vsub.s32 0, %v50_v36  ;;  %v47_v38 = vld [vmem:[%s487_s2] sm:$0x3]  ;;  %v55_v39 = vsub.s32 1, %v50_v36 }
   0xe   :  { %v52_v40 = vrot.slane %v47_v38, %v51_v37  ;;  %v56_v41 = vrot.slane %v47_v38, %v55_v39 }
   0xf   :  { %233 = vmatpush1.bf16.msra.mxu0 %v318_v7 }
  0x10   :  { %234 = vmatprep.subr.bf16.mxu0 %v319_v8 }
  0x13   :  { %235 = vmatpush1.bf16.msra.mxu0 %v321_v9 }
  0x14   :  { %236 = vmatprep.subr.bf16.mxu0 %v322_v10 }
  0x17   :  { %237 = vmatpush1.bf16.msra.mxu0 %v324_v11 }
  0x18   :  { %238 = vmatprep.subr.bf16.mxu0 %v325_v12 }
  0x1b   :  { %239 = vmatpush1.bf16.msra.mxu0 %v327_v15 }
  0x1c   :  { %240 = vmatprep.subr.bf16.mxu0 %v328_v16 }
  0x1f   :  { %241 = vmatpush1.bf16.msra.mxu0 %v330_v17 }
  0x20   :  { %242 = vmatprep.subr.bf16.mxu0 %v331_v18 }
  0x23   :  { %243 = vmatpush1.bf16.msra.mxu0 %v333_v19 }
  0x24   :  { %244 = vmatprep.subr.bf16.mxu0 %v334_v20 }
  0x27   :  { %245 = vmatpush1.bf16.msra.mxu0 %v336_v21 }
  0x28   :  { %246 = vmatprep.subr.bf16.mxu0 %v337_v22 }
  0x2b   :  { %247 = vmatpush1.bf16.msra.mxu0 %v339_v23 }
  0x2c   :  { %248 = vmatprep.subr.bf16.mxu0 %v340_v24 }
  0x2f   :  { %249 = vmatpush1.bf16.msra.mxu0 %v342_v25 }
  0x30   :  { %250 = vmatprep.subr.bf16.mxu0 %v343_v26 }
  0x33   :  { %251 = vmatpush1.bf16.msra.mxu0 %v345_v27 }
  0x34   :  { %252 = vmatprep.subr.bf16.mxu0 %v346_v28 }
  0x37   :  { %253 = vmatpush1.bf16.msra.mxu0 %v348_v29 }
  0x38   :  { %254 = vmatprep.subr.bf16.mxu0 %v349_v30 }
  0x3b   :  { %255 = vmatpush1.bf16.msra.mxu0 %v351_v31 }
  0x3c   :  { %256 = vmatprep.subr.bf16.mxu0 %v352_v32 }
  0x3f   :  { %257 = vmatpush1.bf16.msra.mxu0 %v354_v33 }
  0x42   :  { %259 = vmatmul.mubr.bf16.vlgmr.msra.gmra.mrb[0].mxu0 %v273_v34 }
 0x115   :  { %v260_v42 = vpop.f32.mrb[0].mxu0 }
 0x116   :  { %v261_v43 = vadd.f32 %v260_v42, %v52_v40  ;;  %v262_v44 = vpop.f32.mrb[1].mxu0 }
 0x117   :  { %v263_v45 = vadd.f32 %v262_v44, %v56_v41  ;;  %v264_v46 = vpop.f32.mrb[2].mxu0 }
 0x118   :  { %267 = vst [vmem:[%s488_s3] sm:$0xff] %v261_v43  ;;  %v265_v47 = vpop.f32.mrb[3].mxu0 }
 0x119   :  { %268 = vst [vmem:[%s488_s3 + $0x8] sm:$0xff] %v263_v45 }

// kernel: net_forward.96
= control target key start
LH: loop header
LB: loop body
LE: loop exit
PB: predicated region body
PF: predicated region fallthrough
CT: control target
= control target key end

     0   :  { %v56_v40 = vlaneseq  ;;  %s682_s1 = inlined_call_operand.vmem [shape: bf16[256,256], index: 1, kind: input, shape index: {}]   ;;  %s683_s0 = inlined_call_operand.vmem [shape: bf16[64,256], index: 0, kind: input, shape index: {}]   ;;  %s684_s2 = inlined_call_operand.vmem [shape: f32[1,256], index: 2, kind: input, shape index: {}]   ;;  %s685_s3 = inlined_call_operand.vmem [shape: f32[64,256], index: 3, kind: output, shape index: {}]  }
   0x1   :  { %v431_v0 = vld [vmem:[%s682_s1 + $0x4] ss:$8 sps:$4 sm:$0xff]   ;;  %v433_v1 = vld [vmem:[%s682_s1] ss:$8 sps:$4 sm:$0xff]   ;;  %v434_v2 = vld [vmem:[%s682_s1 + $0x14] ss:$8 sps:$4 sm:$0xff]  }
   0x2   :  { %266 = vmatprep.subr.bf16.mxu0 %v431_v0  ;;  %399 = vmatprep.subr.bf16.mxu1 %v431_v0  ;;  %v436_v3 = vld [vmem:[%s682_s1 + $0x10] ss:$8 sps:$4 sm:$0xff]   ;;  %v437_v4 = vld [vmem:[%s682_s1 + $0x24] ss:$8 sps:$4 sm:$0xff]   ;;  %v439_v5 = vld [vmem:[%s682_s1 + $0x20] ss:$8 sps:$4 sm:$0xff]  }
   0x3   :  { %267 = vmatpush1.bf16.msra.mxu0 %v433_v1  ;;  %415 = vmatpush1.bf16.msra.mxu1 %v433_v1  ;;  %v440_v6 = vld [vmem:[%s682_s1 + $0x34] ss:$8 sps:$4 sm:$0xff]   ;;  %v442_v7 = vld [vmem:[%s682_s1 + $0x30] ss:$8 sps:$4 sm:$0xff]   ;;  %v443_v8 = vld [vmem:[%s682_s1 + $0x44] ss:$8 sps:$4 sm:$0xff]  }
   0x4   :  { %268 = vmatprep.subr.bf16.mxu0 %v434_v2  ;;  %400 = vmatprep.subr.bf16.mxu1 %v434_v2  ;;  %v445_v9 = vld [vmem:[%s682_s1 + $0x40] ss:$8 sps:$4 sm:$0xff]   ;;  %v446_v10 = vld [vmem:[%s682_s1 + $0x54] ss:$8 sps:$4 sm:$0xff]   ;;  %v448_v11 = vld [vmem:[%s682_s1 + $0x50] ss:$8 sps:$4 sm:$0xff]  }
   0x5   :  { %v449_v12 = vld [vmem:[%s682_s1 + $0x64] ss:$8 sps:$4 sm:$0xff]   ;;  %v451_v14 = vld [vmem:[%s682_s1 + $0x60] ss:$8 sps:$4 sm:$0xff]   ;;  %v452_v16 = vld [vmem:[%s682_s1 + $0x74] ss:$8 sps:$4 sm:$0xff]  }
   0x6   :  { %v481_v13 = vld [vmem:[%s683_s0 + $0x4] ss:$8 sps:$4 sm:$0xff]   ;;  %v454_v17 = vld [vmem:[%s682_s1 + $0x70] ss:$8 sps:$4 sm:$0xff]   ;;  %v457_v19 = vld [vmem:[%s682_s1 + $0x80] ss:$8 sps:$4 sm:$0xff]  }
   0x7   :  { %269 = vmatpush1.bf16.msra.mxu0 %v436_v3  ;;  %416 = vmatpush1.bf16.msra.mxu1 %v436_v3  ;;  %v484_v15 = vld [vmem:[%s683_s0 + $0x24] ss:$8 sps:$4 sm:$0xff]   ;;  %v458_v20 = vld [vmem:[%s682_s1 + $0x94] ss:$8 sps:$4 sm:$0xff]   ;;  %v460_v21 = vld [vmem:[%s682_s1 + $0x90] ss:$8 sps:$4 sm:$0xff]  }
   0x8   :  { %270 = vmatprep.subr.bf16.mxu0 %v437_v4  ;;  %401 = vmatprep.subr.bf16.mxu1 %v437_v4  ;;  %v455_v18 = vld [vmem:[%s682_s1 + $0x84] ss:$8 sps:$4 sm:$0xff]   ;;  %v463_v23 = vld [vmem:[%s682_s1 + $0xa0] ss:$8 sps:$4 sm:$0xff]   ;;  %v464_v24 = vld [vmem:[%s682_s1 + $0xb4] ss:$8 sps:$4 sm:$0xff]  }
   0x9   :  { %298 = vmatprep.mubr.bf16.mxu0 %v481_v13  ;;  %318 = vmatprep.mubr.bf16.mxu1 %v484_v15  ;;  %v461_v22 = vld [vmem:[%s682_s1 + $0xa4] ss:$8 sps:$4 sm:$0xff]   ;;  %v466_v25 = vld [vmem:[%s682_s1 + $0xb0] ss:$8 sps:$4 sm:$0xff]   ;;  %v469_v27 = vld [vmem:[%s682_s1 + $0xc0] ss:$8 sps:$4 sm:$0xff]  }
   0xa   :  { %v467_v26 = vld [vmem:[%s682_s1 + $0xc4] ss:$8 sps:$4 sm:$0xff]   ;;  %v470_v28 = vld [vmem:[%s682_s1 + $0xd4] ss:$8 sps:$4 sm:$0xff]   ;;  %v472_v29 = vld [vmem:[%s682_s1 + $0xd0] ss:$8 sps:$4 sm:$0xff]  }
   0xb   :  { %271 = vmatpush1.bf16.msra.mxu0 %v439_v5  ;;  %417 = vmatpush1.bf16.msra.mxu1 %v439_v5  ;;  %v473_v30 = vld [vmem:[%s682_s1 + $0xe4] ss:$8 sps:$4 sm:$0xff]   ;;  %v475_v31 = vld [vmem:[%s682_s1 + $0xe0] ss:$8 sps:$4 sm:$0xff]   ;;  %v476_v32 = vld [vmem:[%s682_s1 + $0xf4] ss:$8 sps:$4 sm:$0xff]  }
   0xc   :  { %272 = vmatprep.subr.bf16.mxu0 %v440_v6  ;;  %402 = vmatprep.subr.bf16.mxu1 %v440_v6  ;;  %v478_v33 = vld [vmem:[%s682_s1 + $0xf0] ss:$8 sps:$4 sm:$0xff]   ;;  %v479_v34 = vld [vmem:[%s683_s0] ss:$8 sps:$4 sm:$0xff]   ;;  %v485_v36 = vld [vmem:[%s683_s0 + $0x14] ss:$8 sps:$4 sm:$0xff]  }
   0xd   :  { %v482_v35 = vld [vmem:[%s683_s0 + $0x20] ss:$8 sps:$4 sm:$0xff]   ;;  %v487_v37 = vld [vmem:[%s683_s0 + $0x34] ss:$8 sps:$4 sm:$0xff]   ;;  %v489_v38 = vld [vmem:[%s683_s0 + $0x10] ss:$8 sps:$4 sm:$0xff]  }
   0xe   :  { %v490_v39 = vld [vmem:[%s683_s0 + $0x30] ss:$8 sps:$4 sm:$0xff]   ;;  %v57_v41 = vshrl.u32 %v56_v40, 7  ;;  %v54_v43 = vld [vmem:[%s684_s2] sm:$0x3] }
   0xf   :  { %273 = vmatpush1.bf16.msra.mxu0 %v442_v7  ;;  %418 = vmatpush1.bf16.msra.mxu1 %v442_v7 }
  0x10   :  { %274 = vmatprep.subr.bf16.mxu0 %v443_v8  ;;  %403 = vmatprep.subr.bf16.mxu1 %v443_v8  ;;  %v58_v42 = vsub.s32 0, %v57_v41  ;;  %v62_v44 = vsub.s32 1, %v57_v41 }
  0x12   :  { %v59_v45 = vrot.slane %v54_v43, %v58_v42  ;;  %v63_v46 = vrot.slane %v54_v43, %v62_v44 }
  0x13   :  { %275 = vmatpush1.bf16.msra.mxu0 %v445_v9  ;;  %419 = vmatpush1.bf16.msra.mxu1 %v445_v9 }
  0x14   :  { %276 = vmatprep.subr.bf16.mxu0 %v446_v10  ;;  %404 = vmatprep.subr.bf16.mxu1 %v446_v10 }
  0x17   :  { %277 = vmatpush1.bf16.msra.mxu0 %v448_v11  ;;  %420 = vmatpush1.bf16.msra.mxu1 %v448_v11 }
  0x18   :  { %278 = vmatprep.subr.bf16.mxu0 %v449_v12  ;;  %405 = vmatprep.subr.bf16.mxu1 %v449_v12 }
  0x1b   :  { %279 = vmatpush1.bf16.msra.mxu0 %v451_v14  ;;  %421 = vmatpush1.bf16.msra.mxu1 %v451_v14 }
  0x1c   :  { %280 = vmatprep.subr.bf16.mxu0 %v452_v16  ;;  %406 = vmatprep.subr.bf16.mxu1 %v452_v16 }
  0x1f   :  { %281 = vmatpush1.bf16.msra.mxu0 %v454_v17  ;;  %422 = vmatpush1.bf16.msra.mxu1 %v454_v17 }
  0x20   :  { %282 = vmatprep.subr.bf16.mxu0 %v455_v18  ;;  %407 = vmatprep.subr.bf16.mxu1 %v455_v18 }
  0x23   :  { %283 = vmatpush1.bf16.msra.mxu0 %v457_v19  ;;  %423 = vmatpush1.bf16.msra.mxu1 %v457_v19 }
  0x24   :  { %284 = vmatprep.subr.bf16.mxu0 %v458_v20  ;;  %408 = vmatprep.subr.bf16.mxu1 %v458_v20 }
  0x27   :  { %285 = vmatpush1.bf16.msra.mxu0 %v460_v21  ;;  %424 = vmatpush1.bf16.msra.mxu1 %v460_v21 }
  0x28   :  { %286 = vmatprep.subr.bf16.mxu0 %v461_v22  ;;  %409 = vmatprep.subr.bf16.mxu1 %v461_v22 }
  0x2b   :  { %287 = vmatpush1.bf16.msra.mxu0 %v463_v23  ;;  %425 = vmatpush1.bf16.msra.mxu1 %v463_v23 }
  0x2c   :  { %288 = vmatprep.subr.bf16.mxu0 %v464_v24  ;;  %410 = vmatprep.subr.bf16.mxu1 %v464_v24 }
  0x2f   :  { %289 = vmatpush1.bf16.msra.mxu0 %v466_v25  ;;  %426 = vmatpush1.bf16.msra.mxu1 %v466_v25 }
  0x30   :  { %290 = vmatprep.subr.bf16.mxu0 %v467_v26  ;;  %411 = vmatprep.subr.bf16.mxu1 %v467_v26 }
  0x33   :  { %291 = vmatpush1.bf16.msra.mxu0 %v469_v27  ;;  %427 = vmatpush1.bf16.msra.mxu1 %v469_v27 }
  0x34   :  { %292 = vmatprep.subr.bf16.mxu0 %v470_v28  ;;  %412 = vmatprep.subr.bf16.mxu1 %v470_v28 }
  0x37   :  { %293 = vmatpush1.bf16.msra.mxu0 %v472_v29  ;;  %428 = vmatpush1.bf16.msra.mxu1 %v472_v29 }
  0x38   :  { %294 = vmatprep.subr.bf16.mxu0 %v473_v30  ;;  %413 = vmatprep.subr.bf16.mxu1 %v473_v30 }
  0x3b   :  { %295 = vmatpush1.bf16.msra.mxu0 %v475_v31  ;;  %429 = vmatpush1.bf16.msra.mxu1 %v475_v31 }
  0x3c   :  { %296 = vmatprep.subr.bf16.mxu0 %v476_v32  ;;  %414 = vmatprep.subr.bf16.mxu1 %v476_v32 }
  0x3f   :  { %297 = vmatpush1.bf16.msra.mxu0 %v478_v33  ;;  %430 = vmatpush1.bf16.msra.mxu1 %v478_v33 }
  0x42   :  { %299 = vmatmul.mubr.bf16.vlgmr.msra.gmra.mrb[0].mxu0 %v479_v34  ;;  %319 = vmatmul.mubr.bf16.vlgmr.msra.gmra.mrb[0].mxu1 %v482_v35 }
  0x43   :  { %308 = vmatprep.mubr.bf16.mxu0 %v485_v36  ;;  %328 = vmatprep.mubr.bf16.mxu1 %v487_v37 }
  0x4a   :  { %309 = vmatmul.mubr.bf16.gmra.mrb[4].mxu0 %v489_v38  ;;  %329 = vmatmul.mubr.bf16.gmra.mrb[4].mxu1 %v490_v39 }
 0x115   :  { %v300_v47 = vpop.f32.mrb[0].mxu0  ;;  %v320_v48 = vpop.f32.mrb[0].mxu1 }
 0x116   :  { %v301_v49 = vadd.f32 %v300_v47, %v59_v45  ;;  %v321_v50 = vadd.f32 %v320_v48, %v59_v45  ;;  %v302_v51 = vpop.f32.mrb[1].mxu0  ;;  %v322_v52 = vpop.f32.mrb[1].mxu1 }
 0x117   :  { %v303_v53 = vadd.f32 %v302_v51, %v63_v46  ;;  %v323_v54 = vadd.f32 %v322_v52, %v63_v46  ;;  %v304_v55 = vpop.f32.mrb[2].mxu0  ;;  %v324_v56 = vpop.f32.mrb[2].mxu1 }
 0x118   :  { %339 = vst [vmem:[%s685_s3] sm:$0xff] %v301_v49  ;;  %347 = vst [vmem:[%s685_s3 + $0x40] sm:$0xff] %v321_v50  ;;  %v305_v57 = vadd.f32 %v304_v55, %v59_v45  ;;  %v325_v58 = vadd.f32 %v324_v56, %v59_v45  ;;  %v306_v59 = vpop.f32.mrb[3].mxu0  ;;  %v326_v60 = vpop.f32.mrb[3].mxu1 }
 0x119   :  { %340 = vst [vmem:[%s685_s3 + $0x8] sm:$0xff] %v303_v53  ;;  %348 = vst [vmem:[%s685_s3 + $0x48] sm:$0xff] %v323_v54  ;;  %v307_v61 = vadd.f32 %v306_v59, %v63_v46  ;;  %v327_v62 = vadd.f32 %v326_v60, %v63_v46 }
 0x11a   :  { %341 = vst [vmem:[%s685_s3 + $0x10] sm:$0xff] %v305_v57  ;;  %349 = vst [vmem:[%s685_s3 + $0x50] sm:$0xff] %v325_v58 }
 0x11b   :  { %342 = vst [vmem:[%s685_s3 + $0x18] sm:$0xff] %v307_v61  ;;  %350 = vst [vmem:[%s685_s3 + $0x58] sm:$0xff] %v327_v62 }
 0x11d   :  { %v310_v63 = vpop.f32.mrb[4].mxu0  ;;  %v330_v0 = vpop.f32.mrb[4].mxu1 }
 0x11e   :  { %v311_v1 = vadd.f32 %v310_v63, %v59_v45  ;;  %v331_v2 = vadd.f32 %v330_v0, %v59_v45  ;;  %v312_v3 = vpop.f32.mrb[5].mxu0  ;;  %v332_v4 = vpop.f32.mrb[5].mxu1 }
 0x11f   :  { %v313_v5 = vadd.f32 %v312_v3, %v63_v46  ;;  %v333_v6 = vadd.f32 %v332_v4, %v63_v46  ;;  %v314_v7 = vpop.f32.mrb[6].mxu0  ;;  %v334_v8 = vpop.f32.mrb[6].mxu1 }
 0x120   :  { %343 = vst [vmem:[%s685_s3 + $0x20] sm:$0xff] %v311_v1  ;;  %351 = vst [vmem:[%s685_s3 + $0x60] sm:$0xff] %v331_v2  ;;  %v315_v9 = vadd.f32 %v314_v7, %v59_v45  ;;  %v335_v10 = vadd.f32 %v334_v8, %v59_v45  ;;  %v316_v11 = vpop.f32.mrb[7].mxu0  ;;  %v336_v12 = vpop.f32.mrb[7].mxu1 }
 0x121   :  { %344 = vst [vmem:[%s685_s3 + $0x28] sm:$0xff] %v313_v5  ;;  %352 = vst [vmem:[%s685_s3 + $0x68] sm:$0xff] %v333_v6  ;;  %v317_v13 = vadd.f32 %v316_v11, %v63_v46  ;;  %v337_v14 = vadd.f32 %v336_v12, %v63_v46 }
 0x122   :  { %345 = vst [vmem:[%s685_s3 + $0x30] sm:$0xff] %v315_v9  ;;  %353 = vst [vmem:[%s685_s3 + $0x70] sm:$0xff] %v335_v10 }
 0x123   :  { %346 = vst [vmem:[%s685_s3 + $0x38] sm:$0xff] %v317_v13  ;;  %354 = vst [vmem:[%s685_s3 + $0x78] sm:$0xff] %v337_v14 }

// kernel: net_forward.95
= control target key start
LH: loop header
LB: loop body
LE: loop exit
PB: predicated region body
PF: predicated region fallthrough
CT: control target
= control target key end

     0   :  { %s4316_s9 = smov 0   ;;  %s4318_s10 = smov 0   ;;  %s6164_s0 = inlined_call_operand.vmem [shape: bf16[1,64,256], index: 0, kind: input, shape index: {}]   ;;  %s6165_s1 = inlined_call_operand.vmem [shape: bf16[1,13824,256], index: 1, kind: input, shape index: {}]   ;;  %s6166_s2 = inlined_call_operand.vmem [shape: f32[1,64,256], index: 2, kind: output, shape index: {}]  }
   0x1   :  { %s4320_s11 = smov 0  }
   0x2 LB: > { %s21_s12 = sadd.s32 1, %s4291_s10  ;;  %p3274_p0 = scmp.ge.s32.totalorder %s4295_s11, 1  ;;  %s4295_s11 = sphi %s4320_s11, %s12_s11   ;;  %s4291_s10 = sphi %s4318_s10, %s6420_s10   ;;  %s4287_s9 = sphi %s4316_s9, %s6419_s9  }
   0x3   : > { %p22_p1 = scmp.ge.s32.totalorder %s21_s12, 9  ;;  %p142_p2 = scmp.lt.s32.totalorder %s4295_s11, 10 }
   0x5   : > { %s6422_s12 = smov (%p22_p1, %s21_s12), 0  ;;  %p143_p3 = pnand %p3274_p0, %p142_p2 }
   0x7   : > { %146 = sbr.rel (%p143_p3) target bundleno = 1713 (0x6b1), region = 28 }
   0xe   : > { %s179_s13 = smul.u32 192, %s4287_s9  ;;  %p3277_p5 = scmp.ne.s32.totalorder %s4287_s9, 0 }
   0xf   : > { %vm199_vm0 = vcmask (!%p3277_p5), 7168   ;;  %v4297_v0 = vmov (!%p3277_p5), -inf   ;;  %v4298_v1 = vmov (!%p3277_p5), 0.0  }
  0x10   : > { %p182_p4 = scmp.lt.s32.totalorder %s179_s13, 1727  ;;  %198 = sbr.rel (%p3277_p5) target bundleno = 32 (0x20), region = 32  ;;  %200 = vst.msk [vmem:[#allocation2] sm:$0xff] (!%p3277_p5), %vm199_vm0, %v4297_v0  ;;  %201 = vst.msk [vmem:[#allocation2 + $0x8] sm:$0xff] (!%p3277_p5), %vm199_vm0, %v4297_v0 }
  0x11   : > { %202 = vst.msk [vmem:[#allocation2 + $0x10] sm:$0xff] (!%p3277_p5), %vm199_vm0, %v4297_v0  ;;  %203 = vst.msk [vmem:[#allocation2 + $0x18] sm:$0xff] (!%p3277_p5), %vm199_vm0, %v4297_v0 }
  0x12   : > { %s6424_s13 = smov (!%p182_p4, %s179_s13), 1727  ;;  %204 = vst.msk [vmem:[#allocation2 + $0x20] sm:$0xff] (!%p3277_p5), %vm199_vm0, %v4297_v0  ;;  %205 = vst.msk [vmem:[#allocation2 + $0x28] sm:$0xff] (!%p3277_p5), %vm199_vm0, %v4297_v0 }
  0x13   : > { %s3482_s14 = sshll.u32 %s6424_s13, 3  ;;  %206 = vst.msk [vmem:[#allocation2 + $0x30] sm:$0xff] (!%p3277_p5), %vm199_vm0, %v4297_v0  ;;  %207 = vst.msk [vmem:[#allocation2 + $0x38] sm:$0xff] (!%p3277_p5), %vm199_vm0, %v4297_v0 }
  0x14   : > { %s4340_s17 = scalar_lea.vmem %s6165_s1, %s3482_s14  ;;  %208 = vst.msk [vmem:[#allocation3] sm:$0xff] (!%p3277_p5), %vm199_vm0, %v4298_v1  ;;  %209 = vst.msk [vmem:[#allocation3 + $0x8] sm:$0xff] (!%p3277_p5), %vm199_vm0, %v4298_v1 }
  0x15   : > { %210 = vst.msk [vmem:[#allocation3 + $0x10] sm:$0xff] (!%p3277_p5), %vm199_vm0, %v4298_v1  ;;  %211 = vst.msk [vmem:[#allocation3 + $0x18] sm:$0xff] (!%p3277_p5), %vm199_vm0, %v4298_v1 }
  0x16   : > { %212 = vst.msk [vmem:[#allocation3 + $0x20] sm:$0xff] (!%p3277_p5), %vm199_vm0, %v4298_v1  ;;  %213 = vst.msk [vmem:[#allocation3 + $0x28] sm:$0xff] (!%p3277_p5), %vm199_vm0, %v4298_v1 }
  0x17   : > { %214 = vst.msk [vmem:[#allocation3 + $0x30] sm:$0xff] %vm199_vm0, %v4298_v1  ;;  %215 = vst.msk [vmem:[#allocation3 + $0x38] sm:$0xff] %vm199_vm0, %v4298_v1 }
  0x18   : > { %216 = vst [vmem:[#allocation4] sm:$0xff] %v4298_v1  ;;  %217 = vst [vmem:[#allocation4 + $0x8] sm:$0xff] %v4298_v1 }
  0x19   : > { %218 = vst [vmem:[#allocation4 + $0x10] sm:$0xff] %v4298_v1  ;;  %219 = vst [vmem:[#allocation4 + $0x18] sm:$0xff] %v4298_v1 }
  0x1a   : > { %220 = vst [vmem:[#allocation4 + $0x20] sm:$0xff] %v4298_v1  ;;  %221 = vst [vmem:[#allocation4 + $0x28] sm:$0xff] %v4298_v1 }
  0x1b   : > { %222 = vst [vmem:[#allocation4 + $0x30] sm:$0xff] %v4298_v1  ;;  %223 = vst [vmem:[#allocation4 + $0x38] sm:$0xff] %v4298_v1 }
  0x1c   : > { %224 = vst [vmem:[#allocation4 + $0x40] sm:$0xff] %v4298_v1  ;;  %225 = vst [vmem:[#allocation4 + $0x48] sm:$0xff] %v4298_v1 }
  0x1d   : > { %226 = vst [vmem:[#allocation4 + $0x50] sm:$0xff] %v4298_v1  ;;  %227 = vst [vmem:[#allocation4 + $0x58] sm:$0xff] %v4298_v1 }
  0x1e   : > { %228 = vst [vmem:[#allocation4 + $0x60] sm:$0xff] %v4298_v1  ;;  %229 = vst [vmem:[#allocation4 + $0x68] sm:$0xff] %v4298_v1 }
  0x1f   : > { %230 = vst [vmem:[#allocation4 + $0x70] sm:$0xff] %v4298_v1  ;;  %231 = vst [vmem:[#allocation4 + $0x78] sm:$0xff] %v4298_v1 }
  0x20 PF: > { %v3593_v2 = vld [vmem:[%s4340_s17 + $0x4] ss:$8 sps:$4 sm:$0xff]   ;;  %v3595_v3 = vld [vmem:[%s4340_s17] ss:$8 sps:$4 sm:$0xff]   ;;  %v3596_v4 = vld [vmem:[%s4340_s17 + $0x14] ss:$8 sps:$4 sm:$0xff]  }
  0x21   : > { %1432 = vmatprep.subr.bf16.mxu1 %v3593_v2  ;;  %v3598_v5 = vld [vmem:[%s4340_s17 + $0x10] ss:$8 sps:$4 sm:$0xff]   ;;  %v3599_v6 = vld [vmem:[%s4340_s17 + $0x24] ss:$8 sps:$4 sm:$0xff]   ;;  %v3601_v7 = vld [vmem:[%s4340_s17 + $0x20] ss:$8 sps:$4 sm:$0xff]  }
  0x22   : > { %1433 = vmatpush1.bf16.xpose.msra.mxu1 %v3595_v3  ;;  %v3602_v8 = vld [vmem:[%s4340_s17 + $0x34] ss:$8 sps:$4 sm:$0xff]   ;;  %v4369_v9 = vld [vmem:[%s6164_s0 + $0x4] ss:$8 sps:$4 sm:$0xff]   ;;  %v3604_v10 = vld [vmem:[%s4340_s17 + $0x30] ss:$8 sps:$4 sm:$0xff]  }
  0x23   : > { %1434 = vmatprep.subr.bf16.mxu1 %v3596_v4  ;;  %v3605_v11 = vld [vmem:[%s4340_s17 + $0x44] ss:$8 sps:$4 sm:$0xff]   ;;  %1464 = vmatprep.mubr.bf16.mxu1 %v4369_v9  ;;  %v3649_v13 = vld [vmem:[%s4340_s17 + $0x200] ss:$8 sps:$4 sm:$0xff]   ;;  %v3653_v14 = vld [vmem:[%s4340_s17 + $0x214] ss:$8 sps:$4 sm:$0xff]  }
  0x24   : > { %v3647_v12 = vld [vmem:[%s4340_s17 + $0x204] ss:$8 sps:$4 sm:$0xff]   ;;  %1610 = vmatprep.mubr.bf16.mxu0 %v4369_v9  ;;  %v3607_v15 = vld [vmem:[%s4340_s17 + $0x40] ss:$8 sps:$4 sm:$0xff]   ;;  %v3608_v16 = vld [vmem:[%s4340_s17 + $0x54] ss:$8 sps:$4 sm:$0xff]  }
  0x25   : > { %1578 = vmatprep.subr.bf16.mxu0 %v3647_v12  ;;  %v3655_v17 = vld [vmem:[%s4340_s17 + $0x210] ss:$8 sps:$4 sm:$0xff]   ;;  %v3659_v18 = vld [vmem:[%s4340_s17 + $0x224] ss:$8 sps:$4 sm:$0xff]   ;;  %v3661_v20 = vld [vmem:[%s4340_s17 + $0x220] ss:$8 sps:$4 sm:$0xff]  }
  0x26   : > { %1579 = vmatpush1.bf16.xpose.msra.mxu0 %v3649_v13  ;;  %v3610_v19 = vld [vmem:[%s4340_s17 + $0x50] ss:$8 sps:$4 sm:$0xff]   ;;  %v3611_v21 = vld [vmem:[%s4340_s17 + $0x64] ss:$8 sps:$4 sm:$0xff]   ;;  %v3665_v22 = vld [vmem:[%s4340_s17 + $0x234] ss:$8 sps:$4 sm:$0xff]  }
  0x27   : > { %1580 = vmatprep.subr.bf16.mxu0 %v3653_v14  ;;  %v3613_v23 = vld [vmem:[%s4340_s17 + $0x60] ss:$8 sps:$4 sm:$0xff]   ;;  %v3667_v24 = vld [vmem:[%s4340_s17 + $0x230] ss:$8 sps:$4 sm:$0xff]   ;;  %v3614_v25 = vld [vmem:[%s4340_s17 + $0x74] ss:$8 sps:$4 sm:$0xff]  }
  0x28   : > { %v3671_v26 = vld [vmem:[%s4340_s17 + $0x244] ss:$8 sps:$4 sm:$0xff]   ;;  %v3616_v27 = vld [vmem:[%s4340_s17 + $0x70] ss:$8 sps:$4 sm:$0xff]   ;;  %v3673_v28 = vld [vmem:[%s4340_s17 + $0x240] ss:$8 sps:$4 sm:$0xff]  }
  0x29   : > { %v3617_v29 = vld [vmem:[%s4340_s17 + $0x84] ss:$8 sps:$4 sm:$0xff]   ;;  %v3677_v30 = vld [vmem:[%s4340_s17 + $0x254] ss:$8 sps:$4 sm:$0xff]   ;;  %v3619_v31 = vld [vmem:[%s4340_s17 + $0x80] ss:$8 sps:$4 sm:$0xff]  }
  0x2a   : > { %1435 = vmatpush1.bf16.xpose.msra.mxu1 %v3598_v5  ;;  %v3679_v32 = vld [vmem:[%s4340_s17 + $0x250] ss:$8 sps:$4 sm:$0xff]   ;;  %v3620_v33 = vld [vmem:[%s4340_s17 + $0x94] ss:$8 sps:$4 sm:$0xff]   ;;  %v3683_v34 = vld [vmem:[%s4340_s17 + $0x264] ss:$8 sps:$4 sm:$0xff]  }
  0x2b   : > { %1436 = vmatprep.subr.bf16.mxu1 %v3599_v6  ;;  %v3622_v35 = vld [vmem:[%s4340_s17 + $0x90] ss:$8 sps:$4 sm:$0xff]   ;;  %v3685_v36 = vld [vmem:[%s4340_s17 + $0x260] ss:$8 sps:$4 sm:$0xff]   ;;  %v3623_v37 = vld [vmem:[%s4340_s17 + $0xa4] ss:$8 sps:$4 sm:$0xff]  }
  0x2c   : > { %v3689_v38 = vld [vmem:[%s4340_s17 + $0x274] ss:$8 sps:$4 sm:$0xff]   ;;  %v3625_v39 = vld [vmem:[%s4340_s17 + $0xa0] ss:$8 sps:$4 sm:$0xff]   ;;  %v3691_v40 = vld [vmem:[%s4340_s17 + $0x270] ss:$8 sps:$4 sm:$0xff]  }
  0x2d   : > { %v3626_v41 = vld [vmem:[%s4340_s17 + $0xb4] ss:$8 sps:$4 sm:$0xff]   ;;  %v3695_v42 = vld [vmem:[%s4340_s17 + $0x284] ss:$8 sps:$4 sm:$0xff]   ;;  %v3628_v43 = vld [vmem:[%s4340_s17 + $0xb0] ss:$8 sps:$4 sm:$0xff]  }
  0x2e   : > { %1581 = vmatpush1.bf16.xpose.msra.mxu0 %v3655_v17  ;;  %v3697_v44 = vld [vmem:[%s4340_s17 + $0x280] ss:$8 sps:$4 sm:$0xff]   ;;  %v3629_v45 = vld [vmem:[%s4340_s17 + $0xc4] ss:$8 sps:$4 sm:$0xff]   ;;  %v3701_v46 = vld [vmem:[%s4340_s17 + $0x294] ss:$8 sps:$4 sm:$0xff]  }
  0x2f   : > { %1582 = vmatprep.subr.bf16.mxu0 %v3659_v18  ;;  %v4411_v47 = vld [vmem:[%s4340_s17 + $0xc0] ss:$8 sps:$4 sm:$0xff]   ;;  %v3703_v48 = vld [vmem:[%s4340_s17 + $0x290] ss:$8 sps:$4 sm:$0xff]   ;;  %v4415_v49 = vld [vmem:[%s4340_s17 + $0xd4] ss:$8 sps:$4 sm:$0xff]  }
  0x30   : > { %v3707_v50 = vld [vmem:[%s4340_s17 + $0x2a4] ss:$8 sps:$4 sm:$0xff]   ;;  %v4421_v51 = vld [vmem:[%s4340_s17 + $0xd0] ss:$8 sps:$4 sm:$0xff]   ;;  %v3709_v52 = vld [vmem:[%s4340_s17 + $0x2a0] ss:$8 sps:$4 sm:$0xff]  }
  0x31   : > { %v4425_v53 = vld [vmem:[%s4340_s17 + $0xe4] ss:$8 sps:$4 sm:$0xff]   ;;  %v3713_v54 = vld [vmem:[%s4340_s17 + $0x2b4] ss:$8 sps:$4 sm:$0xff]   ;;  %v4431_v55 = vld [vmem:[%s4340_s17 + $0xe0] ss:$8 sps:$4 sm:$0xff]  }
  0x32   : > { %1437 = vmatpush1.bf16.xpose.msra.mxu1 %v3601_v7  ;;  %v3715_v56 = vld [vmem:[%s4340_s17 + $0x2b0] ss:$8 sps:$4 sm:$0xff]   ;;  %v4435_v57 = vld [vmem:[%s4340_s17 + $0xf4] ss:$8 sps:$4 sm:$0xff]   ;;  %v3719_v58 = vld [vmem:[%s4340_s17 + $0x2c4] ss:$8 sps:$4 sm:$0xff]  }
  0x33   : > { %1438 = vmatprep.subr.bf16.mxu1 %v3602_v8  ;;  %v4441_v59 = vld [vmem:[%s4340_s17 + $0xf0] ss:$8 sps:$4 sm:$0xff]   ;;  %v3723_v60 = vld [vmem:[%s4340_s17 + $0x2c0] ss:$8 sps:$4 sm:$0xff]   ;;  %v4445_v61 = vld [vmem:[%s4340_s17 + $0x104] ss:$8 sps:$4 sm:$0xff]  }
  0x34   : > { %v3728_v62 = vld [vmem:[%s4340_s17 + $0x2d4] ss:$8 sps:$4 sm:$0xff]   ;;  %v4453_v63 = vld [vmem:[%s6164_s0] ss:$8 sps:$4 sm:$0xff]   ;;  %v3732_v3 = vld [vmem:[%s4340_s17 + $0x2d0] ss:$8 sps:$4 sm:$0xff]  }
  0x35   : > { %v4456_v0 = vld [vmem:[%s4340_s17 + $0x100] ss:$8 sps:$4 sm:$0xff]   ;;  %v4461_v1 = vld [vmem:[%s6164_s0 + $0x14] ss:$8 sps:$4 sm:$0xff]   ;;  %v3737_v4 = vld [vmem:[%s4340_s17 + $0x2e4] ss:$8 sps:$4 sm:$0xff]  }
  0x36   : > { %1583 = vmatpush1.bf16.xpose.msra.mxu0 %v3661_v20  ;;  %v4464_v2 = vld [vmem:[%s4340_s17 + $0x114] ss:$8 sps:$4 sm:$0xff]   ;;  %v4475_v5 = vld [vmem:[%s6164_s0 + $0x10] ss:$8 sps:$4 sm:$0xff]   ;;  %v4483_v7 = vld [vmem:[%s6164_s0 + $0x24] ss:$8 sps:$4 sm:$0xff]  }
  0x37   : > { %1584 = vmatprep.subr.bf16.mxu0 %v3665_v22  ;;  %v4478_v6 = vld [vmem:[%s4340_s17 + $0x110] ss:$8 sps:$4 sm:$0xff]   ;;  %v4486_v8 = vld [vmem:[%s4340_s17 + $0x124] ss:$8 sps:$4 sm:$0xff]   ;;  %v4497_v12 = vld [vmem:[%s6164_s0 + $0x20] ss:$8 sps:$4 sm:$0xff]  }
  0x38   : > { %v4500_v13 = vld [vmem:[%s4340_s17 + $0x120] ss:$8 sps:$4 sm:$0xff]   ;;  %v4505_v14 = vld [vmem:[%s6164_s0 + $0x34] ss:$8 sps:$4 sm:$0xff]   ;;  %v3754_v17 = vld [vmem:[%s4340_s17 + $0x404] ss:$8 sps:$4 sm:$0xff]  }
  0x39   : > { %v4519_v18 = vld [vmem:[%s6164_s0 + $0x30] ss:$8 sps:$4 sm:$0xff]   ;;  %v4525_v20 = vld [vmem:[%s4340_s17 + $0x144] ss:$8 sps:$4 sm:$0xff]   ;;  %v3760_v22 = vld [vmem:[%s4340_s17 + $0x414] ss:$8 sps:$4 sm:$0xff]  }
  0x3a   : > { %1439 = vmatpush1.bf16.xpose.msra.mxu1 %v3604_v10  ;;  %v3741_v10 = vld [vmem:[%s4340_s17 + $0x2e0] ss:$8 sps:$4 sm:$0xff]   ;;  %vm2470_vm1 = vcmask 7168   ;;  %p3478_p6 = scmp.ne.s32.totalorder %s4287_s9, 8 }
  0x3b   : > { %1440 = vmatprep.subr.bf16.mxu1 %v3605_v11  ;;  %v3746_v11 = vld [vmem:[%s4340_s17 + $0x2f4] ss:$8 sps:$4 sm:$0xff]  }
  0x3e   : > { %1585 = vmatpush1.bf16.xpose.msra.mxu0 %v3667_v24  ;;  %v4539_v24 = vld [vmem:[%s4340_s17 + $0x154] ss:$8 sps:$4 sm:$0xff]  }
  0x3f   : > { %1586 = vmatprep.subr.bf16.mxu0 %v3671_v26  ;;  %v3766_v26 = vld [vmem:[%s4340_s17 + $0x424] ss:$8 sps:$4 sm:$0xff]  }
  0x42   : > { %1441 = vmatpush1.bf16.xpose.msra.mxu1 %v3607_v15  ;;  %v4508_v15 = vld [vmem:[%s4340_s17 + $0x134] ss:$8 sps:$4 sm:$0xff]  }
  0x43   : > { %1442 = vmatprep.subr.bf16.mxu1 %v3608_v16  ;;  %v3748_v16 = vld [vmem:[%s4340_s17 + $0x2f0] ss:$8 sps:$4 sm:$0xff]  }
  0x46   : > { %1587 = vmatpush1.bf16.xpose.msra.mxu0 %v3673_v28  ;;  %v4551_v28 = vld [vmem:[%s4340_s17 + $0x164] ss:$8 sps:$4 sm:$0xff]  }
  0x47   : > { %1588 = vmatprep.subr.bf16.mxu0 %v3677_v30  ;;  %v3772_v30 = vld [vmem:[%s4340_s17 + $0x434] ss:$8 sps:$4 sm:$0xff]  }
  0x4a   : > { %1443 = vmatpush1.bf16.xpose.msra.mxu1 %v3610_v19  ;;  %v4522_v19 = vld [vmem:[%s4340_s17 + $0x130] ss:$8 sps:$4 sm:$0xff]  }
  0x4b   : > { %1444 = vmatprep.subr.bf16.mxu1 %v3611_v21  ;;  %v3752_v21 = vld [vmem:[%s4340_s17 + $0x400] ss:$8 sps:$4 sm:$0xff]  }
  0x4e   : > { %1589 = vmatpush1.bf16.xpose.msra.mxu0 %v3679_v32  ;;  %v4563_v32 = vld [vmem:[%s4340_s17 + $0x174] ss:$8 sps:$4 sm:$0xff]  }
  0x4f   : > { %1590 = vmatprep.subr.bf16.mxu0 %v3683_v34  ;;  %v3778_v34 = vld [vmem:[%s4340_s17 + $0x444] ss:$8 sps:$4 sm:$0xff]  }
  0x52   : > { %1445 = vmatpush1.bf16.xpose.msra.mxu1 %v3613_v23  ;;  %v4536_v23 = vld [vmem:[%s4340_s17 + $0x140] ss:$8 sps:$4 sm:$0xff]  }
  0x53   : > { %1446 = vmatprep.subr.bf16.mxu1 %v3614_v25  ;;  %v3758_v25 = vld [vmem:[%s4340_s17 + $0x410] ss:$8 sps:$4 sm:$0xff]  }
  0x56   : > { %1591 = vmatpush1.bf16.xpose.msra.mxu0 %v3685_v36  ;;  %v4575_v36 = vld [vmem:[%s4340_s17 + $0x184] ss:$8 sps:$4 sm:$0xff]  }
  0x57   : > { %1592 = vmatprep.subr.bf16.mxu0 %v3689_v38  ;;  %v3784_v38 = vld [vmem:[%s4340_s17 + $0x454] ss:$8 sps:$4 sm:$0xff]  }
  0x5a   : > { %1447 = vmatpush1.bf16.xpose.msra.mxu1 %v3616_v27  ;;  %v4548_v27 = vld [vmem:[%s4340_s17 + $0x150] ss:$8 sps:$4 sm:$0xff]  }
  0x5b   : > { %1448 = vmatprep.subr.bf16.mxu1 %v3617_v29  ;;  %v3764_v29 = vld [vmem:[%s4340_s17 + $0x420] ss:$8 sps:$4 sm:$0xff]  }
  0x5e   : > { %1593 = vmatpush1.bf16.xpose.msra.mxu0 %v3691_v40  ;;  %v4585_v40 = vld [vmem:[%s4340_s17 + $0x194] ss:$8 sps:$4 sm:$0xff]  }
  0x5f   : > { %1594 = vmatprep.subr.bf16.mxu0 %v3695_v42  ;;  %v3790_v42 = vld [vmem:[%s4340_s17 + $0x464] ss:$8 sps:$4 sm:$0xff]  }
  0x62   : > { %1449 = vmatpush1.bf16.xpose.msra.mxu1 %v3619_v31  ;;  %v4560_v31 = vld [vmem:[%s4340_s17 + $0x160] ss:$8 sps:$4 sm:$0xff]  }
  0x63   : > { %1450 = vmatprep.subr.bf16.mxu1 %v3620_v33  ;;  %v3770_v33 = vld [vmem:[%s4340_s17 + $0x430] ss:$8 sps:$4 sm:$0xff]  }
  0x66   : > { %1595 = vmatpush1.bf16.xpose.msra.mxu0 %v3697_v44  ;;  %v4595_v44 = vld [vmem:[%s4340_s17 + $0x1a4] ss:$8 sps:$4 sm:$0xff]  }
  0x67   : > { %1596 = vmatprep.subr.bf16.mxu0 %v3701_v46  ;;  %v3796_v46 = vld [vmem:[%s4340_s17 + $0x474] ss:$8 sps:$4 sm:$0xff]  }
  0x6a   : > { %1451 = vmatpush1.bf16.xpose.msra.mxu1 %v3622_v35  ;;  %v4572_v35 = vld [vmem:[%s4340_s17 + $0x170] ss:$8 sps:$4 sm:$0xff]  }
  0x6b   : > { %1452 = vmatprep.subr.bf16.mxu1 %v3623_v37  ;;  %v3776_v37 = vld [vmem:[%s4340_s17 + $0x440] ss:$8 sps:$4 sm:$0xff]  }
  0x6e   : > { %1597 = vmatpush1.bf16.xpose.msra.mxu0 %v3703_v48  ;;  %v4602_v48 = vld [vmem:[%s4340_s17 + $0x1a0] ss:$8 sps:$4 sm:$0xff]  }
  0x6f   : > { %1598 = vmatprep.subr.bf16.mxu0 %v3707_v50  ;;  %v4605_v50 = vld [vmem:[%s4340_s17 + $0x1b4] ss:$8 sps:$4 sm:$0xff]  }
  0x72   : > { %1453 = vmatpush1.bf16.xpose.msra.mxu1 %v3625_v39  ;;  %v4582_v39 = vld [vmem:[%s4340_s17 + $0x180] ss:$8 sps:$4 sm:$0xff]  }
  0x73   : > { %1454 = vmatprep.subr.bf16.mxu1 %v3626_v41  ;;  %v3782_v41 = vld [vmem:[%s4340_s17 + $0x450] ss:$8 sps:$4 sm:$0xff]  }
  0x76   : > { %1599 = vmatpush1.bf16.xpose.msra.mxu0 %v3709_v52  ;;  %v3794_v52 = vld [vmem:[%s4340_s17 + $0x470] ss:$8 sps:$4 sm:$0xff]  }
  0x77   : > { %1600 = vmatprep.subr.bf16.mxu0 %v3713_v54  ;;  %v3802_v54 = vld [vmem:[%s4340_s17 + $0x484] ss:$8 sps:$4 sm:$0xff]  }
  0x7a   : > { %1455 = vmatpush1.bf16.xpose.msra.mxu1 %v3628_v43  ;;  %v4592_v43 = vld [vmem:[%s4340_s17 + $0x190] ss:$8 sps:$4 sm:$0xff]  }
  0x7b   : > { %1456 = vmatprep.subr.bf16.mxu1 %v3629_v45  ;;  %v3788_v45 = vld [vmem:[%s4340_s17 + $0x460] ss:$8 sps:$4 sm:$0xff]  }
  0x7e   : > { %1601 = vmatpush1.bf16.xpose.msra.mxu0 %v3715_v56  ;;  %v4612_v56 = vld [vmem:[%s4340_s17 + $0x1b0] ss:$8 sps:$4 sm:$0xff]  }
  0x7f   : > { %1602 = vmatprep.subr.bf16.mxu0 %v3719_v58  ;;  %v4615_v58 = vld [vmem:[%s4340_s17 + $0x1c4] ss:$8 sps:$4 sm:$0xff]  }
  0x82   : > { %1457 = vmatpush1.bf16.xpose.msra.mxu1 %v4411_v47 }
  0x83   : > { %1458 = vmatprep.subr.bf16.mxu1 %v4415_v49 }
  0x86   : > { %1603 = vmatpush1.bf16.xpose.msra.mxu0 %v3723_v60  ;;  %v3800_v60 = vld [vmem:[%s4340_s17 + $0x480] ss:$8 sps:$4 sm:$0xff]  }
  0x87   : > { %1604 = vmatprep.subr.bf16.mxu0 %v3728_v62  ;;  %v3808_v62 = vld [vmem:[%s4340_s17 + $0x494] ss:$8 sps:$4 sm:$0xff]  }
  0x8a   : > { %1459 = vmatpush1.bf16.xpose.msra.mxu1 %v4421_v51 }
  0x8b   : > { %1460 = vmatprep.subr.bf16.mxu1 %v4425_v53 }
  0x8e   : > { %1605 = vmatpush1.bf16.xpose.msra.mxu0 %v3732_v3  ;;  %v4622_v3 = vld [vmem:[%s4340_s17 + $0x1c0] ss:$8 sps:$4 sm:$0xff]  }
  0x8f   : > { %1606 = vmatprep.subr.bf16.mxu0 %v3737_v4  ;;  %v4625_v4 = vld [vmem:[%s4340_s17 + $0x1d4] ss:$8 sps:$4 sm:$0xff]  }
  0x92   : > { %1461 = vmatpush1.bf16.xpose.msra.mxu1 %v4431_v55 }
  0x93   : > { %1462 = vmatprep.subr.bf16.mxu1 %v4435_v57 }
  0x96   : > { %1607 = vmatpush1.bf16.xpose.msra.mxu0 %v3741_v10  ;;  %v3806_v10 = vld [vmem:[%s4340_s17 + $0x490] ss:$8 sps:$4 sm:$0xff]  }
  0x97   : > { %1608 = vmatprep.subr.bf16.mxu0 %v3746_v11  ;;  %v3814_v11 = vld [vmem:[%s4340_s17 + $0x4a4] ss:$8 sps:$4 sm:$0xff]  }
  0x9a   : > { %1463 = vmatpush1.bf16.xpose.msra.mxu1 %v4441_v59 }
  0x9b   : > { %1505 = vmatprep.subr.bf16.mxu1 %v4445_v61 }
  0x9e   : > { %1609 = vmatpush1.bf16.xpose.msra.mxu0 %v3748_v16  ;;  %v4632_v16 = vld [vmem:[%s4340_s17 + $0x1d0] ss:$8 sps:$4 sm:$0xff]  }
  0x9f   : > { %1724 = vmatprep.subr.bf16.mxu0 %v3754_v17  ;;  %v4635_v17 = vld [vmem:[%s4340_s17 + $0x1e4] ss:$8 sps:$4 sm:$0xff]  }
  0xa1   : > { %1465 = vmatmul.mubr.bf16.vlgmr.msra.gmra.mrb[0].mxu1 %v4453_v63 }
  0xa2   : > { %1506 = vmatpush1.bf16.xpose.msra.mxu1 %v4456_v0  ;;  %1474 = vmatprep.mubr.bf16.mxu1 %v4461_v1 }
  0xa3   : > { %1507 = vmatprep.subr.bf16.mxu1 %v4464_v2 }
  0xa5   : > { %1611 = vmatmul.mubr.bf16.vlgmr.msra.gmra.mrb[0].mxu0 %v4453_v63 }
  0xa6   : > { %1725 = vmatpush1.bf16.xpose.msra.mxu0 %v3752_v21  ;;  %1620 = vmatprep.mubr.bf16.mxu0 %v4461_v1  ;;  %v3812_v21 = vld [vmem:[%s4340_s17 + $0x4a0] ss:$8 sps:$4 sm:$0xff]  }
  0xa7   : > { %1726 = vmatprep.subr.bf16.mxu0 %v3760_v22  ;;  %v3820_v22 = vld [vmem:[%s4340_s17 + $0x4b4] ss:$8 sps:$4 sm:$0xff]  }
  0xa9   : > { %1475 = vmatmul.mubr.bf16.gmra.mrb[4].mxu1 %v4475_v5 }
  0xaa   : > { %1508 = vmatpush1.bf16.xpose.msra.mxu1 %v4478_v6  ;;  %1484 = vmatprep.mubr.bf16.mxu1 %v4483_v7 }
  0xab   : > { %1509 = vmatprep.subr.bf16.mxu1 %v4486_v8 }
  0xad   : > { %1621 = vmatmul.mubr.bf16.gmra.mrb[4].mxu0 %v4475_v5 }
  0xae   : > { %1727 = vmatpush1.bf16.xpose.msra.mxu0 %v3758_v25  ;;  %1630 = vmatprep.mubr.bf16.mxu0 %v4483_v7  ;;  %v4642_v25 = vld [vmem:[%s4340_s17 + $0x1e0] ss:$8 sps:$4 sm:$0xff]  }
  0xaf   : > { %1728 = vmatprep.subr.bf16.mxu0 %v3766_v26  ;;  %v4645_v26 = vld [vmem:[%s4340_s17 + $0x1f4] ss:$8 sps:$4 sm:$0xff]  }
  0xb1   : > { %1485 = vmatmul.mubr.bf16.gmra.mrb[8].mxu1 %v4497_v12 }
  0xb2   : > { %1510 = vmatpush1.bf16.xpose.msra.mxu1 %v4500_v13  ;;  %1494 = vmatprep.mubr.bf16.mxu1 %v4505_v14 }
  0xb3   : > { %1511 = vmatprep.subr.bf16.mxu1 %v4508_v15 }
  0xb5   : > { %1631 = vmatmul.mubr.bf16.gmra.mrb[8].mxu0 %v4497_v12 }
  0xb6   : > { %1729 = vmatpush1.bf16.xpose.msra.mxu0 %v3764_v29  ;;  %1640 = vmatprep.mubr.bf16.mxu0 %v4505_v14  ;;  %v3818_v29 = vld [vmem:[%s4340_s17 + $0x4b0] ss:$8 sps:$4 sm:$0xff]  }
  0xb7   : > { %1730 = vmatprep.subr.bf16.mxu0 %v3772_v30  ;;  %v3826_v30 = vld [vmem:[%s4340_s17 + $0x4c4] ss:$8 sps:$4 sm:$0xff]  }
  0xb9   : > { %1495 = vmatmul.mubr.bf16.gmra.mrb[12].mxu1 %v4519_v18 }
  0xba   : > { %1512 = vmatpush1.bf16.xpose.msra.mxu1 %v4522_v19  ;;  %1537 = vmatprep.mubr.bf16.mxu1 %v4369_v9 }
  0xbb   : > { %1513 = vmatprep.subr.bf16.mxu1 %v4525_v20 }
  0xbd   : > { %1641 = vmatmul.mubr.bf16.gmra.mrb[12].mxu0 %v4519_v18 }
  0xbe   : > { %1731 = vmatpush1.bf16.xpose.msra.mxu0 %v3770_v33  ;;  %1756 = vmatprep.mubr.bf16.mxu0 %v4369_v9  ;;  %v4652_v33 = vld [vmem:[%s4340_s17 + $0x1f0] ss:$8 sps:$4 sm:$0xff]  }
  0xbf   : > { %1732 = vmatprep.subr.bf16.mxu0 %v3778_v34  ;;  %v3751_v34 = vld [vmem:[%s4340_s17 + $0x304] ss:$8 sps:$4 sm:$0xff]  }
  0xc2   : > { %1514 = vmatpush1.bf16.xpose.msra.mxu1 %v4536_v23 }
  0xc3   : > { %1515 = vmatprep.subr.bf16.mxu1 %v4539_v24 }
  0xc6   : > { %1733 = vmatpush1.bf16.xpose.msra.mxu0 %v3776_v37  ;;  %v3824_v37 = vld [vmem:[%s4340_s17 + $0x4c0] ss:$8 sps:$4 sm:$0xff]  }
  0xc7   : > { %1734 = vmatprep.subr.bf16.mxu0 %v3784_v38  ;;  %v3832_v38 = vld [vmem:[%s4340_s17 + $0x4d4] ss:$8 sps:$4 sm:$0xff]  }
  0xca   : > { %1516 = vmatpush1.bf16.xpose.msra.mxu1 %v4548_v27 }
  0xcb   : > { %1517 = vmatprep.subr.bf16.mxu1 %v4551_v28 }
  0xce   : > { %1735 = vmatpush1.bf16.xpose.msra.mxu0 %v3782_v41  ;;  %v3749_v41 = vld [vmem:[%s4340_s17 + $0x300] ss:$8 sps:$4 sm:$0xff]  }
  0xcf   : > { %1736 = vmatprep.subr.bf16.mxu0 %v3790_v42  ;;  %v3757_v42 = vld [vmem:[%s4340_s17 + $0x314] ss:$8 sps:$4 sm:$0xff]  }
  0xd2   : > { %1518 = vmatpush1.bf16.xpose.msra.mxu1 %v4560_v31 }
  0xd3   : > { %1519 = vmatprep.subr.bf16.mxu1 %v4563_v32 }
  0xd6   : > { %1737 = vmatpush1.bf16.xpose.msra.mxu0 %v3788_v45  ;;  %v3830_v45 = vld [vmem:[%s4340_s17 + $0x4d0] ss:$8 sps:$4 sm:$0xff]  }
  0xd7   : > { %1738 = vmatprep.subr.bf16.mxu0 %v3796_v46  ;;  %v3838_v46 = vld [vmem:[%s4340_s17 + $0x4e4] ss:$8 sps:$4 sm:$0xff]  }
  0xda   : > { %1520 = vmatpush1.bf16.xpose.msra.mxu1 %v4572_v35 }
  0xdb   : > { %1521 = vmatprep.subr.bf16.mxu1 %v4575_v36 }
  0xde   : > { %1739 = vmatpush1.bf16.xpose.msra.mxu0 %v3794_v52  ;;  %v3755_v52 = vld [vmem:[%s4340_s17 + $0x310] ss:$8 sps:$4 sm:$0xff]  }
  0xdf   : > { %1740 = vmatprep.subr.bf16.mxu0 %v3802_v54  ;;  %v3763_v54 = vld [vmem:[%s4340_s17 + $0x324] ss:$8 sps:$4 sm:$0xff]  }
  0xe2   : > { %1522 = vmatpush1.bf16.xpose.msra.mxu1 %v4582_v39 }
  0xe3   : > { %1523 = vmatprep.subr.bf16.mxu1 %v4585_v40 }
  0xe6   : > { %1741 = vmatpush1.bf16.xpose.msra.mxu0 %v3800_v60  ;;  %v3836_v60 = vld [vmem:[%s4340_s17 + $0x4e0] ss:$8 sps:$4 sm:$0xff]  }
  0xe7   : > { %1742 = vmatprep.subr.bf16.mxu0 %v3808_v62  ;;  %v3844_v62 = vld [vmem:[%s4340_s17 + $0x4f4] ss:$8 sps:$4 sm:$0xff]  }
  0xea   : > { %1524 = vmatpush1.bf16.xpose.msra.mxu1 %v4592_v43 }
  0xeb   : > { %1525 = vmatprep.subr.bf16.mxu1 %v4595_v44 }
  0xee   : > { %1743 = vmatpush1.bf16.xpose.msra.mxu0 %v3806_v10  ;;  %v3761_v10 = vld [vmem:[%s4340_s17 + $0x320] ss:$8 sps:$4 sm:$0xff]  }
  0xef   : > { %1744 = vmatprep.subr.bf16.mxu0 %v3814_v11  ;;  %v3769_v11 = vld [vmem:[%s4340_s17 + $0x334] ss:$8 sps:$4 sm:$0xff]  }
  0xf2   : > { %1526 = vmatpush1.bf16.xpose.msra.mxu1 %v4602_v48 }
  0xf3   : > { %1527 = vmatprep.subr.bf16.mxu1 %v4605_v50 }
  0xf6   : > { %1745 = vmatpush1.bf16.xpose.msra.mxu0 %v3812_v21  ;;  %v3842_v21 = vld [vmem:[%s4340_s17 + $0x4f0] ss:$8 sps:$4 sm:$0xff]  }
  0xf7   : > { %1746 = vmatprep.subr.bf16.mxu0 %v3820_v22  ;;  %v3767_v22 = vld [vmem:[%s4340_s17 + $0x330] ss:$8 sps:$4 sm:$0xff]  }
  0xfa   : > { %1528 = vmatpush1.bf16.xpose.msra.mxu1 %v4612_v56 }
  0xfb   : > { %1529 = vmatprep.subr.bf16.mxu1 %v4615_v58 }
  0xfe   : > { %1747 = vmatpush1.bf16.xpose.msra.mxu0 %v3818_v29  ;;  %v3775_v29 = vld [vmem:[%s4340_s17 + $0x344] ss:$8 sps:$4 sm:$0xff]  }
  0xff   : > { %1748 = vmatprep.subr.bf16.mxu0 %v3826_v30  ;;  %v3773_v30 = vld [vmem:[%s4340_s17 + $0x340] ss:$8 sps:$4 sm:$0xff]  }
 0x102   : > { %1530 = vmatpush1.bf16.xpose.msra.mxu1 %v4622_v3 }
 0x103   : > { %1531 = vmatprep.subr.bf16.mxu1 %v4625_v4 }
 0x106   : > { %1749 = vmatpush1.bf16.xpose.msra.mxu0 %v3824_v37 }
 0x107   : > { %1750 = vmatprep.subr.bf16.mxu0 %v3832_v38  ;;  %v3835_v38 = vld [vmem:[%s4340_s17 + $0x3e4] ss:$8 sps:$4 sm:$0xff]  }
 0x10a   : > { %1532 = vmatpush1.bf16.xpose.msra.mxu1 %v4632_v16 }
 0x10b   : > { %1533 = vmatprep.subr.bf16.mxu1 %v4635_v17 }
 0x10e   : > { %1751 = vmatpush1.bf16.xpose.msra.mxu0 %v3830_v45 }
 0x10f   : > { %1752 = vmatprep.subr.bf16.mxu0 %v3838_v46 }
 0x112   : > { %1534 = vmatpush1.bf16.xpose.msra.mxu1 %v4642_v25 }
 0x113   : > { %1535 = vmatprep.subr.bf16.mxu1 %v4645_v26 }
 0x116   : > { %1753 = vmatpush1.bf16.xpose.msra.mxu0 %v3836_v60 }
 0x117   : > { %1754 = vmatprep.subr.bf16.mxu0 %v3844_v62 }
 0x11a   : > { %1536 = vmatpush1.bf16.xpose.msra.mxu1 %v4652_v33 }
 0x11b   : > { %1651 = vmatprep.subr.bf16.mxu1 %v3751_v34  ;;  %v3886_v34 = vld [vmem:[%s4340_s17 + $0x5d4] ss:$8 sps:$4 sm:$0xff]  }
 0x11e   : > { %1755 = vmatpush1.bf16.xpose.msra.mxu0 %v3842_v21 }
 0x11f   : > { %2672 = vmatprep.subr.bf16.mxu0 %v4445_v61  ;;  %v3781_v61 = vld [vmem:[%s4340_s17 + $0x354] ss:$8 sps:$4 sm:$0xff]  }
 0x121   : > { %1538 = vmatmul.mubr.bf16.vlgmr.msra.gmra.mrb[16].mxu1 %v4453_v63 }
 0x122   : > { %1652 = vmatpush1.bf16.xpose.msra.mxu1 %v3749_v41  ;;  %1547 = vmatprep.mubr.bf16.mxu1 %v4461_v1 }
 0x123   : > { %1653 = vmatprep.subr.bf16.mxu1 %v3757_v42  ;;  %v3881_v42 = vld [vmem:[%s4340_s17 + $0x5c0] ss:$8 sps:$4 sm:$0xff]  }
 0x125   : > { %1757 = vmatmul.mubr.bf16.vlgmr.msra.gmra.mrb[16].mxu0 %v4453_v63 }
 0x126   : > { %1766 = vmatprep.mubr.bf16.mxu0 %v4461_v1  ;;  %2673 = vmatpush1.bf16.msra.mxu0 %v4456_v0  ;;  %v3787_v0 = vld [vmem:[%s4340_s17 + $0x364] ss:$8 sps:$4 sm:$0xff]  }
 0x127   : > { %2674 = vmatprep.subr.bf16.mxu0 %v4464_v2  ;;  %v3785_v2 = vld [vmem:[%s4340_s17 + $0x360] ss:$8 sps:$4 sm:$0xff]  }
 0x129   : > { %1548 = vmatmul.mubr.bf16.gmra.mrb[20].mxu1 %v4475_v5 }
 0x12a   : > { %1654 = vmatpush1.bf16.xpose.msra.mxu1 %v3755_v52  ;;  %1557 = vmatprep.mubr.bf16.mxu1 %v4483_v7  ;;  %v3833_v52 = vld [vmem:[%s4340_s17 + $0x3e0] ss:$8 sps:$4 sm:$0xff]  }
 0x12b   : > { %1655 = vmatprep.subr.bf16.mxu1 %v3763_v54  ;;  %2675 = vmatpush1.bf16.msra.mxu0 %v4478_v6  ;;  %v3793_v6 = vld [vmem:[%s4340_s17 + $0x374] ss:$8 sps:$4 sm:$0xff]  }
 0x12c   : > { %2676 = vmatprep.subr.bf16.mxu0 %v4486_v8  ;;  %v3791_v8 = vld [vmem:[%s4340_s17 + $0x370] ss:$8 sps:$4 sm:$0xff]  }
 0x12d   : > { %1767 = vmatmul.mubr.bf16.gmra.mrb[20].mxu0 %v4475_v5 }
 0x12e   : > { %1776 = vmatprep.mubr.bf16.mxu0 %v4483_v7 }
 0x12f   : > { %2677 = vmatpush1.bf16.msra.mxu0 %v4500_v13  ;;  %v3799_v13 = vld [vmem:[%s4340_s17 + $0x384] ss:$8 sps:$4 sm:$0xff]  }
 0x130   : > { %2678 = vmatprep.subr.bf16.mxu0 %v4508_v15  ;;  %v3797_v15 = vld [vmem:[%s4340_s17 + $0x380] ss:$8 sps:$4 sm:$0xff]  }
 0x131   : > { %1558 = vmatmul.mubr.bf16.gmra.mrb[24].mxu1 %v4497_v12 }
 0x132   : > { %1656 = vmatpush1.bf16.xpose.msra.mxu1 %v3761_v10  ;;  %1567 = vmatprep.mubr.bf16.mxu1 %v4505_v14  ;;  %v3841_v10 = vld [vmem:[%s4340_s17 + $0x3f4] ss:$8 sps:$4 sm:$0xff]  }
 0x133   : > { %1657 = vmatprep.subr.bf16.mxu1 %v3769_v11  ;;  %2679 = vmatpush1.bf16.msra.mxu0 %v4522_v19  ;;  %v3805_v19 = vld [vmem:[%s4340_s17 + $0x394] ss:$8 sps:$4 sm:$0xff]  }
 0x134   : > { %2680 = vmatprep.subr.bf16.mxu0 %v4525_v20  ;;  %v3803_v20 = vld [vmem:[%s4340_s17 + $0x390] ss:$8 sps:$4 sm:$0xff]  }
 0x135   : > { %1777 = vmatmul.mubr.bf16.gmra.mrb[24].mxu0 %v4497_v12 }
 0x136   : > { %1786 = vmatprep.mubr.bf16.mxu0 %v4505_v14 }
 0x137   : > { %2681 = vmatpush1.bf16.msra.mxu0 %v4536_v23  ;;  %v3811_v23 = vld [vmem:[%s4340_s17 + $0x3a4] ss:$8 sps:$4 sm:$0xff]  }
 0x138   : > { %2682 = vmatprep.subr.bf16.mxu0 %v4539_v24  ;;  %v3809_v24 = vld [vmem:[%s4340_s17 + $0x3a0] ss:$8 sps:$4 sm:$0xff]  }
 0x139   : > { %1568 = vmatmul.mubr.bf16.gmra.mrb[28].mxu1 %v4519_v18 }
 0x13a   : > { %1658 = vmatpush1.bf16.xpose.msra.mxu1 %v3767_v22  ;;  %1683 = vmatprep.mubr.bf16.mxu1 %v4369_v9  ;;  %v3779_v9 = vld [vmem:[%s4340_s17 + $0x350] ss:$8 sps:$4 sm:$0xff]  }
 0x13b   : > { %1659 = vmatprep.subr.bf16.mxu1 %v3775_v29  ;;  %2683 = vmatpush1.bf16.msra.mxu0 %v4548_v27  ;;  %v3817_v27 = vld [vmem:[%s4340_s17 + $0x3b4] ss:$8 sps:$4 sm:$0xff]  }
 0x13c   : > { %2684 = vmatprep.subr.bf16.mxu0 %v4551_v28 }
 0x13d   : > { %1787 = vmatmul.mubr.bf16.gmra.mrb[28].mxu0 %v4519_v18 }
 0x13f   : > { %2685 = vmatpush1.bf16.msra.mxu0 %v4560_v31 }
 0x140   : > { %2686 = vmatprep.subr.bf16.mxu0 %v4563_v32 }
 0x142   : > { %1660 = vmatpush1.bf16.xpose.msra.mxu1 %v3773_v30 }
 0x143   : > { %1661 = vmatprep.subr.bf16.mxu1 %v3781_v61  ;;  %2687 = vmatpush1.bf16.msra.mxu0 %v4572_v35  ;;  %v3839_v61 = vld [vmem:[%s4340_s17 + $0x3f0] ss:$8 sps:$4 sm:$0xff]  }
 0x144   : > { %2688 = vmatprep.subr.bf16.mxu0 %v4575_v36  ;;  %v3815_v36 = vld [vmem:[%s4340_s17 + $0x3b0] ss:$8 sps:$4 sm:$0xff]  }
 0x147   : > { %2689 = vmatpush1.bf16.msra.mxu0 %v4582_v39 }
 0x148   : > { %2690 = vmatprep.subr.bf16.mxu0 %v4585_v40  ;;  %v3823_v40 = vld [vmem:[%s4340_s17 + $0x3c4] ss:$8 sps:$4 sm:$0xff]  }
 0x14a   : > { %1662 = vmatpush1.bf16.xpose.msra.mxu1 %v3779_v9 }
 0x14b   : > { %1663 = vmatprep.subr.bf16.mxu1 %v3787_v0  ;;  %2691 = vmatpush1.bf16.msra.mxu0 %v4592_v43  ;;  %v3847_v0 = vld [vmem:[%s4340_s17 + $0x504] ss:$8 sps:$4 sm:$0xff]  }
 0x14c   : > { %2692 = vmatprep.subr.bf16.mxu0 %v4595_v44  ;;  %v4101_v44 = vld [vmem:[%s4340_s17 + $0x204] ss:$8 sps:$4 sm:$0xff]  }
 0x14f   : > { %2693 = vmatpush1.bf16.msra.mxu0 %v4602_v48 }
 0x150   : > { %2694 = vmatprep.subr.bf16.mxu0 %v4605_v50 }
 0x152   : > { %1664 = vmatpush1.bf16.xpose.msra.mxu1 %v3785_v2 }
 0x153   : > { %1665 = vmatprep.subr.bf16.mxu1 %v3793_v6  ;;  %2695 = vmatpush1.bf16.msra.mxu0 %v4612_v56  ;;  %v3821_v56 = vld [vmem:[%s4340_s17 + $0x3c0] ss:$8 sps:$4 sm:$0xff]  }
 0x154   : > { %2696 = vmatprep.subr.bf16.mxu0 %v4615_v58 }
 0x157   : > { %2697 = vmatpush1.bf16.msra.mxu0 %v4622_v3 }
 0x158   : > { %2698 = vmatprep.subr.bf16.mxu0 %v4625_v4  ;;  %v3829_v4 = vld [vmem:[%s4340_s17 + $0x3d4] ss:$8 sps:$4 sm:$0xff]  }
 0x15a   : > { %1666 = vmatpush1.bf16.xpose.msra.mxu1 %v3791_v8 }
 0x15b   : > { %1667 = vmatprep.subr.bf16.mxu1 %v3799_v13  ;;  %2699 = vmatpush1.bf16.msra.mxu0 %v4632_v16  ;;  %v3845_v13 = vld [vmem:[%s4340_s17 + $0x500] ss:$8 sps:$4 sm:$0xff]  }
 0x15c   : > { %2700 = vmatprep.subr.bf16.mxu0 %v4635_v17 }
 0x15f   : > { %2701 = vmatpush1.bf16.msra.mxu0 %v4642_v25 }
 0x160   : > { %2702 = vmatprep.subr.bf16.mxu0 %v4645_v26 }
 0x162   : > { %1668 = vmatpush1.bf16.xpose.msra.mxu1 %v3797_v15 }
 0x163   : > { %1669 = vmatprep.subr.bf16.mxu1 %v3805_v19  ;;  %2703 = vmatpush1.bf16.msra.mxu0 %v4652_v33  ;;  %v3827_v33 = vld [vmem:[%s4340_s17 + $0x3d0] ss:$8 sps:$4 sm:$0xff]   ;;  %v3850_v19 = vld [vmem:[%s4340_s17 + $0x514] ss:$8 sps:$4 sm:$0xff]  }
 0x164   : > { %2745 = vmatprep.subr.bf16.mxu0 %v4101_v44 }
 0x16a   : > { %1670 = vmatpush1.bf16.xpose.msra.mxu1 %v3803_v20 }
 0x16b   : > { %1671 = vmatprep.subr.bf16.mxu1 %v3811_v23 }
 0x172   : > { %1672 = vmatpush1.bf16.xpose.msra.mxu1 %v3809_v24 }
 0x173   : > { %1673 = vmatprep.subr.bf16.mxu1 %v3817_v27  ;;  %v3848_v27 = vld [vmem:[%s4340_s17 + $0x510] ss:$8 sps:$4 sm:$0xff]  }
 0x174   : > { %v4729_v28 = vpop.f32.mrb[0].mxu1 }
 0x175   : > { %v4732_v31 = vpop.f32.mrb[1].mxu1 }
 0x176   : > { %v1878_v32 = vmax.f32 %v4729_v28, %v4732_v31  ;;  %v4737_v35 = vpop.f32.mrb[2].mxu1 }
 0x177   : > { %v4740_v39 = vpop.f32.mrb[3].mxu1 }
 0x178   : > { %v1891_v43 = vmax.f32 %v4737_v35, %v4740_v39  ;;  %v4784_v62 = vpop.f32.mrb[0].mxu0 }
 0x179   : > { %v4789_v21 = vpop.f32.mrb[1].mxu0 }
 0x17a   : > { %1674 = vmatpush1.bf16.xpose.msra.mxu1 %v3815_v36  ;;  %v4793_v29 = vpop.f32.mrb[2].mxu0 }
 0x17b   : > { %1675 = vmatprep.subr.bf16.mxu1 %v3823_v40  ;;  %6252 = vst [vmem:[#allocation13_spill] sm:$0xff] %v4793_v29  ;;  %v4795_v30 = vpop.f32.mrb[3].mxu0  ;;  %v3853_v40 = vld [vmem:[%s4340_s17 + $0x524] ss:$8 sps:$4 sm:$0xff]  }
 0x17c   : > { %v4747_v48 = vpop.f32.mrb[4].mxu1 }
 0x17d   : > { %v4749_v50 = vpop.f32.mrb[5].mxu1 }
 0x17e   : > { %v1904_v58 = vmax.f32 %v4747_v48, %v4749_v50  ;;  %v4754_v3 = vpop.f32.mrb[6].mxu1 }
 0x17f   : > { %v4757_v16 = vpop.f32.mrb[7].mxu1 }
 0x180   : > { %v1917_v17 = vmax.f32 %v4754_v3, %v4757_v16  ;;  %v4798_v9 = vpop.f32.mrb[4].mxu0 }
 0x181   : > { %6253 = vst [vmem:[#allocation14_spill] sm:$0xff] %v4798_v9  ;;  %v4801_v2 = vpop.f32.mrb[5].mxu0 }
 0x182   : > { %1676 = vmatpush1.bf16.xpose.msra.mxu1 %v3821_v56  ;;  %v4803_v6 = vpop.f32.mrb[6].mxu0 }
 0x183   : > { %1677 = vmatprep.subr.bf16.mxu1 %v3829_v4  ;;  %6254 = vst [vmem:[#allocation15_spill] sm:$0xff] %v4803_v6  ;;  %v4805_v8 = vpop.f32.mrb[7].mxu0 }
 0x184   : > { %v4761_v25 = vpop.f32.mrb[8].mxu1 }
 0x185   : > { %6244 = vst [vmem:[#allocation5_spill] sm:$0xff] %v4761_v25  ;;  %v4763_v26 = vpop.f32.mrb[9].mxu1 }
 0x186   : > { %6245 = vst [vmem:[#allocation6_spill] sm:$0xff] %v4763_v26  ;;  %v4768_v37 = vpop.f32.mrb[10].mxu1 }
 0x187   : > { %6246 = vst [vmem:[#allocation7_spill] sm:$0xff] %v4768_v37  ;;  %v4771_v41 = vpop.f32.mrb[11].mxu1 }
 0x188   : > { %6247 = vst [vmem:[#allocation8_spill] sm:$0xff] %v4771_v41  ;;  %v4808_v15 = vpop.f32.mrb[8].mxu0 }
 0x189   : > { %6255 = vst [vmem:[#allocation16_spill] sm:$0xff] %v4808_v15  ;;  %v4811_v20 = vpop.f32.mrb[9].mxu0 }
 0x18a   : > { %1678 = vmatpush1.bf16.xpose.msra.mxu1 %v3827_v33  ;;  %v4813_v23 = vpop.f32.mrb[10].mxu0  ;;  %v3851_v33 = vld [vmem:[%s4340_s17 + $0x520] ss:$8 sps:$4 sm:$0xff]  }
 0x18b   : > { %1679 = vmatprep.subr.bf16.mxu1 %v3835_v38  ;;  %6256 = vst [vmem:[#allocation17_spill] sm:$0xff] %v4813_v23  ;;  %v4816_v24 = vpop.f32.mrb[11].mxu0  ;;  %v3856_v38 = vld [vmem:[%s4340_s17 + $0x534] ss:$8 sps:$4 sm:$0xff]  }
 0x18c   : > { %v4775_v45 = vpop.f32.mrb[12].mxu1  ;;  %6257 = vst [vmem:[#allocation18_spill] sm:$0xff] %v4816_v24 }
 0x18d   : > { %6248 = vst [vmem:[#allocation9_spill] sm:$0xff] %v4775_v45  ;;  %v4777_v46 = vpop.f32.mrb[13].mxu1 }
 0x18e   : > { %6249 = vst [vmem:[#allocation10_spill] sm:$0xff] %v4777_v46  ;;  %v4782_v60 = vpop.f32.mrb[14].mxu1 }
 0x18f   : > { %6250 = vst [vmem:[#allocation11_spill] sm:$0xff] %v4782_v60  ;;  %v4787_v11 = vpop.f32.mrb[15].mxu1 }
 0x190   : > { %6251 = vst [vmem:[#allocation12_spill] sm:$0xff] %v4787_v11  ;;  %v4820_v36 = vpop.f32.mrb[12].mxu0 }
 0x191   : > { %6258 = vst [vmem:[#allocation19_spill] sm:$0xff] %v4820_v36  ;;  %v4823_v44 = vpop.f32.mrb[13].mxu0 }
 0x192   : > { %1680 = vmatpush1.bf16.xpose.msra.mxu1 %v3833_v52  ;;  %6259 = vst [vmem:[#allocation20_spill] sm:$0xff] %v4823_v44  ;;  %v4825_v56 = vpop.f32.mrb[14].mxu0  ;;  %v3854_v52 = vld [vmem:[%s4340_s17 + $0x530] ss:$8 sps:$4 sm:$0xff]  }
 0x193   : > { %1681 = vmatprep.subr.bf16.mxu1 %v3841_v10  ;;  %6260 = vst [vmem:[#allocation21_spill] sm:$0xff] %v4825_v56  ;;  %v4828_v4 = vpop.f32.mrb[15].mxu0  ;;  %v3859_v10 = vld [vmem:[%s4340_s17 + $0x544] ss:$8 sps:$4 sm:$0xff]  }
 0x194   : > { %6261 = vst [vmem:[#allocation22_spill] sm:$0xff] %v4828_v4 }
 0x19a   : > { %1682 = vmatpush1.bf16.xpose.msra.mxu1 %v3839_v61  ;;  %v4102_v61 = vld [vmem:[%s6164_s0 + $0x4] ss:$8 sps:$4 sm:$0xff]  }
 0x19b   : > { %1797 = vmatprep.subr.bf16.mxu1 %v3847_v0  ;;  %v3857_v0 = vld [vmem:[%s4340_s17 + $0x540] ss:$8 sps:$4 sm:$0xff]  }
 0x1a1   : > { %1684 = vmatmul.mubr.bf16.vlgmr.msra.gmra.mrb[32].mxu1 %v4453_v63 }
 0x1a2   : > { %1798 = vmatpush1.bf16.xpose.msra.mxu1 %v3845_v13  ;;  %1693 = vmatprep.mubr.bf16.mxu1 %v4461_v1  ;;  %v3862_v13 = vld [vmem:[%s4340_s17 + $0x554] ss:$8 sps:$4 sm:$0xff]  }
 0x1a3   : > { %1799 = vmatprep.subr.bf16.mxu1 %v3850_v19  ;;  %v3860_v19 = vld [vmem:[%s4340_s17 + $0x550] ss:$8 sps:$4 sm:$0xff]  }
 0x1a9   : > { %1694 = vmatmul.mubr.bf16.gmra.mrb[36].mxu1 %v4475_v5 }
 0x1aa   : > { %1800 = vmatpush1.bf16.xpose.msra.mxu1 %v3848_v27  ;;  %1703 = vmatprep.mubr.bf16.mxu1 %v4483_v7  ;;  %v3865_v27 = vld [vmem:[%s4340_s17 + $0x564] ss:$8 sps:$4 sm:$0xff]  }
 0x1ab   : > { %1801 = vmatprep.subr.bf16.mxu1 %v3853_v40  ;;  %v3863_v40 = vld [vmem:[%s4340_s17 + $0x560] ss:$8 sps:$4 sm:$0xff]  }
 0x1b1   : > { %1704 = vmatmul.mubr.bf16.gmra.mrb[40].mxu1 %v4497_v12 }
 0x1b2   : > { %1802 = vmatpush1.bf16.xpose.msra.mxu1 %v3851_v33  ;;  %1713 = vmatprep.mubr.bf16.mxu1 %v4505_v14  ;;  %v3868_v33 = vld [vmem:[%s4340_s17 + $0x574] ss:$8 sps:$4 sm:$0xff]  }
 0x1b3   : > { %1803 = vmatprep.subr.bf16.mxu1 %v3856_v38  ;;  %v3866_v38 = vld [vmem:[%s4340_s17 + $0x570] ss:$8 sps:$4 sm:$0xff]  }
 0x1b9   : > { %1714 = vmatmul.mubr.bf16.gmra.mrb[44].mxu1 %v4519_v18 }
 0x1ba   : > { %1804 = vmatpush1.bf16.xpose.msra.mxu1 %v3854_v52  ;;  %1829 = vmatprep.mubr.bf16.mxu1 %v4102_v61  ;;  %v3871_v52 = vld [vmem:[%s4340_s17 + $0x584] ss:$8 sps:$4 sm:$0xff]   ;;  %v3874_v61 = vld [vmem:[%s4340_s17 + $0x594] ss:$8 sps:$4 sm:$0xff]  }
 0x1bb   : > { %1805 = vmatprep.subr.bf16.mxu1 %v3859_v10  ;;  %v3869_v10 = vld [vmem:[%s4340_s17 + $0x580] ss:$8 sps:$4 sm:$0xff]  }
 0x1c2   : > { %1806 = vmatpush1.bf16.xpose.msra.mxu1 %v3857_v0  ;;  %v3872_v0 = vld [vmem:[%s4340_s17 + $0x590] ss:$8 sps:$4 sm:$0xff]  }
 0x1c3   : > { %1807 = vmatprep.subr.bf16.mxu1 %v3862_v13  ;;  %v3877_v13 = vld [vmem:[%s4340_s17 + $0x5a4] ss:$8 sps:$4 sm:$0xff]  }
 0x1ca   : > { %1808 = vmatpush1.bf16.xpose.msra.mxu1 %v3860_v19  ;;  %v3875_v19 = vld [vmem:[%s4340_s17 + $0x5a0] ss:$8 sps:$4 sm:$0xff]  }
 0x1cb   : > { %1809 = vmatprep.subr.bf16.mxu1 %v3865_v27  ;;  %v3880_v27 = vld [vmem:[%s4340_s17 + $0x5b4] ss:$8 sps:$4 sm:$0xff]  }
 0x1d2   : > { %1810 = vmatpush1.bf16.xpose.msra.mxu1 %v3863_v40 }
 0x1d3   : > { %1811 = vmatprep.subr.bf16.mxu1 %v3868_v33 }
 0x1da   : > { %1812 = vmatpush1.bf16.xpose.msra.mxu1 %v3866_v38 }
 0x1db   : > { %1813 = vmatprep.subr.bf16.mxu1 %v3871_v52 }
 0x1e2   : > { %1814 = vmatpush1.bf16.xpose.msra.mxu1 %v3869_v10  ;;  %v3878_v10 = vld [vmem:[%s4340_s17 + $0x5b0] ss:$8 sps:$4 sm:$0xff]  }
 0x1e3   : > { %1815 = vmatprep.subr.bf16.mxu1 %v3874_v61 }
 0x1ea   : > { %1816 = vmatpush1.bf16.xpose.msra.mxu1 %v3872_v0 }
 0x1eb   : > { %1817 = vmatprep.subr.bf16.mxu1 %v3877_v13 }
 0x1f2   : > { %1818 = vmatpush1.bf16.xpose.msra.mxu1 %v3875_v19  ;;  %v3883_v19 = vld [vmem:[%s4340_s17 + $0x5c4] ss:$8 sps:$4 sm:$0xff]  }
 0x1f3   : > { %1819 = vmatprep.subr.bf16.mxu1 %v3880_v27 }
 0x1f4   : > { %v4855_v40 = vpop.f32.mrb[16].mxu1 }
 0x1f5   : > { %v1879_v33 = vmax.f32 %v1878_v32, %v4855_v40  ;;  %v4861_v38 = vpop.f32.mrb[17].mxu1 }
 0x1f6   : > { %v4863_v52 = vpop.f32.mrb[18].mxu1 }
 0x1f7   : > { %v1880_v61 = vmax.f32 %v1879_v33, %v4861_v38  ;;  %v1892_v0 = vmax.f32 %v1891_v43, %v4863_v52  ;;  %v4871_v13 = vpop.f32.mrb[19].mxu1 }
 0x1f9   : > { %v1893_v27 = vmax.f32 %v1892_v0, %v4871_v13  ;;  %v4876_v32 = vmax.f32 %v1880_v61, %v4784_v62 }
 0x1fa   : > { %1820 = vmatpush1.bf16.xpose.msra.mxu1 %v3878_v10 }
 0x1fb   : > { %v4881_v33 = vmax.f32 %v1893_v27, %v4793_v29  ;;  %1821 = vmatprep.subr.bf16.mxu1 %v3883_v19 }
 0x1fc   : > { %v4883_v54 = vpop.f32.mrb[20].mxu1 }
 0x1fd   : > { %6262 = vst [vmem:[#allocation23_spill] sm:$0xff] %v4883_v54  ;;  %v1905_v43 = vmax.f32 %v1904_v58, %v4883_v54  ;;  %v4891_v61 = vpop.f32.mrb[21].mxu1 }
 0x1fe   : > { %v4893_v10 = vpop.f32.mrb[22].mxu1 }
 0x1ff   : > { %6263 = vst [vmem:[#allocation24_spill] sm:$0xff] %v4893_v10  ;;  %v1906_v27 = vmax.f32 %v1905_v43, %v4891_v61  ;;  %v1918_v19 = vmax.f32 %v1917_v17, %v4893_v10  ;;  %v4901_v22 = vpop.f32.mrb[23].mxu1  ;;  %v6265_v17 = vmax.f32 %v4761_v25, %v4763_v26  ;;  %v3889_v25 = vld [vmem:[%s4340_s17 + $0x5e4] ss:$8 sps:$4 sm:$0xff]   ;;  %v4126_v26 = vld [vmem:[%s4340_s17 + $0xb0] ss:$8 sps:$4 sm:$0xff]  }
 0x201   : > { %v1919_v58 = vmax.f32 %v1918_v19, %v4901_v22  ;;  %v4906_v0 = vmax.f32 %v1906_v27, %v4798_v9  ;;  %v3884_v9 = vld [vmem:[%s4340_s17 + $0x5d0] ss:$8 sps:$4 sm:$0xff]  }
 0x202   : > { %1822 = vmatpush1.bf16.xpose.msra.mxu1 %v3881_v42 }
 0x203   : > { %v4911_v43 = vmax.f32 %v1919_v58, %v4803_v6  ;;  %1823 = vmatprep.subr.bf16.mxu1 %v3886_v34  ;;  %v6268_v34 = vmax.f32 %v4768_v37, %v4771_v41  ;;  %v4107_v41 = vld [vmem:[%s4340_s17 + $0x24] ss:$8 sps:$4 sm:$0xff]  }
 0x204   : > { %v4913_v54 = vpop.f32.mrb[24].mxu1 }
 0x205   : > { %6264 = vst [vmem:[#allocation25_spill] sm:$0xff] %v4913_v54  ;;  %v1931_v10 = vmax.f32 %v6265_v17, %v4913_v54  ;;  %v4921_v27 = vpop.f32.mrb[25].mxu1  ;;  %v4956_v54 = vpop.f32.mrb[16].mxu0 }
 0x206   : > { %6266 = vst [vmem:[#allocation26_spill] sm:$0xff] %v4921_v27  ;;  %v4923_v42 = vpop.f32.mrb[26].mxu1 }
 0x207   : > { %6267 = vst [vmem:[#allocation27_spill] sm:$0xff] %v4923_v42  ;;  %v1932_v58 = vmax.f32 %v1931_v10, %v4921_v27  ;;  %v1944_v29 = vmax.f32 %v6268_v34, %v4923_v42  ;;  %v4931_v6 = vpop.f32.mrb[27].mxu1  ;;  %v6271_v34 = vmax.f32 %v4775_v45, %v4777_v46 }
 0x208   : > { %6269 = vst [vmem:[#allocation28_spill] sm:$0xff] %v4931_v6 }
 0x209   : > { %v1945_v17 = vmax.f32 %v1944_v29, %v4931_v6  ;;  %v4936_v19 = vmax.f32 %v1932_v58, %v4808_v15  ;;  %v3887_v15 = vld [vmem:[%s4340_s17 + $0x5e0] ss:$8 sps:$4 sm:$0xff]  }
 0x20a   : > { %1824 = vmatpush1.bf16.xpose.msra.mxu1 %v3884_v9 }
 0x20b   : > { %v4941_v10 = vmax.f32 %v1945_v17, %v4813_v23  ;;  %1825 = vmatprep.subr.bf16.mxu1 %v3889_v25  ;;  %v6274_v17 = vmax.f32 %v4782_v60, %v4787_v11  ;;  %v3890_v60 = vld [vmem:[%s4340_s17 + $0x5f0] ss:$8 sps:$4 sm:$0xff]  }
 0x20c   : > { %v4943_v27 = vpop.f32.mrb[28].mxu1 }
 0x20d   : > { %6270 = vst [vmem:[#allocation29_spill] sm:$0xff] %v4943_v27  ;;  %v1957_v42 = vmax.f32 %v6271_v34, %v4943_v27  ;;  %v4951_v58 = vpop.f32.mrb[29].mxu1  ;;  %v3892_v34 = vld [vmem:[%s4340_s17 + $0x5f4] ss:$8 sps:$4 sm:$0xff]   ;;  %v4966_v27 = vpop.f32.mrb[17].mxu0 }
 0x20e   : > { %6272 = vst [vmem:[#allocation30_spill] sm:$0xff] %v4951_v58  ;;  %v4953_v9 = vpop.f32.mrb[30].mxu1  ;;  %v4968_v29 = vpop.f32.mrb[18].mxu0 }
 0x20f   : > { %6273 = vst [vmem:[#allocation31_spill] sm:$0xff] %v4953_v9  ;;  %v1958_v25 = vmax.f32 %v1957_v42, %v4951_v58  ;;  %v1970_v23 = vmax.f32 %v6274_v17, %v4953_v9  ;;  %v4963_v45 = vpop.f32.mrb[31].mxu1  ;;  %v4974_v6 = vpop.f32.mrb[19].mxu0  ;;  %v4103_v42 = vld [vmem:[%s4340_s17 + $0x4] ss:$8 sps:$4 sm:$0xff]  }
 0x210   : > { %6275 = vst [vmem:[#allocation32_spill] sm:$0xff] %v4963_v45  ;;  %v4106_v58 = vld [vmem:[%s4340_s17 + $0x10] ss:$8 sps:$4 sm:$0xff]  }
 0x211   : > { %v1971_v46 = vmax.f32 %v1970_v23, %v4963_v45  ;;  %v4972_v37 = vmax.f32 %v1958_v25, %v4820_v36  ;;  %v4984_v23 = vpop.f32.mrb[20].mxu0  ;;  %v4104_v45 = vld [vmem:[%s4340_s17] ss:$8 sps:$4 sm:$0xff]  }
 0x212   : > { %1826 = vmatpush1.bf16.xpose.msra.mxu1 %v3887_v15  ;;  %v4986_v25 = vpop.f32.mrb[21].mxu0 }
 0x213   : > { %v4979_v17 = vmax.f32 %v1971_v46, %v4825_v56  ;;  %1827 = vmatprep.subr.bf16.mxu1 %v3892_v34  ;;  %v4988_v36 = vpop.f32.mrb[22].mxu0 }
 0x214   : > { %6276 = vst [vmem:[#allocation33_spill] sm:$0xff] %v4988_v36  ;;  %v4990_v15 = vpop.f32.mrb[23].mxu0 }
 0x215   : > { %v4993_v46 = vpop.f32.mrb[24].mxu0 }
 0x216   : > { %v4995_v34 = vpop.f32.mrb[25].mxu0 }
 0x217   : > { %v4997_v9 = vpop.f32.mrb[26].mxu0 }
 0x218   : > { %6277 = vst [vmem:[#allocation34_spill] sm:$0xff] %v4997_v9  ;;  %v5000_v56 = vpop.f32.mrb[27].mxu0 }
 0x219   : > { %6278 = vst [vmem:[#allocation35_spill] sm:$0xff] %v5000_v56 }
 0x21a   : > { %1828 = vmatpush1.bf16.xpose.msra.mxu1 %v3890_v60  ;;  %v4105_v60 = vld [vmem:[%s4340_s17 + $0x14] ss:$8 sps:$4 sm:$0xff]  }
 0x21b   : > { %2599 = vmatprep.subr.bf16.mxu1 %v4103_v42  ;;  %v5005_v42 = vpop.f32.mrb[28].mxu0 }
 0x21c   : > { %6279 = vst [vmem:[#allocation36_spill] sm:$0xff] %v5005_v42  ;;  %v5008_v11 = vpop.f32.mrb[29].mxu0 }
 0x21d   : > { %6280 = vst [vmem:[#allocation37_spill] sm:$0xff] %v5008_v11 }
 0x221   : > { %1830 = vmatmul.mubr.bf16.vlgmr.msra.gmra.mrb[48].mxu1 %v4453_v63  ;;  %v5011_v63 = vpop.f32.mrb[30].mxu0 }
 0x222   : > { %1839 = vmatprep.mubr.bf16.mxu1 %v4461_v1  ;;  %2600 = vmatpush1.bf16.msra.mxu1 %v4104_v45  ;;  %6281 = vst [vmem:[#allocation38_spill] sm:$0xff] %v5011_v63  ;;  %v5014_v1 = vpop.f32.mrb[31].mxu0  ;;  %v4108_v45 = vld [vmem:[%s4340_s17 + $0x20] ss:$8 sps:$4 sm:$0xff]  }
 0x223   : > { %2601 = vmatprep.subr.bf16.mxu1 %v4105_v60  ;;  %6282 = vst [vmem:[#allocation39_spill] sm:$0xff] %v5014_v1  ;;  %v4109_v60 = vld [vmem:[%s4340_s17 + $0x34] ss:$8 sps:$4 sm:$0xff]  }
 0x226   : > { %2602 = vmatpush1.bf16.msra.mxu1 %v4106_v58  ;;  %v4110_v58 = vld [vmem:[%s4340_s17 + $0x30] ss:$8 sps:$4 sm:$0xff]  }
 0x227   : > { %2603 = vmatprep.subr.bf16.mxu1 %v4107_v41  ;;  %v4111_v41 = vld [vmem:[%s4340_s17 + $0x44] ss:$8 sps:$4 sm:$0xff]  }
 0x229   : > { %1840 = vmatmul.mubr.bf16.gmra.mrb[52].mxu1 %v4475_v5  ;;  %v4112_v5 = vld [vmem:[%s4340_s17 + $0x40] ss:$8 sps:$4 sm:$0xff]  }
 0x22a   : > { %1849 = vmatprep.mubr.bf16.mxu1 %v4483_v7  ;;  %2604 = vmatpush1.bf16.msra.mxu1 %v4108_v45  ;;  %v4113_v7 = vld [vmem:[%s4340_s17 + $0x54] ss:$8 sps:$4 sm:$0xff]   ;;  %v4114_v45 = vld [vmem:[%s4340_s17 + $0x50] ss:$8 sps:$4 sm:$0xff]  }
 0x22b   : > { %2605 = vmatprep.subr.bf16.mxu1 %v4109_v60  ;;  %v4115_v60 = vld [vmem:[%s4340_s17 + $0x64] ss:$8 sps:$4 sm:$0xff]  }
 0x22e   : > { %2606 = vmatpush1.bf16.msra.mxu1 %v4110_v58  ;;  %v4116_v58 = vld [vmem:[%s4340_s17 + $0x60] ss:$8 sps:$4 sm:$0xff]  }
 0x22f   : > { %2607 = vmatprep.subr.bf16.mxu1 %v4111_v41  ;;  %v4119_v41 = vld [vmem:[%s4340_s17 + $0x84] ss:$8 sps:$4 sm:$0xff]  }
 0x231   : > { %1850 = vmatmul.mubr.bf16.gmra.mrb[56].mxu1 %v4497_v12  ;;  %v4117_v12 = vld [vmem:[%s4340_s17 + $0x74] ss:$8 sps:$4 sm:$0xff]  }
 0x232   : > { %1859 = vmatprep.mubr.bf16.mxu1 %v4505_v14  ;;  %2608 = vmatpush1.bf16.msra.mxu1 %v4112_v5  ;;  %v4118_v14 = vld [vmem:[%s4340_s17 + $0x70] ss:$8 sps:$4 sm:$0xff]   ;;  %v4120_v5 = vld [vmem:[%s4340_s17 + $0x80] ss:$8 sps:$4 sm:$0xff]  }
 0x233   : > { %2609 = vmatprep.subr.bf16.mxu1 %v4113_v7  ;;  %v4121_v7 = vld [vmem:[%s4340_s17 + $0x94] ss:$8 sps:$4 sm:$0xff]  }
 0x236   : > { %2610 = vmatpush1.bf16.msra.mxu1 %v4114_v45  ;;  %v4122_v45 = vld [vmem:[%s4340_s17 + $0x90] ss:$8 sps:$4 sm:$0xff]  }
 0x237   : > { %2611 = vmatprep.subr.bf16.mxu1 %v4115_v60  ;;  %v4123_v60 = vld [vmem:[%s4340_s17 + $0xa4] ss:$8 sps:$4 sm:$0xff]  }
 0x239   : > { %1860 = vmatmul.mubr.bf16.gmra.mrb[60].mxu1 %v4519_v18  ;;  %v4124_v18 = vld [vmem:[%s4340_s17 + $0xa0] ss:$8 sps:$4 sm:$0xff]  }
 0x23a   : > { %2612 = vmatpush1.bf16.msra.mxu1 %v4116_v58  ;;  %v4125_v58 = vld [vmem:[%s4340_s17 + $0xb4] ss:$8 sps:$4 sm:$0xff]  }
 0x23b   : > { %2613 = vmatprep.subr.bf16.mxu1 %v4117_v12  ;;  %v4127_v12 = vld [vmem:[%s4340_s17 + $0xc4] ss:$8 sps:$4 sm:$0xff]  }
 0x23e   : > { %2614 = vmatpush1.bf16.msra.mxu1 %v4118_v14 }
 0x23f   : > { %2615 = vmatprep.subr.bf16.mxu1 %v4119_v41 }
 0x242   : > { %2616 = vmatpush1.bf16.msra.mxu1 %v4120_v5 }
 0x243   : > { %2617 = vmatprep.subr.bf16.mxu1 %v4121_v7 }
 0x246   : > { %2618 = vmatpush1.bf16.msra.mxu1 %v4122_v45 }
 0x247   : > { %2619 = vmatprep.subr.bf16.mxu1 %v4123_v60  ;;  %v6285_v60 = vmax.f32 %v4906_v0, %v4801_v2 }
 0x24a   : > { %2620 = vmatpush1.bf16.msra.mxu1 %v4124_v18 }
 0x24b   : > { %2621 = vmatprep.subr.bf16.mxu1 %v4125_v58 }
 0x24e   : > { %2622 = vmatpush1.bf16.msra.mxu1 %v4126_v26  ;;  %v6283_v26 = vmax.f32 %v4876_v32, %v4789_v21 }
 0x24f   : > { %2623 = vmatprep.subr.bf16.mxu1 %v4127_v12 }
 0x252   : > { %2624 = vmatpush1.bf16.msra.mxu1 %v4411_v47 }
 0x253   : > { %2625 = vmatprep.subr.bf16.mxu1 %v4415_v49 }
 0x256   : > { %2626 = vmatpush1.bf16.msra.mxu1 %v4421_v51 }
 0x257   : > { %2627 = vmatprep.subr.bf16.mxu1 %v4425_v53  ;;  %v6284_v53 = vmax.f32 %v4881_v33, %v4795_v30 }
 0x25a   : > { %2628 = vmatpush1.bf16.msra.mxu1 %v4431_v55 }
 0x25b   : > { %2629 = vmatprep.subr.bf16.mxu1 %v4435_v57 }
 0x25e   : > { %2630 = vmatpush1.bf16.msra.mxu1 %v4441_v59 }
 0x274   : > { %v5047_v14 = vpop.f32.mrb[32].mxu1 }
 0x275   : > { %v1883_v41 = vmax.f32 %v6283_v26, %v5047_v14  ;;  %v5053_v47 = vpop.f32.mrb[33].mxu1 }
 0x276   : > { %v5055_v49 = vpop.f32.mrb[34].mxu1 }
 0x277   : > { %v1884_v51 = vmax.f32 %v1883_v41, %v5053_v47  ;;  %v1896_v55 = vmax.f32 %v6284_v53, %v5055_v49  ;;  %v5062_v57 = vpop.f32.mrb[35].mxu1  ;;  %v6287_v41 = vmax.f32 %v4911_v43, %v4805_v8 }
 0x279   : > { %v1897_v59 = vmax.f32 %v1896_v55, %v5062_v57  ;;  %v1885_v5 = vmax.f32 %v1884_v51, %v4956_v54 }
 0x27b   : > { %v1886_v32 = vmax.f32 %v1885_v5, %v4966_v27  ;;  %v1898_v7 = vmax.f32 %v1897_v59, %v4968_v29 }
 0x27c   : > { %v5068_v45 = vpop.f32.mrb[36].mxu1 }
 0x27d   : > { %v1909_v18 = vmax.f32 %v6285_v60, %v5068_v45  ;;  %v1899_v33 = vmax.f32 %v1898_v7, %v4974_v6  ;;  %v5075_v58 = vpop.f32.mrb[37].mxu1  ;;  %v6289_v60 = vmax.f32 %v4936_v19, %v4811_v20 }
 0x27e   : > { %v5077_v12 = vpop.f32.mrb[38].mxu1 }
 0x27f   : > { %6286 = vst [vmem:[#allocation40_spill] sm:$0xff] %v5077_v12  ;;  %v1910_v26 = vmax.f32 %v1909_v18, %v5075_v58  ;;  %v1922_v51 = vmax.f32 %v6287_v41, %v5077_v12  ;;  %v5084_v53 = vpop.f32.mrb[39].mxu1 }
 0x281   : > { %v1923_v55 = vmax.f32 %v1922_v51, %v5084_v53  ;;  %v1911_v0 = vmax.f32 %v1910_v26, %v4984_v23  ;;  %v6292_v26 = vmax.f32 %v4941_v10, %v4816_v24 }
 0x283   : > { %v1912_v59 = vmax.f32 %v1911_v0, %v4986_v25  ;;  %v1924_v5 = vmax.f32 %v1923_v55, %v4988_v36 }
 0x284   : > { %v5090_v7 = vpop.f32.mrb[40].mxu1 }
 0x285   : > { %6288 = vst [vmem:[#allocation41_spill] sm:$0xff] %v5090_v7  ;;  %v1935_v18 = vmax.f32 %v6289_v60, %v5090_v7  ;;  %v1925_v43 = vmax.f32 %v1924_v5, %v4990_v15  ;;  %v5097_v41 = vpop.f32.mrb[41].mxu1 }
 0x286   : > { %6290 = vst [vmem:[#allocation42_spill] sm:$0xff] %v5097_v41  ;;  %v5099_v12 = vpop.f32.mrb[42].mxu1 }
 0x287   : > { %6291 = vst [vmem:[#allocation43_spill] sm:$0xff] %v5099_v12  ;;  %v1936_v51 = vmax.f32 %v1935_v18, %v5097_v41  ;;  %v1948_v55 = vmax.f32 %v6292_v26, %v5099_v12  ;;  %v5106_v0 = vpop.f32.mrb[43].mxu1  ;;  %v6295_v18 = vmax.f32 %v4972_v37, %v4823_v44 }
 0x288   : > { %6293 = vst [vmem:[#allocation44_spill] sm:$0xff] %v5106_v0 }
 0x289   : > { %v1949_v36 = vmax.f32 %v1948_v55, %v5106_v0  ;;  %v1937_v19 = vmax.f32 %v1936_v51, %v4993_v46  ;;  %v6298_v51 = vmax.f32 %v4979_v17, %v4828_v4 }
 0x28b   : > { %v1938_v60 = vmax.f32 %v1937_v19, %v4995_v34  ;;  %v1950_v5 = vmax.f32 %v1949_v36, %v4997_v9 }
 0x28c   : > { %v5112_v7 = vpop.f32.mrb[44].mxu1 }
 0x28d   : > { %6294 = vst [vmem:[#allocation45_spill] sm:$0xff] %v5112_v7  ;;  %v1961_v41 = vmax.f32 %v6295_v18, %v5112_v7  ;;  %v1951_v10 = vmax.f32 %v1950_v5, %v5000_v56  ;;  %v5119_v26 = vpop.f32.mrb[45].mxu1 }
 0x28e   : > { %6296 = vst [vmem:[#allocation46_spill] sm:$0xff] %v5119_v26  ;;  %v5121_v12 = vpop.f32.mrb[46].mxu1 }
 0x28f   : > { %6297 = vst [vmem:[#allocation47_spill] sm:$0xff] %v5121_v12  ;;  %v1962_v55 = vmax.f32 %v1961_v41, %v5119_v26  ;;  %v1974_v36 = vmax.f32 %v6298_v51, %v5121_v12  ;;  %v5128_v19 = vpop.f32.mrb[47].mxu1 }
 0x290   : > { %6299 = vst [vmem:[#allocation48_spill] sm:$0xff] %v5128_v19 }
 0x291   : > { %v1975_v9 = vmax.f32 %v1974_v36, %v5128_v19  ;;  %v1963_v37 = vmax.f32 %v1962_v55, %v5005_v42 }
 0x293   : > { %v1964_v18 = vmax.f32 %v1963_v37, %v5008_v11  ;;  %v1976_v5 = vmax.f32 %v1975_v9, %v5011_v63  ;;  %v4299_v11 = vmov 0  }
 0x294   : > { %3591 = vset.pattern.permute.xlu0 %v4299_v11  ;;  %3592 = vset.pattern.permute.xlu1 %v4299_v11 }
 0x295   : > { %v1977_v7 = vmax.f32 %v1976_v5, %v5014_v1 }
 0x2f4   : > { %v5135_v44 = vpop.f32.mrb[48].mxu1 }
 0x2f5   : > { %v1887_v41 = vmax.f32 %v1886_v32, %v5135_v44  ;;  %v5138_v26 = vpop.f32.mrb[49].mxu1 }
 0x2f6   : > { %v5140_v17 = vpop.f32.mrb[50].mxu1 }
 0x2f7   : > { %v1900_v51 = vmax.f32 %v1899_v33, %v5140_v17  ;;  %v5143_v12 = vpop.f32.mrb[51].mxu1  ;;  %v1888_v55 = vmax.f32 %v1887_v41, %v5138_v26 }
 0x2f9   : > { %1889 = vmax.xlane.f32.xlu0 %v1888_v55  ;;  %v1901_v36 = vmax.f32 %v1900_v51, %v5143_v12 }
 0x2fc   : > { %v5147_v9 = vpop.f32.mrb[52].mxu1 }
 0x2fd   : > { %v1913_v37 = vmax.f32 %v1912_v59, %v5147_v9  ;;  %1902 = vmax.xlane.f32.xlu0 %v1901_v36  ;;  %v5150_v5 = vpop.f32.mrb[53].mxu1 }
 0x2fe   : > { %v5152_v32 = vpop.f32.mrb[54].mxu1 }
 0x2ff   : > { %v1926_v1 = vmax.f32 %v1925_v43, %v5152_v32  ;;  %v5155_v63 = vpop.f32.mrb[55].mxu1  ;;  %v1914_v33 = vmax.f32 %v1913_v37, %v5150_v5 }
 0x301   : > { %1915 = vmax.xlane.f32.xlu1 %v1914_v33  ;;  %v1927_v41 = vmax.f32 %v1926_v1, %v5155_v63 }
 0x304   : > { %v5159_v55 = vpop.f32.mrb[56].mxu1 }
 0x305   : > { %v1939_v51 = vmax.f32 %v1938_v60, %v5159_v55  ;;  %1928 = vmax.xlane.f32.xlu1 %v1927_v41  ;;  %v5162_v59 = vpop.f32.mrb[57].mxu1 }
 0x306   : > { %6300 = vst [vmem:[#allocation49_spill] sm:$0xff] %v5162_v59  ;;  %v5164_v36 = vpop.f32.mrb[58].mxu1 }
 0x307   : > { %6301 = vst [vmem:[#allocation50_spill] sm:$0xff] %v5164_v36  ;;  %v1952_v19 = vmax.f32 %v1951_v10, %v5164_v36  ;;  %v5167_v4 = vpop.f32.mrb[59].mxu1  ;;  %v1940_v43 = vmax.f32 %v1939_v51, %v5162_v59  ;;  %v5194_v59 = vld [vmem:[#allocation2 + $0x38] sm:$0xff] }
 0x308   : > { %6302 = vst [vmem:[#allocation51_spill] sm:$0xff] %v5167_v4  ;;  %6309 = vst [vmem:[#allocation58_spill] sm:$0xff] %v5194_v59 }
 0x309   : > { %1941 = vmax.xlane.f32.xlu0 %v1940_v43  ;;  %v1953_v1 = vmax.f32 %v1952_v19, %v5167_v4  ;;  %v1870_v19 = vld [vmem:[#allocation2] sm:$0xff]  ;;  %v1871_v4 = vld [vmem:[#allocation2 + $0x8] sm:$0xff] }
 0x30b   : > { %1954 = vmax.xlane.f32.xlu1 %v1953_v1 }
 0x30c   : > { %v5171_v37 = vpop.f32.mrb[60].mxu1 }
 0x30d   : > { %6303 = vst [vmem:[#allocation52_spill] sm:$0xff] %v5171_v37  ;;  %v1965_v60 = vmax.f32 %v1964_v18, %v5171_v37  ;;  %v5174_v33 = vpop.f32.mrb[61].mxu1 }
 0x30e   : > { %6304 = vst [vmem:[#allocation53_spill] sm:$0xff] %v5174_v33  ;;  %v5176_v41 = vpop.f32.mrb[62].mxu1 }
 0x30f   : > { %6305 = vst [vmem:[#allocation54_spill] sm:$0xff] %v5176_v41  ;;  %v1978_v10 = vmax.f32 %v1977_v7, %v5176_v41  ;;  %v5179_v42 = vpop.f32.mrb[63].mxu1  ;;  %v1966_v51 = vmax.f32 %v1965_v60, %v5174_v33  ;;  %v1872_v41 = vld [vmem:[#allocation2 + $0x10] sm:$0xff] }
 0x310   : > { %6306 = vst [vmem:[#allocation55_spill] sm:$0xff] %v5179_v42 }
 0x311   : > { %1967 = vmax.xlane.f32.xlu0 %v1966_v51  ;;  %v1979_v11 = vmax.f32 %v1978_v10, %v5179_v42  ;;  %v1873_v51 = vld [vmem:[#allocation2 + $0x18] sm:$0xff] }
 0x313   : > { %1980 = vmax.xlane.f32.xlu1 %v1979_v11 }
 0x386   : > { %v1890_v43 = vpop.xlane.xlu0 %1889 }
 0x387   : > { %v1982_v1 = vmax.f32 %v1870_v19, %v1890_v43 }
 0x389   : > { %v1990_v18 = vsub.f32 %v1870_v19, %v1982_v1  ;;  %3069 = vst.msk [vmem:[#allocation2] sm:$0xff] %vm2470_vm1, %v1982_v1  ;;  %2016 = vperm.xlu0 %3591, %v1982_v1   ;;  %v1874_v19 = vld [vmem:[#allocation2 + $0x20] sm:$0xff] }
 0x38a   : > { %v1903_v37 = vpop.xlane.xlu0 %1902 }
 0x38b   : > { %v1998_v36 = vmul.f32 1.442695, %v1990_v18  ;;  %v1983_v7 = vmax.f32 %v1871_v4, %v1903_v37  ;;  %v1875_v18 = vld [vmem:[#allocation2 + $0x28] sm:$0xff] }
 0x38d   : > { %3893 = vpow2.f32 %v1998_v36  ;;  %3070 = vst.msk [vmem:[#allocation2 + $0x8] sm:$0xff] %vm2470_vm1, %v1983_v7  ;;  %2021 = vperm.xlu1 %3592, %v1983_v7   ;;  %v1991_v1 = vsub.f32 %v1871_v4, %v1983_v7  ;;  %v5192_v4 = vld [vmem:[#allocation2 + $0x30] sm:$0xff] }
 0x38e   : > { %v1916_v60 = vpop.xlane.xlu1 %1915  ;;  %6308 = vst [vmem:[#allocation57_spill] sm:$0xff] %v5192_v4 }
 0x38f   : > { %v1984_v10 = vmax.f32 %v1872_v41, %v1916_v60 }
 0x391   : > { %3071 = vst.msk [vmem:[#allocation2 + $0x10] sm:$0xff] %vm2470_vm1, %v1984_v10  ;;  %2026 = vperm.xlu1 %3592, %v1984_v10  }
 0x392   : > { %v1929_v11 = vpop.xlane.xlu1 %1928 }
 0x393   : > { %v1985_v43 = vmax.f32 %v1873_v51, %v1929_v11  ;;  %v2000_v11 = vmul.f32 1.442695, %v1991_v1 }
 0x395   : > { %v1993_v42 = vsub.f32 %v1873_v51, %v1985_v43  ;;  %3072 = vst.msk [vmem:[#allocation2 + $0x18] sm:$0xff] %vm2470_vm1, %v1985_v43  ;;  %2031 = vperm.xlu1 %3592, %v1985_v43   ;;  %v1992_v51 = vsub.f32 %v1872_v41, %v1984_v10 }
 0x396   : > { %v1942_v37 = vpop.xlane.xlu0 %1941 }
 0x397   : > { %v5187_v36 = vpop.eup %3893  ;;  %v2004_v33 = vmul.f32 1.442695, %v1993_v42  ;;  %v1986_v56 = vmax.f32 %v1874_v19, %v1942_v37  ;;  %v2002_v42 = vmul.f32 1.442695, %v1992_v51 }
 0x398   : > { %6307 = vst [vmem:[#allocation56_spill] sm:$0xff] %v5187_v36  ;;  %v1955_v0 = vpop.xlane.xlu1 %1954  ;;  %2497 = vperm.xlu0 %3591, %v5187_v36   ;;  %v4129_v36 = vld [vmem:[%s4340_s17 + $0x214] ss:$8 sps:$4 sm:$0xff]  }
 0x399   : > { %3895 = vpow2.f32 %v2004_v33  ;;  %3073 = vst.msk [vmem:[#allocation2 + $0x20] sm:$0xff] %vm2470_vm1, %v1986_v56  ;;  %v1987_v60 = vmax.f32 %v1875_v18, %v1955_v0  ;;  %2036 = vperm.xlu1 %3592, %v1986_v56   ;;  %v1994_v43 = vsub.f32 %v1874_v19, %v1986_v56 }
 0x39a   : > { %3897 = vpow2.f32 %v2000_v11 }
 0x39b   : > { %v1995_v24 = vsub.f32 %v1875_v18, %v1987_v60  ;;  %3074 = vst.msk [vmem:[#allocation2 + $0x28] sm:$0xff] %vm2470_vm1, %v1987_v60  ;;  %v2006_v56 = vmul.f32 1.442695, %v1994_v43 }
 0x39d   : > { %v2008_v7 = vmul.f32 1.442695, %v1995_v24  ;;  %2041 = vperm.xlu1 %3592, %v1987_v60  }
 0x39e   : > { %v1968_v37 = vpop.xlane.xlu0 %1967 }
 0x39f   : > { %3899 = vpow2.f32 %v2008_v7  ;;  %v5197_v33 = vmax.f32 %v5192_v4, %v1968_v37 }
 0x3a0   : > { %v1981_v0 = vpop.xlane.xlu1 %1980  ;;  %3901 = vpow2.f32 %v2002_v42 }
 0x3a1   : > { %6310 = vst [vmem:[#allocation59_spill] sm:$0xff] %v5197_v33  ;;  %3075 = vst.msk [vmem:[#allocation2 + $0x30] sm:$0xff] %vm2470_vm1, %v5197_v33  ;;  %v5204_v24 = vmax.f32 %v5194_v59, %v1981_v0  ;;  %2046 = vperm.xlu1 %3592, %v5197_v33   ;;  %3903 = vpow2.f32 %v2006_v56 }
 0x3a3   : > { %6311 = vst [vmem:[#allocation60_spill] sm:$0xff] %v5204_v24  ;;  %v5207_v10 = vpop.eup %3895  ;;  %3076 = vst.msk [vmem:[#allocation2 + $0x38] sm:$0xff] %vm2470_vm1, %v5204_v24 }
 0x3a4   : > { %6312 = vst [vmem:[#allocation61_spill] sm:$0xff] %v5207_v10  ;;  %2512 = vperm.xlu0 %3591, %v5207_v10   ;;  %v5215_v1 = vpop.eup %3897 }
 0x3a5   : > { %2051 = vperm.xlu1 %3592, %v5204_v24   ;;  %6313 = vst [vmem:[#allocation62_spill] sm:$0xff] %v5215_v1 }
 0x3a9   : > { %v5217_v18 = vpop.eup %3899  ;;  %2502 = vperm.xlu1 %3592, %v5215_v1  }
 0x3aa   : > { %6314 = vst [vmem:[#allocation63_spill] sm:$0xff] %v5217_v18  ;;  %2522 = vperm.xlu0 %3591, %v5217_v18   ;;  %v5221_v60 = vpop.eup %3901 }
 0x3ab   : > { %6315 = vst [vmem:[#allocation64_spill] sm:$0xff] %v5221_v60  ;;  %v5224_v11 = vpop.eup %3903 }
 0x3ac   : > { %6316 = vst [vmem:[#allocation65_spill] sm:$0xff] %v5224_v11 }
 0x3ad   : > { %2507 = vperm.xlu1 %3592, %v5221_v60   ;;  %v6325_v60 = vld [vmem:[#allocation7_spill] sm:$0xff] }
 0x3b1   : > { %2517 = vperm.xlu1 %3592, %v5224_v11  }
 0x408   : > { %v5227_v51 = vpop.permute.xlu0 %2016 }
 0x409   : > { %v2055_v7 = vsub.f32 %v4732_v31, %v5227_v51  ;;  %v2057_v42 = vsub.f32 %v4861_v38, %v5227_v51  ;;  %v2054_v43 = vsub.f32 %v4729_v28, %v5227_v51  ;;  %v2056_v37 = vsub.f32 %v4855_v40, %v5227_v51 }
 0x40b   : > { %v2152_v0 = vmul.f32 1.442695, %v2055_v7  ;;  %v2156_v56 = vmul.f32 1.442695, %v2057_v42  ;;  %v2150_v41 = vmul.f32 1.442695, %v2054_v43 }
 0x40c   : > { %v5237_v19 = vpop.permute.xlu1 %2021  ;;  %v2154_v18 = vmul.f32 1.442695, %v2056_v37 }
 0x40d   : > { %v2067_v11 = vsub.f32 %v4740_v39, %v5237_v19  ;;  %3905 = vpow2.f32 %v2152_v0  ;;  %v2069_v31 = vsub.f32 %v4871_v13, %v5237_v19  ;;  %v2066_v38 = vsub.f32 %v4737_v35, %v5237_v19 }
 0x40e   : > { %3907 = vpow2.f32 %v2156_v56  ;;  %v2068_v28 = vsub.f32 %v4863_v52, %v5237_v19  ;;  %v2058_v39 = vsub.f32 %v4784_v62, %v5227_v51  ;;  %v2060_v62 = vsub.f32 %v5047_v14, %v5227_v51 }
 0x40f   : > { %v2176_v40 = vmul.f32 1.442695, %v2067_v11  ;;  %v2180_v7 = vmul.f32 1.442695, %v2069_v31  ;;  %3909 = vpow2.f32 %v2150_v41  ;;  %v2174_v42 = vmul.f32 1.442695, %v2066_v38 }
 0x410   : > { %v5247_v43 = vpop.permute.xlu1 %2026  ;;  %3911 = vpow2.f32 %v2154_v18  ;;  %v2178_v37 = vmul.f32 1.442695, %v2068_v28  ;;  %v6317_v41 = vld [vmem:[#allocation23_spill] sm:$0xff]  ;;  %v2059_v18 = vsub.f32 %v4789_v21, %v5227_v51  ;;  %v2062_v38 = vsub.f32 %v4956_v54, %v5227_v51 }
 0x411   : > { %3913 = vpow2.f32 %v2176_v40  ;;  %v2079_v13 = vsub.f32 %v4749_v50, %v5247_v43  ;;  %v2081_v35 = vsub.f32 %v4891_v61, %v5247_v43  ;;  %v2078_v52 = vsub.f32 %v4747_v48, %v5247_v43  ;;  %v6318_v40 = vld [vmem:[#allocation24_spill] sm:$0xff] }
 0x412   : > { %3915 = vpow2.f32 %v2180_v7  ;;  %v2080_v11 = vsub.f32 %v6317_v41, %v5247_v43  ;;  %v2061_v48 = vsub.f32 %v5053_v47, %v5227_v51  ;;  %v2063_v47 = vsub.f32 %v4966_v27, %v5227_v51 }
 0x413   : > { %3917 = vpow2.f32 %v2174_v42  ;;  %v2200_v0 = vmul.f32 1.442695, %v2079_v13  ;;  %v2204_v56 = vmul.f32 1.442695, %v2081_v35  ;;  %v2198_v50 = vmul.f32 1.442695, %v2078_v52 }
 0x414   : > { %v5263_v31 = vpop.permute.xlu1 %2031  ;;  %3919 = vpow2.f32 %v2178_v37  ;;  %v2202_v61 = vmul.f32 1.442695, %v2080_v11  ;;  %v2064_v54 = vsub.f32 %v5135_v44, %v5227_v51  ;;  %v2065_v52 = vsub.f32 %v5138_v26, %v5227_v51 }
 0x415   : > { %v2091_v21 = vsub.f32 %v4757_v16, %v5263_v31  ;;  %3921 = vpow2.f32 %v2200_v0  ;;  %v2093_v14 = vsub.f32 %v4901_v22, %v5263_v31  ;;  %v2090_v28 = vsub.f32 %v4754_v3, %v5263_v31 }
 0x416   : > { %3923 = vpow2.f32 %v2204_v56  ;;  %v2092_v7 = vsub.f32 %v6318_v40, %v5263_v31  ;;  %v2158_v11 = vmul.f32 1.442695, %v2058_v39  ;;  %v2160_v27 = vmul.f32 1.442695, %v2059_v18  ;;  %v6320_v18 = vld [vmem:[#allocation26_spill] sm:$0xff] }
 0x417   : > { %v3906_v42 = vpop.eup %3905  ;;  %v2224_v37 = vmul.f32 1.442695, %v2091_v21  ;;  %v2228_v16 = vmul.f32 1.442695, %v2093_v14  ;;  %3925 = vpow2.f32 %v2198_v50  ;;  %v2222_v13 = vmul.f32 1.442695, %v2090_v28 }
 0x418   : > { %v3908_v35 = vpop.eup %3907  ;;  %v5281_v22 = vpop.permute.xlu1 %2036  ;;  %3927 = vpow2.f32 %v2202_v61  ;;  %v2226_v3 = vmul.f32 1.442695, %v2092_v7  ;;  %v2162_v0 = vmul.f32 1.442695, %v2060_v62  ;;  %v2164_v44 = vmul.f32 1.442695, %v2061_v48 }
 0x419   : > { %v3910_v41 = vpop.eup %3909  ;;  %3929 = vpow2.f32 %v2224_v37  ;;  %v2166_v21 = vmul.f32 1.442695, %v2062_v38  ;;  %v2168_v28 = vmul.f32 1.442695, %v2063_v47  ;;  %v2170_v40 = vmul.f32 1.442695, %v2064_v54 }
 0x41a   : > { %v3912_v56 = vpop.eup %3911  ;;  %3931 = vpow2.f32 %v2228_v16  ;;  %v2358_v14 = vadd.f32 %v3910_v41, %v3906_v42  ;;  %v6319_v61 = vld [vmem:[#allocation6_spill] sm:$0xff]  ;;  %v2105_v62 = vsub.f32 %v6320_v18, %v5281_v22  ;;  %v6321_v47 = vld [vmem:[#allocation5_spill] sm:$0xff] }
 0x41b   : > { %v5285_v50 = vpop.eup %3913  ;;  %3933 = vpow2.f32 %v2222_v13  ;;  %v2103_v7 = vsub.f32 %v6319_v61, %v5281_v22  ;;  %v2102_v54 = vsub.f32 %v6321_v47, %v5281_v22  ;;  %v6322_v37 = vld [vmem:[#allocation25_spill] sm:$0xff]  ;;  %v6324_v47 = vld [vmem:[#allocation28_spill] sm:$0xff] }
 0x41c   : > { %v5289_v10 = vpop.eup %3915  ;;  %v5291_v26 = vpop.permute.xlu1 %2041  ;;  %v2552_v51 = vpack.c.bf16 %v5285_v50, %v3906_v42  ;;  %3935 = vpow2.f32 %v2226_v3  ;;  %v2359_v39 = vadd.f32 %v3912_v56, %v2358_v14  ;;  %v2104_v16 = vsub.f32 %v6322_v37, %v5281_v22  ;;  %v6323_v14 = vld [vmem:[#allocation8_spill] sm:$0xff] }
 0x41d   : > { %v5296_v48 = vpop.eup %3917  ;;  %v2554_v38 = vpack.c.bf16 %v5289_v10, %v3908_v35  ;;  %3937 = vpow2.f32 %v2158_v11  ;;  %v2115_v61 = vsub.f32 %v6323_v14, %v5291_v26  ;;  %v2117_v37 = vsub.f32 %v6324_v47, %v5291_v26  ;;  %v6327_v47 = vld [vmem:[#allocation27_spill] sm:$0xff] }
 0x41e   : > { %v5303_v13 = vpop.eup %3919  ;;  %2631 = vmatprep.mubr.bf16.mxu1 %v2552_v51  ;;  %v2551_v42 = vpack.c.bf16 %v5296_v48, %v3910_v41  ;;  %3939 = vpow2.f32 %v2160_v27  ;;  %v2360_v3 = vadd.f32 %v3908_v35, %v2359_v39  ;;  %v2114_v51 = vsub.f32 %v6325_v60, %v5291_v26  ;;  %v6326_v41 = vld [vmem:[#allocation13_spill] sm:$0xff] }
 0x41f   : > { %v5308_v18 = vpop.eup %3921  ;;  %2704 = vmatprep.mubr.bf16.mxu0 %v2554_v38  ;;  %v2553_v11 = vpack.c.bf16 %v5303_v13, %v3912_v56  ;;  %3941 = vpow2.f32 %v2162_v0  ;;  %v2172_v35 = vmul.f32 1.442695, %v2065_v52  ;;  %v2070_v27 = vsub.f32 %v6326_v41, %v5237_v19 }
 0x420   : > { %v5315_v1 = vpop.eup %3923  ;;  %2632 = vmatmul.mubr.bf16.vlgmr.msra.gmra.mrb[64].mxu1 %v2551_v42  ;;  %3943 = vpow2.f32 %v2164_v44  ;;  %v2071_v56 = vsub.f32 %v4795_v30, %v5237_v19  ;;  %v2248_v39 = vmul.f32 1.442695, %v2103_v7  ;;  %v2252_v38 = vmul.f32 1.442695, %v2105_v62  ;;  %v4128_v44 = vld [vmem:[%s4340_s17 + $0x200] ss:$8 sps:$4 sm:$0xff]  }
 0x421   : > { %v5321_v0 = vpop.eup %3925  ;;  %2705 = vmatmul.mubr.bf16.vlgmr.msra.gmra.mrb[32].mxu0 %v2553_v11  ;;  %3945 = vpow2.f32 %v2166_v21  ;;  %v2072_v60 = vsub.f32 %v5055_v49, %v5237_v19  ;;  %v2272_v52 = vmul.f32 1.442695, %v2115_v61  ;;  %v2246_v42 = vmul.f32 1.442695, %v2102_v54 }
 0x422   : > { %v5325_v14 = vpop.eup %3927  ;;  %2746 = vmatpush1.bf16.msra.mxu0 %v4128_v44  ;;  %3947 = vpow2.f32 %v2168_v28  ;;  %v2116_v41 = vsub.f32 %v6327_v47, %v5291_v26  ;;  %v2276_v21 = vmul.f32 1.442695, %v2117_v37  ;;  %v2270_v7 = vmul.f32 1.442695, %v2114_v51  ;;  %v4130_v51 = vld [vmem:[%s4340_s17 + $0x210] ss:$8 sps:$4 sm:$0xff]  }
 0x423   : > { %v5330_v30 = vpop.eup %3929  ;;  %2747 = vmatprep.subr.bf16.mxu0 %v4129_v36  ;;  %3949 = vpow2.f32 %v2170_v40  ;;  %v2250_v62 = vmul.f32 1.442695, %v2104_v16  ;;  %v2073_v28 = vsub.f32 %v5062_v57, %v5237_v19  ;;  %v2074_v54 = vsub.f32 %v4968_v29, %v5237_v19 }
 0x424   : > { %v5333_v49 = vpop.eup %3931  ;;  %v2564_v11 = vpack.c.bf16 %v5330_v30, %v5308_v18  ;;  %3951 = vpow2.f32 %v2172_v35  ;;  %v2075_v40 = vsub.f32 %v4974_v6, %v5237_v19  ;;  %v2076_v16 = vsub.f32 %v5140_v17, %v5237_v19  ;;  %v4131_v6 = vld [vmem:[%s4340_s17 + $0x224] ss:$8 sps:$4 sm:$0xff]  }
 0x425   : > { %v5341_v61 = vpop.eup %3933  ;;  %v2566_v36 = vpack.c.bf16 %v5333_v49, %v5315_v1  ;;  %3953 = vpow2.f32 %v2248_v39  ;;  %v2274_v57 = vmul.f32 1.442695, %v2116_v41  ;;  %v2077_v35 = vsub.f32 %v5143_v12, %v5237_v19 }
 0x426   : > { %v5349_v37 = vpop.eup %3935  ;;  %2748 = vmatpush1.bf16.msra.mxu0 %v4130_v51  ;;  %2641 = vmatprep.mubr.bf16.mxu1 %v2564_v11  ;;  %v2563_v29 = vpack.c.bf16 %v5341_v61, %v5321_v0  ;;  %3955 = vpow2.f32 %v2272_v52  ;;  %v2182_v44 = vmul.f32 1.442695, %v2070_v27  ;;  %v2371_v47 = vadd.f32 %v5296_v48, %v5285_v50  ;;  %v5371_v50 = vpop.permute.xlu1 %2046  ;;  %v4132_v48 = vld [vmem:[%s4340_s17 + $0x220] ss:$8 sps:$4 sm:$0xff]  }
 0x427   : > { %v5356_v39 = vpop.eup %3937  ;;  %2714 = vmatprep.mubr.bf16.mxu0 %v2566_v36  ;;  %2749 = vmatprep.subr.bf16.mxu0 %v4131_v6  ;;  %v2565_v17 = vpack.c.bf16 %v5349_v37, %v5325_v14  ;;  %3957 = vpow2.f32 %v2252_v38  ;;  %v2184_v12 = vmul.f32 1.442695, %v2071_v56  ;;  %v2186_v19 = vmul.f32 1.442695, %v2072_v60  ;;  %v6328_v60 = vld [vmem:[#allocation14_spill] sm:$0xff] }
 0x428   : > { %v5363_v11 = vpop.eup %3939  ;;  %2642 = vmatmul.mubr.bf16.gmra.mrb[68].mxu1 %v2563_v29  ;;  %v2361_v52 = vadd.f32 %v5356_v39, %v2360_v3  ;;  %3959 = vpow2.f32 %v2276_v21  ;;  %v2188_v36 = vmul.f32 1.442695, %v2073_v28  ;;  %v2190_v38 = vmul.f32 1.442695, %v2074_v54 }
 0x429   : > { %v5366_v41 = vpop.eup %3941  ;;  %2715 = vmatmul.mubr.bf16.gmra.mrb[36].mxu0 %v2565_v17  ;;  %3961 = vpow2.f32 %v2246_v42  ;;  %v2372_v27 = vadd.f32 %v5303_v13, %v2371_v47  ;;  %v2192_v56 = vmul.f32 1.442695, %v2075_v40  ;;  %v2082_v21 = vsub.f32 %v6328_v60, %v5247_v43  ;;  %v4133_v42 = vld [vmem:[%s4340_s17 + $0x234] ss:$8 sps:$4 sm:$0xff]  }
 0x42a   : > { %v5369_v51 = vpop.eup %3943  ;;  %2750 = vmatpush1.bf16.msra.mxu0 %v4132_v48  ;;  %v2362_v3 = vadd.f32 %v5363_v11, %v2361_v52  ;;  %3963 = vpow2.f32 %v2270_v7  ;;  %v2083_v28 = vsub.f32 %v4801_v2, %v5247_v43  ;;  %v2084_v54 = vsub.f32 %v5068_v45, %v5247_v43 }
 0x42b   : > { %v5377_v29 = vpop.eup %3945  ;;  %2751 = vmatprep.subr.bf16.mxu0 %v4133_v42  ;;  %3965 = vpow2.f32 %v2250_v62  ;;  %v5381_v13 = vadd.f32 %v5289_v10, %v2372_v27  ;;  %v2085_v6 = vsub.f32 %v5075_v58, %v5247_v43  ;;  %v2086_v62 = vsub.f32 %v4984_v23, %v5247_v43 }
 0x42c   : > { %v5387_v7 = vpop.eup %3947  ;;  %v2363_v40 = vadd.f32 %v5366_v41, %v2362_v3  ;;  %3967 = vpow2.f32 %v2274_v57  ;;  %v2194_v17 = vmul.f32 1.442695, %v2076_v16  ;;  %v2087_v2 = vsub.f32 %v4986_v25, %v5247_v43  ;;  %v4134_v57 = vld [vmem:[%s4340_s17 + $0x230] ss:$8 sps:$4 sm:$0xff]   ;;  %v4135_v16 = vld [vmem:[%s4340_s17 + $0x244] ss:$8 sps:$4 sm:$0xff]   ;;  %v5411_v3 = vpop.permute.xlu1 %2051 }
 0x42d   : > { %v5394_v10 = vpop.eup %3949  ;;  %3969 = vpow2.f32 %v2182_v44  ;;  %v2088_v45 = vsub.f32 %v5147_v9, %v5247_v43  ;;  %v2196_v58 = vmul.f32 1.442695, %v2077_v35  ;;  %v2089_v23 = vsub.f32 %v5150_v5, %v5247_v43 }
 0x42e   : > { %6329 = vst [vmem:[#allocation23_spill] sm:$0xff] %v5394_v10  ;;  %v5400_v47 = vpop.eup %3951  ;;  %2752 = vmatpush1.bf16.msra.mxu0 %v4134_v57  ;;  %v2364_v52 = vadd.f32 %v5369_v51, %v2363_v40  ;;  %3971 = vpow2.f32 %v2184_v12  ;;  %v2206_v25 = vmul.f32 1.442695, %v2082_v21  ;;  %v2208_v44 = vmul.f32 1.442695, %v2083_v28 }
 0x42f   : > { %6330 = vst [vmem:[#allocation24_spill] sm:$0xff] %v5400_v47  ;;  %v5406_v27 = vpop.eup %3953  ;;  %2753 = vmatprep.subr.bf16.mxu0 %v4135_v16  ;;  %3973 = vpow2.f32 %v2186_v19  ;;  %v2210_v9 = vmul.f32 1.442695, %v2084_v54  ;;  %v2212_v35 = vmul.f32 1.442695, %v2085_v6 }
 0x430   : > { %v5409_v48 = vpop.eup %3955  ;;  %v2365_v60 = vadd.f32 %v5377_v29, %v2364_v52  ;;  %3975 = vpow2.f32 %v2188_v36  ;;  %v2214_v12 = vmul.f32 1.442695, %v2086_v62  ;;  %v2216_v19 = vmul.f32 1.442695, %v2087_v2  ;;  %v4136_v54 = vld [vmem:[%s4340_s17 + $0x240] ss:$8 sps:$4 sm:$0xff]  }
 0x431   : > { %v5414_v5 = vpop.eup %3957  ;;  %v2576_v43 = vpack.c.bf16 %v5409_v48, %v5406_v27  ;;  %3977 = vpow2.f32 %v2190_v38  ;;  %v2218_v21 = vmul.f32 1.442695, %v2088_v45  ;;  %v5422_v40 = vmul.f32 1.442695, %v2089_v23  ;;  %v4137_v62 = vld [vmem:[%s4340_s17 + $0x254] ss:$8 sps:$4 sm:$0xff]  }
 0x432   : > { %v5418_v42 = vpop.eup %3959  ;;  %v2366_v28 = vadd.f32 %v5387_v7, %v2365_v60  ;;  %2754 = vmatpush1.bf16.msra.mxu0 %v4136_v54  ;;  %3979 = vpow2.f32 %v2192_v56  ;;  %v2384_v36 = vadd.f32 %v5321_v0, %v5308_v18  ;;  %v6331_v2 = vld [vmem:[#allocation10_spill] sm:$0xff]  ;;  %v6332_v56 = vld [vmem:[#allocation12_spill] sm:$0xff] }
 0x433   : > { %v5426_v6 = vpop.eup %3961  ;;  %2651 = vmatprep.mubr.bf16.mxu1 %v2576_v43  ;;  %v2578_v38 = vpack.c.bf16 %v5418_v42, %v5414_v5  ;;  %2755 = vmatprep.subr.bf16.mxu0 %v4137_v62  ;;  %3981 = vpow2.f32 %v2194_v17  ;;  %v2127_v45 = vsub.f32 %v6331_v2, %v5371_v50  ;;  %v2139_v57 = vsub.f32 %v6332_v56, %v5411_v3  ;;  %v6333_v23 = vld [vmem:[#allocation30_spill] sm:$0xff] }
 0x434   : > { %v5435_v52 = vpop.eup %3963  ;;  %v2367_v18 = vadd.f32 %v5394_v10, %v2366_v28  ;;  %3983 = vpow2.f32 %v2196_v58  ;;  %v2385_v0 = vadd.f32 %v5325_v14, %v2384_v36  ;;  %v2129_v16 = vsub.f32 %v6333_v23, %v5371_v50  ;;  %v4138_v58 = vld [vmem:[%s4340_s17 + $0x250] ss:$8 sps:$4 sm:$0xff]  }
 0x435   : > { %v5441_v60 = vpop.eup %3965  ;;  %2724 = vmatprep.mubr.bf16.mxu0 %v2578_v38  ;;  %v2575_v17 = vpack.c.bf16 %v5435_v52, %v5426_v6  ;;  %3985 = vpow2.f32 %v2206_v25  ;;  %v2296_v43 = vmul.f32 1.442695, %v2127_v45  ;;  %v2320_v54 = vmul.f32 1.442695, %v2139_v57  ;;  %v6334_v36 = vld [vmem:[#allocation32_spill] sm:$0xff]  ;;  %v6335_v57 = vld [vmem:[#allocation9_spill] sm:$0xff] }
 0x436   : > { %v5445_v62 = vpop.eup %3967  ;;  %v2368_v28 = vadd.f32 %v5400_v47, %v2367_v18  ;;  %2756 = vmatpush1.bf16.msra.mxu0 %v4138_v58  ;;  %3987 = vpow2.f32 %v2208_v44  ;;  %v2386_v14 = vadd.f32 %v5315_v1, %v2385_v0  ;;  %v2141_v2 = vsub.f32 %v6334_v36, %v5411_v3  ;;  %v4139_v38 = vld [vmem:[%s4340_s17 + $0x264] ss:$8 sps:$4 sm:$0xff]   ;;  %v6336_v0 = vld [vmem:[#allocation11_spill] sm:$0xff] }
 0x437   : > { %v5452_v56 = vpop.eup %3969  ;;  %2652 = vmatmul.mubr.bf16.gmra.mrb[72].mxu1 %v2575_v17  ;;  %v2577_v25 = vpack.c.bf16 %v5445_v62, %v5441_v60  ;;  %2757 = vmatprep.subr.bf16.mxu0 %v4139_v38  ;;  %3989 = vpow2.f32 %v2210_v9  ;;  %v2300_v45 = vmul.f32 1.442695, %v2129_v16  ;;  %v2126_v18 = vsub.f32 %v6335_v57, %v5371_v50  ;;  %v6337_v16 = vld [vmem:[#allocation29_spill] sm:$0xff]  ;;  %v6338_v38 = vld [vmem:[#allocation31_spill] sm:$0xff] }
 0x438   : > { %v5459_v23 = vpop.eup %3971  ;;  %2369 = vadd.xlane.f32.xlu1 %v2368_v28  ;;  %v2374_v1 = vadd.f32 %v5452_v56, %v5381_v13  ;;  %3991 = vpow2.f32 %v2212_v35  ;;  %v2324_v44 = vmul.f32 1.442695, %v2141_v2  ;;  %v2138_v17 = vsub.f32 %v6336_v0, %v5411_v3  ;;  %v4140_v2 = vld [vmem:[%s4340_s17 + $0x260] ss:$8 sps:$4 sm:$0xff]   ;;  %v4157_v47 = vld [vmem:[%s4340_s17 + $0x2f4] ss:$8 sps:$4 sm:$0xff]  }
 0x439   : > { %v5465_v58 = vpop.eup %3973  ;;  %2725 = vmatmul.mubr.bf16.gmra.mrb[40].mxu0 %v2577_v25  ;;  %3993 = vpow2.f32 %v2214_v12  ;;  %v2294_v9 = vmul.f32 1.442695, %v2126_v18  ;;  %v2128_v36 = vsub.f32 %v6337_v16, %v5371_v50  ;;  %v2140_v28 = vsub.f32 %v6338_v38, %v5411_v3  ;;  %v4141_v16 = vld [vmem:[%s4340_s17 + $0x274] ss:$8 sps:$4 sm:$0xff]  }
 0x43a   : > { %v5471_v57 = vpop.eup %3975  ;;  %v2375_v13 = vadd.f32 %v5459_v23, %v2374_v1  ;;  %3995 = vpow2.f32 %v2216_v19  ;;  %v2318_v35 = vmul.f32 1.442695, %v2138_v17  ;;  %2758 = vmatpush1.bf16.msra.mxu0 %v4140_v2  ;;  %v6339_v38 = vld [vmem:[#allocation15_spill] sm:$0xff]  ;;  %v2095_v1 = vsub.f32 %v4805_v8, %v5263_v31  ;;  %v6340_v17 = vld [vmem:[#allocation40_spill] sm:$0xff]  ;;  %v6342_v2 = vld [vmem:[#allocation33_spill] sm:$0xff] }
 0x43b   : > { %v5477_v0 = vpop.eup %3977  ;;  %3997 = vpow2.f32 %v2218_v21  ;;  %v2298_v12 = vmul.f32 1.442695, %v2128_v36  ;;  %v2322_v18 = vmul.f32 1.442695, %v2140_v28  ;;  %2759 = vmatprep.subr.bf16.mxu0 %v4141_v16  ;;  %v2094_v33 = vsub.f32 %v6339_v38, %v5263_v31 }
 0x43c   : > { %v5482_v4 = vpop.eup %3979  ;;  %v2376_v19 = vadd.f32 %v5465_v58, %v2375_v13  ;;  %3999 = vpow2.f32 %v5422_v40  ;;  %v2096_v21 = vsub.f32 %v6340_v17, %v5263_v31  ;;  %v2097_v28 = vsub.f32 %v5084_v53, %v5263_v31  ;;  %v4142_v17 = vld [vmem:[%s4340_s17 + $0x270] ss:$8 sps:$4 sm:$0xff]  }
 0x43d   : > { %v5490_v36 = vpop.eup %3981  ;;  %4001 = vpow2.f32 %v2296_v43  ;;  %v2098_v16 = vsub.f32 %v6342_v2, %v5263_v31  ;;  %v2099_v13 = vsub.f32 %v4990_v15, %v5263_v31  ;;  %v2100_v38 = vsub.f32 %v5152_v32, %v5263_v31  ;;  %v4143_v15 = vld [vmem:[%s4340_s17 + $0x284] ss:$8 sps:$4 sm:$0xff]  }
 0x43e   : > { %6341 = vst [vmem:[#allocation6_spill] sm:$0xff] %v5490_v36  ;;  %v5498_v40 = vpop.eup %3983  ;;  %v2377_v8 = vadd.f32 %v5471_v57, %v2376_v19  ;;  %4003 = vpow2.f32 %v2320_v54  ;;  %v2101_v43 = vsub.f32 %v5155_v63, %v5263_v31  ;;  %2760 = vmatpush1.bf16.msra.mxu0 %v4142_v17  ;;  %v2230_v2 = vmul.f32 1.442695, %v2094_v33 }
 0x43f   : > { %6343 = vst [vmem:[#allocation26_spill] sm:$0xff] %v5498_v40  ;;  %v5506_v53 = vpop.eup %3985  ;;  %4005 = vpow2.f32 %v2300_v45  ;;  %v2232_v25 = vmul.f32 1.442695, %v2095_v1  ;;  %v2234_v24 = vmul.f32 1.442695, %v2096_v21  ;;  %2761 = vmatprep.subr.bf16.mxu0 %v4143_v15 }
 0x440   : > { %v5509_v59 = vpop.eup %3987  ;;  %v2378_v54 = vadd.f32 %v5477_v0, %v2377_v8  ;;  %v2387_v32 = vadd.f32 %v5506_v53, %v2386_v14  ;;  %4007 = vpow2.f32 %v2324_v44  ;;  %v2236_v19 = vmul.f32 1.442695, %v2097_v28  ;;  %v4144_v8 = vld [vmem:[%s4340_s17 + $0x280] ss:$8 sps:$4 sm:$0xff]  }
 0x441   : > { %v5513_v63 = vpop.eup %3989  ;;  %4009 = vpow2.f32 %v2294_v9  ;;  %v2238_v31 = vmul.f32 1.442695, %v2098_v16  ;;  %v2240_v45 = vmul.f32 1.442695, %v2099_v13  ;;  %v2242_v33 = vmul.f32 1.442695, %v2100_v38 }
 0x442   : > { %v5515_v1 = vpop.eup %3991  ;;  %v2379_v21 = vadd.f32 %v5482_v4, %v2378_v54  ;;  %v2388_v17 = vadd.f32 %v5509_v59, %v2387_v32  ;;  %4011 = vpow2.f32 %v2318_v35  ;;  %v2244_v15 = vmul.f32 1.442695, %v2101_v43  ;;  %2762 = vmatpush1.bf16.msra.mxu0 %v4144_v8  ;;  %v6344_v9 = vld [vmem:[#allocation16_spill] sm:$0xff] }
 0x443   : > { %v5520_v14 = vpop.eup %3993  ;;  %4013 = vpow2.f32 %v2298_v12  ;;  %v2397_v44 = vadd.f32 %v5341_v61, %v5330_v30  ;;  %v2106_v28 = vsub.f32 %v6344_v9, %v5281_v22  ;;  %v2107_v16 = vsub.f32 %v4811_v20, %v5281_v22  ;;  %v4145_v13 = vld [vmem:[%s4340_s17 + $0x294] ss:$8 sps:$4 sm:$0xff]   ;;  %v6345_v12 = vld [vmem:[#allocation41_spill] sm:$0xff]  ;;  %v6347_v20 = vld [vmem:[#allocation42_spill] sm:$0xff] }
 0x444   : > { %2763 = vmatprep.subr.bf16.mxu0 %v4145_v13  ;;  %v5529_v38 = vpop.eup %3995  ;;  %v2380_v35 = vadd.f32 %v5490_v36, %v2379_v21  ;;  %v2389_v43 = vadd.f32 %v5513_v63, %v2388_v17  ;;  %4015 = vpow2.f32 %v2322_v18  ;;  %v2108_v54 = vsub.f32 %v6345_v12, %v5281_v22 }
 0x445   : > { %v5535_v30 = vpop.eup %3997  ;;  %4017 = vpow2.f32 %v2230_v2  ;;  %v2398_v61 = vadd.f32 %v5349_v37, %v2397_v44  ;;  %v2109_v32 = vsub.f32 %v6347_v20, %v5281_v22  ;;  %v2110_v8 = vsub.f32 %v4993_v46, %v5281_v22  ;;  %v4146_v2 = vld [vmem:[%s4340_s17 + $0x290] ss:$8 sps:$4 sm:$0xff]   ;;  %v6349_v44 = vld [vmem:[#allocation49_spill] sm:$0xff] }
 0x446   : > { %6346 = vst [vmem:[#allocation5_spill] sm:$0xff] %v5535_v30  ;;  %v5542_v9 = vpop.eup %3999  ;;  %v2381_v21 = vadd.f32 %v5498_v40, %v2380_v35  ;;  %v2390_v18 = vadd.f32 %v5515_v1, %v2389_v43  ;;  %4019 = vpow2.f32 %v2232_v25  ;;  %v2111_v17 = vsub.f32 %v4995_v34, %v5281_v22  ;;  %2764 = vmatpush1.bf16.msra.mxu0 %v4146_v2  ;;  %v4147_v35 = vld [vmem:[%s4340_s17 + $0x2a4] ss:$8 sps:$4 sm:$0xff]  }
 0x447   : > { %6348 = vst [vmem:[#allocation25_spill] sm:$0xff] %v5542_v9  ;;  %v5549_v13 = vpop.eup %4001  ;;  %4021 = vpow2.f32 %v2234_v24  ;;  %v2399_v37 = vadd.f32 %v5333_v49, %v2398_v61  ;;  %v2112_v46 = vsub.f32 %v5159_v55, %v5281_v22  ;;  %v2113_v12 = vsub.f32 %v6349_v44, %v5281_v22  ;;  %2765 = vmatprep.subr.bf16.mxu0 %v4147_v35 }
 0x448   : > { %v5557_v43 = vpop.eup %4003  ;;  %2382 = vadd.xlane.f32.xlu0 %v2381_v21  ;;  %v2391_v34 = vadd.f32 %v5520_v14, %v2390_v18  ;;  %4023 = vpow2.f32 %v2236_v19  ;;  %v2254_v25 = vmul.f32 1.442695, %v2106_v28  ;;  %v2256_v20 = vmul.f32 1.442695, %v2107_v16  ;;  %v4148_v18 = vld [vmem:[%s4340_s17 + $0x2a0] ss:$8 sps:$4 sm:$0xff]  }
 0x449   : > { %v5560_v24 = vpop.eup %4005  ;;  %v2588_v49 = vpack.c.bf16 %v5557_v43, %v5549_v13  ;;  %4025 = vpow2.f32 %v2238_v31  ;;  %v2258_v55 = vmul.f32 1.442695, %v2108_v54  ;;  %v2260_v22 = vmul.f32 1.442695, %v2109_v32  ;;  %v4149_v54 = vld [vmem:[%s4340_s17 + $0x2b4] ss:$8 sps:$4 sm:$0xff]  }
 0x44a   : > { %v5564_v61 = vpop.eup %4007  ;;  %v2392_v2 = vadd.f32 %v5529_v38, %v2391_v34  ;;  %4027 = vpow2.f32 %v2240_v45  ;;  %v2262_v21 = vmul.f32 1.442695, %v2110_v8  ;;  %v2264_v44 = vmul.f32 1.442695, %v2111_v17  ;;  %2766 = vmatpush1.bf16.msra.mxu0 %v4148_v18  ;;  %v6350_v17 = vld [vmem:[#allocation17_spill] sm:$0xff]  ;;  %v6353_v18 = vld [vmem:[#allocation44_spill] sm:$0xff] }
 0x44b   : > { %v5568_v19 = vpop.eup %4009  ;;  %2661 = vmatprep.mubr.bf16.mxu1 %v2588_v49  ;;  %v2590_v28 = vpack.c.bf16 %v5564_v61, %v5560_v24  ;;  %4029 = vpow2.f32 %v2242_v33  ;;  %v2266_v31 = vmul.f32 1.442695, %v2112_v46  ;;  %v2268_v16 = vmul.f32 1.442695, %v2113_v12  ;;  %2767 = vmatprep.subr.bf16.mxu0 %v4149_v54  ;;  %v6351_v46 = vld [vmem:[#allocation18_spill] sm:$0xff]  ;;  %v6352_v49 = vld [vmem:[#allocation43_spill] sm:$0xff] }
 0x44c   : > { %v5573_v32 = vpop.eup %4011  ;;  %v2393_v45 = vadd.f32 %v5535_v30, %v2392_v2  ;;  %4031 = vpow2.f32 %v2244_v15  ;;  %v2410_v8 = vadd.f32 %v5426_v6, %v5406_v27  ;;  %v2118_v35 = vsub.f32 %v6350_v17, %v5291_v26  ;;  %v4150_v54 = vld [vmem:[%s4340_s17 + $0x2b0] ss:$8 sps:$4 sm:$0xff]   ;;  %v4151_v30 = vld [vmem:[%s4340_s17 + $0x2c4] ss:$8 sps:$4 sm:$0xff]  }
 0x44d   : > { %v5580_v34 = vpop.eup %4013  ;;  %2734 = vmatprep.mubr.bf16.mxu0 %v2590_v28  ;;  %v2587_v33 = vpack.c.bf16 %v5573_v32, %v5568_v19  ;;  %4033 = vpow2.f32 %v2254_v25  ;;  %v2119_v12 = vsub.f32 %v6351_v46, %v5291_v26  ;;  %v2120_v15 = vsub.f32 %v6352_v49, %v5291_v26  ;;  %v6354_v46 = vld [vmem:[#allocation34_spill] sm:$0xff] }
 0x44e   : > { %v5588_v2 = vpop.eup %4015  ;;  %v2394_v27 = vadd.f32 %v5542_v9, %v2393_v45  ;;  %4035 = vpow2.f32 %v2256_v20  ;;  %v2411_v6 = vadd.f32 %v5441_v60, %v2410_v8  ;;  %v2121_v28 = vsub.f32 %v6353_v18, %v5291_v26  ;;  %2768 = vmatpush1.bf16.msra.mxu0 %v4150_v54  ;;  %v6355_v45 = vld [vmem:[#allocation35_spill] sm:$0xff]  ;;  %v6356_v18 = vld [vmem:[#allocation50_spill] sm:$0xff] }
 0x44f   : > { %v5595_v25 = vpop.eup %4017  ;;  %2662 = vmatmul.mubr.bf16.gmra.mrb[76].mxu1 %v2587_v33  ;;  %v2589_v17 = vpack.c.bf16 %v5588_v2, %v5580_v34  ;;  %4037 = vpow2.f32 %v2258_v55  ;;  %v2122_v49 = vsub.f32 %v6354_v46, %v5291_v26  ;;  %v2123_v20 = vsub.f32 %v6355_v45, %v5291_v26  ;;  %2769 = vmatprep.subr.bf16.mxu0 %v4151_v30  ;;  %v6357_v46 = vld [vmem:[#allocation51_spill] sm:$0xff] }
 0x450   : > { %v5604_v60 = vpop.eup %4019  ;;  %2395 = vadd.xlane.f32.xlu0 %v2394_v27  ;;  %v2400_v8 = vadd.f32 %v5595_v25, %v2399_v37  ;;  %4039 = vpow2.f32 %v2260_v22  ;;  %v2412_v33 = vadd.f32 %v5414_v5, %v2411_v6  ;;  %v2124_v55 = vsub.f32 %v6356_v18, %v5291_v26  ;;  %v4152_v18 = vld [vmem:[%s4340_s17 + $0x2c0] ss:$8 sps:$4 sm:$0xff]  }
 0x451   : > { %v5610_v54 = vpop.eup %4021  ;;  %2735 = vmatmul.mubr.bf16.gmra.mrb[44].mxu0 %v2589_v17  ;;  %4041 = vpow2.f32 %v2262_v21  ;;  %v2125_v45 = vsub.f32 %v6357_v46, %v5291_v26  ;;  %v2278_v30 = vmul.f32 1.442695, %v2118_v35  ;;  %v2280_v9 = vmul.f32 1.442695, %v2119_v12  ;;  %v4153_v12 = vld [vmem:[%s4340_s17 + $0x2d4] ss:$8 sps:$4 sm:$0xff]  }
 0x452   : > { %v5614_v27 = vpop.eup %4023  ;;  %v6358_v37 = vpack.c.bf16 %v5459_v23, %v5363_v11  ;;  %v2401_v5 = vadd.f32 %v5604_v60, %v2400_v8  ;;  %4043 = vpow2.f32 %v2264_v44  ;;  %v2282_v22 = vmul.f32 1.442695, %v2120_v15  ;;  %2770 = vmatpush1.bf16.msra.mxu0 %v4152_v18  ;;  %v6362_v8 = vld [vmem:[#allocation45_spill] sm:$0xff]  ;;  %v6365_v18 = vld [vmem:[#allocation36_spill] sm:$0xff] }
 0x453   : > { %v2284_v6 = vmul.f32 1.442695, %v2121_v28  ;;  %v5621_v21 = vpop.eup %4025  ;;  %4045 = vpow2.f32 %v2266_v31  ;;  %v2286_v26 = vmul.f32 1.442695, %v2122_v49  ;;  %v2288_v17 = vmul.f32 1.442695, %v2123_v20  ;;  %2771 = vmatprep.subr.bf16.mxu0 %v4153_v12 }
 0x454   : > { %2777 = vmatprep.mubr.bf16.mxu0 %v6358_v37  ;;  %v2290_v35 = vmul.f32 1.442695, %v2124_v55  ;;  %v5624_v46 = vpop.eup %4027  ;;  %v2402_v11 = vadd.f32 %v5610_v54, %v2401_v5  ;;  %4047 = vpow2.f32 %v2268_v16  ;;  %v2292_v23 = vmul.f32 1.442695, %v2125_v45  ;;  %v6360_v31 = vld [vmem:[#allocation19_spill] sm:$0xff]  ;;  %v6361_v49 = vld [vmem:[#allocation20_spill] sm:$0xff] }
 0x455   : > { %v2423_v44 = vadd.f32 %v5435_v52, %v5409_v48  ;;  %v5629_v15 = vpop.eup %4029  ;;  %4049 = vpow2.f32 %v2278_v30  ;;  %v2130_v28 = vsub.f32 %v6360_v31, %v5371_v50  ;;  %v2131_v20 = vsub.f32 %v6361_v49, %v5371_v50  ;;  %v6364_v52 = vld [vmem:[#allocation46_spill] sm:$0xff]  ;;  %v4154_v30 = vld [vmem:[%s4340_s17 + $0x2d0] ss:$8 sps:$4 sm:$0xff]   ;;  %v6366_v31 = vld [vmem:[#allocation37_spill] sm:$0xff] }
 0x456   : > { %6359 = vst [vmem:[#allocation8_spill] sm:$0xff] %v5629_v15  ;;  %v2132_v55 = vsub.f32 %v6362_v8, %v5371_v50  ;;  %v5637_v37 = vpop.eup %4031  ;;  %v2403_v16 = vadd.f32 %v5614_v27, %v2402_v11  ;;  %4051 = vpow2.f32 %v2280_v9  ;;  %v2133_v45 = vsub.f32 %v6364_v52, %v5371_v50  ;;  %2772 = vmatpush1.bf16.msra.mxu0 %v4154_v30  ;;  %v6367_v8 = vld [vmem:[#allocation52_spill] sm:$0xff]  ;;  %v4155_v9 = vld [vmem:[%s4340_s17 + $0x2e4] ss:$8 sps:$4 sm:$0xff]  }
 0x457   : > { %6363 = vst [vmem:[#allocation28_spill] sm:$0xff] %v5637_v37  ;;  %v2424_v48 = vadd.f32 %v5445_v62, %v2423_v44  ;;  %v5644_v5 = vpop.eup %4033  ;;  %4053 = vpow2.f32 %v2282_v22  ;;  %v2134_v12 = vsub.f32 %v6365_v18, %v5371_v50  ;;  %v2135_v49 = vsub.f32 %v6366_v31, %v5371_v50  ;;  %2773 = vmatprep.subr.bf16.mxu0 %v4155_v9  ;;  %v6368_v18 = vld [vmem:[#allocation53_spill] sm:$0xff] }
 0x458   : > { %v2136_v11 = vsub.f32 %v6367_v8, %v5371_v50  ;;  %v5653_v62 = vpop.eup %4035  ;;  %v2404_v44 = vadd.f32 %v5621_v21, %v2403_v16  ;;  %v2413_v52 = vadd.f32 %v5644_v5, %v2412_v33  ;;  %4055 = vpow2.f32 %v2284_v6  ;;  %v4156_v6 = vld [vmem:[%s4340_s17 + $0x2e0] ss:$8 sps:$4 sm:$0xff]  }
 0x459   : > { %v2425_v22 = vadd.f32 %v5418_v42, %v2424_v48  ;;  %v5658_v30 = vpop.eup %4037  ;;  %4057 = vpow2.f32 %v2286_v26  ;;  %v2137_v31 = vsub.f32 %v6368_v18, %v5371_v50  ;;  %v2302_v8 = vmul.f32 1.442695, %v2130_v28 }
 0x45a   : > { %v2304_v36 = vmul.f32 1.442695, %v2131_v20  ;;  %v5662_v9 = vpop.eup %4039  ;;  %v2405_v10 = vadd.f32 %v5624_v46, %v2404_v44  ;;  %v2414_v16 = vadd.f32 %v5653_v62, %v2413_v52  ;;  %4059 = vpow2.f32 %v2288_v17  ;;  %2774 = vmatpush1.bf16.msra.mxu0 %v4156_v6  ;;  %v4158_v52 = vld [vmem:[%s4340_s17 + $0x2f0] ss:$8 sps:$4 sm:$0xff]   ;;  %v4159_v6 = vld [vmem:[%s4340_s17 + $0x304] ss:$8 sps:$4 sm:$0xff]  }
 0x45b   : > { %v2306_v33 = vmul.f32 1.442695, %v2132_v55  ;;  %v5667_v42 = vpop.eup %4041  ;;  %4061 = vpow2.f32 %v2290_v35  ;;  %v2308_v26 = vmul.f32 1.442695, %v2133_v45  ;;  %v2310_v48 = vmul.f32 1.442695, %v2134_v12  ;;  %2775 = vmatprep.subr.bf16.mxu0 %v4157_v47 }
 0x45c   : > { %v2312_v40 = vmul.f32 1.442695, %v2135_v49  ;;  %v5670_v50 = vpop.eup %4043  ;;  %v2406_v28 = vadd.f32 %v5629_v15, %v2405_v10  ;;  %v2415_v20 = vadd.f32 %v5658_v30, %v2414_v16  ;;  %4063 = vpow2.f32 %v2292_v23  ;;  %v6369_v45 = vld [vmem:[#allocation21_spill] sm:$0xff]  ;;  %v6370_v23 = vld [vmem:[#allocation22_spill] sm:$0xff] }
 0x45d   : > { %v2314_v17 = vmul.f32 1.442695, %v2136_v11  ;;  %v5674_v55 = vpop.eup %4045  ;;  %4065 = vpow2.f32 %v2302_v8  ;;  %v2316_v44 = vmul.f32 1.442695, %v2137_v31  ;;  %v2436_v35 = vadd.f32 %v5568_v19, %v5549_v13  ;;  %v6371_v19 = vld [vmem:[#allocation47_spill] sm:$0xff]  ;;  %v6372_v8 = vld [vmem:[#allocation48_spill] sm:$0xff] }
 0x45e   : > { %v2142_v47 = vsub.f32 %v6369_v45, %v5411_v3  ;;  %v5680_v12 = vpop.eup %4047  ;;  %v2407_v49 = vadd.f32 %v5637_v37, %v2406_v28  ;;  %v2416_v10 = vadd.f32 %v5662_v9, %v2415_v20  ;;  %4067 = vpow2.f32 %v2304_v36  ;;  %2776 = vmatpush1.bf16.msra.mxu0 %v4158_v52 }
 0x45f   : > { %v2143_v11 = vsub.f32 %v6370_v23, %v5411_v3  ;;  %v5687_v18 = vpop.eup %4049  ;;  %4069 = vpow2.f32 %v2306_v33  ;;  %v2437_v13 = vadd.f32 %v5580_v34, %v2436_v35  ;;  %v2144_v31 = vsub.f32 %v6371_v19, %v5411_v3  ;;  %2818 = vmatprep.subr.bf16.mxu0 %v4159_v6  ;;  %v6373_v33 = vld [vmem:[#allocation38_spill] sm:$0xff]  ;;  %v6374_v23 = vld [vmem:[#allocation39_spill] sm:$0xff] }
 0x460   : > { %v2145_v16 = vsub.f32 %v6372_v8, %v5411_v3  ;;  %v5695_v28 = vpop.eup %4051  ;;  %2408 = vadd.xlane.f32.xlu1 %v2407_v49  ;;  %v2417_v36 = vadd.f32 %v5667_v42, %v2416_v10  ;;  %v2426_v20 = vadd.f32 %v5687_v18, %v2425_v22  ;;  %4071 = vpow2.f32 %v2308_v26  ;;  %v6375_v19 = vld [vmem:[#allocation54_spill] sm:$0xff]  ;;  %v6376_v26 = vld [vmem:[#allocation55_spill] sm:$0xff] }
 0x461   : > { %v2146_v45 = vsub.f32 %v6373_v33, %v5411_v3  ;;  %v5701_v34 = vpop.eup %4053  ;;  %4073 = vpow2.f32 %v2310_v48  ;;  %v2438_v35 = vadd.f32 %v5560_v24, %v2437_v13  ;;  %v2147_v52 = vsub.f32 %v6374_v23, %v5411_v3 }
 0x462   : > { %v2148_v8 = vsub.f32 %v6375_v19, %v5411_v3  ;;  %v5708_v49 = vpop.eup %4055  ;;  %v2418_v10 = vadd.f32 %v5670_v50, %v2417_v36  ;;  %v2427_v22 = vadd.f32 %v5695_v28, %v2426_v20  ;;  %4075 = vpow2.f32 %v2312_v40 }
 0x463   : > { %v2149_v6 = vsub.f32 %v6376_v26, %v5411_v3  ;;  %v5714_v33 = vpop.eup %4057  ;;  %4077 = vpow2.f32 %v2314_v17  ;;  %v2326_v24 = vmul.f32 1.442695, %v2142_v47  ;;  %v2328_v48 = vmul.f32 1.442695, %v2143_v11 }
 0x464   : > { %v2330_v13 = vmul.f32 1.442695, %v2144_v31  ;;  %v5716_v23 = vpop.eup %4059  ;;  %v2419_v19 = vadd.f32 %v5674_v55, %v2418_v10  ;;  %v2428_v15 = vadd.f32 %v5701_v34, %v2427_v22  ;;  %4079 = vpow2.f32 %v2316_v44 }
 0x465   : > { %v2332_v36 = vmul.f32 1.442695, %v2145_v16  ;;  %v5720_v37 = vpop.eup %4061  ;;  %4081 = vpow2.f32 %v2326_v24  ;;  %v2334_v40 = vmul.f32 1.442695, %v2146_v45  ;;  %v2336_v20 = vmul.f32 1.442695, %v2147_v52 }
 0x466   : > { %v2338_v3 = vmul.f32 1.442695, %v2148_v8  ;;  %v5722_v26 = vpop.eup %4063  ;;  %v2420_v17 = vadd.f32 %v5680_v12, %v2419_v19  ;;  %v2429_v47 = vadd.f32 %v5708_v49, %v2428_v15  ;;  %4083 = vpow2.f32 %v2328_v48 }
 0x467   : > { %v2340_v11 = vmul.f32 1.442695, %v2149_v6  ;;  %v5726_v31 = vpop.eup %4065  ;;  %4085 = vpow2.f32 %v2330_v13  ;;  %v2449_v44 = vadd.f32 %v5573_v32, %v5557_v43  ;;  %v2555_v16 = vpack.c.bf16 %v5452_v56, %v5356_v39  ;;  %v4166_v6 = vld [vmem:[%s4340_s17 + $0x330] ss:$8 sps:$4 sm:$0xff]  }
 0x468   : > { %v2568_v45 = vpack.c.bf16 %v5604_v60, %v5509_v59  ;;  %v5734_v52 = vpop.eup %4067  ;;  %2421 = vadd.xlane.f32.xlu0 %v2420_v17  ;;  %v2430_v15 = vadd.f32 %v5714_v33, %v2429_v47  ;;  %v2439_v8 = vadd.f32 %v5726_v31, %v2438_v35  ;;  %4087 = vpow2.f32 %v2332_v36 }
 0x469   : > { %v2567_v10 = vpack.c.bf16 %v5595_v25, %v5506_v53  ;;  %v5740_v22 = vpop.eup %4069  ;;  %4089 = vpow2.f32 %v2334_v40  ;;  %v2450_v39 = vadd.f32 %v5588_v2, %v2449_v44  ;;  %2778 = vmatmul.mubr.bf16.vlgmr.msra.gmra.mrb[32].mxu0 %v2555_v16  ;;  %v2580_v59 = vpack.c.bf16 %v5695_v28, %v5653_v62  ;;  %v4160_v53 = vld [vmem:[%s4340_s17 + $0x300] ss:$8 sps:$4 sm:$0xff]   ;;  %v4161_v28 = vld [vmem:[%s4340_s17 + $0x314] ss:$8 sps:$4 sm:$0xff]   ;;  %v4162_v44 = vld [vmem:[%s4340_s17 + $0x310] ss:$8 sps:$4 sm:$0xff]  }
 0x46a   : > { %v2579_v56 = vpack.c.bf16 %v5687_v18, %v5644_v5  ;;  %v5747_v43 = vpop.eup %4071  ;;  %v2431_v32 = vadd.f32 %v5716_v23, %v2430_v15  ;;  %v2440_v60 = vadd.f32 %v5734_v52, %v2439_v8  ;;  %4091 = vpow2.f32 %v2336_v20  ;;  %2787 = vmatprep.mubr.bf16.mxu0 %v2568_v45  ;;  %2819 = vmatpush1.bf16.msra.mxu0 %v4160_v53  ;;  %v4163_v8 = vld [vmem:[%s4340_s17 + $0x324] ss:$8 sps:$4 sm:$0xff]   ;;  %v6382_v40 = vld [vmem:[#allocation28_spill] sm:$0xff] }
 0x46b   : > { %v2558_v2 = vpack.c.bf16 %v5471_v57, %v5369_v51  ;;  %v5754_v25 = vpop.eup %4073  ;;  %4093 = vpow2.f32 %v2338_v3  ;;  %v2451_v62 = vadd.f32 %v5564_v61, %v2450_v39  ;;  %2820 = vmatprep.subr.bf16.mxu0 %v4161_v28  ;;  %v2557_v35 = vpack.c.bf16 %v5465_v58, %v5366_v41  ;;  %v6378_v53 = vld [vmem:[#allocation26_spill] sm:$0xff]  ;;  %v6381_v20 = vld [vmem:[#allocation25_spill] sm:$0xff]  ;;  %v6384_v61 = vld [vmem:[#allocation8_spill] sm:$0xff] }
 0x46c   : > { %v5762_v24 = vpop.eup %4075  ;;  %v2432_v48 = vadd.f32 %v5720_v37, %v2431_v32  ;;  %v2441_v13 = vadd.f32 %v5740_v22, %v2440_v60  ;;  %4095 = vpow2.f32 %v2340_v11  ;;  %v6377_v60 = vld [vmem:[#allocation24_spill] sm:$0xff]  ;;  %v6383_v32 = vld [vmem:[#allocation5_spill] sm:$0xff]  ;;  %v6393_v41 = vpack.c.bf16 %v5708_v49, %v5662_v9 }
 0x46d   : > { %v5768_v19 = vpop.eup %4077  ;;  %v4164_v39 = vld [vmem:[%s4340_s17 + $0x320] ss:$8 sps:$4 sm:$0xff]   ;;  %v4178_v57 = vld [vmem:[%s4340_s17 + $0x390] ss:$8 sps:$4 sm:$0xff]  }
 0x46e   : > { %v5778_v17 = vpop.eup %4079  ;;  %v2433_v47 = vadd.f32 %v5722_v26, %v2432_v48  ;;  %v2442_v11 = vadd.f32 %v5747_v43, %v2441_v13  ;;  %2821 = vmatpush1.bf16.msra.mxu0 %v4162_v44  ;;  %v6379_v48 = vld [vmem:[#allocation23_spill] sm:$0xff]  ;;  %v6380_v13 = vld [vmem:[#allocation6_spill] sm:$0xff] }
 0x46f   : > { %v4082_v15 = vpop.eup %4081  ;;  %2822 = vmatprep.subr.bf16.mxu0 %v4163_v8  ;;  %v4165_v44 = vld [vmem:[%s4340_s17 + $0x334] ss:$8 sps:$4 sm:$0xff]   ;;  %v4196_v58 = vld [vmem:[%s4340_s17 + $0x420] ss:$8 sps:$4 sm:$0xff]  }
 0x470   : > { %v4084_v3 = vpop.eup %4083  ;;  %2434 = vadd.xlane.f32.xlu1 %v2433_v47  ;;  %v2443_v45 = vadd.f32 %v5754_v25, %v2442_v11  ;;  %v2452_v16 = vadd.f32 %v4082_v15, %v2451_v62  ;;  %v2591_v8 = vpack.c.bf16 %v4082_v15, %v5726_v31  ;;  %v4200_v9 = vld [vmem:[%s4340_s17 + $0x440] ss:$8 sps:$4 sm:$0xff]  }
 0x471   : > { %v5800_v36 = vpop.eup %4085  ;;  %2788 = vmatmul.mubr.bf16.gmra.mrb[36].mxu0 %v2567_v10  ;;  %v2592_v28 = vpack.c.bf16 %v4084_v3, %v5734_v52 }
 0x472   : > { %v5809_v11 = vpop.eup %4087  ;;  %v2444_v31 = vadd.f32 %v5762_v24, %v2443_v45  ;;  %v2453_v15 = vadd.f32 %v4084_v3, %v2452_v16  ;;  %2797 = vmatprep.mubr.bf16.mxu0 %v2580_v59  ;;  %2823 = vmatpush1.bf16.msra.mxu0 %v4164_v39  ;;  %v6386_v3 = vld [vmem:[#allocation60_spill] sm:$0xff] }
 0x473   : > { %v5815_v10 = vpop.eup %4089  ;;  %2824 = vmatprep.subr.bf16.mxu0 %v4165_v44 }
 0x474   : > { %v5820_v47 = vpop.eup %4091  ;;  %v2445_v45 = vadd.f32 %v5768_v19, %v2444_v31  ;;  %v2454_v59 = vadd.f32 %v5800_v36, %v2453_v15  ;;  %v4167_v15 = vld [vmem:[%s4340_s17 + $0x344] ss:$8 sps:$4 sm:$0xff]  }
 0x475   : > { %v5826_v16 = vpop.eup %4093 }
 0x476   : > { %v5830_v52 = vpop.eup %4095  ;;  %v2446_v44 = vadd.f32 %v5778_v17, %v2445_v45  ;;  %v2455_v62 = vadd.f32 %v5809_v11, %v2454_v59  ;;  %2825 = vmatpush1.bf16.msra.mxu0 %v4166_v6  ;;  %v4168_v6 = vld [vmem:[%s4340_s17 + $0x340] ss:$8 sps:$4 sm:$0xff]   ;;  %v4169_v59 = vld [vmem:[%s4340_s17 + $0x354] ss:$8 sps:$4 sm:$0xff]  }
 0x477   : > { %2826 = vmatprep.subr.bf16.mxu0 %v4167_v15 }
 0x478   : > { %2447 = vadd.xlane.f32.xlu0 %v2446_v44  ;;  %v2456_v39 = vadd.f32 %v5815_v10, %v2455_v62  ;;  %v4170_v44 = vld [vmem:[%s4340_s17 + $0x350] ss:$8 sps:$4 sm:$0xff]   ;;  %v6385_v62 = vld [vmem:[#allocation58_spill] sm:$0xff] }
 0x479   : > { %2798 = vmatmul.mubr.bf16.gmra.mrb[40].mxu0 %v2579_v56  ;;  %v6387_v5 = vsub.f32 %v6385_v62, %v6386_v3  ;;  %v4171_v56 = vld [vmem:[%s4340_s17 + $0x364] ss:$8 sps:$4 sm:$0xff]   ;;  %v4173_v3 = vld [vmem:[%s4340_s17 + $0x374] ss:$8 sps:$4 sm:$0xff]  }
 0x47a   : > { %v2457_v45 = vadd.f32 %v5820_v47, %v2456_v39  ;;  %2807 = vmatprep.mubr.bf16.mxu0 %v2592_v28  ;;  %2827 = vmatpush1.bf16.msra.mxu0 %v4168_v6  ;;  %v6388_v28 = vld [vmem:[#allocation57_spill] sm:$0xff]  ;;  %v6389_v39 = vld [vmem:[#allocation59_spill] sm:$0xff] }
 0x47b   : > { %2828 = vmatprep.subr.bf16.mxu0 %v4169_v59  ;;  %v2012_v18 = vmul.f32 1.442695, %v6387_v5  ;;  %v6390_v6 = vsub.f32 %v6388_v28, %v6389_v39  ;;  %v4172_v59 = vld [vmem:[%s4340_s17 + $0x360] ss:$8 sps:$4 sm:$0xff]   ;;  %v4183_v28 = vld [vmem:[%s4340_s17 + $0x3c4] ss:$8 sps:$4 sm:$0xff]  }
 0x47c   : > { %v2458_v15 = vadd.f32 %v5826_v16, %v2457_v45  ;;  %v4180_v5 = vld [vmem:[%s4340_s17 + $0x3a0] ss:$8 sps:$4 sm:$0xff]  }
 0x47d   : > { %v2010_v45 = vmul.f32 1.442695, %v6390_v6  ;;  %4097 = vpow2.f32 %v2012_v18  ;;  %v4181_v18 = vld [vmem:[%s4340_s17 + $0x3b4] ss:$8 sps:$4 sm:$0xff]   ;;  %v4184_v39 = vld [vmem:[%s4340_s17 + $0x3c0] ss:$8 sps:$4 sm:$0xff]  }
 0x47e   : > { %v2459_v31 = vadd.f32 %v5830_v52, %v2458_v15  ;;  %2829 = vmatpush1.bf16.msra.mxu0 %v4170_v44  ;;  %v4174_v15 = vld [vmem:[%s4340_s17 + $0x370] ss:$8 sps:$4 sm:$0xff]   ;;  %v4177_v44 = vld [vmem:[%s4340_s17 + $0x394] ss:$8 sps:$4 sm:$0xff]  }
 0x47f   : > { %2830 = vmatprep.subr.bf16.mxu0 %v4171_v56  ;;  %4099 = vpow2.f32 %v2010_v45  ;;  %v4182_v56 = vld [vmem:[%s4340_s17 + $0x3b0] ss:$8 sps:$4 sm:$0xff]   ;;  %v4185_v6 = vld [vmem:[%s4340_s17 + $0x3d4] ss:$8 sps:$4 sm:$0xff]  }
 0x480   : > { %2460 = vadd.xlane.f32.xlu1 %v2459_v31  ;;  %v4176_v31 = vld [vmem:[%s4340_s17 + $0x380] ss:$8 sps:$4 sm:$0xff]   ;;  %v4186_v45 = vld [vmem:[%s4340_s17 + $0x3d0] ss:$8 sps:$4 sm:$0xff]  }
 0x481   : > { %2808 = vmatmul.mubr.bf16.gmra.mrb[44].mxu0 %v2591_v8  ;;  %v4175_v8 = vld [vmem:[%s4340_s17 + $0x384] ss:$8 sps:$4 sm:$0xff]  }
 0x482   : > { %2831 = vmatpush1.bf16.msra.mxu0 %v4172_v59  ;;  %2850 = vmatprep.mubr.bf16.mxu0 %v2558_v2  ;;  %v4179_v2 = vld [vmem:[%s4340_s17 + $0x3a4] ss:$8 sps:$4 sm:$0xff]  }
 0x483   : > { %2832 = vmatprep.subr.bf16.mxu0 %v4173_v3  ;;  %v4187_v59 = vld [vmem:[%s4340_s17 + $0x3e4] ss:$8 sps:$4 sm:$0xff]   ;;  %v4188_v3 = vld [vmem:[%s4340_s17 + $0x3e0] ss:$8 sps:$4 sm:$0xff]  }
 0x486   : > { %2833 = vmatpush1.bf16.msra.mxu0 %v4174_v15  ;;  %v4189_v15 = vld [vmem:[%s4340_s17 + $0x3f4] ss:$8 sps:$4 sm:$0xff]  }
 0x487   : > { %2834 = vmatprep.subr.bf16.mxu0 %v4175_v8  ;;  %v5866_v51 = vpop.eup %4097  ;;  %v4190_v8 = vld [vmem:[%s4340_s17 + $0x3f0] ss:$8 sps:$4 sm:$0xff]  }
 0x489   : > { %v5871_v62 = vpop.eup %4099 }
 0x48a   : > { %2835 = vmatpush1.bf16.msra.mxu0 %v4176_v31  ;;  %v4191_v31 = vld [vmem:[%s4340_s17 + $0x404] ss:$8 sps:$4 sm:$0xff]  }
 0x48b   : > { %2836 = vmatprep.subr.bf16.mxu0 %v4177_v44  ;;  %v6391_v44 = vpack.c.bf16 %v5614_v27, %v5515_v1  ;;  %v4197_v1 = vld [vmem:[%s4340_s17 + $0x434] ss:$8 sps:$4 sm:$0xff]   ;;  %v5904_v27 = vpop.permute.xlu1 %2502 }
 0x48e   : > { %2532 = vperm.xlu0 %3591, %v5866_v51   ;;  %2837 = vmatpush1.bf16.msra.mxu0 %v4178_v57  ;;  %v4192_v57 = vld [vmem:[%s4340_s17 + $0x400] ss:$8 sps:$4 sm:$0xff]  }
 0x48f   : > { %2838 = vmatprep.subr.bf16.mxu0 %v4179_v2  ;;  %v4193_v2 = vld [vmem:[%s4340_s17 + $0x414] ss:$8 sps:$4 sm:$0xff]   ;;  %v5915_v49 = vpop.permute.xlu1 %2507 }
 0x491   : > { %2527 = vperm.xlu1 %3592, %v5871_v62  }
 0x492   : > { %2839 = vmatpush1.bf16.msra.mxu0 %v4180_v5  ;;  %v4194_v5 = vld [vmem:[%s4340_s17 + $0x410] ss:$8 sps:$4 sm:$0xff]  }
 0x493   : > { %2840 = vmatprep.subr.bf16.mxu0 %v4181_v18  ;;  %v4195_v18 = vld [vmem:[%s4340_s17 + $0x424] ss:$8 sps:$4 sm:$0xff]  }
 0x496   : > { %2841 = vmatpush1.bf16.msra.mxu0 %v4182_v56  ;;  %v6392_v56 = vpack.c.bf16 %v5610_v54, %v5513_v63  ;;  %v6394_v63 = vpack.c.bf16 %v5701_v34, %v5658_v30  ;;  %v6395_v54 = vpack.c.bf16 %v5809_v11, %v5747_v43  ;;  %v6396_v30 = vpack.c.bf16 %v5800_v36, %v5740_v22  ;;  %v2342_v34 = vld [vmem:[#allocation3] sm:$0xff] }
 0x497   : > { %2842 = vmatprep.subr.bf16.mxu0 %v4183_v28  ;;  %v4199_v28 = vld [vmem:[%s4340_s17 + $0x444] ss:$8 sps:$4 sm:$0xff]   ;;  %v4204_v43 = vld [vmem:[%s4340_s17 + $0x460] ss:$8 sps:$4 sm:$0xff]   ;;  %v6397_v11 = vpack.c.bf16 %v5482_v4, %v5387_v7  ;;  %v4209_v7 = vld [vmem:[%s4340_s17 + $0x494] ss:$8 sps:$4 sm:$0xff]  }
 0x498   : > { %v4207_v36 = vld [vmem:[%s4340_s17 + $0x484] ss:$8 sps:$4 sm:$0xff]   ;;  %v4208_v4 = vld [vmem:[%s4340_s17 + $0x480] ss:$8 sps:$4 sm:$0xff]  }
 0x49a   : > { %2843 = vmatpush1.bf16.msra.mxu0 %v4184_v39  ;;  %v4201_v39 = vld [vmem:[%s4340_s17 + $0x454] ss:$8 sps:$4 sm:$0xff]  }
 0x49b   : > { %2844 = vmatprep.subr.bf16.mxu0 %v4185_v6  ;;  %v4202_v6 = vld [vmem:[%s4340_s17 + $0x450] ss:$8 sps:$4 sm:$0xff]  }
 0x49e   : > { %2845 = vmatpush1.bf16.msra.mxu0 %v4186_v45  ;;  %v4203_v45 = vld [vmem:[%s4340_s17 + $0x464] ss:$8 sps:$4 sm:$0xff]  }
 0x49f   : > { %2846 = vmatprep.subr.bf16.mxu0 %v4187_v59  ;;  %v5920_v59 = vpop.permute.xlu1 %2517 }
 0x4a2   : > { %2847 = vmatpush1.bf16.msra.mxu0 %v4188_v3  ;;  %v4205_v3 = vld [vmem:[%s4340_s17 + $0x474] ss:$8 sps:$4 sm:$0xff]  }
 0x4a3   : > { %2848 = vmatprep.subr.bf16.mxu0 %v4189_v15  ;;  %v6398_v15 = vld [vmem:[#allocation56_spill] sm:$0xff] }
 0x4a6   : > { %2849 = vmatpush1.bf16.msra.mxu0 %v4190_v8  ;;  %v2350_v8 = vmul.f32 %v6398_v15, %v2342_v34  ;;  %v6400_v34 = vld [vmem:[#allocation64_spill] sm:$0xff] }
 0x4a7   : > { %2891 = vmatprep.subr.bf16.mxu0 %v4191_v31  ;;  %v4218_v15 = vld [vmem:[%s4340_s17 + $0x4d0] ss:$8 sps:$4 sm:$0xff]  }
 0x4a9   : > { %2851 = vmatmul.mubr.bf16.vlgmr.msra.gmra.mrb[32].mxu0 %v2557_v35  ;;  %v4198_v35 = vld [vmem:[%s4340_s17 + $0x430] ss:$8 sps:$4 sm:$0xff]  }
 0x4aa   : > { %2860 = vmatprep.mubr.bf16.mxu0 %v6391_v44  ;;  %2892 = vmatpush1.bf16.msra.mxu0 %v4192_v57  ;;  %v4206_v44 = vld [vmem:[%s4340_s17 + $0x470] ss:$8 sps:$4 sm:$0xff]   ;;  %v5934_v57 = vpop.permute.xlu0 %2497 }
 0x4ab   : > { %2893 = vmatprep.subr.bf16.mxu0 %v4193_v2 }
 0x4ae   : > { %2894 = vmatpush1.bf16.msra.mxu0 %v4194_v5  ;;  %v5938_v2 = vpop.permute.xlu0 %2512  ;;  %v4210_v5 = vld [vmem:[%s4340_s17 + $0x490] ss:$8 sps:$4 sm:$0xff]  }
 0x4af   : > { %2895 = vmatprep.subr.bf16.mxu0 %v4195_v18  ;;  %v4211_v18 = vld [vmem:[%s4340_s17 + $0x4a4] ss:$8 sps:$4 sm:$0xff]  }
 0x4b1   : > { %2861 = vmatmul.mubr.bf16.gmra.mrb[36].mxu0 %v6392_v56 }
 0x4b2   : > { %2870 = vmatprep.mubr.bf16.mxu0 %v6393_v41  ;;  %2896 = vmatpush1.bf16.msra.mxu0 %v4196_v58  ;;  %v5942_v56 = vpop.permute.xlu0 %2522  ;;  %v2343_v41 = vld [vmem:[#allocation3 + $0x8] sm:$0xff] }
 0x4b3   : > { %2897 = vmatprep.subr.bf16.mxu0 %v4197_v1  ;;  %v4212_v58 = vld [vmem:[%s4340_s17 + $0x4a0] ss:$8 sps:$4 sm:$0xff]   ;;  %v4213_v1 = vld [vmem:[%s4340_s17 + $0x4b4] ss:$8 sps:$4 sm:$0xff]  }
 0x4b6   : > { %2898 = vmatpush1.bf16.msra.mxu0 %v4198_v35  ;;  %v6399_v35 = vld [vmem:[#allocation62_spill] sm:$0xff] }
 0x4b7   : > { %2899 = vmatprep.subr.bf16.mxu0 %v4199_v28  ;;  %v2351_v28 = vmul.f32 %v6399_v35, %v2343_v41  ;;  %v4225_v41 = vld [vmem:[%s4340_s17 + $0x514] ss:$8 sps:$4 sm:$0xff]  }
 0x4b9   : > { %2871 = vmatmul.mubr.bf16.gmra.mrb[40].mxu0 %v6394_v63 }
 0x4ba   : > { %2880 = vmatprep.mubr.bf16.mxu0 %v6395_v54  ;;  %2900 = vmatpush1.bf16.msra.mxu0 %v4200_v9  ;;  %v4214_v9 = vld [vmem:[%s4340_s17 + $0x4b0] ss:$8 sps:$4 sm:$0xff]  }
 0x4bb   : > { %2901 = vmatprep.subr.bf16.mxu0 %v4201_v39  ;;  %v4215_v39 = vld [vmem:[%s4340_s17 + $0x4c4] ss:$8 sps:$4 sm:$0xff]  }
 0x4be   : > { %2902 = vmatpush1.bf16.msra.mxu0 %v4202_v6  ;;  %v2344_v6 = vld [vmem:[#allocation3 + $0x10] sm:$0xff] }
 0x4bf   : > { %2903 = vmatprep.subr.bf16.mxu0 %v4203_v45  ;;  %v4216_v45 = vld [vmem:[%s4340_s17 + $0x4c0] ss:$8 sps:$4 sm:$0xff]  }
 0x4c1   : > { %2881 = vmatmul.mubr.bf16.gmra.mrb[44].mxu0 %v6396_v30  ;;  %v4217_v30 = vld [vmem:[%s4340_s17 + $0x4d4] ss:$8 sps:$4 sm:$0xff]  }
 0x4c2   : > { %2904 = vmatpush1.bf16.msra.mxu0 %v4204_v43  ;;  %2923 = vmatprep.mubr.bf16.mxu0 %v6397_v11  ;;  %v2352_v43 = vmul.f32 %v6400_v34, %v2344_v6  ;;  %v6406_v6 = vld [vmem:[#allocation65_spill] sm:$0xff] }
 0x4c3   : > { %2905 = vmatprep.subr.bf16.mxu0 %v4205_v3 }
 0x4c5   : > { %v2370_v31 = vpop.xlane.xlu1 %2369 }
 0x4c6   : > { %2906 = vmatpush1.bf16.msra.mxu0 %v4206_v44  ;;  %v2462_v22 = vadd.f32 %v2370_v31, %v2350_v8  ;;  %v4219_v8 = vld [vmem:[%s4340_s17 + $0x4e4] ss:$8 sps:$4 sm:$0xff]   ;;  %v4220_v31 = vld [vmem:[%s4340_s17 + $0x4e0] ss:$8 sps:$4 sm:$0xff]   ;;  %v4221_v44 = vld [vmem:[%s4340_s17 + $0x4f4] ss:$8 sps:$4 sm:$0xff]  }
 0x4c7   : > { %2907 = vmatprep.subr.bf16.mxu0 %v4207_v36  ;;  %v4223_v36 = vld [vmem:[%s4340_s17 + $0x504] ss:$8 sps:$4 sm:$0xff]  }
 0x4c8   : > { %2471 = vst.msk [vmem:[#allocation3] sm:$0xff] %vm2470_vm1, %v2462_v22  ;;  %v4222_v22 = vld [vmem:[%s4340_s17 + $0x4f0] ss:$8 sps:$4 sm:$0xff]  }
 0x4ca   : > { %2908 = vmatpush1.bf16.msra.mxu0 %v4208_v4  ;;  %v2345_v4 = vld [vmem:[#allocation3 + $0x18] sm:$0xff] }
 0x4cb   : > { %2909 = vmatprep.subr.bf16.mxu0 %v4209_v7  ;;  %v6401_v7 = vpack.c.bf16 %v5477_v0, %v5377_v29  ;;  %v2346_v29 = vld [vmem:[#allocation3 + $0x20] sm:$0xff]  ;;  %v6404_v0 = vpack.c.bf16 %v5621_v21, %v5520_v14 }
 0x4ce   : > { %2910 = vmatpush1.bf16.msra.mxu0 %v4210_v5  ;;  %v6402_v5 = vpack.c.bf16 %v5624_v46, %v5529_v38  ;;  %v6405_v38 = vpack.c.bf16 %v5716_v23, %v5670_v50  ;;  %v4228_v46 = vld [vmem:[%s4340_s17 + $0x520] ss:$8 sps:$4 sm:$0xff]   ;;  %v4231_v23 = vld [vmem:[%s4340_s17 + $0x544] ss:$8 sps:$4 sm:$0xff]  }
 0x4cf   : > { %2911 = vmatprep.subr.bf16.mxu0 %v4211_v18  ;;  %v4224_v18 = vld [vmem:[%s4340_s17 + $0x500] ss:$8 sps:$4 sm:$0xff]  }
 0x4d2   : > { %2912 = vmatpush1.bf16.msra.mxu0 %v4212_v58  ;;  %v6403_v58 = vld [vmem:[#allocation61_spill] sm:$0xff] }
 0x4d3   : > { %2913 = vmatprep.subr.bf16.mxu0 %v4213_v1  ;;  %v2353_v1 = vmul.f32 %v6403_v58, %v2345_v4  ;;  %v4236_v58 = vld [vmem:[%s4340_s17 + $0x560] ss:$8 sps:$4 sm:$0xff]  }
 0x4d5   : > { %v2383_v63 = vpop.xlane.xlu0 %2382 }
 0x4d6   : > { %v2463_v54 = vadd.f32 %v2383_v63, %v2351_v28  ;;  %2914 = vmatpush1.bf16.msra.mxu0 %v4214_v9  ;;  %v4226_v63 = vld [vmem:[%s4340_s17 + $0x510] ss:$8 sps:$4 sm:$0xff]   ;;  %v4229_v9 = vld [vmem:[%s4340_s17 + $0x534] ss:$8 sps:$4 sm:$0xff]  }
 0x4d7   : > { %2915 = vmatprep.subr.bf16.mxu0 %v4215_v39 }
 0x4d8   : > { %2472 = vst.msk [vmem:[#allocation3 + $0x8] sm:$0xff] %vm2470_vm1, %v2463_v54  ;;  %v4227_v54 = vld [vmem:[%s4340_s17 + $0x524] ss:$8 sps:$4 sm:$0xff]  }
 0x4da   : > { %2916 = vmatpush1.bf16.msra.mxu0 %v4216_v45  ;;  %v2354_v45 = vmul.f32 %v6406_v6, %v2346_v29  ;;  %v4238_v29 = vld [vmem:[%s4340_s17 + $0x570] ss:$8 sps:$4 sm:$0xff]  }
 0x4db   : > { %2917 = vmatprep.subr.bf16.mxu0 %v4217_v30 }
 0x4dd   : > { %v2396_v11 = vpop.xlane.xlu0 %2395 }
 0x4de   : > { %v2464_v3 = vadd.f32 %v2396_v11, %v2352_v43  ;;  %2918 = vmatpush1.bf16.msra.mxu0 %v4218_v15  ;;  %v4230_v43 = vld [vmem:[%s4340_s17 + $0x530] ss:$8 sps:$4 sm:$0xff]   ;;  %v2347_v11 = vld [vmem:[#allocation3 + $0x28] sm:$0xff]  ;;  %v6408_v15 = vpack.c.bf16 %v5820_v47, %v5762_v24 }
 0x4df   : > { %2919 = vmatprep.subr.bf16.mxu0 %v4219_v8  ;;  %v4232_v8 = vld [vmem:[%s4340_s17 + $0x540] ss:$8 sps:$4 sm:$0xff]   ;;  %v4235_v47 = vld [vmem:[%s4340_s17 + $0x564] ss:$8 sps:$4 sm:$0xff]  }
 0x4e0   : > { %2473 = vst.msk [vmem:[#allocation3 + $0x10] sm:$0xff] %vm2470_vm1, %v2464_v3  ;;  %v6407_v3 = vpack.c.bf16 %v5714_v33, %v5667_v42 }
 0x4e2   : > { %2920 = vmatpush1.bf16.msra.mxu0 %v4220_v31  ;;  %v4233_v31 = vld [vmem:[%s4340_s17 + $0x554] ss:$8 sps:$4 sm:$0xff]  }
 0x4e3   : > { %2921 = vmatprep.subr.bf16.mxu0 %v4221_v44 }
 0x4e6   : > { %2922 = vmatpush1.bf16.msra.mxu0 %v4222_v22  ;;  %v6409_v22 = vld [vmem:[#allocation63_spill] sm:$0xff] }
 0x4e7   : > { %2964 = vmatprep.subr.bf16.mxu0 %v4223_v36  ;;  %v2355_v36 = vmul.f32 %v6409_v22, %v2347_v11  ;;  %v4247_v11 = vld [vmem:[%s4340_s17 + $0x5c4] ss:$8 sps:$4 sm:$0xff]  }
 0x4e9   : > { %2924 = vmatmul.mubr.bf16.vlgmr.msra.gmra.mrb[32].mxu0 %v6401_v7 }
 0x4ea   : > { %2933 = vmatprep.mubr.bf16.mxu0 %v6402_v5  ;;  %2965 = vmatpush1.bf16.msra.mxu0 %v4224_v18  ;;  %v4234_v5 = vld [vmem:[%s4340_s17 + $0x550] ss:$8 sps:$4 sm:$0xff]  }
 0x4eb   : > { %2966 = vmatprep.subr.bf16.mxu0 %v4225_v41  ;;  %v2348_v18 = vld [vmem:[#allocation3 + $0x30] sm:$0xff]  ;;  %v6410_v41 = vpack.c.bf16 %v5815_v10, %v5754_v25  ;;  %v2349_v25 = vld [vmem:[#allocation3 + $0x38] sm:$0xff]  ;;  %v4240_v10 = vld [vmem:[%s4340_s17 + $0x580] ss:$8 sps:$4 sm:$0xff]  }
 0x4ed   : > { %v2409_v35 = vpop.xlane.xlu1 %2408 }
 0x4ee   : > { %v2465_v28 = vadd.f32 %v2409_v35, %v2353_v1  ;;  %2967 = vmatpush1.bf16.msra.mxu0 %v4226_v63  ;;  %v6411_v1 = vpack.c.bf16 %v6378_v53, %v6377_v60  ;;  %v4237_v35 = vld [vmem:[%s4340_s17 + $0x574] ss:$8 sps:$4 sm:$0xff]  }
 0x4ef   : > { %2968 = vmatprep.subr.bf16.mxu0 %v4227_v54  ;;  %v4241_v53 = vld [vmem:[%s4340_s17 + $0x594] ss:$8 sps:$4 sm:$0xff]  }
 0x4f0   : > { %2474 = vst.msk [vmem:[#allocation3 + $0x18] sm:$0xff] %vm2470_vm1, %v2465_v28  ;;  %v2356_v28 = vmul.f32 %v5871_v62, %v2348_v18  ;;  %v4254_v18 = vld [vmem:[%s4340_s17 + $0x5f0] ss:$8 sps:$4 sm:$0xff]  }
 0x4f1   : > { %2934 = vmatmul.mubr.bf16.gmra.mrb[36].mxu0 %v6404_v0  ;;  %v4239_v0 = vld [vmem:[%s4340_s17 + $0x584] ss:$8 sps:$4 sm:$0xff]  }
 0x4f2   : > { %2943 = vmatprep.mubr.bf16.mxu0 %v6405_v38  ;;  %2969 = vmatpush1.bf16.msra.mxu0 %v4228_v46  ;;  %v2357_v38 = vmul.f32 %v5866_v51, %v2349_v25  ;;  %v4245_v51 = vld [vmem:[%s4340_s17 + $0x5b4] ss:$8 sps:$4 sm:$0xff]  }
 0x4f3   : > { %2970 = vmatprep.subr.bf16.mxu0 %v4229_v9  ;;  %v5980_v39 = vpop.f32.mrb[64].mxu1 }
 0x4f4   : > { %v5983_v30 = vpop.f32.mrb[65].mxu1 }
 0x4f5   : > { %v2422_v34 = vpop.xlane.xlu0 %2421  ;;  %v5985_v14 = vpop.f32.mrb[66].mxu1 }
 0x4f6   : > { %v2466_v21 = vadd.f32 %v2422_v34, %v2354_v45  ;;  %2971 = vmatpush1.bf16.msra.mxu0 %v4230_v43  ;;  %v5988_v50 = vpop.f32.mrb[67].mxu1  ;;  %v4242_v45 = vld [vmem:[%s4340_s17 + $0x590] ss:$8 sps:$4 sm:$0xff]   ;;  %v4244_v43 = vld [vmem:[%s4340_s17 + $0x5a0] ss:$8 sps:$4 sm:$0xff]  }
 0x4f7   : > { %2972 = vmatprep.subr.bf16.mxu0 %v4231_v23  ;;  %v4246_v23 = vld [vmem:[%s4340_s17 + $0x5b0] ss:$8 sps:$4 sm:$0xff]  }
 0x4f8   : > { %2475 = vst.msk [vmem:[#allocation3 + $0x20] sm:$0xff] %vm2470_vm1, %v2466_v21  ;;  %v4243_v21 = vld [vmem:[%s4340_s17 + $0x5a4] ss:$8 sps:$4 sm:$0xff]  }
 0x4f9   : > { %2944 = vmatmul.mubr.bf16.gmra.mrb[40].mxu0 %v6407_v3  ;;  %v4248_v3 = vld [vmem:[%s4340_s17 + $0x5c0] ss:$8 sps:$4 sm:$0xff]  }
 0x4fa   : > { %2953 = vmatprep.mubr.bf16.mxu0 %v6408_v15  ;;  %2973 = vmatpush1.bf16.msra.mxu0 %v4232_v8  ;;  %v4249_v15 = vld [vmem:[%s4340_s17 + $0x5d4] ss:$8 sps:$4 sm:$0xff]   ;;  %v4250_v8 = vld [vmem:[%s4340_s17 + $0x5d0] ss:$8 sps:$4 sm:$0xff]  }
 0x4fb   : > { %2974 = vmatprep.subr.bf16.mxu0 %v4233_v31  ;;  %v6000_v44 = vpop.f32.mrb[68].mxu1  ;;  %v4251_v31 = vld [vmem:[%s4340_s17 + $0x5e4] ss:$8 sps:$4 sm:$0xff]  }
 0x4fc   : > { %v6003_v4 = vpop.f32.mrb[69].mxu1 }
 0x4fd   : > { %v2435_v7 = vpop.xlane.xlu1 %2434  ;;  %v6005_v42 = vpop.f32.mrb[70].mxu1 }
 0x4fe   : > { %v2467_v33 = vadd.f32 %v2435_v7, %v2355_v36  ;;  %2975 = vmatpush1.bf16.msra.mxu0 %v4234_v5  ;;  %v6008_v24 = vpop.f32.mrb[71].mxu1  ;;  %v4252_v36 = vld [vmem:[%s4340_s17 + $0x5e0] ss:$8 sps:$4 sm:$0xff]  }
 0x4ff   : > { %2976 = vmatprep.subr.bf16.mxu0 %v4235_v47 }
 0x500   : > { %2476 = vst.msk [vmem:[#allocation3 + $0x28] sm:$0xff] %vm2470_vm1, %v2467_v33  ;;  %v4253_v33 = vld [vmem:[%s4340_s17 + $0x5f4] ss:$8 sps:$4 sm:$0xff]  }
 0x501   : > { %2954 = vmatmul.mubr.bf16.gmra.mrb[44].mxu0 %v6410_v41  ;;  %v6412_v41 = vpack.c.bf16 %v6380_v13, %v6379_v48  ;;  %v6417_v48 = vpack.c.bf16 %v5830_v52, %v5778_v17  ;;  %v2480_v13 = vld [vmem:[#allocation4 + $0x8] sm:$0xff] }
 0x502   : > { %2977 = vmatpush1.bf16.msra.mxu0 %v4236_v58  ;;  %2996 = vmatprep.mubr.bf16.mxu0 %v6411_v1  ;;  %v6413_v58 = vpack.c.bf16 %v6382_v40, %v6381_v20  ;;  %v6414_v1 = vpack.c.bf16 %v6384_v61, %v6383_v32  ;;  %v6418_v40 = vpack.c.bf16 %v5826_v16, %v5768_v19  ;;  %v2479_v20 = vld [vmem:[#allocation4] sm:$0xff]  ;;  %v2481_v61 = vld [vmem:[#allocation4 + $0x10] sm:$0xff] }
 0x503   : > { %2978 = vmatprep.subr.bf16.mxu0 %v4237_v35  ;;  %v6415_v35 = vpack.c.bf16 %v5722_v26, %v5680_v12  ;;  %v2482_v12 = vld [vmem:[#allocation4 + $0x18] sm:$0xff]  ;;  %v2537_v52 = vmul.f32 %v5904_v27, %v2481_v61 }
 0x505   : > { %v2448_v63 = vpop.xlane.xlu0 %2447 }
 0x506   : > { %v2468_v54 = vadd.f32 %v2448_v63, %v2356_v28  ;;  %2979 = vmatpush1.bf16.msra.mxu0 %v4238_v29  ;;  %v6416_v28 = vpack.c.bf16 %v5720_v37, %v5674_v55  ;;  %v2535_v63 = vmul.f32 %v5934_v57, %v2479_v20  ;;  %v2536_v37 = vmul.f32 %v5934_v57, %v2480_v13  ;;  %v2484_v57 = vld [vmem:[#allocation4 + $0x28] sm:$0xff] }
 0x507   : > { %2980 = vmatprep.subr.bf16.mxu0 %v4239_v0  ;;  %v2538_v0 = vmul.f32 %v5904_v27, %v2482_v12  ;;  %v2540_v27 = vmul.f32 %v5915_v49, %v2484_v57 }
 0x508   : > { %2477 = vst.msk [vmem:[#allocation3 + $0x30] sm:$0xff] %vm2470_vm1, %v2468_v54 }
 0x50a   : > { %2981 = vmatpush1.bf16.msra.mxu0 %v4240_v10  ;;  %v6025_v60 = vpop.f32.mrb[72].mxu1 }
 0x50b   : > { %2982 = vmatprep.subr.bf16.mxu0 %v4241_v53  ;;  %v6028_v62 = vpop.f32.mrb[73].mxu1 }
 0x50c   : > { %v6031_v46 = vpop.f32.mrb[74].mxu1 }
 0x50d   : > { %v2461_v9 = vpop.xlane.xlu1 %2460  ;;  %v6034_v34 = vpop.f32.mrb[75].mxu1 }
 0x50e   : > { %v2469_v6 = vadd.f32 %v2461_v9, %v2357_v38  ;;  %2983 = vmatpush1.bf16.msra.mxu0 %v4242_v45 }
 0x50f   : > { %2984 = vmatprep.subr.bf16.mxu0 %v4243_v21 }
 0x510   : > { %2478 = vst.msk [vmem:[#allocation3 + $0x38] sm:$0xff] %vm2470_vm1, %v2469_v6  ;;  %v2486_v6 = vld [vmem:[#allocation4 + $0x38] sm:$0xff] }
 0x511   : > { %v2528_v12 = vpop.permute.xlu1 %2527 }
 0x512   : > { %2985 = vmatpush1.bf16.msra.mxu0 %v4244_v43 }
 0x513   : > { %2986 = vmatprep.subr.bf16.mxu0 %v4245_v51 }
 0x516   : > { %2987 = vmatpush1.bf16.msra.mxu0 %v4246_v23 }
 0x517   : > { %2988 = vmatprep.subr.bf16.mxu0 %v4247_v11 }
 0x51a   : > { %2989 = vmatpush1.bf16.msra.mxu0 %v4248_v3 }
 0x51b   : > { %2990 = vmatprep.subr.bf16.mxu0 %v4249_v15  ;;  %v2542_v15 = vmul.f32 %v5938_v2, %v2486_v6  ;;  %v3101_v6 = vld [vmem:[#allocation3 + $0x20] sm:$0xff] (!%p3478_p6) }
 0x51e   : > { %2991 = vmatpush1.bf16.msra.mxu0 %v4250_v8 }
 0x51f   : > { %2992 = vmatprep.subr.bf16.mxu0 %v4251_v31 }
 0x522   : > { %v6046_v22 = vpop.f32.mrb[76].mxu1  ;;  %2993 = vmatpush1.bf16.msra.mxu0 %v4252_v36 }
 0x523   : > { %v6049_v7 = vpop.f32.mrb[77].mxu1  ;;  %2994 = vmatprep.subr.bf16.mxu0 %v4253_v33 }
 0x524   : > { %v6052_v5 = vpop.f32.mrb[78].mxu1 }
 0x525   : > { %v6054_v47 = vpop.f32.mrb[79].mxu1 }
 0x526   : > { %2995 = vmatpush1.bf16.msra.mxu0 %v4254_v18 }
 0x529   : > { %2997 = vmatmul.mubr.bf16.vlgmr.msra.gmra.mrb[32].mxu0 %v6412_v41  ;;  %v2490_v41 = vld [vmem:[#allocation4 + $0x58] sm:$0xff] }
 0x52a   : > { %3006 = vmatprep.mubr.bf16.mxu0 %v6413_v58  ;;  %v2546_v13 = vmul.f32 %v5942_v56, %v2490_v41 }
 0x531   : > { %3007 = vmatmul.mubr.bf16.gmra.mrb[36].mxu0 %v6414_v1 }
 0x532   : > { %3016 = vmatprep.mubr.bf16.mxu0 %v6415_v35 }
 0x539   : > { %3017 = vmatmul.mubr.bf16.gmra.mrb[40].mxu0 %v6416_v28 }
 0x53a   : > { %3026 = vmatprep.mubr.bf16.mxu0 %v6417_v48 }
 0x541   : > { %3027 = vmatmul.mubr.bf16.gmra.mrb[44].mxu0 %v6418_v40 }
 0x5fc   : > { %v2998_v32 = vpop.f32.mrb[32].mxu0 }
 0x5fd   : > { %v3483_v26 = vadd.f32 %v2998_v32, %v5980_v39  ;;  %v3000_v54 = vpop.f32.mrb[33].mxu0  ;;  %v2483_v39 = vld [vmem:[#allocation4 + $0x20] sm:$0xff] }
 0x5fe   : > { %v3484_v55 = vadd.f32 %v3000_v54, %v5983_v30  ;;  %v3002_v17 = vpop.f32.mrb[34].mxu0  ;;  %v2485_v30 = vld [vmem:[#allocation4 + $0x30] sm:$0xff]  ;;  %v2539_v45 = vmul.f32 %v5915_v49, %v2483_v39  ;;  %v2488_v49 = vld [vmem:[#allocation4 + $0x48] sm:$0xff]  ;;  %v2533_v54 = vpop.permute.xlu0 %2532 }
 0x5ff   : > { %v3037_v29 = vadd.f32 %v3483_v26, %v2535_v63  ;;  %v3485_v19 = vadd.f32 %v3002_v17, %v5985_v14  ;;  %v3004_v16 = vpop.f32.mrb[35].mxu0  ;;  %v2541_v51 = vmul.f32 %v5938_v2, %v2485_v30  ;;  %v2544_v2 = vmul.f32 %v5920_v59, %v2488_v49  ;;  %v2492_v26 = vld [vmem:[#allocation4 + $0x68] sm:$0xff]  ;;  %v3100_v30 = vld [vmem:[#allocation3 + $0x18] sm:$0xff] (!%p3478_p6) }
 0x600   : > { %v3038_v25 = vadd.f32 %v3484_v55, %v2536_v37  ;;  %v3486_v10 = vadd.f32 %v3004_v16, %v5988_v50  ;;  %v2494_v55 = vld [vmem:[#allocation4 + $0x78] sm:$0xff] }
 0x601   : > { %3053 = vst [vmem:[#allocation4] sm:$0xff] %v3037_v29  ;;  %v3039_v53 = vadd.f32 %v3485_v19, %v2537_v52  ;;  %v2548_v52 = vmul.f32 %v2528_v12, %v2492_v26 }
 0x602   : > { %3054 = vst [vmem:[#allocation4 + $0x8] sm:$0xff] %v3038_v25  ;;  %v3040_v38 = vadd.f32 %v3486_v10, %v2538_v0  ;;  %v2550_v10 = vmul.f32 %v2533_v54, %v2494_v55 }
 0x603   : > { %3055 = vst [vmem:[#allocation4 + $0x10] sm:$0xff] %v3039_v53 }
 0x604   : > { %3056 = vst [vmem:[#allocation4 + $0x18] sm:$0xff] %v3040_v38  ;;  %v3008_v9 = vpop.f32.mrb[36].mxu0 }
 0x605   : > { %v3487_v14 = vadd.f32 %v3008_v9, %v6000_v44  ;;  %v3010_v21 = vpop.f32.mrb[37].mxu0  ;;  %v2487_v44 = vld [vmem:[#allocation4 + $0x40] sm:$0xff]  ;;  %v4300_v9 = vmov (!%p3478_p6), 0  }
 0x606   : > { %v3488_v50 = vadd.f32 %v3010_v21, %v6003_v4  ;;  %v3012_v43 = vpop.f32.mrb[38].mxu0  ;;  %v2489_v4 = vld [vmem:[#allocation4 + $0x50] sm:$0xff]  ;;  %v2543_v58 = vmul.f32 %v5920_v59, %v2487_v44  ;;  %4256 = vset.pattern.permute.xlu1 (!%p3478_p6), %v4300_v9  ;;  %4255 = vset.pattern.permute.xlu0 (!%p3478_p6), %v4300_v9 }
 0x607   : > { %v3041_v23 = vadd.f32 %v3487_v14, %v2539_v45  ;;  %v3489_v11 = vadd.f32 %v3012_v43, %v6005_v42  ;;  %v3014_v3 = vpop.f32.mrb[39].mxu0  ;;  %v2545_v28 = vmul.f32 %v5942_v56, %v2489_v4  ;;  %v3104_v45 = vld [vmem:[#allocation3 + $0x38] sm:$0xff] (!%p3478_p6)  ;;  %v3103_v14 = vld [vmem:[#allocation3 + $0x30] sm:$0xff] (!%p3478_p6) }
 0x608   : > { %v3042_v8 = vadd.f32 %v3488_v50, %v2540_v27  ;;  %v3490_v31 = vadd.f32 %v3014_v3, %v6008_v24 }
 0x609   : > { %3057 = vst [vmem:[#allocation4 + $0x20] sm:$0xff] %v3041_v23  ;;  %v3043_v36 = vadd.f32 %v3489_v11, %v2541_v51 }
 0x60a   : > { %3058 = vst [vmem:[#allocation4 + $0x28] sm:$0xff] %v3042_v8  ;;  %v3044_v33 = vadd.f32 %v3490_v31, %v2542_v15  ;;  %v3081_v31 = vld [vmem:[#allocation4] sm:$0xff] (!%p3478_p6) }
 0x60b   : > { %3059 = vst [vmem:[#allocation4 + $0x30] sm:$0xff] %v3043_v36  ;;  %v3082_v36 = vld [vmem:[#allocation4 + $0x8] sm:$0xff] (!%p3478_p6) }
 0x60c   : > { %3060 = vst [vmem:[#allocation4 + $0x38] sm:$0xff] %v3044_v33  ;;  %v3018_v18 = vpop.f32.mrb[40].mxu0 }
 0x60d   : > { %v3491_v42 = vadd.f32 %v3018_v18, %v6025_v60  ;;  %v3020_v1 = vpop.f32.mrb[41].mxu0  ;;  %v2491_v60 = vld [vmem:[#allocation4 + $0x60] sm:$0xff] }
 0x60e   : > { %v3492_v24 = vadd.f32 %v3020_v1, %v6028_v62  ;;  %v3022_v35 = vpop.f32.mrb[42].mxu0  ;;  %v2493_v62 = vld [vmem:[#allocation4 + $0x70] sm:$0xff] }
 0x60f   : > { %v3045_v48 = vadd.f32 %v3491_v42, %v2543_v58  ;;  %v3493_v40 = vadd.f32 %v3022_v35, %v6031_v46  ;;  %v3024_v20 = vpop.f32.mrb[43].mxu0  ;;  %v2547_v46 = vmul.f32 %v2528_v12, %v2491_v60  ;;  %v2549_v19 = vmul.f32 %v2533_v54, %v2493_v62  ;;  %v3083_v1 = vld [vmem:[#allocation4 + $0x10] sm:$0xff] (!%p3478_p6) }
 0x610   : > { %v3046_v61 = vadd.f32 %v3492_v24, %v2544_v2  ;;  %v3494_v32 = vadd.f32 %v3024_v20, %v6034_v34  ;;  %v3085_v15 = vld [vmem:[#allocation4 + $0x20] sm:$0xff] (!%p3478_p6)  ;;  %v3084_v2 = vld [vmem:[#allocation4 + $0x18] sm:$0xff] (!%p3478_p6) }
 0x611   : > { %3061 = vst [vmem:[#allocation4 + $0x40] sm:$0xff] %v3045_v48  ;;  %v3047_v63 = vadd.f32 %v3493_v40, %v2545_v28  ;;  %v3086_v8 = vld [vmem:[#allocation4 + $0x28] sm:$0xff] (!%p3478_p6) }
 0x612   : > { %3062 = vst [vmem:[#allocation4 + $0x48] sm:$0xff] %v3046_v61  ;;  %v3048_v59 = vadd.f32 %v3494_v32, %v2546_v13  ;;  %v3087_v58 = vld [vmem:[#allocation4 + $0x30] sm:$0xff] (!%p3478_p6) }
 0x613   : > { %3063 = vst [vmem:[#allocation4 + $0x50] sm:$0xff] %v3047_v63  ;;  %v3088_v42 = vld [vmem:[#allocation4 + $0x38] sm:$0xff] (!%p3478_p6) }
 0x614   : > { %3064 = vst [vmem:[#allocation4 + $0x58] sm:$0xff] %v3048_v59  ;;  %v3028_v37 = vpop.f32.mrb[44].mxu0 }
 0x615   : > { %v3495_v17 = vadd.f32 %v3028_v37, %v6046_v22  ;;  %v3030_v56 = vpop.f32.mrb[45].mxu0  ;;  %v3099_v22 = vld [vmem:[#allocation3 + $0x10] sm:$0xff] (!%p3478_p6) }
 0x616   : > { %v3496_v34 = vadd.f32 %v3030_v56, %v6049_v7  ;;  %v3032_v29 = vpop.f32.mrb[46].mxu0  ;;  %3080 = sbr.rel (%p3478_p6) target bundleno = 1713 (0x6b1), region = 36  ;;  %v3097_v7 = vld [vmem:[#allocation3] sm:$0xff] (!%p3478_p6)  ;;  %4257 = vrcp.f32 (!%p3478_p6), %v3099_v22 }
 0x617   : > { %v3049_v16 = vadd.f32 %v3495_v17, %v2547_v46  ;;  %v3497_v0 = vadd.f32 %v3032_v29, %v6052_v5  ;;  %v3034_v25 = vpop.f32.mrb[47].mxu0  ;;  %v3098_v5 = vld [vmem:[#allocation3 + $0x8] sm:$0xff] (!%p3478_p6)  ;;  %4259 = vrcp.f32 (!%p3478_p6), %v3097_v7 }
 0x618   : > { %v3050_v53 = vadd.f32 %v3496_v34, %v2548_v52  ;;  %v3498_v39 = vadd.f32 %v3034_v25, %v6054_v47  ;;  %4261 = vrcp.f32 (!%p3478_p6), %v3100_v30  ;;  %v3102_v47 = vld [vmem:[#allocation3 + $0x28] sm:$0xff] (!%p3478_p6)  ;;  %v3089_v32 = vld [vmem:[#allocation4 + $0x40] sm:$0xff] (!%p3478_p6) }
 0x619   : > { %3065 = vst [vmem:[#allocation4 + $0x60] sm:$0xff] %v3049_v16  ;;  %v3051_v38 = vadd.f32 %v3497_v0, %v2549_v19  ;;  %4263 = vrcp.f32 (!%p3478_p6), %v3098_v5  ;;  %v3090_v63 = vld [vmem:[#allocation4 + $0x48] sm:$0xff] (!%p3478_p6) }
 0x61a   : > { %3066 = vst [vmem:[#allocation4 + $0x68] sm:$0xff] %v3050_v53  ;;  %v3052_v57 = vadd.f32 %v3498_v39, %v2550_v10  ;;  %4265 = vrcp.f32 (!%p3478_p6), %v3102_v47  ;;  %v3091_v13 = vld [vmem:[#allocation4 + $0x50] sm:$0xff] (!%p3478_p6) }
 0x61b   : > { %3067 = vst [vmem:[#allocation4 + $0x70] sm:$0xff] %v3051_v38  ;;  %4267 = vrcp.f32 (!%p3478_p6), %v3101_v6  ;;  %v3092_v61 = vld [vmem:[#allocation4 + $0x58] sm:$0xff] (!%p3478_p6) }
 0x61c   : > { %3068 = vst [vmem:[#allocation4 + $0x78] sm:$0xff] %v3052_v57  ;;  %4269 = vrcp.f32 (!%p3478_p6), %v3104_v45 }
 0x61d   : > { %4271 = vrcp.f32 %v3103_v14 }
 0x620   : > { %v4258_v21 = vpop.eup %4257  ;;  %v3093_v46 = vld [vmem:[#allocation4 + $0x60] sm:$0xff] }
 0x621   : > { %v4260_v27 = vpop.eup %4259  ;;  %3125 = vperm.xlu1 %4256, %v4258_v21   ;;  %v3094_v17 = vld [vmem:[#allocation4 + $0x68] sm:$0xff] }
 0x622   : > { %v4262_v50 = vpop.eup %4261  ;;  %3115 = vperm.xlu0 %4255, %v4260_v27   ;;  %v3095_v37 = vld [vmem:[#allocation4 + $0x70] sm:$0xff] }
 0x623   : > { %v4264_v43 = vpop.eup %4263  ;;  %v3096_v55 = vld [vmem:[#allocation4 + $0x78] sm:$0xff] }
 0x624   : > { %v4266_v51 = vpop.eup %4265 }
 0x625   : > { %3130 = vperm.xlu1 %4256, %v4262_v50   ;;  %v4268_v23 = vpop.eup %4267 }
 0x626   : > { %3120 = vperm.xlu0 %4255, %v4264_v43   ;;  %v4270_v11 = vpop.eup %4269 }
 0x627   : > { %v4272_v3 = vpop.eup %4271 }
 0x629   : > { %3140 = vperm.xlu1 %4256, %v4266_v51  }
 0x62a   : > { %3135 = vperm.xlu0 %4255, %v4268_v23  }
 0x62d   : > { %3150 = vperm.xlu1 %4256, %v4270_v11  }
 0x62e   : > { %3145 = vperm.xlu0 %4255, %v4272_v3  }
 0x6a0   : > { %v3126_v44 = vpop.permute.xlu1 %3125 }
 0x6a1   : > { %v3157_v33 = vmul.f32 %v3126_v44, %v3085_v15  ;;  %v3158_v49 = vmul.f32 %v3126_v44, %v3086_v8  ;;  %v3116_v4 = vpop.permute.xlu0 %3115 }
 0x6a2   : > { %v3153_v18 = vmul.f32 %v3116_v4, %v3081_v31  ;;  %v3154_v41 = vmul.f32 %v3116_v4, %v3082_v36 }
 0x6a3   : > { %3173 = vst [vmem:[%s6166_s2 + $0x20] sm:$0xff] %v3157_v33  ;;  %3174 = vst [vmem:[%s6166_s2 + $0x28] sm:$0xff] %v3158_v49 }
 0x6a4   : > { %3169 = vst [vmem:[%s6166_s2] sm:$0xff] %v3153_v18  ;;  %3170 = vst [vmem:[%s6166_s2 + $0x8] sm:$0xff] %v3154_v41  ;;  %v3131_v24 = vpop.permute.xlu1 %3130 }
 0x6a5   : > { %v3159_v35 = vmul.f32 %v3131_v24, %v3087_v58  ;;  %v3160_v28 = vmul.f32 %v3131_v24, %v3088_v42  ;;  %v3121_v48 = vpop.permute.xlu0 %3120 }
 0x6a6   : > { %v3155_v40 = vmul.f32 %v3121_v48, %v3083_v1  ;;  %v3156_v20 = vmul.f32 %v3121_v48, %v3084_v2 }
 0x6a7   : > { %3175 = vst [vmem:[%s6166_s2 + $0x30] sm:$0xff] %v3159_v35  ;;  %3176 = vst [vmem:[%s6166_s2 + $0x38] sm:$0xff] %v3160_v28 }
 0x6a8   : > { %3171 = vst [vmem:[%s6166_s2 + $0x10] sm:$0xff] %v3155_v40  ;;  %3172 = vst [vmem:[%s6166_s2 + $0x18] sm:$0xff] %v3156_v20  ;;  %v3141_v60 = vpop.permute.xlu1 %3140 }
 0x6a9   : > { %v3163_v12 = vmul.f32 %v3141_v60, %v3091_v13  ;;  %v3164_v59 = vmul.f32 %v3141_v60, %v3092_v61  ;;  %v3136_v26 = vpop.permute.xlu0 %3135 }
 0x6aa   : > { %v3161_v62 = vmul.f32 %v3136_v26, %v3089_v32  ;;  %v3162_v54 = vmul.f32 %v3136_v26, %v3090_v63 }
 0x6ab   : > { %3179 = vst [vmem:[%s6166_s2 + $0x50] sm:$0xff] %v3163_v12  ;;  %3180 = vst [vmem:[%s6166_s2 + $0x58] sm:$0xff] %v3164_v59 }
 0x6ac   : > { %3177 = vst [vmem:[%s6166_s2 + $0x40] sm:$0xff] %v3161_v62  ;;  %3178 = vst [vmem:[%s6166_s2 + $0x48] sm:$0xff] %v3162_v54  ;;  %v3151_v56 = vpop.permute.xlu1 %3150 }
 0x6ad   : > { %v3167_v52 = vmul.f32 %v3151_v56, %v3095_v37  ;;  %v3168_v34 = vmul.f32 %v3151_v56, %v3096_v55  ;;  %v3146_v29 = vpop.permute.xlu0 %3145 }
 0x6ae   : > { %v3165_v19 = vmul.f32 %v3146_v29, %v3093_v46  ;;  %v3166_v16 = vmul.f32 %v3146_v29, %v3094_v17 }
 0x6af   : > { %3183 = vst [vmem:[%s6166_s2 + $0x70] sm:$0xff] %v3167_v52  ;;  %3184 = vst [vmem:[%s6166_s2 + $0x78] sm:$0xff] %v3168_v34 }
 0x6b0   : > { %3181 = vst [vmem:[%s6166_s2 + $0x60] sm:$0xff] %v3165_v19  ;;  %3182 = vst [vmem:[%s6166_s2 + $0x68] sm:$0xff] %v3166_v16 }
 0x6b1 PF: > { %s12_s11 = sadd.s32 1, %s4295_s11   ;;  %s6419_s9 = smov %s4291_s10 }
 0x6b2   : > { %p9_p7 = scmp.ge.s32.totalorder %s12_s11, 11   ;;  %s6420_s10 = smov %s6422_s12 }
 0x6b4   :  { %11 = sbr.rel (!%p9_p7) target bundleno = 2 (0x2), region = 69 }

// kernel: net_forward.124
= control target key start
LH: loop header
LB: loop body
LE: loop exit
PB: predicated region body
PF: predicated region fallthrough
CT: control target
= control target key end

     0   :  { %s1652_s1 = inlined_call_operand.vmem [shape: bf16[384,128], index: 1, kind: input, shape index: {}]   ;;  %s1653_s0 = inlined_call_operand.vmem [shape: bf16[256,384], index: 0, kind: input, shape index: {}]   ;;  %s1654_s2 = inlined_call_operand.vmem [shape: f32[1,128], index: 2, kind: input, shape index: {}]   ;;  %s1655_s3 = inlined_call_operand.vmem [shape: f32[256,128], index: 3, kind: output, shape index: {}]  }
   0x1   :  { %v1165_v0 = vld [vmem:[%s1652_s1 + $0x40] sm:$0xff]   ;;  %v1167_v2 = vld [vmem:[%s1652_s1 + $0x48] sm:$0xff]   ;;  %v1169_v4 = vld [vmem:[%s1652_s1 + $0x50] sm:$0xff]  }
   0x2   :  { %v1166_v1 = vld [vmem:[%s1652_s1] sm:$0xff]   ;;  %965 = vmatprep.subr.bf16.mxu0 %v1165_v0  ;;  %1149 = vmatprep.subr.bf16.mxu1 %v1165_v0  ;;  %v1168_v3 = vld [vmem:[%s1652_s1 + $0x8] sm:$0xff]   ;;  %v1170_v5 = vld [vmem:[%s1652_s1 + $0x10] sm:$0xff]  }
   0x3   :  { %966 = vmatpush3.bf16.msra.mxu0 %v1166_v1  ;;  %1157 = vmatpush3.bf16.msra.mxu1 %v1166_v1  ;;  %v1171_v6 = vld [vmem:[%s1652_s1 + $0x58] sm:$0xff]   ;;  %v1173_v8 = vld [vmem:[%s1652_s1 + $0x60] sm:$0xff]   ;;  %v1175_v10 = vld [vmem:[%s1652_s1 + $0x68] sm:$0xff]  }
   0x4   :  { %967 = vmatprep.subr.bf16.mxu0 %v1167_v2  ;;  %1150 = vmatprep.subr.bf16.mxu1 %v1167_v2  ;;  %v1172_v7 = vld [vmem:[%s1652_s1 + $0x18] sm:$0xff]   ;;  %v1174_v9 = vld [vmem:[%s1652_s1 + $0x20] sm:$0xff]   ;;  %v1176_v13 = vld [vmem:[%s1652_s1 + $0x28] sm:$0xff]  }
   0x5   :  { %v1183_v11 = vld [vmem:[%s1653_s0 + $0x4] ss:$12 sps:$4 sm:$0xff]   ;;  %v1179_v16 = vld [vmem:[%s1652_s1 + $0x78] sm:$0xff]   ;;  %v1181_v19 = vld [vmem:[%s1653_s0] ss:$12 sps:$4 sm:$0xff]  }
   0x6   :  { %v1186_v12 = vld [vmem:[%s1653_s0 + $0x124] ss:$12 sps:$4 sm:$0xff]   ;;  %566 = vmatprep.mubr.bf16.mxu0 %v1183_v11  ;;  %v1180_v17 = vld [vmem:[%s1652_s1 + $0x38] sm:$0xff]   ;;  %v1184_v20 = vld [vmem:[%s1653_s0 + $0x120] ss:$12 sps:$4 sm:$0xff]  }
   0x7   :  { %968 = vmatpush3.bf16.msra.mxu0 %v1168_v3  ;;  %1158 = vmatpush3.bf16.msra.mxu1 %v1168_v3  ;;  %v1177_v14 = vld [vmem:[%s1652_s1 + $0x70] sm:$0xff]   ;;  %v1187_v18 = vld [vmem:[%s1652_s1 + $0x80] sm:$0xff]   ;;  %v1189_v21 = vld [vmem:[%s1653_s0 + $0x1c] ss:$12 sps:$4 sm:$0xff]  }
   0x8   :  { %969 = vmatprep.subr.bf16.mxu0 %v1169_v4  ;;  %1151 = vmatprep.subr.bf16.mxu1 %v1169_v4  ;;  %v1178_v15 = vld [vmem:[%s1652_s1 + $0x30] sm:$0xff]   ;;  %v1188_v22 = vld [vmem:[%s1652_s1 + $0x88] sm:$0xff]   ;;  %v1193_v24 = vld [vmem:[%s1653_s0 + $0x18] ss:$12 sps:$4 sm:$0xff]  }
   0x9   :  { %662 = vmatprep.mubr.bf16.mxu1 %v1186_v12  ;;  %v1191_v23 = vld [vmem:[%s1653_s0 + $0x13c] ss:$12 sps:$4 sm:$0xff]   ;;  %v1195_v25 = vld [vmem:[%s1652_s1 + $0x90] sm:$0xff]   ;;  %v1194_v26 = vld [vmem:[%s1653_s0 + $0x138] ss:$12 sps:$4 sm:$0xff]  }
   0xa   :  { %v1196_v27 = vld [vmem:[%s1652_s1 + $0x98] sm:$0xff]   ;;  %v1197_v28 = vld [vmem:[%s1653_s0 + $0x34] ss:$12 sps:$4 sm:$0xff]   ;;  %v1204_v33 = vld [vmem:[%s1652_s1 + $0xa8] sm:$0xff]  }
   0xb   :  { %970 = vmatpush3.bf16.msra.mxu0 %v1170_v5  ;;  %1159 = vmatpush3.bf16.msra.mxu1 %v1170_v5  ;;  %v1199_v29 = vld [vmem:[%s1653_s0 + $0x154] ss:$12 sps:$4 sm:$0xff]   ;;  %v1201_v31 = vld [vmem:[%s1653_s0 + $0x30] ss:$12 sps:$4 sm:$0xff]   ;;  %v1205_v34 = vld [vmem:[%s1653_s0 + $0x4c] ss:$12 sps:$4 sm:$0xff]  }
   0xc   :  { %971 = vmatprep.subr.bf16.mxu0 %v1171_v6  ;;  %1152 = vmatprep.subr.bf16.mxu1 %v1171_v6  ;;  %v1203_v30 = vld [vmem:[%s1652_s1 + $0xa0] sm:$0xff]   ;;  %v1202_v32 = vld [vmem:[%s1653_s0 + $0x150] ss:$12 sps:$4 sm:$0xff]   ;;  %v1207_v35 = vld [vmem:[%s1653_s0 + $0x16c] ss:$12 sps:$4 sm:$0xff]  }
   0xd   :  { %v1211_v36 = vld [vmem:[%s1652_s1 + $0xb0] sm:$0xff]   ;;  %v1212_v40 = vld [vmem:[%s1652_s1 + $0xb8] sm:$0xff]   ;;  %v1216_v42 = vld [vmem:[%s1653_s0 + $0x60] ss:$12 sps:$4 sm:$0xff]  }
   0xe   :  { %v1209_v37 = vld [vmem:[%s1653_s0 + $0x48] ss:$12 sps:$4 sm:$0xff]   ;;  %v1213_v39 = vld [vmem:[%s1653_s0 + $0x64] ss:$12 sps:$4 sm:$0xff]   ;;  %v1217_v43 = vld [vmem:[%s1653_s0 + $0x20] ss:$12 sps:$4 sm:$0xff]  }
   0xf   :  { %972 = vmatpush3.bf16.msra.mxu0 %v1172_v7  ;;  %1160 = vmatpush3.bf16.msra.mxu1 %v1172_v7  ;;  %v1210_v38 = vld [vmem:[%s1653_s0 + $0x168] ss:$12 sps:$4 sm:$0xff]   ;;  %v1220_v45 = vld [vmem:[%s1653_s0 + $0x38] ss:$12 sps:$4 sm:$0xff]   ;;  %v1222_v47 = vld [vmem:[%s1653_s0 + $0x50] ss:$12 sps:$4 sm:$0xff]  }
  0x10   :  { %973 = vmatprep.subr.bf16.mxu0 %v1173_v8  ;;  %1153 = vmatprep.subr.bf16.mxu1 %v1173_v8  ;;  %v1215_v41 = vld [vmem:[%s1653_s0 + $0x8] ss:$12 sps:$4 sm:$0xff]   ;;  %v1221_v46 = vld [vmem:[%s1653_s0 + $0x78] ss:$12 sps:$4 sm:$0xff]   ;;  %v1226_v50 = vld [vmem:[%s1653_s0 + $0x90] ss:$12 sps:$4 sm:$0xff]  }
  0x11   :  { %v1218_v44 = vld [vmem:[%s1653_s0 + $0x7c] ss:$12 sps:$4 sm:$0xff]   ;;  %v1223_v48 = vld [vmem:[%s1653_s0 + $0x94] ss:$12 sps:$4 sm:$0xff]   ;;  %v1228_v52 = vld [vmem:[%s1653_s0 + $0xac] ss:$12 sps:$4 sm:$0xff]  }
  0x12   :  { %v1225_v49 = vld [vmem:[%s1653_s0 + $0x68] ss:$12 sps:$4 sm:$0xff]   ;;  %v1227_v51 = vld [vmem:[%s1653_s0 + $0x80] ss:$12 sps:$4 sm:$0xff]   ;;  %v1230_v53 = vld [vmem:[%s1653_s0 + $0x98] ss:$12 sps:$4 sm:$0xff]  }
  0x13   :  { %974 = vmatpush3.bf16.msra.mxu0 %v1174_v9  ;;  %1161 = vmatpush3.bf16.msra.mxu1 %v1174_v9  ;;  %v1231_v54 = vld [vmem:[%s1653_s0 + $0xa8] ss:$12 sps:$4 sm:$0xff]   ;;  %v1232_v55 = vld [vmem:[%s1653_s0 + $0xb0] ss:$12 sps:$4 sm:$0xff]   ;;  %v1236_v58 = vld [vmem:[%s1653_s0 + $0xc0] ss:$12 sps:$4 sm:$0xff]  }
  0x14   :  { %975 = vmatprep.subr.bf16.mxu0 %v1175_v10  ;;  %1154 = vmatprep.subr.bf16.mxu1 %v1175_v10  ;;  %v1233_v56 = vld [vmem:[%s1653_s0 + $0xc4] ss:$12 sps:$4 sm:$0xff]   ;;  %v1235_v57 = vld [vmem:[%s1653_s0 + $0xc8] ss:$12 sps:$4 sm:$0xff]   ;;  %v1237_v59 = vld [vmem:[%s1653_s0 + $0xe0] ss:$12 sps:$4 sm:$0xff]  }
  0x15   :  { %v1238_v60 = vld [vmem:[%s1653_s0 + $0xdc] ss:$12 sps:$4 sm:$0xff]   ;;  %v1240_v61 = vld [vmem:[%s1653_s0 + $0xf8] ss:$12 sps:$4 sm:$0xff]   ;;  %v1243_v0 = vld [vmem:[%s1653_s0 + $0xf4] ss:$12 sps:$4 sm:$0xff]  }
  0x16   :  { %v1241_v62 = vld [vmem:[%s1653_s0 + $0xd8] ss:$12 sps:$4 sm:$0xff]   ;;  %v1242_v63 = vld [vmem:[%s1653_s0 + $0x110] ss:$12 sps:$4 sm:$0xff]   ;;  %v1245_v1 = vld [vmem:[%s1653_s0 + $0x128] ss:$12 sps:$4 sm:$0xff]  }
  0x17   :  { %976 = vmatpush3.bf16.msra.mxu0 %v1176_v13  ;;  %1162 = vmatpush3.bf16.msra.mxu1 %v1176_v13  ;;  %v1246_v2 = vld [vmem:[%s1653_s0 + $0xf0] ss:$12 sps:$4 sm:$0xff]   ;;  %v1247_v3 = vld [vmem:[%s1653_s0 + $0x140] ss:$12 sps:$4 sm:$0xff]   ;;  %v1250_v5 = vld [vmem:[%s1653_s0 + $0x158] ss:$12 sps:$4 sm:$0xff]  }
  0x18   :  { %977 = vmatprep.subr.bf16.mxu0 %v1177_v14  ;;  %1155 = vmatprep.subr.bf16.mxu1 %v1177_v14  ;;  %v1248_v4 = vld [vmem:[%s1653_s0 + $0x10c] ss:$12 sps:$4 sm:$0xff]   ;;  %v1251_v6 = vld [vmem:[%s1653_s0 + $0x108] ss:$12 sps:$4 sm:$0xff]   ;;  %v1252_v7 = vld [vmem:[%s1653_s0 + $0x170] ss:$12 sps:$4 sm:$0xff]  }
  0x1b   :  { %978 = vmatpush3.bf16.msra.mxu0 %v1178_v15  ;;  %1163 = vmatpush3.bf16.msra.mxu1 %v1178_v15 }
  0x1c   :  { %979 = vmatprep.subr.bf16.mxu0 %v1179_v16  ;;  %1156 = vmatprep.subr.bf16.mxu1 %v1179_v16 }
  0x1f   :  { %980 = vmatpush3.bf16.msra.mxu0 %v1180_v17  ;;  %1164 = vmatpush3.bf16.msra.mxu1 %v1180_v17 }
  0x20   :  { %1101 = vmatprep.subr.bf16.mxu1 %v1187_v18 }
  0x22   :  { %567 = vmatmul.mubr.bf16.vlgmr.msra.gmra.mrb[0].mxu0 %v1181_v19  ;;  %663 = vmatmul.mubr.bf16.vlgmr.msra.gmra.mrb[0].mxu1 %v1184_v20 }
  0x23   :  { %1102 = vmatpush3.bf16.msra.mxu1 %v1187_v18  ;;  %574 = vmatprep.mubr.bf16.mxu0 %v1189_v21 }
  0x24   :  { %1103 = vmatprep.subr.bf16.mxu1 %v1188_v22  ;;  %670 = vmatprep.mubr.bf16.mxu1 %v1191_v23 }
  0x27   :  { %1104 = vmatpush3.bf16.msra.mxu1 %v1188_v22 }
  0x28   :  { %1105 = vmatprep.subr.bf16.mxu1 %v1195_v25 }
  0x2a   :  { %575 = vmatmul.mubr.bf16.gmra.mrb[4].mxu0 %v1193_v24  ;;  %671 = vmatmul.mubr.bf16.gmra.mrb[4].mxu1 %v1194_v26 }
  0x2b   :  { %1106 = vmatpush3.bf16.msra.mxu1 %v1195_v25  ;;  %582 = vmatprep.mubr.bf16.mxu0 %v1197_v28 }
  0x2c   :  { %1107 = vmatprep.subr.bf16.mxu1 %v1196_v27  ;;  %678 = vmatprep.mubr.bf16.mxu1 %v1199_v29 }
  0x2f   :  { %1108 = vmatpush3.bf16.msra.mxu1 %v1196_v27 }
  0x30   :  { %1109 = vmatprep.subr.bf16.mxu1 %v1203_v30 }
  0x32   :  { %583 = vmatmul.mubr.bf16.gmra.mrb[8].mxu0 %v1201_v31  ;;  %679 = vmatmul.mubr.bf16.gmra.mrb[8].mxu1 %v1202_v32 }
  0x33   :  { %1110 = vmatpush3.bf16.msra.mxu1 %v1203_v30  ;;  %590 = vmatprep.mubr.bf16.mxu0 %v1205_v34 }
  0x34   :  { %1111 = vmatprep.subr.bf16.mxu1 %v1204_v33  ;;  %686 = vmatprep.mubr.bf16.mxu1 %v1207_v35 }
  0x37   :  { %1112 = vmatpush3.bf16.msra.mxu1 %v1204_v33 }
  0x38   :  { %1113 = vmatprep.subr.bf16.mxu1 %v1211_v36 }
  0x3a   :  { %591 = vmatmul.mubr.bf16.gmra.mrb[12].mxu0 %v1209_v37  ;;  %687 = vmatmul.mubr.bf16.gmra.mrb[12].mxu1 %v1210_v38 }
  0x3b   :  { %1114 = vmatpush3.bf16.msra.mxu1 %v1211_v36  ;;  %598 = vmatprep.mubr.bf16.mxu0 %v1213_v39 }
  0x3c   :  { %1115 = vmatprep.subr.bf16.mxu1 %v1212_v40  ;;  %1117 = vmatprep.mubr.bf16.mxu1 %v1215_v41 }
  0x3f   :  { %1116 = vmatpush3.bf16.msra.mxu1 %v1212_v40 }
  0x42   :  { %599 = vmatmul.mubr.bf16.gmra.mrb[16].mxu0 %v1216_v42  ;;  %1118 = vmatmul.mubr.bf16.vlgmr.msra.gmra.mrb[16].mxu1 %v1217_v43 }
  0x43   :  { %606 = vmatprep.mubr.bf16.mxu0 %v1218_v44  ;;  %1121 = vmatprep.mubr.bf16.mxu1 %v1220_v45 }
  0x4a   :  { %607 = vmatmul.mubr.bf16.gmra.mrb[20].mxu0 %v1221_v46  ;;  %1122 = vmatmul.mubr.bf16.gmra.mrb[20].mxu1 %v1222_v47 }
  0x4b   :  { %614 = vmatprep.mubr.bf16.mxu0 %v1223_v48  ;;  %1125 = vmatprep.mubr.bf16.mxu1 %v1225_v49 }
  0x52   :  { %615 = vmatmul.mubr.bf16.gmra.mrb[24].mxu0 %v1226_v50  ;;  %1126 = vmatmul.mubr.bf16.gmra.mrb[24].mxu1 %v1227_v51 }
  0x53   :  { %622 = vmatprep.mubr.bf16.mxu0 %v1228_v52  ;;  %1129 = vmatprep.mubr.bf16.mxu1 %v1230_v53 }
  0x5a   :  { %623 = vmatmul.mubr.bf16.gmra.mrb[28].mxu0 %v1231_v54  ;;  %1130 = vmatmul.mubr.bf16.gmra.mrb[28].mxu1 %v1232_v55 }
  0x5b   :  { %630 = vmatprep.mubr.bf16.mxu0 %v1233_v56  ;;  %1133 = vmatprep.mubr.bf16.mxu1 %v1235_v57  ;;  %v1508_v56 = vld [vmem:[%s1654_s2] ss:$0 sm:$0xff] }
  0x62   :  { %631 = vmatmul.mubr.bf16.gmra.mrb[32].mxu0 %v1236_v58  ;;  %1134 = vmatmul.mubr.bf16.gmra.mrb[32].mxu1 %v1237_v59 }
  0x63   :  { %638 = vmatprep.mubr.bf16.mxu0 %v1238_v60  ;;  %1137 = vmatprep.mubr.bf16.mxu1 %v1240_v61 }
  0x6a   :  { %639 = vmatmul.mubr.bf16.gmra.mrb[36].mxu0 %v1241_v62  ;;  %1138 = vmatmul.mubr.bf16.gmra.mrb[36].mxu1 %v1242_v63 }
  0x6b   :  { %646 = vmatprep.mubr.bf16.mxu0 %v1243_v0  ;;  %1141 = vmatprep.mubr.bf16.mxu1 %v1245_v1 }
  0x72   :  { %647 = vmatmul.mubr.bf16.gmra.mrb[40].mxu0 %v1246_v2  ;;  %1142 = vmatmul.mubr.bf16.gmra.mrb[40].mxu1 %v1247_v3 }
  0x73   :  { %654 = vmatprep.mubr.bf16.mxu0 %v1248_v4  ;;  %1145 = vmatprep.mubr.bf16.mxu1 %v1250_v5 }
  0x7a   :  { %655 = vmatmul.mubr.bf16.gmra.mrb[44].mxu0 %v1251_v6  ;;  %1146 = vmatmul.mubr.bf16.gmra.mrb[44].mxu1 %v1252_v7 }
  0xf5   :  { %v981_v8 = vpop.f32.mrb[0].mxu0  ;;  %v1053_v9 = vpop.f32.mrb[0].mxu1 }
  0xf6   :  { %v982_v10 = vpop.f32.mrb[1].mxu0  ;;  %v1054_v11 = vpop.f32.mrb[1].mxu1 }
  0xf7   :  { %v983_v12 = vadd.f32 %v982_v10, %v981_v8  ;;  %v984_v13 = vpop.f32.mrb[2].mxu0  ;;  %v1489_v14 = vadd.f32 %v1054_v11, %v1053_v9  ;;  %v1056_v15 = vpop.f32.mrb[2].mxu1 }
  0xf8   :  { %v985_v16 = vpop.f32.mrb[3].mxu0  ;;  %v1057_v17 = vpop.f32.mrb[3].mxu1 }
  0xf9   :  { %v986_v18 = vadd.f32 %v985_v16, %v984_v13  ;;  %v1491_v19 = vadd.f32 %v1057_v17, %v1056_v15  ;;  %v569_v60 = vadd.f32 %v983_v12, %v1508_v56 }
  0xfb   :  { %v572_v5 = vadd.f32 %v986_v18, %v1508_v56 }
  0xfd   :  { %v987_v20 = vpop.f32.mrb[4].mxu0  ;;  %v1059_v21 = vpop.f32.mrb[4].mxu1 }
  0xfe   :  { %v988_v22 = vpop.f32.mrb[5].mxu0  ;;  %v1060_v23 = vpop.f32.mrb[5].mxu1 }
  0xff   :  { %v989_v24 = vadd.f32 %v988_v22, %v987_v20  ;;  %v990_v25 = vpop.f32.mrb[6].mxu0  ;;  %v1493_v26 = vadd.f32 %v1060_v23, %v1059_v21  ;;  %v1062_v27 = vpop.f32.mrb[6].mxu1 }
 0x100   :  { %v991_v28 = vpop.f32.mrb[7].mxu0  ;;  %v1063_v29 = vpop.f32.mrb[7].mxu1 }
 0x101   :  { %v992_v30 = vadd.f32 %v991_v28, %v990_v25  ;;  %v1495_v31 = vadd.f32 %v1063_v29, %v1062_v27  ;;  %v577_v57 = vadd.f32 %v989_v24, %v1508_v56 }
 0x103   :  { %v580_v0 = vadd.f32 %v992_v30, %v1508_v56 }
 0x105   :  { %v993_v32 = vpop.f32.mrb[8].mxu0  ;;  %v1065_v33 = vpop.f32.mrb[8].mxu1 }
 0x106   :  { %v994_v34 = vpop.f32.mrb[9].mxu0  ;;  %v1066_v35 = vpop.f32.mrb[9].mxu1 }
 0x107   :  { %v995_v36 = vadd.f32 %v994_v34, %v993_v32  ;;  %v996_v37 = vpop.f32.mrb[10].mxu0  ;;  %v1497_v38 = vadd.f32 %v1066_v35, %v1065_v33  ;;  %v1068_v39 = vpop.f32.mrb[10].mxu1 }
 0x108   :  { %v997_v40 = vpop.f32.mrb[11].mxu0  ;;  %v1069_v41 = vpop.f32.mrb[11].mxu1 }
 0x109   :  { %v998_v42 = vadd.f32 %v997_v40, %v996_v37  ;;  %v1499_v43 = vadd.f32 %v1069_v41, %v1068_v39  ;;  %v585_v15 = vadd.f32 %v995_v36, %v1508_v56 }
 0x10b   :  { %v588_v25 = vadd.f32 %v998_v42, %v1508_v56 }
 0x10d   :  { %v999_v44 = vpop.f32.mrb[12].mxu0  ;;  %v1071_v45 = vpop.f32.mrb[12].mxu1 }
 0x10e   :  { %v1000_v46 = vpop.f32.mrb[13].mxu0  ;;  %v1072_v47 = vpop.f32.mrb[13].mxu1 }
 0x10f   :  { %v1001_v48 = vadd.f32 %v1000_v46, %v999_v44  ;;  %v1002_v49 = vpop.f32.mrb[14].mxu0  ;;  %v1501_v50 = vadd.f32 %v1072_v47, %v1071_v45  ;;  %v1074_v51 = vpop.f32.mrb[14].mxu1 }
 0x110   :  { %v1003_v52 = vpop.f32.mrb[15].mxu0  ;;  %v1075_v53 = vpop.f32.mrb[15].mxu1 }
 0x111   :  { %v1004_v54 = vadd.f32 %v1003_v52, %v1002_v49  ;;  %v1503_v55 = vadd.f32 %v1075_v53, %v1074_v51  ;;  %v593_v11 = vadd.f32 %v1001_v48, %v1508_v56 }
 0x113   :  { %v596_v20 = vadd.f32 %v1004_v54, %v1508_v56 }
 0x115   :  { %v1005_v58 = vpop.f32.mrb[16].mxu0  ;;  %v1119_v59 = vpop.f32.mrb[16].mxu1 }
 0x116   :  { %v738_v61 = vadd.f32 %v1119_v59, %v577_v57  ;;  %v1006_v62 = vpop.f32.mrb[17].mxu0  ;;  %v729_v63 = vpop.f32.mrb[17].mxu1 }
 0x117   :  { %v1007_v1 = vadd.f32 %v1006_v62, %v1005_v58  ;;  %v730_v2 = vadd.f32 %v729_v63, %v569_v60  ;;  %v1008_v3 = vpop.f32.mrb[18].mxu0  ;;  %v1120_v4 = vpop.f32.mrb[18].mxu1 }
 0x118   :  { %858 = vst [vmem:[%s1655_s3 + $0x10] sm:$0xff] %v738_v61  ;;  %v741_v6 = vadd.f32 %v1120_v4, %v580_v0  ;;  %v1009_v7 = vpop.f32.mrb[19].mxu0  ;;  %v732_v8 = vpop.f32.mrb[19].mxu1 }
 0x119   :  { %856 = vst [vmem:[%s1655_s3] sm:$0xff] %v730_v2  ;;  %v1010_v9 = vadd.f32 %v1009_v7, %v1008_v3  ;;  %v733_v10 = vadd.f32 %v732_v8, %v572_v5  ;;  %v601_v36 = vadd.f32 %v1007_v1, %v1508_v56 }
 0x11a   :  { %859 = vst [vmem:[%s1655_s3 + $0x18] sm:$0xff] %v741_v6 }
 0x11b   :  { %857 = vst [vmem:[%s1655_s3 + $0x8] sm:$0xff] %v733_v10  ;;  %v604_v47 = vadd.f32 %v1010_v9, %v1508_v56 }
 0x11d   :  { %v1011_v12 = vpop.f32.mrb[20].mxu0  ;;  %v1123_v13 = vpop.f32.mrb[20].mxu1 }
 0x11e   :  { %v754_v16 = vadd.f32 %v1123_v13, %v593_v11  ;;  %v1012_v17 = vpop.f32.mrb[21].mxu0  ;;  %v745_v18 = vpop.f32.mrb[21].mxu1 }
 0x11f   :  { %v1013_v21 = vadd.f32 %v1012_v17, %v1011_v12  ;;  %v746_v22 = vadd.f32 %v745_v18, %v585_v15  ;;  %v1014_v23 = vpop.f32.mrb[22].mxu0  ;;  %v1124_v24 = vpop.f32.mrb[22].mxu1 }
 0x120   :  { %862 = vst [vmem:[%s1655_s3 + $0x30] sm:$0xff] %v754_v16  ;;  %v757_v27 = vadd.f32 %v1124_v24, %v596_v20  ;;  %v1015_v28 = vpop.f32.mrb[23].mxu0  ;;  %v748_v29 = vpop.f32.mrb[23].mxu1 }
 0x121   :  { %860 = vst [vmem:[%s1655_s3 + $0x20] sm:$0xff] %v746_v22  ;;  %v1016_v30 = vadd.f32 %v1015_v28, %v1014_v23  ;;  %v749_v32 = vadd.f32 %v748_v29, %v588_v25  ;;  %v609_v33 = vadd.f32 %v1013_v21, %v1508_v56 }
 0x122   :  { %863 = vst [vmem:[%s1655_s3 + $0x38] sm:$0xff] %v757_v27 }
 0x123   :  { %861 = vst [vmem:[%s1655_s3 + $0x28] sm:$0xff] %v749_v32  ;;  %v612_v41 = vadd.f32 %v1016_v30, %v1508_v56 }
 0x125   :  { %v1017_v34 = vpop.f32.mrb[24].mxu0  ;;  %v1127_v35 = vpop.f32.mrb[24].mxu1 }
 0x126   :  { %v770_v37 = vadd.f32 %v1127_v35, %v609_v33  ;;  %v1018_v39 = vpop.f32.mrb[25].mxu0  ;;  %v761_v40 = vpop.f32.mrb[25].mxu1 }
 0x127   :  { %v1019_v42 = vadd.f32 %v1018_v39, %v1017_v34  ;;  %v762_v44 = vadd.f32 %v761_v40, %v601_v36  ;;  %v1020_v45 = vpop.f32.mrb[26].mxu0  ;;  %v1128_v46 = vpop.f32.mrb[26].mxu1 }
 0x128   :  { %866 = vst [vmem:[%s1655_s3 + $0x50] sm:$0xff] %v770_v37  ;;  %v773_v48 = vadd.f32 %v1128_v46, %v612_v41  ;;  %v1021_v49 = vpop.f32.mrb[27].mxu0  ;;  %v764_v51 = vpop.f32.mrb[27].mxu1 }
 0x129   :  { %864 = vst [vmem:[%s1655_s3 + $0x40] sm:$0xff] %v762_v44  ;;  %v1022_v52 = vadd.f32 %v1021_v49, %v1020_v45  ;;  %v765_v53 = vadd.f32 %v764_v51, %v604_v47  ;;  %v617_v58 = vadd.f32 %v1019_v42, %v1508_v56  ;;  %v673_v42 = vadd.f32 %v1493_v26, %v1508_v56 }
 0x12a   :  { %867 = vst [vmem:[%s1655_s3 + $0x58] sm:$0xff] %v773_v48  ;;  %v665_v47 = vadd.f32 %v1489_v14, %v1508_v56 }
 0x12b   :  { %865 = vst [vmem:[%s1655_s3 + $0x48] sm:$0xff] %v765_v53  ;;  %v620_v1 = vadd.f32 %v1022_v52, %v1508_v56  ;;  %v676_v52 = vadd.f32 %v1495_v31, %v1508_v56 }
 0x12d   :  { %v1023_v54 = vpop.f32.mrb[28].mxu0  ;;  %v1131_v57 = vpop.f32.mrb[28].mxu1 }
 0x12e   :  { %v1024_v59 = vpop.f32.mrb[29].mxu0  ;;  %v777_v60 = vpop.f32.mrb[29].mxu1 }
 0x12f   :  { %v1025_v61 = vadd.f32 %v1024_v59, %v1023_v54  ;;  %v778_v62 = vadd.f32 %v777_v60, %v617_v58  ;;  %v1026_v63 = vpop.f32.mrb[30].mxu0  ;;  %v1132_v0 = vpop.f32.mrb[30].mxu1  ;;  %v668_v58 = vadd.f32 %v1491_v19, %v1508_v56 }
 0x130   :  { %v1027_v2 = vpop.f32.mrb[31].mxu0  ;;  %v780_v3 = vpop.f32.mrb[31].mxu1 }
 0x131   :  { %v625_v4 = vadd.f32 %v1025_v61, %v1508_v56  ;;  %868 = vst [vmem:[%s1655_s3 + $0x60] sm:$0xff] %v778_v62  ;;  %v1028_v5 = vadd.f32 %v1027_v2, %v1026_v63  ;;  %v781_v6 = vadd.f32 %v780_v3, %v620_v1 }
 0x133   :  { %v786_v7 = vadd.f32 %v1131_v57, %v625_v4  ;;  %v628_v8 = vadd.f32 %v1028_v5, %v1508_v56  ;;  %869 = vst [vmem:[%s1655_s3 + $0x68] sm:$0xff] %v781_v6  ;;  %v681_v4 = vadd.f32 %v1497_v38, %v1508_v56 }
 0x135   :  { %870 = vst [vmem:[%s1655_s3 + $0x70] sm:$0xff] %v786_v7  ;;  %v789_v9 = vadd.f32 %v1132_v0, %v628_v8  ;;  %v1029_v10 = vpop.f32.mrb[32].mxu0  ;;  %v1135_v11 = vpop.f32.mrb[32].mxu1  ;;  %v689_v0 = vadd.f32 %v1501_v50, %v1508_v56  ;;  %v692_v8 = vadd.f32 %v1503_v55, %v1508_v56 }
 0x136   :  { %v1030_v12 = vpop.f32.mrb[33].mxu0  ;;  %v793_v13 = vpop.f32.mrb[33].mxu1 }
 0x137   :  { %871 = vst [vmem:[%s1655_s3 + $0x78] sm:$0xff] %v789_v9  ;;  %v1031_v15 = vadd.f32 %v1030_v12, %v1029_v10  ;;  %v1032_v16 = vpop.f32.mrb[34].mxu0  ;;  %v1136_v17 = vpop.f32.mrb[34].mxu1  ;;  %v684_v12 = vadd.f32 %v1499_v43, %v1508_v56 }
 0x138   :  { %v1033_v18 = vpop.f32.mrb[35].mxu0  ;;  %v796_v20 = vpop.f32.mrb[35].mxu1 }
 0x139   :  { %v633_v21 = vadd.f32 %v1031_v15, %v1508_v56  ;;  %v1034_v22 = vadd.f32 %v1033_v18, %v1032_v16 }
 0x13b   :  { %v794_v23 = vadd.f32 %v793_v13, %v633_v21  ;;  %v636_v24 = vadd.f32 %v1034_v22, %v1508_v56 }
 0x13d   :  { %872 = vst [vmem:[%s1655_s3 + $0x80] sm:$0xff] %v794_v23  ;;  %v797_v25 = vadd.f32 %v796_v20, %v636_v24  ;;  %v1035_v27 = vpop.f32.mrb[36].mxu0  ;;  %v1579_v28 = vpop.f32.mrb[36].mxu1 }
 0x13e   :  { %v1036_v29 = vpop.f32.mrb[37].mxu0  ;;  %v809_v30 = vpop.f32.mrb[37].mxu1 }
 0x13f   :  { %873 = vst [vmem:[%s1655_s3 + $0x88] sm:$0xff] %v797_v25  ;;  %v1037_v32 = vadd.f32 %v1036_v29, %v1035_v27  ;;  %v1038_v33 = vpop.f32.mrb[38].mxu0  ;;  %v1584_v34 = vpop.f32.mrb[38].mxu1 }
 0x140   :  { %v1039_v35 = vpop.f32.mrb[39].mxu0  ;;  %v812_v36 = vpop.f32.mrb[39].mxu1 }
 0x141   :  { %v641_v37 = vadd.f32 %v1037_v32, %v1508_v56  ;;  %v1040_v39 = vadd.f32 %v1039_v35, %v1038_v33 }
 0x143   :  { %v802_v40 = vadd.f32 %v1135_v11, %v641_v37  ;;  %v644_v41 = vadd.f32 %v1040_v39, %v1508_v56 }
 0x145   :  { %874 = vst [vmem:[%s1655_s3 + $0x90] sm:$0xff] %v802_v40  ;;  %v805_v44 = vadd.f32 %v1136_v17, %v644_v41  ;;  %v1041_v45 = vpop.f32.mrb[40].mxu0  ;;  %v1143_v46 = vpop.f32.mrb[40].mxu1 }
 0x146   :  { %v834_v48 = vadd.f32 %v1143_v46, %v673_v42  ;;  %v1042_v49 = vpop.f32.mrb[41].mxu0  ;;  %v825_v51 = vpop.f32.mrb[41].mxu1 }
 0x147   :  { %875 = vst [vmem:[%s1655_s3 + $0x98] sm:$0xff] %v805_v44  ;;  %v1043_v26 = vadd.f32 %v1042_v49, %v1041_v45  ;;  %v826_v53 = vadd.f32 %v825_v51, %v665_v47  ;;  %v1044_v54 = vpop.f32.mrb[42].mxu0  ;;  %v1144_v57 = vpop.f32.mrb[42].mxu1 }
 0x148   :  { %882 = vst [vmem:[%s1655_s3 + $0xd0] sm:$0xff] %v834_v48  ;;  %v837_v14 = vadd.f32 %v1144_v57, %v676_v52  ;;  %v1045_v59 = vpop.f32.mrb[43].mxu0  ;;  %v828_v60 = vpop.f32.mrb[43].mxu1 }
 0x149   :  { %v649_v31 = vadd.f32 %v1043_v26, %v1508_v56  ;;  %880 = vst [vmem:[%s1655_s3 + $0xc0] sm:$0xff] %v826_v53  ;;  %v1046_v61 = vadd.f32 %v1045_v59, %v1044_v54  ;;  %v829_v62 = vadd.f32 %v828_v60, %v668_v58 }
 0x14a   :  { %883 = vst [vmem:[%s1655_s3 + $0xd8] sm:$0xff] %v837_v14 }
 0x14b   :  { %v810_v19 = vadd.f32 %v809_v30, %v649_v31  ;;  %v652_v63 = vadd.f32 %v1046_v61, %v1508_v56  ;;  %881 = vst [vmem:[%s1655_s3 + $0xc8] sm:$0xff] %v829_v62 }
 0x14d   :  { %876 = vst [vmem:[%s1655_s3 + $0xa0] sm:$0xff] %v810_v19  ;;  %v813_v1 = vadd.f32 %v812_v36, %v652_v63  ;;  %v1047_v2 = vpop.f32.mrb[44].mxu0  ;;  %v1147_v3 = vpop.f32.mrb[44].mxu1 }
 0x14e   :  { %v850_v5 = vadd.f32 %v1147_v3, %v689_v0  ;;  %v1048_v6 = vpop.f32.mrb[45].mxu0  ;;  %v841_v7 = vpop.f32.mrb[45].mxu1 }
 0x14f   :  { %877 = vst [vmem:[%s1655_s3 + $0xa8] sm:$0xff] %v813_v1  ;;  %v1049_v50 = vadd.f32 %v1048_v6, %v1047_v2  ;;  %v842_v9 = vadd.f32 %v841_v7, %v681_v4  ;;  %v1050_v10 = vpop.f32.mrb[46].mxu0  ;;  %v1148_v11 = vpop.f32.mrb[46].mxu1 }
 0x150   :  { %886 = vst [vmem:[%s1655_s3 + $0xf0] sm:$0xff] %v850_v5  ;;  %v853_v38 = vadd.f32 %v1148_v11, %v692_v8  ;;  %v1051_v13 = vpop.f32.mrb[47].mxu0  ;;  %v844_v15 = vpop.f32.mrb[47].mxu1 }
 0x151   :  { %v657_v55 = vadd.f32 %v1049_v50, %v1508_v56  ;;  %884 = vst [vmem:[%s1655_s3 + $0xe0] sm:$0xff] %v842_v9  ;;  %v1052_v16 = vadd.f32 %v1051_v13, %v1050_v10  ;;  %v845_v17 = vadd.f32 %v844_v15, %v684_v12 }
 0x152   :  { %887 = vst [vmem:[%s1655_s3 + $0xf8] sm:$0xff] %v853_v38 }
 0x153   :  { %v818_v43 = vadd.f32 %v1579_v28, %v657_v55  ;;  %v660_v18 = vadd.f32 %v1052_v16, %v1508_v56  ;;  %885 = vst [vmem:[%s1655_s3 + $0xe8] sm:$0xff] %v845_v17 }
 0x155   :  { %878 = vst [vmem:[%s1655_s3 + $0xb0] sm:$0xff] %v818_v43  ;;  %v821_v20 = vadd.f32 %v1584_v34, %v660_v18 }
 0x157   :  { %879 = vst [vmem:[%s1655_s3 + $0xb8] sm:$0xff] %v821_v20 }

// kernel: split.32
= control target key start
LH: loop header
LB: loop body
LE: loop exit
PB: predicated region body
PF: predicated region fallthrough
CT: control target
= control target key end

     0   :  { %v258_v3 = vmov 0.0   ;;  %s493_s0 = inlined_call_operand.vmem [shape: f32[1,192,16,16], index: 0, kind: input, shape index: {}]   ;;  %s494_s1 = inlined_call_operand.vmem [shape: bf16[1,64,16,16], index: 1, kind: output, shape index: {}]  }
   0x1   :  { %v194_v0 = vld [vmem:[%s493_s0 + $0x8] sm:$0xff]  ;;  %v225_v32 = vld [vmem:[%s493_s0 + $0x18] sm:$0xff] }
   0x2   :  { %v195_v1 = vld [vmem:[%s493_s0 + $0x28] sm:$0xff]  ;;  %v6_v4 = vpack.c.bf16 %v258_v3, %v194_v0  ;;  %v227_v33 = vld [vmem:[%s493_s0 + $0x38] sm:$0xff]  ;;  %v86_v35 = vpack.c.bf16 %v258_v3, %v225_v32 }
   0x3   :  { %v197_v2 = vld [vmem:[%s493_s0 + $0x48] sm:$0xff]  ;;  %v11_v5 = vpack.c.bf16 %v258_v3, %v195_v1  ;;  %v91_v36 = vpack.c.bf16 %v258_v3, %v227_v33  ;;  %v229_v37 = vld [vmem:[%s493_s0 + $0x58] sm:$0xff] }
   0x4   :  { %v16_v6 = vpack.c.bf16 %v258_v3, %v197_v2  ;;  %v199_v7 = vld [vmem:[%s493_s0 + $0x68] sm:$0xff]  ;;  %7 = vst [vmem:[%s494_s1] sm:$0xf] %v6_v4  ;;  %v231_v38 = vld [vmem:[%s493_s0 + $0x78] sm:$0xff]  ;;  %v96_v40 = vpack.c.bf16 %v258_v3, %v229_v37  ;;  %226 = vst [vmem:[%s494_s1 + $0x4] sm:$0xf] %v86_v35 }
   0x5   :  { %v201_v8 = vld [vmem:[%s493_s0 + $0x88] sm:$0xff]  ;;  %v21_v10 = vpack.c.bf16 %v258_v3, %v199_v7  ;;  %196 = vst [vmem:[%s494_s1 + $0x8] sm:$0xf] %v11_v5  ;;  %v233_v39 = vld [vmem:[%s493_s0 + $0x98] sm:$0xff]  ;;  %v101_v41 = vpack.c.bf16 %v258_v3, %v231_v38  ;;  %228 = vst [vmem:[%s494_s1 + $0xc] sm:$0xf] %v91_v36 }
   0x6   :  { %v203_v9 = vld [vmem:[%s493_s0 + $0xa8] sm:$0xff]  ;;  %v26_v11 = vpack.c.bf16 %v258_v3, %v201_v8  ;;  %198 = vst [vmem:[%s494_s1 + $0x10] sm:$0xf] %v16_v6  ;;  %v106_v42 = vpack.c.bf16 %v258_v3, %v233_v39  ;;  %v235_v43 = vld [vmem:[%s493_s0 + $0xb8] sm:$0xff]  ;;  %230 = vst [vmem:[%s494_s1 + $0x14] sm:$0xf] %v96_v40 }
   0x7   :  { %v31_v12 = vpack.c.bf16 %v258_v3, %v203_v9  ;;  %v205_v13 = vld [vmem:[%s493_s0 + $0xc8] sm:$0xff]  ;;  %200 = vst [vmem:[%s494_s1 + $0x18] sm:$0xf] %v21_v10  ;;  %v237_v44 = vld [vmem:[%s493_s0 + $0xd8] sm:$0xff]  ;;  %v111_v46 = vpack.c.bf16 %v258_v3, %v235_v43  ;;  %232 = vst [vmem:[%s494_s1 + $0x1c] sm:$0xf] %v101_v41 }
   0x8   :  { %v207_v14 = vld [vmem:[%s493_s0 + $0xe8] sm:$0xff]  ;;  %v36_v16 = vpack.c.bf16 %v258_v3, %v205_v13  ;;  %202 = vst [vmem:[%s494_s1 + $0x20] sm:$0xf] %v26_v11  ;;  %v239_v45 = vld [vmem:[%s493_s0 + $0xf8] sm:$0xff]  ;;  %v116_v47 = vpack.c.bf16 %v258_v3, %v237_v44  ;;  %234 = vst [vmem:[%s494_s1 + $0x24] sm:$0xf] %v106_v42 }
   0x9   :  { %v209_v15 = vld [vmem:[%s493_s0 + $0x108] sm:$0xff]  ;;  %v41_v17 = vpack.c.bf16 %v258_v3, %v207_v14  ;;  %204 = vst [vmem:[%s494_s1 + $0x28] sm:$0xf] %v31_v12  ;;  %v121_v48 = vpack.c.bf16 %v258_v3, %v239_v45  ;;  %v241_v49 = vld [vmem:[%s493_s0 + $0x118] sm:$0xff]  ;;  %236 = vst [vmem:[%s494_s1 + $0x2c] sm:$0xf] %v111_v46 }
   0xa   :  { %v46_v18 = vpack.c.bf16 %v258_v3, %v209_v15  ;;  %v211_v19 = vld [vmem:[%s493_s0 + $0x128] sm:$0xff]  ;;  %206 = vst [vmem:[%s494_s1 + $0x30] sm:$0xf] %v36_v16  ;;  %v243_v50 = vld [vmem:[%s493_s0 + $0x138] sm:$0xff]  ;;  %v126_v52 = vpack.c.bf16 %v258_v3, %v241_v49  ;;  %238 = vst [vmem:[%s494_s1 + $0x34] sm:$0xf] %v116_v47 }
   0xb   :  { %v213_v20 = vld [vmem:[%s493_s0 + $0x148] sm:$0xff]  ;;  %v51_v22 = vpack.c.bf16 %v258_v3, %v211_v19  ;;  %208 = vst [vmem:[%s494_s1 + $0x38] sm:$0xf] %v41_v17  ;;  %v245_v51 = vld [vmem:[%s493_s0 + $0x158] sm:$0xff]  ;;  %v131_v53 = vpack.c.bf16 %v258_v3, %v243_v50  ;;  %240 = vst [vmem:[%s494_s1 + $0x3c] sm:$0xf] %v121_v48 }
   0xc   :  { %v215_v21 = vld [vmem:[%s493_s0 + $0x168] sm:$0xff]  ;;  %v56_v23 = vpack.c.bf16 %v258_v3, %v213_v20  ;;  %210 = vst [vmem:[%s494_s1 + $0x40] sm:$0xf] %v46_v18  ;;  %v136_v54 = vpack.c.bf16 %v258_v3, %v245_v51  ;;  %v247_v55 = vld [vmem:[%s493_s0 + $0x178] sm:$0xff]  ;;  %242 = vst [vmem:[%s494_s1 + $0x44] sm:$0xf] %v126_v52 }
   0xd   :  { %v61_v24 = vpack.c.bf16 %v258_v3, %v215_v21  ;;  %v217_v25 = vld [vmem:[%s493_s0 + $0x188] sm:$0xff]  ;;  %212 = vst [vmem:[%s494_s1 + $0x48] sm:$0xf] %v51_v22  ;;  %v249_v56 = vld [vmem:[%s493_s0 + $0x198] sm:$0xff]  ;;  %v141_v58 = vpack.c.bf16 %v258_v3, %v247_v55  ;;  %244 = vst [vmem:[%s494_s1 + $0x4c] sm:$0xf] %v131_v53 }
   0xe   :  { %v219_v26 = vld [vmem:[%s493_s0 + $0x1a8] sm:$0xff]  ;;  %v66_v28 = vpack.c.bf16 %v258_v3, %v217_v25  ;;  %214 = vst [vmem:[%s494_s1 + $0x50] sm:$0xf] %v56_v23  ;;  %v251_v57 = vld [vmem:[%s493_s0 + $0x1b8] sm:$0xff]  ;;  %v146_v59 = vpack.c.bf16 %v258_v3, %v249_v56  ;;  %246 = vst [vmem:[%s494_s1 + $0x54] sm:$0xf] %v136_v54 }
   0xf   :  { %v221_v27 = vld [vmem:[%s493_s0 + $0x1c8] sm:$0xff]  ;;  %v71_v29 = vpack.c.bf16 %v258_v3, %v219_v26  ;;  %216 = vst [vmem:[%s494_s1 + $0x58] sm:$0xf] %v61_v24  ;;  %v151_v60 = vpack.c.bf16 %v258_v3, %v251_v57  ;;  %v253_v61 = vld [vmem:[%s493_s0 + $0x1d8] sm:$0xff]  ;;  %248 = vst [vmem:[%s494_s1 + $0x5c] sm:$0xf] %v141_v58 }
  0x10   :  { %v76_v30 = vpack.c.bf16 %v258_v3, %v221_v27  ;;  %v223_v31 = vld [vmem:[%s493_s0 + $0x1e8] sm:$0xff]  ;;  %218 = vst [vmem:[%s494_s1 + $0x60] sm:$0xf] %v66_v28  ;;  %v255_v62 = vld [vmem:[%s493_s0 + $0x1f8] sm:$0xff]  ;;  %v156_v63 = vpack.c.bf16 %v258_v3, %v253_v61  ;;  %250 = vst [vmem:[%s494_s1 + $0x64] sm:$0xf] %v146_v59 }
  0x11   :  { %v81_v34 = vpack.c.bf16 %v258_v3, %v223_v31  ;;  %220 = vst [vmem:[%s494_s1 + $0x68] sm:$0xf] %v71_v29  ;;  %v161_v0 = vpack.c.bf16 %v258_v3, %v255_v62  ;;  %252 = vst [vmem:[%s494_s1 + $0x6c] sm:$0xf] %v151_v60 }
  0x12   :  { %222 = vst [vmem:[%s494_s1 + $0x70] sm:$0xf] %v76_v30  ;;  %254 = vst [vmem:[%s494_s1 + $0x74] sm:$0xf] %v156_v63 }
  0x13   :  { %224 = vst [vmem:[%s494_s1 + $0x78] sm:$0xf] %v81_v34  ;;  %256 = vst [vmem:[%s494_s1 + $0x7c] sm:$0xf] %v161_v0 }

// kernel: net_forward.162
= control target key start
LH: loop header
LB: loop body
LE: loop exit
PB: predicated region body
PF: predicated region fallthrough
CT: control target
= control target key end

     0   :  { %v988_v1 = vmov 0   ;;  %v81_v49 = vlaneseq  ;;  %s1708_s1 = inlined_call_operand.vmem [shape: bf16[128,512], index: 1, kind: input, shape index: {}]   ;;  %s1709_s0 = inlined_call_operand.vmem [shape: bf16[256,128], index: 0, kind: input, shape index: {}]   ;;  %s1710_s2 = inlined_call_operand.vmem [shape: f32[1,512], index: 2, kind: input, shape index: {}]   ;;  %s1711_s3 = inlined_call_operand.vmem [shape: f32[256,512], index: 3, kind: output, shape index: {}]  }
   0x1   :  { %v924_v0 = vld [vmem:[%s1708_s1 + $0x4] ss:$16 sps:$4 sm:$0xff]   ;;  %389 = vmatprep.mubr.bf16.mxu0 %v988_v1  ;;  %582 = vmatprep.mubr.bf16.mxu1 %v988_v1  ;;  %v926_v2 = vld [vmem:[%s1708_s1 + $0xc] ss:$16 sps:$4 sm:$0xff]   ;;  %v928_v3 = vld [vmem:[%s1708_s1] ss:$16 sps:$4 sm:$0xff]  }
   0x2   :  { %357 = vmatprep.subr.bf16.mxu0 %v924_v0  ;;  %v929_v4 = vld [vmem:[%s1708_s1 + $0x8] ss:$16 sps:$4 sm:$0xff]   ;;  %550 = vmatprep.subr.bf16.mxu1 %v926_v2  ;;  %v930_v5 = vld [vmem:[%s1708_s1 + $0x24] ss:$16 sps:$4 sm:$0xff]   ;;  %v932_v6 = vld [vmem:[%s1708_s1 + $0x2c] ss:$16 sps:$4 sm:$0xff]  }
   0x3   :  { %358 = vmatpush1.bf16.msra.mxu0 %v928_v3  ;;  %551 = vmatpush1.bf16.msra.mxu1 %v929_v4  ;;  %v934_v7 = vld [vmem:[%s1708_s1 + $0x20] ss:$16 sps:$4 sm:$0xff]   ;;  %v935_v8 = vld [vmem:[%s1708_s1 + $0x28] ss:$16 sps:$4 sm:$0xff]   ;;  %v936_v9 = vld [vmem:[%s1708_s1 + $0x44] ss:$16 sps:$4 sm:$0xff]  }
   0x4   :  { %359 = vmatprep.subr.bf16.mxu0 %v930_v5  ;;  %552 = vmatprep.subr.bf16.mxu1 %v932_v6  ;;  %v938_v10 = vld [vmem:[%s1708_s1 + $0x4c] ss:$16 sps:$4 sm:$0xff]   ;;  %v940_v11 = vld [vmem:[%s1708_s1 + $0x40] ss:$16 sps:$4 sm:$0xff]   ;;  %v941_v12 = vld [vmem:[%s1708_s1 + $0x48] ss:$16 sps:$4 sm:$0xff]  }
   0x5   :  { %v942_v13 = vld [vmem:[%s1708_s1 + $0x64] ss:$16 sps:$4 sm:$0xff]   ;;  %v944_v14 = vld [vmem:[%s1708_s1 + $0x6c] ss:$16 sps:$4 sm:$0xff]   ;;  %v946_v15 = vld [vmem:[%s1708_s1 + $0x60] ss:$16 sps:$4 sm:$0xff]  }
   0x6   :  { %v947_v16 = vld [vmem:[%s1708_s1 + $0x68] ss:$16 sps:$4 sm:$0xff]   ;;  %v948_v17 = vld [vmem:[%s1708_s1 + $0x84] ss:$16 sps:$4 sm:$0xff]   ;;  %v950_v18 = vld [vmem:[%s1708_s1 + $0x8c] ss:$16 sps:$4 sm:$0xff]  }
   0x7   :  { %360 = vmatpush1.bf16.msra.mxu0 %v934_v7  ;;  %553 = vmatpush1.bf16.msra.mxu1 %v935_v8  ;;  %v952_v19 = vld [vmem:[%s1708_s1 + $0x80] ss:$16 sps:$4 sm:$0xff]   ;;  %v953_v20 = vld [vmem:[%s1708_s1 + $0x88] ss:$16 sps:$4 sm:$0xff]   ;;  %v954_v21 = vld [vmem:[%s1708_s1 + $0xa4] ss:$16 sps:$4 sm:$0xff]  }
   0x8   :  { %361 = vmatprep.subr.bf16.mxu0 %v936_v9  ;;  %554 = vmatprep.subr.bf16.mxu1 %v938_v10  ;;  %v956_v22 = vld [vmem:[%s1708_s1 + $0xac] ss:$16 sps:$4 sm:$0xff]   ;;  %v958_v23 = vld [vmem:[%s1708_s1 + $0xa0] ss:$16 sps:$4 sm:$0xff]   ;;  %v959_v24 = vld [vmem:[%s1708_s1 + $0xa8] ss:$16 sps:$4 sm:$0xff]  }
   0x9   :  { %v960_v25 = vld [vmem:[%s1708_s1 + $0xc4] ss:$16 sps:$4 sm:$0xff]   ;;  %v962_v26 = vld [vmem:[%s1708_s1 + $0xcc] ss:$16 sps:$4 sm:$0xff]   ;;  %v964_v27 = vld [vmem:[%s1708_s1 + $0xc0] ss:$16 sps:$4 sm:$0xff]  }
   0xa   :  { %v965_v28 = vld [vmem:[%s1708_s1 + $0xc8] ss:$16 sps:$4 sm:$0xff]   ;;  %v966_v29 = vld [vmem:[%s1708_s1 + $0xe4] ss:$16 sps:$4 sm:$0xff]   ;;  %v968_v30 = vld [vmem:[%s1708_s1 + $0xec] ss:$16 sps:$4 sm:$0xff]  }
   0xb   :  { %362 = vmatpush1.bf16.msra.mxu0 %v940_v11  ;;  %555 = vmatpush1.bf16.msra.mxu1 %v941_v12  ;;  %v970_v31 = vld [vmem:[%s1708_s1 + $0xe0] ss:$16 sps:$4 sm:$0xff]   ;;  %v971_v32 = vld [vmem:[%s1708_s1 + $0xe8] ss:$16 sps:$4 sm:$0xff]   ;;  %v82_v50 = vshrl.u32 %v81_v49, 7 }
   0xc   :  { %363 = vmatprep.subr.bf16.mxu0 %v942_v13  ;;  %556 = vmatprep.subr.bf16.mxu1 %v944_v14  ;;  %v972_v33 = vld [vmem:[%s1709_s0] sm:$0xff]   ;;  %v973_v34 = vld [vmem:[%s1709_s0 + $0x8] sm:$0xff]   ;;  %v974_v35 = vld [vmem:[%s1709_s0 + $0x10] sm:$0xff]  }
   0xd   :  { %v975_v36 = vld [vmem:[%s1709_s0 + $0x18] sm:$0xff]   ;;  %v976_v37 = vld [vmem:[%s1709_s0 + $0x20] sm:$0xff]   ;;  %v977_v38 = vld [vmem:[%s1709_s0 + $0x28] sm:$0xff]   ;;  %v83_v51 = vsub.s32 0, %v82_v50  ;;  %v91_v52 = vsub.s32 2, %v82_v50  ;;  %v87_v54 = vsub.s32 1, %v82_v50 }
   0xe   :  { %v978_v39 = vld [vmem:[%s1709_s0 + $0x30] sm:$0xff]   ;;  %v979_v40 = vld [vmem:[%s1709_s0 + $0x38] sm:$0xff]   ;;  %v980_v41 = vld [vmem:[%s1709_s0 + $0x40] sm:$0xff]   ;;  %v95_v55 = vsub.s32 3, %v82_v50 }
   0xf   :  { %364 = vmatpush1.bf16.msra.mxu0 %v946_v15  ;;  %557 = vmatpush1.bf16.msra.mxu1 %v947_v16  ;;  %v981_v42 = vld [vmem:[%s1709_s0 + $0x48] sm:$0xff]   ;;  %v982_v43 = vld [vmem:[%s1709_s0 + $0x50] sm:$0xff]   ;;  %v983_v44 = vld [vmem:[%s1709_s0 + $0x58] sm:$0xff]  }
  0x10   :  { %365 = vmatprep.subr.bf16.mxu0 %v948_v17  ;;  %558 = vmatprep.subr.bf16.mxu1 %v950_v18  ;;  %v984_v45 = vld [vmem:[%s1709_s0 + $0x60] sm:$0xff]   ;;  %v985_v46 = vld [vmem:[%s1709_s0 + $0x68] sm:$0xff]   ;;  %v986_v47 = vld [vmem:[%s1709_s0 + $0x70] sm:$0xff]  }
  0x11   :  { %v987_v48 = vld [vmem:[%s1709_s0 + $0x78] sm:$0xff]   ;;  %v79_v53 = vld [vmem:[%s1710_s2] sm:$0xf] }
  0x12   :  { %v1188_v56 = vrot.slane %v79_v53, %v83_v51  ;;  %v1190_v57 = vrot.slane %v79_v53, %v91_v52  ;;  %v1192_v58 = vrot.slane %v79_v53, %v87_v54  ;;  %v1194_v59 = vrot.slane %v79_v53, %v95_v55 }
  0x13   :  { %366 = vmatpush1.bf16.msra.mxu0 %v952_v19  ;;  %559 = vmatpush1.bf16.msra.mxu1 %v953_v20 }
  0x14   :  { %367 = vmatprep.subr.bf16.mxu0 %v954_v21  ;;  %560 = vmatprep.subr.bf16.mxu1 %v956_v22 }
  0x17   :  { %368 = vmatpush1.bf16.msra.mxu0 %v958_v23  ;;  %561 = vmatpush1.bf16.msra.mxu1 %v959_v24 }
  0x18   :  { %369 = vmatprep.subr.bf16.mxu0 %v960_v25  ;;  %562 = vmatprep.subr.bf16.mxu1 %v962_v26 }
  0x1b   :  { %370 = vmatpush1.bf16.msra.mxu0 %v964_v27  ;;  %563 = vmatpush1.bf16.msra.mxu1 %v965_v28 }
  0x1c   :  { %371 = vmatprep.subr.bf16.mxu0 %v966_v29  ;;  %564 = vmatprep.subr.bf16.mxu1 %v968_v30 }
  0x1f   :  { %372 = vmatpush1.bf16.msra.mxu0 %v970_v31  ;;  %565 = vmatpush1.bf16.msra.mxu1 %v971_v32 }
  0x22   :  { %390 = vmatmul.mubr.bf16.vlgmr.msra.gmra.mrb[0].mxu0 %v972_v33  ;;  %583 = vmatmul.mubr.bf16.vlgmr.msra.gmra.mrb[0].mxu1 %v972_v33 }
  0x23   :  { %399 = vmatprep.mubr.bf16.mxu0 %v988_v1  ;;  %592 = vmatprep.mubr.bf16.mxu1 %v988_v1 }
  0x2a   :  { %400 = vmatmul.mubr.bf16.gmra.mrb[4].mxu0 %v973_v34  ;;  %593 = vmatmul.mubr.bf16.gmra.mrb[4].mxu1 %v973_v34 }
  0x2b   :  { %409 = vmatprep.mubr.bf16.mxu0 %v988_v1  ;;  %602 = vmatprep.mubr.bf16.mxu1 %v988_v1 }
  0x32   :  { %410 = vmatmul.mubr.bf16.gmra.mrb[8].mxu0 %v974_v35  ;;  %603 = vmatmul.mubr.bf16.gmra.mrb[8].mxu1 %v974_v35 }
  0x33   :  { %419 = vmatprep.mubr.bf16.mxu0 %v988_v1  ;;  %612 = vmatprep.mubr.bf16.mxu1 %v988_v1 }
  0x3a   :  { %420 = vmatmul.mubr.bf16.gmra.mrb[12].mxu0 %v975_v36  ;;  %613 = vmatmul.mubr.bf16.gmra.mrb[12].mxu1 %v975_v36 }
  0x3b   :  { %429 = vmatprep.mubr.bf16.mxu0 %v988_v1  ;;  %622 = vmatprep.mubr.bf16.mxu1 %v988_v1 }
  0x42   :  { %430 = vmatmul.mubr.bf16.gmra.mrb[16].mxu0 %v976_v37  ;;  %623 = vmatmul.mubr.bf16.gmra.mrb[16].mxu1 %v976_v37 }
  0x43   :  { %439 = vmatprep.mubr.bf16.mxu0 %v988_v1  ;;  %632 = vmatprep.mubr.bf16.mxu1 %v988_v1 }
  0x4a   :  { %440 = vmatmul.mubr.bf16.gmra.mrb[20].mxu0 %v977_v38  ;;  %633 = vmatmul.mubr.bf16.gmra.mrb[20].mxu1 %v977_v38 }
  0x4b   :  { %449 = vmatprep.mubr.bf16.mxu0 %v988_v1  ;;  %642 = vmatprep.mubr.bf16.mxu1 %v988_v1 }
  0x52   :  { %450 = vmatmul.mubr.bf16.gmra.mrb[24].mxu0 %v978_v39  ;;  %643 = vmatmul.mubr.bf16.gmra.mrb[24].mxu1 %v978_v39 }
  0x53   :  { %459 = vmatprep.mubr.bf16.mxu0 %v988_v1  ;;  %652 = vmatprep.mubr.bf16.mxu1 %v988_v1 }
  0x5a   :  { %460 = vmatmul.mubr.bf16.gmra.mrb[28].mxu0 %v979_v40  ;;  %653 = vmatmul.mubr.bf16.gmra.mrb[28].mxu1 %v979_v40 }
  0x5b   :  { %469 = vmatprep.mubr.bf16.mxu0 %v988_v1  ;;  %662 = vmatprep.mubr.bf16.mxu1 %v988_v1 }
  0x62   :  { %470 = vmatmul.mubr.bf16.gmra.mrb[32].mxu0 %v980_v41  ;;  %663 = vmatmul.mubr.bf16.gmra.mrb[32].mxu1 %v980_v41 }
  0x63   :  { %479 = vmatprep.mubr.bf16.mxu0 %v988_v1  ;;  %672 = vmatprep.mubr.bf16.mxu1 %v988_v1 }
  0x6a   :  { %480 = vmatmul.mubr.bf16.gmra.mrb[36].mxu0 %v981_v42  ;;  %673 = vmatmul.mubr.bf16.gmra.mrb[36].mxu1 %v981_v42 }
  0x6b   :  { %489 = vmatprep.mubr.bf16.mxu0 %v988_v1  ;;  %682 = vmatprep.mubr.bf16.mxu1 %v988_v1 }
  0x72   :  { %490 = vmatmul.mubr.bf16.gmra.mrb[40].mxu0 %v982_v43  ;;  %683 = vmatmul.mubr.bf16.gmra.mrb[40].mxu1 %v982_v43 }
  0x73   :  { %499 = vmatprep.mubr.bf16.mxu0 %v988_v1  ;;  %692 = vmatprep.mubr.bf16.mxu1 %v988_v1 }
  0x7a   :  { %500 = vmatmul.mubr.bf16.gmra.mrb[44].mxu0 %v983_v44  ;;  %693 = vmatmul.mubr.bf16.gmra.mrb[44].mxu1 %v983_v44 }
  0x7b   :  { %509 = vmatprep.mubr.bf16.mxu0 %v988_v1  ;;  %702 = vmatprep.mubr.bf16.mxu1 %v988_v1 }
  0x82   :  { %510 = vmatmul.mubr.bf16.gmra.mrb[48].mxu0 %v984_v45  ;;  %703 = vmatmul.mubr.bf16.gmra.mrb[48].mxu1 %v984_v45 }
  0x83   :  { %519 = vmatprep.mubr.bf16.mxu0 %v988_v1  ;;  %712 = vmatprep.mubr.bf16.mxu1 %v988_v1 }
  0x8a   :  { %520 = vmatmul.mubr.bf16.gmra.mrb[52].mxu0 %v985_v46  ;;  %713 = vmatmul.mubr.bf16.gmra.mrb[52].mxu1 %v985_v46 }
  0x8b   :  { %529 = vmatprep.mubr.bf16.mxu0 %v988_v1  ;;  %722 = vmatprep.mubr.bf16.mxu1 %v988_v1 }
  0x92   :  { %530 = vmatmul.mubr.bf16.gmra.mrb[56].mxu0 %v986_v47  ;;  %723 = vmatmul.mubr.bf16.gmra.mrb[56].mxu1 %v986_v47 }
  0x93   :  { %539 = vmatprep.mubr.bf16.mxu0 %v988_v1  ;;  %732 = vmatprep.mubr.bf16.mxu1 %v988_v1 }
  0x9a   :  { %540 = vmatmul.mubr.bf16.gmra.mrb[60].mxu0 %v987_v48  ;;  %733 = vmatmul.mubr.bf16.gmra.mrb[60].mxu1 %v987_v48 }
  0xf5   :  { %v391_v60 = vpop.f32.mrb[0].mxu0  ;;  %v584_v61 = vpop.f32.mrb[0].mxu1 }
  0xf6   :  { %v392_v62 = vadd.f32 %v391_v60, %v1188_v56  ;;  %v585_v63 = vadd.f32 %v584_v61, %v1190_v57  ;;  %v393_v0 = vpop.f32.mrb[1].mxu0  ;;  %v586_v1 = vpop.f32.mrb[1].mxu1 }
  0xf7   :  { %v394_v2 = vadd.f32 %v393_v0, %v1192_v58  ;;  %v587_v3 = vadd.f32 %v586_v1, %v1194_v59  ;;  %v395_v4 = vpop.f32.mrb[2].mxu0  ;;  %v588_v5 = vpop.f32.mrb[2].mxu1 }
  0xf8   :  { %743 = vst [vmem:[%s1711_s3] sm:$0xff] %v392_v62  ;;  %745 = vst [vmem:[%s1711_s3 + $0x10] sm:$0xff] %v585_v63  ;;  %v396_v6 = vadd.f32 %v395_v4, %v1188_v56  ;;  %v589_v7 = vadd.f32 %v588_v5, %v1190_v57  ;;  %v397_v8 = vpop.f32.mrb[3].mxu0  ;;  %v590_v9 = vpop.f32.mrb[3].mxu1 }
  0xf9   :  { %744 = vst [vmem:[%s1711_s3 + $0x8] sm:$0xff] %v394_v2  ;;  %746 = vst [vmem:[%s1711_s3 + $0x18] sm:$0xff] %v587_v3  ;;  %v398_v10 = vadd.f32 %v397_v8, %v1192_v58  ;;  %v591_v11 = vadd.f32 %v590_v9, %v1194_v59 }
  0xfa   :  { %747 = vst [vmem:[%s1711_s3 + $0x20] sm:$0xff] %v396_v6  ;;  %749 = vst [vmem:[%s1711_s3 + $0x30] sm:$0xff] %v589_v7 }
  0xfb   :  { %748 = vst [vmem:[%s1711_s3 + $0x28] sm:$0xff] %v398_v10  ;;  %750 = vst [vmem:[%s1711_s3 + $0x38] sm:$0xff] %v591_v11 }
  0xfd   :  { %v401_v12 = vpop.f32.mrb[4].mxu0  ;;  %v594_v13 = vpop.f32.mrb[4].mxu1 }
  0xfe   :  { %v402_v14 = vadd.f32 %v401_v12, %v1188_v56  ;;  %v595_v15 = vadd.f32 %v594_v13, %v1190_v57  ;;  %v403_v16 = vpop.f32.mrb[5].mxu0  ;;  %v596_v17 = vpop.f32.mrb[5].mxu1 }
  0xff   :  { %v404_v18 = vadd.f32 %v403_v16, %v1192_v58  ;;  %v597_v19 = vadd.f32 %v596_v17, %v1194_v59  ;;  %v405_v20 = vpop.f32.mrb[6].mxu0  ;;  %v598_v21 = vpop.f32.mrb[6].mxu1 }
 0x100   :  { %751 = vst [vmem:[%s1711_s3 + $0x40] sm:$0xff] %v402_v14  ;;  %753 = vst [vmem:[%s1711_s3 + $0x50] sm:$0xff] %v595_v15  ;;  %v406_v22 = vadd.f32 %v405_v20, %v1188_v56  ;;  %v599_v23 = vadd.f32 %v598_v21, %v1190_v57  ;;  %v407_v24 = vpop.f32.mrb[7].mxu0  ;;  %v600_v25 = vpop.f32.mrb[7].mxu1 }
 0x101   :  { %752 = vst [vmem:[%s1711_s3 + $0x48] sm:$0xff] %v404_v18  ;;  %754 = vst [vmem:[%s1711_s3 + $0x58] sm:$0xff] %v597_v19  ;;  %v408_v26 = vadd.f32 %v407_v24, %v1192_v58  ;;  %v601_v27 = vadd.f32 %v600_v25, %v1194_v59 }
 0x102   :  { %755 = vst [vmem:[%s1711_s3 + $0x60] sm:$0xff] %v406_v22  ;;  %757 = vst [vmem:[%s1711_s3 + $0x70] sm:$0xff] %v599_v23 }
 0x103   :  { %756 = vst [vmem:[%s1711_s3 + $0x68] sm:$0xff] %v408_v26  ;;  %758 = vst [vmem:[%s1711_s3 + $0x78] sm:$0xff] %v601_v27 }
 0x105   :  { %v411_v28 = vpop.f32.mrb[8].mxu0  ;;  %v604_v29 = vpop.f32.mrb[8].mxu1 }
 0x106   :  { %v412_v30 = vadd.f32 %v411_v28, %v1188_v56  ;;  %v605_v31 = vadd.f32 %v604_v29, %v1190_v57  ;;  %v413_v32 = vpop.f32.mrb[9].mxu0  ;;  %v606_v33 = vpop.f32.mrb[9].mxu1 }
 0x107   :  { %v414_v34 = vadd.f32 %v413_v32, %v1192_v58  ;;  %v607_v35 = vadd.f32 %v606_v33, %v1194_v59  ;;  %v415_v36 = vpop.f32.mrb[10].mxu0  ;;  %v608_v37 = vpop.f32.mrb[10].mxu1 }
 0x108   :  { %759 = vst [vmem:[%s1711_s3 + $0x80] sm:$0xff] %v412_v30  ;;  %761 = vst [vmem:[%s1711_s3 + $0x90] sm:$0xff] %v605_v31  ;;  %v416_v38 = vadd.f32 %v415_v36, %v1188_v56  ;;  %v609_v39 = vadd.f32 %v608_v37, %v1190_v57  ;;  %v417_v40 = vpop.f32.mrb[11].mxu0  ;;  %v610_v41 = vpop.f32.mrb[11].mxu1 }
 0x109   :  { %760 = vst [vmem:[%s1711_s3 + $0x88] sm:$0xff] %v414_v34  ;;  %762 = vst [vmem:[%s1711_s3 + $0x98] sm:$0xff] %v607_v35  ;;  %v418_v42 = vadd.f32 %v417_v40, %v1192_v58  ;;  %v611_v43 = vadd.f32 %v610_v41, %v1194_v59 }
 0x10a   :  { %763 = vst [vmem:[%s1711_s3 + $0xa0] sm:$0xff] %v416_v38  ;;  %765 = vst [vmem:[%s1711_s3 + $0xb0] sm:$0xff] %v609_v39 }
 0x10b   :  { %764 = vst [vmem:[%s1711_s3 + $0xa8] sm:$0xff] %v418_v42  ;;  %766 = vst [vmem:[%s1711_s3 + $0xb8] sm:$0xff] %v611_v43 }
 0x10d   :  { %v421_v44 = vpop.f32.mrb[12].mxu0  ;;  %v614_v45 = vpop.f32.mrb[12].mxu1 }
 0x10e   :  { %v422_v46 = vadd.f32 %v421_v44, %v1188_v56  ;;  %v615_v47 = vadd.f32 %v614_v45, %v1190_v57  ;;  %v423_v48 = vpop.f32.mrb[13].mxu0  ;;  %v616_v49 = vpop.f32.mrb[13].mxu1 }
 0x10f   :  { %v424_v50 = vadd.f32 %v423_v48, %v1192_v58  ;;  %v617_v51 = vadd.f32 %v616_v49, %v1194_v59  ;;  %v425_v52 = vpop.f32.mrb[14].mxu0  ;;  %v618_v53 = vpop.f32.mrb[14].mxu1 }
 0x110   :  { %767 = vst [vmem:[%s1711_s3 + $0xc0] sm:$0xff] %v422_v46  ;;  %769 = vst [vmem:[%s1711_s3 + $0xd0] sm:$0xff] %v615_v47  ;;  %v426_v54 = vadd.f32 %v425_v52, %v1188_v56  ;;  %v619_v55 = vadd.f32 %v618_v53, %v1190_v57  ;;  %v427_v60 = vpop.f32.mrb[15].mxu0  ;;  %v620_v61 = vpop.f32.mrb[15].mxu1 }
 0x111   :  { %768 = vst [vmem:[%s1711_s3 + $0xc8] sm:$0xff] %v424_v50  ;;  %770 = vst [vmem:[%s1711_s3 + $0xd8] sm:$0xff] %v617_v51  ;;  %v428_v62 = vadd.f32 %v427_v60, %v1192_v58  ;;  %v621_v63 = vadd.f32 %v620_v61, %v1194_v59 }
 0x112   :  { %771 = vst [vmem:[%s1711_s3 + $0xe0] sm:$0xff] %v426_v54  ;;  %773 = vst [vmem:[%s1711_s3 + $0xf0] sm:$0xff] %v619_v55 }
 0x113   :  { %772 = vst [vmem:[%s1711_s3 + $0xe8] sm:$0xff] %v428_v62  ;;  %774 = vst [vmem:[%s1711_s3 + $0xf8] sm:$0xff] %v621_v63 }
 0x115   :  { %v431_v0 = vpop.f32.mrb[16].mxu0  ;;  %v624_v1 = vpop.f32.mrb[16].mxu1 }
 0x116   :  { %v432_v2 = vadd.f32 %v431_v0, %v1188_v56  ;;  %v625_v3 = vadd.f32 %v624_v1, %v1190_v57  ;;  %v433_v4 = vpop.f32.mrb[17].mxu0  ;;  %v626_v5 = vpop.f32.mrb[17].mxu1 }
 0x117   :  { %v434_v6 = vadd.f32 %v433_v4, %v1192_v58  ;;  %v627_v7 = vadd.f32 %v626_v5, %v1194_v59  ;;  %v435_v8 = vpop.f32.mrb[18].mxu0  ;;  %v628_v9 = vpop.f32.mrb[18].mxu1 }
 0x118   :  { %775 = vst [vmem:[%s1711_s3 + $0x100] sm:$0xff] %v432_v2  ;;  %777 = vst [vmem:[%s1711_s3 + $0x110] sm:$0xff] %v625_v3  ;;  %v436_v10 = vadd.f32 %v435_v8, %v1188_v56  ;;  %v629_v11 = vadd.f32 %v628_v9, %v1190_v57  ;;  %v437_v12 = vpop.f32.mrb[19].mxu0  ;;  %v630_v13 = vpop.f32.mrb[19].mxu1 }
 0x119   :  { %776 = vst [vmem:[%s1711_s3 + $0x108] sm:$0xff] %v434_v6  ;;  %778 = vst [vmem:[%s1711_s3 + $0x118] sm:$0xff] %v627_v7  ;;  %v438_v14 = vadd.f32 %v437_v12, %v1192_v58  ;;  %v631_v15 = vadd.f32 %v630_v13, %v1194_v59 }
 0x11a   :  { %779 = vst [vmem:[%s1711_s3 + $0x120] sm:$0xff] %v436_v10  ;;  %781 = vst [vmem:[%s1711_s3 + $0x130] sm:$0xff] %v629_v11 }
 0x11b   :  { %780 = vst [vmem:[%s1711_s3 + $0x128] sm:$0xff] %v438_v14  ;;  %782 = vst [vmem:[%s1711_s3 + $0x138] sm:$0xff] %v631_v15 }
 0x11d   :  { %v441_v16 = vpop.f32.mrb[20].mxu0  ;;  %v634_v17 = vpop.f32.mrb[20].mxu1 }
 0x11e   :  { %v442_v18 = vadd.f32 %v441_v16, %v1188_v56  ;;  %v635_v19 = vadd.f32 %v634_v17, %v1190_v57  ;;  %v443_v20 = vpop.f32.mrb[21].mxu0  ;;  %v636_v21 = vpop.f32.mrb[21].mxu1 }
 0x11f   :  { %v444_v22 = vadd.f32 %v443_v20, %v1192_v58  ;;  %v637_v23 = vadd.f32 %v636_v21, %v1194_v59  ;;  %v445_v24 = vpop.f32.mrb[22].mxu0  ;;  %v638_v25 = vpop.f32.mrb[22].mxu1 }
 0x120   :  { %783 = vst [vmem:[%s1711_s3 + $0x140] sm:$0xff] %v442_v18  ;;  %785 = vst [vmem:[%s1711_s3 + $0x150] sm:$0xff] %v635_v19  ;;  %v446_v26 = vadd.f32 %v445_v24, %v1188_v56  ;;  %v639_v27 = vadd.f32 %v638_v25, %v1190_v57  ;;  %v447_v28 = vpop.f32.mrb[23].mxu0  ;;  %v640_v29 = vpop.f32.mrb[23].mxu1 }
 0x121   :  { %784 = vst [vmem:[%s1711_s3 + $0x148] sm:$0xff] %v444_v22  ;;  %786 = vst [vmem:[%s1711_s3 + $0x158] sm:$0xff] %v637_v23  ;;  %v448_v30 = vadd.f32 %v447_v28, %v1192_v58  ;;  %v641_v31 = vadd.f32 %v640_v29, %v1194_v59 }
 0x122   :  { %787 = vst [vmem:[%s1711_s3 + $0x160] sm:$0xff] %v446_v26  ;;  %789 = vst [vmem:[%s1711_s3 + $0x170] sm:$0xff] %v639_v27 }
 0x123   :  { %788 = vst [vmem:[%s1711_s3 + $0x168] sm:$0xff] %v448_v30  ;;  %790 = vst [vmem:[%s1711_s3 + $0x178] sm:$0xff] %v641_v31 }
 0x125   :  { %v451_v32 = vpop.f32.mrb[24].mxu0  ;;  %v644_v33 = vpop.f32.mrb[24].mxu1 }
 0x126   :  { %v452_v34 = vadd.f32 %v451_v32, %v1188_v56  ;;  %v645_v35 = vadd.f32 %v644_v33, %v1190_v57  ;;  %v453_v36 = vpop.f32.mrb[25].mxu0  ;;  %v646_v37 = vpop.f32.mrb[25].mxu1 }
 0x127   :  { %v454_v38 = vadd.f32 %v453_v36, %v1192_v58  ;;  %v647_v39 = vadd.f32 %v646_v37, %v1194_v59  ;;  %v455_v40 = vpop.f32.mrb[26].mxu0  ;;  %v648_v41 = vpop.f32.mrb[26].mxu1 }
 0x128   :  { %791 = vst [vmem:[%s1711_s3 + $0x180] sm:$0xff] %v452_v34  ;;  %793 = vst [vmem:[%s1711_s3 + $0x190] sm:$0xff] %v645_v35  ;;  %v456_v42 = vadd.f32 %v455_v40, %v1188_v56  ;;  %v649_v43 = vadd.f32 %v648_v41, %v1190_v57  ;;  %v457_v44 = vpop.f32.mrb[27].mxu0  ;;  %v650_v45 = vpop.f32.mrb[27].mxu1 }
 0x129   :  { %792 = vst [vmem:[%s1711_s3 + $0x188] sm:$0xff] %v454_v38  ;;  %794 = vst [vmem:[%s1711_s3 + $0x198] sm:$0xff] %v647_v39  ;;  %v458_v46 = vadd.f32 %v457_v44, %v1192_v58  ;;  %v651_v47 = vadd.f32 %v650_v45, %v1194_v59 }
 0x12a   :  { %795 = vst [vmem:[%s1711_s3 + $0x1a0] sm:$0xff] %v456_v42  ;;  %797 = vst [vmem:[%s1711_s3 + $0x1b0] sm:$0xff] %v649_v43 }
 0x12b   :  { %796 = vst [vmem:[%s1711_s3 + $0x1a8] sm:$0xff] %v458_v46  ;;  %798 = vst [vmem:[%s1711_s3 + $0x1b8] sm:$0xff] %v651_v47 }
 0x12d   :  { %v461_v48 = vpop.f32.mrb[28].mxu0  ;;  %v654_v49 = vpop.f32.mrb[28].mxu1 }
 0x12e   :  { %v462_v50 = vadd.f32 %v461_v48, %v1188_v56  ;;  %v655_v51 = vadd.f32 %v654_v49, %v1190_v57  ;;  %v463_v52 = vpop.f32.mrb[29].mxu0  ;;  %v656_v53 = vpop.f32.mrb[29].mxu1 }
 0x12f   :  { %v464_v54 = vadd.f32 %v463_v52, %v1192_v58  ;;  %v657_v55 = vadd.f32 %v656_v53, %v1194_v59  ;;  %v465_v60 = vpop.f32.mrb[30].mxu0  ;;  %v658_v61 = vpop.f32.mrb[30].mxu1 }
 0x130   :  { %799 = vst [vmem:[%s1711_s3 + $0x1c0] sm:$0xff] %v462_v50  ;;  %801 = vst [vmem:[%s1711_s3 + $0x1d0] sm:$0xff] %v655_v51  ;;  %v466_v62 = vadd.f32 %v465_v60, %v1188_v56  ;;  %v659_v63 = vadd.f32 %v658_v61, %v1190_v57  ;;  %v467_v0 = vpop.f32.mrb[31].mxu0  ;;  %v660_v1 = vpop.f32.mrb[31].mxu1 }
 0x131   :  { %800 = vst [vmem:[%s1711_s3 + $0x1c8] sm:$0xff] %v464_v54  ;;  %802 = vst [vmem:[%s1711_s3 + $0x1d8] sm:$0xff] %v657_v55  ;;  %v468_v2 = vadd.f32 %v467_v0, %v1192_v58  ;;  %v661_v3 = vadd.f32 %v660_v1, %v1194_v59 }
 0x132   :  { %803 = vst [vmem:[%s1711_s3 + $0x1e0] sm:$0xff] %v466_v62  ;;  %805 = vst [vmem:[%s1711_s3 + $0x1f0] sm:$0xff] %v659_v63 }
 0x133   :  { %804 = vst [vmem:[%s1711_s3 + $0x1e8] sm:$0xff] %v468_v2  ;;  %806 = vst [vmem:[%s1711_s3 + $0x1f8] sm:$0xff] %v661_v3 }
 0x135   :  { %v471_v4 = vpop.f32.mrb[32].mxu0  ;;  %v664_v5 = vpop.f32.mrb[32].mxu1 }
 0x136   :  { %v472_v6 = vadd.f32 %v471_v4, %v1188_v56  ;;  %v665_v7 = vadd.f32 %v664_v5, %v1190_v57  ;;  %v473_v8 = vpop.f32.mrb[33].mxu0  ;;  %v666_v9 = vpop.f32.mrb[33].mxu1 }
 0x137   :  { %v474_v10 = vadd.f32 %v473_v8, %v1192_v58  ;;  %v667_v11 = vadd.f32 %v666_v9, %v1194_v59  ;;  %v475_v12 = vpop.f32.mrb[34].mxu0  ;;  %v668_v13 = vpop.f32.mrb[34].mxu1 }
 0x138   :  { %807 = vst [vmem:[%s1711_s3 + $0x200] sm:$0xff] %v472_v6  ;;  %809 = vst [vmem:[%s1711_s3 + $0x210] sm:$0xff] %v665_v7  ;;  %v476_v14 = vadd.f32 %v475_v12, %v1188_v56  ;;  %v669_v15 = vadd.f32 %v668_v13, %v1190_v57  ;;  %v477_v16 = vpop.f32.mrb[35].mxu0  ;;  %v670_v17 = vpop.f32.mrb[35].mxu1 }
 0x139   :  { %808 = vst [vmem:[%s1711_s3 + $0x208] sm:$0xff] %v474_v10  ;;  %810 = vst [vmem:[%s1711_s3 + $0x218] sm:$0xff] %v667_v11  ;;  %v478_v18 = vadd.f32 %v477_v16, %v1192_v58  ;;  %v671_v19 = vadd.f32 %v670_v17, %v1194_v59 }
 0x13a   :  { %811 = vst [vmem:[%s1711_s3 + $0x220] sm:$0xff] %v476_v14  ;;  %813 = vst [vmem:[%s1711_s3 + $0x230] sm:$0xff] %v669_v15 }
 0x13b   :  { %812 = vst [vmem:[%s1711_s3 + $0x228] sm:$0xff] %v478_v18  ;;  %814 = vst [vmem:[%s1711_s3 + $0x238] sm:$0xff] %v671_v19 }
 0x13d   :  { %v481_v20 = vpop.f32.mrb[36].mxu0  ;;  %v674_v21 = vpop.f32.mrb[36].mxu1 }
 0x13e   :  { %v482_v22 = vadd.f32 %v481_v20, %v1188_v56  ;;  %v675_v23 = vadd.f32 %v674_v21, %v1190_v57  ;;  %v483_v24 = vpop.f32.mrb[37].mxu0  ;;  %v676_v25 = vpop.f32.mrb[37].mxu1 }
 0x13f   :  { %v484_v26 = vadd.f32 %v483_v24, %v1192_v58  ;;  %v677_v27 = vadd.f32 %v676_v25, %v1194_v59  ;;  %v485_v28 = vpop.f32.mrb[38].mxu0  ;;  %v678_v29 = vpop.f32.mrb[38].mxu1 }
 0x140   :  { %815 = vst [vmem:[%s1711_s3 + $0x240] sm:$0xff] %v482_v22  ;;  %817 = vst [vmem:[%s1711_s3 + $0x250] sm:$0xff] %v675_v23  ;;  %v486_v30 = vadd.f32 %v485_v28, %v1188_v56  ;;  %v679_v31 = vadd.f32 %v678_v29, %v1190_v57  ;;  %v487_v32 = vpop.f32.mrb[39].mxu0  ;;  %v680_v33 = vpop.f32.mrb[39].mxu1 }
 0x141   :  { %816 = vst [vmem:[%s1711_s3 + $0x248] sm:$0xff] %v484_v26  ;;  %818 = vst [vmem:[%s1711_s3 + $0x258] sm:$0xff] %v677_v27  ;;  %v488_v34 = vadd.f32 %v487_v32, %v1192_v58  ;;  %v681_v35 = vadd.f32 %v680_v33, %v1194_v59 }
 0x142   :  { %819 = vst [vmem:[%s1711_s3 + $0x260] sm:$0xff] %v486_v30  ;;  %821 = vst [vmem:[%s1711_s3 + $0x270] sm:$0xff] %v679_v31 }
 0x143   :  { %820 = vst [vmem:[%s1711_s3 + $0x268] sm:$0xff] %v488_v34  ;;  %822 = vst [vmem:[%s1711_s3 + $0x278] sm:$0xff] %v681_v35 }
 0x145   :  { %v491_v36 = vpop.f32.mrb[40].mxu0  ;;  %v684_v37 = vpop.f32.mrb[40].mxu1 }
 0x146   :  { %v492_v38 = vadd.f32 %v491_v36, %v1188_v56  ;;  %v685_v39 = vadd.f32 %v684_v37, %v1190_v57  ;;  %v493_v40 = vpop.f32.mrb[41].mxu0  ;;  %v686_v41 = vpop.f32.mrb[41].mxu1 }
 0x147   :  { %v494_v42 = vadd.f32 %v493_v40, %v1192_v58  ;;  %v687_v43 = vadd.f32 %v686_v41, %v1194_v59  ;;  %v495_v44 = vpop.f32.mrb[42].mxu0  ;;  %v688_v45 = vpop.f32.mrb[42].mxu1 }
 0x148   :  { %823 = vst [vmem:[%s1711_s3 + $0x280] sm:$0xff] %v492_v38  ;;  %825 = vst [vmem:[%s1711_s3 + $0x290] sm:$0xff] %v685_v39  ;;  %v496_v46 = vadd.f32 %v495_v44, %v1188_v56  ;;  %v689_v47 = vadd.f32 %v688_v45, %v1190_v57  ;;  %v497_v48 = vpop.f32.mrb[43].mxu0  ;;  %v690_v49 = vpop.f32.mrb[43].mxu1 }
 0x149   :  { %824 = vst [vmem:[%s1711_s3 + $0x288] sm:$0xff] %v494_v42  ;;  %826 = vst [vmem:[%s1711_s3 + $0x298] sm:$0xff] %v687_v43  ;;  %v498_v50 = vadd.f32 %v497_v48, %v1192_v58  ;;  %v691_v51 = vadd.f32 %v690_v49, %v1194_v59 }
 0x14a   :  { %827 = vst [vmem:[%s1711_s3 + $0x2a0] sm:$0xff] %v496_v46  ;;  %829 = vst [vmem:[%s1711_s3 + $0x2b0] sm:$0xff] %v689_v47 }
 0x14b   :  { %828 = vst [vmem:[%s1711_s3 + $0x2a8] sm:$0xff] %v498_v50  ;;  %830 = vst [vmem:[%s1711_s3 + $0x2b8] sm:$0xff] %v691_v51 }
 0x14d   :  { %v501_v52 = vpop.f32.mrb[44].mxu0  ;;  %v694_v53 = vpop.f32.mrb[44].mxu1 }
 0x14e   :  { %v502_v54 = vadd.f32 %v501_v52, %v1188_v56  ;;  %v695_v55 = vadd.f32 %v694_v53, %v1190_v57  ;;  %v503_v60 = vpop.f32.mrb[45].mxu0  ;;  %v696_v61 = vpop.f32.mrb[45].mxu1 }
 0x14f   :  { %v504_v62 = vadd.f32 %v503_v60, %v1192_v58  ;;  %v697_v63 = vadd.f32 %v696_v61, %v1194_v59  ;;  %v505_v0 = vpop.f32.mrb[46].mxu0  ;;  %v698_v1 = vpop.f32.mrb[46].mxu1 }
 0x150   :  { %831 = vst [vmem:[%s1711_s3 + $0x2c0] sm:$0xff] %v502_v54  ;;  %833 = vst [vmem:[%s1711_s3 + $0x2d0] sm:$0xff] %v695_v55  ;;  %v506_v2 = vadd.f32 %v505_v0, %v1188_v56  ;;  %v699_v3 = vadd.f32 %v698_v1, %v1190_v57  ;;  %v507_v4 = vpop.f32.mrb[47].mxu0  ;;  %v700_v5 = vpop.f32.mrb[47].mxu1 }
 0x151   :  { %832 = vst [vmem:[%s1711_s3 + $0x2c8] sm:$0xff] %v504_v62  ;;  %834 = vst [vmem:[%s1711_s3 + $0x2d8] sm:$0xff] %v697_v63  ;;  %v508_v6 = vadd.f32 %v507_v4, %v1192_v58  ;;  %v701_v7 = vadd.f32 %v700_v5, %v1194_v59 }
 0x152   :  { %835 = vst [vmem:[%s1711_s3 + $0x2e0] sm:$0xff] %v506_v2  ;;  %837 = vst [vmem:[%s1711_s3 + $0x2f0] sm:$0xff] %v699_v3 }
 0x153   :  { %836 = vst [vmem:[%s1711_s3 + $0x2e8] sm:$0xff] %v508_v6  ;;  %838 = vst [vmem:[%s1711_s3 + $0x2f8] sm:$0xff] %v701_v7 }
 0x155   :  { %v511_v8 = vpop.f32.mrb[48].mxu0  ;;  %v704_v9 = vpop.f32.mrb[48].mxu1 }
 0x156   :  { %v512_v10 = vadd.f32 %v511_v8, %v1188_v56  ;;  %v705_v11 = vadd.f32 %v704_v9, %v1190_v57  ;;  %v513_v12 = vpop.f32.mrb[49].mxu0  ;;  %v706_v13 = vpop.f32.mrb[49].mxu1 }
 0x157   :  { %v514_v14 = vadd.f32 %v513_v12, %v1192_v58  ;;  %v707_v15 = vadd.f32 %v706_v13, %v1194_v59  ;;  %v515_v16 = vpop.f32.mrb[50].mxu0  ;;  %v708_v17 = vpop.f32.mrb[50].mxu1 }
 0x158   :  { %839 = vst [vmem:[%s1711_s3 + $0x300] sm:$0xff] %v512_v10  ;;  %841 = vst [vmem:[%s1711_s3 + $0x310] sm:$0xff] %v705_v11  ;;  %v516_v18 = vadd.f32 %v515_v16, %v1188_v56  ;;  %v709_v19 = vadd.f32 %v708_v17, %v1190_v57  ;;  %v517_v20 = vpop.f32.mrb[51].mxu0  ;;  %v710_v21 = vpop.f32.mrb[51].mxu1 }
 0x159   :  { %840 = vst [vmem:[%s1711_s3 + $0x308] sm:$0xff] %v514_v14  ;;  %842 = vst [vmem:[%s1711_s3 + $0x318] sm:$0xff] %v707_v15  ;;  %v518_v22 = vadd.f32 %v517_v20, %v1192_v58  ;;  %v711_v23 = vadd.f32 %v710_v21, %v1194_v59 }
 0x15a   :  { %843 = vst [vmem:[%s1711_s3 + $0x320] sm:$0xff] %v516_v18  ;;  %845 = vst [vmem:[%s1711_s3 + $0x330] sm:$0xff] %v709_v19 }
 0x15b   :  { %844 = vst [vmem:[%s1711_s3 + $0x328] sm:$0xff] %v518_v22  ;;  %846 = vst [vmem:[%s1711_s3 + $0x338] sm:$0xff] %v711_v23 }
 0x15d   :  { %v521_v24 = vpop.f32.mrb[52].mxu0  ;;  %v714_v25 = vpop.f32.mrb[52].mxu1 }
 0x15e   :  { %v522_v26 = vadd.f32 %v521_v24, %v1188_v56  ;;  %v715_v27 = vadd.f32 %v714_v25, %v1190_v57  ;;  %v523_v28 = vpop.f32.mrb[53].mxu0  ;;  %v716_v29 = vpop.f32.mrb[53].mxu1 }
 0x15f   :  { %v524_v30 = vadd.f32 %v523_v28, %v1192_v58  ;;  %v717_v31 = vadd.f32 %v716_v29, %v1194_v59  ;;  %v525_v32 = vpop.f32.mrb[54].mxu0  ;;  %v718_v33 = vpop.f32.mrb[54].mxu1 }
 0x160   :  { %847 = vst [vmem:[%s1711_s3 + $0x340] sm:$0xff] %v522_v26  ;;  %849 = vst [vmem:[%s1711_s3 + $0x350] sm:$0xff] %v715_v27  ;;  %v526_v34 = vadd.f32 %v525_v32, %v1188_v56  ;;  %v719_v35 = vadd.f32 %v718_v33, %v1190_v57  ;;  %v527_v36 = vpop.f32.mrb[55].mxu0  ;;  %v720_v37 = vpop.f32.mrb[55].mxu1 }
 0x161   :  { %848 = vst [vmem:[%s1711_s3 + $0x348] sm:$0xff] %v524_v30  ;;  %850 = vst [vmem:[%s1711_s3 + $0x358] sm:$0xff] %v717_v31  ;;  %v528_v38 = vadd.f32 %v527_v36, %v1192_v58  ;;  %v721_v39 = vadd.f32 %v720_v37, %v1194_v59 }
 0x162   :  { %851 = vst [vmem:[%s1711_s3 + $0x360] sm:$0xff] %v526_v34  ;;  %853 = vst [vmem:[%s1711_s3 + $0x370] sm:$0xff] %v719_v35 }
 0x163   :  { %852 = vst [vmem:[%s1711_s3 + $0x368] sm:$0xff] %v528_v38  ;;  %854 = vst [vmem:[%s1711_s3 + $0x378] sm:$0xff] %v721_v39 }
 0x165   :  { %v531_v40 = vpop.f32.mrb[56].mxu0  ;;  %v724_v41 = vpop.f32.mrb[56].mxu1 }
 0x166   :  { %v532_v42 = vadd.f32 %v531_v40, %v1188_v56  ;;  %v725_v43 = vadd.f32 %v724_v41, %v1190_v57  ;;  %v533_v44 = vpop.f32.mrb[57].mxu0  ;;  %v726_v45 = vpop.f32.mrb[57].mxu1 }
 0x167   :  { %v534_v46 = vadd.f32 %v533_v44, %v1192_v58  ;;  %v727_v47 = vadd.f32 %v726_v45, %v1194_v59  ;;  %v535_v48 = vpop.f32.mrb[58].mxu0  ;;  %v728_v49 = vpop.f32.mrb[58].mxu1 }
 0x168   :  { %855 = vst [vmem:[%s1711_s3 + $0x380] sm:$0xff] %v532_v42  ;;  %857 = vst [vmem:[%s1711_s3 + $0x390] sm:$0xff] %v725_v43  ;;  %v536_v50 = vadd.f32 %v535_v48, %v1188_v56  ;;  %v729_v51 = vadd.f32 %v728_v49, %v1190_v57  ;;  %v537_v52 = vpop.f32.mrb[59].mxu0  ;;  %v730_v53 = vpop.f32.mrb[59].mxu1 }
 0x169   :  { %856 = vst [vmem:[%s1711_s3 + $0x388] sm:$0xff] %v534_v46  ;;  %858 = vst [vmem:[%s1711_s3 + $0x398] sm:$0xff] %v727_v47  ;;  %v538_v54 = vadd.f32 %v537_v52, %v1192_v58  ;;  %v731_v55 = vadd.f32 %v730_v53, %v1194_v59 }
 0x16a   :  { %859 = vst [vmem:[%s1711_s3 + $0x3a0] sm:$0xff] %v536_v50  ;;  %861 = vst [vmem:[%s1711_s3 + $0x3b0] sm:$0xff] %v729_v51 }
 0x16b   :  { %860 = vst [vmem:[%s1711_s3 + $0x3a8] sm:$0xff] %v538_v54  ;;  %862 = vst [vmem:[%s1711_s3 + $0x3b8] sm:$0xff] %v731_v55 }
 0x16d   :  { %v541_v60 = vpop.f32.mrb[60].mxu0  ;;  %v734_v61 = vpop.f32.mrb[60].mxu1 }
 0x16e   :  { %v542_v62 = vadd.f32 %v541_v60, %v1188_v56  ;;  %v735_v63 = vadd.f32 %v734_v61, %v1190_v57  ;;  %v543_v0 = vpop.f32.mrb[61].mxu0  ;;  %v736_v1 = vpop.f32.mrb[61].mxu1 }
 0x16f   :  { %v544_v2 = vadd.f32 %v543_v0, %v1192_v58  ;;  %v737_v3 = vadd.f32 %v736_v1, %v1194_v59  ;;  %v545_v4 = vpop.f32.mrb[62].mxu0  ;;  %v738_v5 = vpop.f32.mrb[62].mxu1 }
 0x170   :  { %863 = vst [vmem:[%s1711_s3 + $0x3c0] sm:$0xff] %v542_v62  ;;  %865 = vst [vmem:[%s1711_s3 + $0x3d0] sm:$0xff] %v735_v63  ;;  %v546_v6 = vadd.f32 %v545_v4, %v1188_v56  ;;  %v739_v7 = vadd.f32 %v738_v5, %v1190_v57  ;;  %v547_v8 = vpop.f32.mrb[63].mxu0  ;;  %v740_v9 = vpop.f32.mrb[63].mxu1 }
 0x171   :  { %864 = vst [vmem:[%s1711_s3 + $0x3c8] sm:$0xff] %v544_v2  ;;  %866 = vst [vmem:[%s1711_s3 + $0x3d8] sm:$0xff] %v737_v3  ;;  %v548_v10 = vadd.f32 %v547_v8, %v1192_v58  ;;  %v741_v11 = vadd.f32 %v740_v9, %v1194_v59 }
 0x172   :  { %867 = vst [vmem:[%s1711_s3 + $0x3e0] sm:$0xff] %v546_v6  ;;  %869 = vst [vmem:[%s1711_s3 + $0x3f0] sm:$0xff] %v739_v7 }
 0x173   :  { %868 = vst [vmem:[%s1711_s3 + $0x3e8] sm:$0xff] %v548_v10  ;;  %870 = vst [vmem:[%s1711_s3 + $0x3f8] sm:$0xff] %v741_v11 }

// kernel: net_forward.163
= control target key start
LH: loop header
LB: loop body
LE: loop exit
PB: predicated region body
PF: predicated region fallthrough
CT: control target
= control target key end

     0   :  { %s1077_s1 = inlined_call_operand.vmem [shape: bf16[256,128], index: 1, kind: input, shape index: {}]   ;;  %s1078_s0 = inlined_call_operand.vmem [shape: bf16[256,256], index: 0, kind: input, shape index: {}]   ;;  %s1079_s2 = inlined_call_operand.vmem [shape: f32[1,128], index: 2, kind: input, shape index: {}]   ;;  %s1080_s3 = inlined_call_operand.vmem [shape: f32[256,128], index: 3, kind: output, shape index: {}]  }
   0x1   :  { %v716_v0 = vld [vmem:[%s1077_s1 + $0x40] sm:$0xff]   ;;  %v718_v2 = vld [vmem:[%s1077_s1 + $0x48] sm:$0xff]   ;;  %v720_v4 = vld [vmem:[%s1077_s1 + $0x50] sm:$0xff]  }
   0x2   :  { %v717_v1 = vld [vmem:[%s1077_s1] sm:$0xff]   ;;  %588 = vmatprep.subr.bf16.mxu0 %v716_v0  ;;  %700 = vmatprep.subr.bf16.mxu1 %v716_v0  ;;  %v719_v3 = vld [vmem:[%s1077_s1 + $0x8] sm:$0xff]   ;;  %v721_v5 = vld [vmem:[%s1077_s1 + $0x10] sm:$0xff]  }
   0x3   :  { %589 = vmatpush3.bf16.msra.mxu0 %v717_v1  ;;  %708 = vmatpush3.bf16.msra.mxu1 %v717_v1  ;;  %v722_v6 = vld [vmem:[%s1077_s1 + $0x58] sm:$0xff]   ;;  %v724_v8 = vld [vmem:[%s1077_s1 + $0x60] sm:$0xff]   ;;  %v726_v10 = vld [vmem:[%s1077_s1 + $0x68] sm:$0xff]  }
   0x4   :  { %590 = vmatprep.subr.bf16.mxu0 %v718_v2  ;;  %701 = vmatprep.subr.bf16.mxu1 %v718_v2  ;;  %v723_v7 = vld [vmem:[%s1077_s1 + $0x18] sm:$0xff]   ;;  %v725_v9 = vld [vmem:[%s1077_s1 + $0x20] sm:$0xff]   ;;  %v727_v13 = vld [vmem:[%s1077_s1 + $0x28] sm:$0xff]  }
   0x5   :  { %v734_v11 = vld [vmem:[%s1078_s0 + $0x4] ss:$8 sps:$4 sm:$0xff]   ;;  %v728_v14 = vld [vmem:[%s1077_s1 + $0x70] sm:$0xff]   ;;  %v730_v16 = vld [vmem:[%s1077_s1 + $0x78] sm:$0xff]  }
   0x6   :  { %v737_v12 = vld [vmem:[%s1078_s0 + $0x84] ss:$8 sps:$4 sm:$0xff]   ;;  %374 = vmatprep.mubr.bf16.mxu0 %v734_v11  ;;  %v729_v15 = vld [vmem:[%s1077_s1 + $0x30] sm:$0xff]   ;;  %v731_v17 = vld [vmem:[%s1077_s1 + $0x38] sm:$0xff]  }
   0x7   :  { %591 = vmatpush3.bf16.msra.mxu0 %v719_v3  ;;  %709 = vmatpush3.bf16.msra.mxu1 %v719_v3  ;;  %v732_v18 = vld [vmem:[%s1078_s0] ss:$8 sps:$4 sm:$0xff]   ;;  %v738_v20 = vld [vmem:[%s1078_s0 + $0x14] ss:$8 sps:$4 sm:$0xff]   ;;  %v742_v22 = vld [vmem:[%s1078_s0 + $0x10] ss:$8 sps:$4 sm:$0xff]  }
   0x8   :  { %592 = vmatprep.subr.bf16.mxu0 %v720_v4  ;;  %702 = vmatprep.subr.bf16.mxu1 %v720_v4  ;;  %v735_v19 = vld [vmem:[%s1078_s0 + $0x80] ss:$8 sps:$4 sm:$0xff]   ;;  %v740_v21 = vld [vmem:[%s1078_s0 + $0x94] ss:$8 sps:$4 sm:$0xff]   ;;  %v743_v23 = vld [vmem:[%s1078_s0 + $0x90] ss:$8 sps:$4 sm:$0xff]  }
   0x9   :  { %438 = vmatprep.mubr.bf16.mxu1 %v737_v12  ;;  %v744_v24 = vld [vmem:[%s1078_s0 + $0x24] ss:$8 sps:$4 sm:$0xff]   ;;  %v748_v26 = vld [vmem:[%s1078_s0 + $0x20] ss:$8 sps:$4 sm:$0xff]   ;;  %v750_v28 = vld [vmem:[%s1078_s0 + $0x34] ss:$8 sps:$4 sm:$0xff]  }
   0xa   :  { %v746_v25 = vld [vmem:[%s1078_s0 + $0xa4] ss:$8 sps:$4 sm:$0xff]   ;;  %v749_v27 = vld [vmem:[%s1078_s0 + $0xa0] ss:$8 sps:$4 sm:$0xff]   ;;  %v752_v29 = vld [vmem:[%s1078_s0 + $0xb4] ss:$8 sps:$4 sm:$0xff]  }
   0xb   :  { %593 = vmatpush3.bf16.msra.mxu0 %v721_v5  ;;  %710 = vmatpush3.bf16.msra.mxu1 %v721_v5  ;;  %v754_v30 = vld [vmem:[%s1078_s0 + $0x30] ss:$8 sps:$4 sm:$0xff]   ;;  %v756_v32 = vld [vmem:[%s1078_s0 + $0x44] ss:$8 sps:$4 sm:$0xff]   ;;  %v760_v34 = vld [vmem:[%s1078_s0 + $0x40] ss:$8 sps:$4 sm:$0xff]  }
   0xc   :  { %594 = vmatprep.subr.bf16.mxu0 %v722_v6  ;;  %703 = vmatprep.subr.bf16.mxu1 %v722_v6  ;;  %v755_v31 = vld [vmem:[%s1078_s0 + $0xb0] ss:$8 sps:$4 sm:$0xff]   ;;  %v758_v33 = vld [vmem:[%s1078_s0 + $0xc4] ss:$8 sps:$4 sm:$0xff]   ;;  %v761_v35 = vld [vmem:[%s1078_s0 + $0xc0] ss:$8 sps:$4 sm:$0xff]  }
   0xd   :  { %v762_v36 = vld [vmem:[%s1078_s0 + $0x54] ss:$8 sps:$4 sm:$0xff]   ;;  %v766_v38 = vld [vmem:[%s1078_s0 + $0x50] ss:$8 sps:$4 sm:$0xff]   ;;  %v768_v40 = vld [vmem:[%s1078_s0 + $0x64] ss:$8 sps:$4 sm:$0xff]  }
   0xe   :  { %v764_v37 = vld [vmem:[%s1078_s0 + $0xd4] ss:$8 sps:$4 sm:$0xff]   ;;  %v767_v39 = vld [vmem:[%s1078_s0 + $0xd0] ss:$8 sps:$4 sm:$0xff]   ;;  %v770_v41 = vld [vmem:[%s1078_s0 + $0xe4] ss:$8 sps:$4 sm:$0xff]  }
   0xf   :  { %595 = vmatpush3.bf16.msra.mxu0 %v723_v7  ;;  %711 = vmatpush3.bf16.msra.mxu1 %v723_v7  ;;  %v772_v42 = vld [vmem:[%s1078_s0 + $0x60] ss:$8 sps:$4 sm:$0xff]   ;;  %v774_v44 = vld [vmem:[%s1078_s0 + $0x74] ss:$8 sps:$4 sm:$0xff]   ;;  %v778_v46 = vld [vmem:[%s1078_s0 + $0x70] ss:$8 sps:$4 sm:$0xff]  }
  0x10   :  { %596 = vmatprep.subr.bf16.mxu0 %v724_v8  ;;  %704 = vmatprep.subr.bf16.mxu1 %v724_v8  ;;  %v773_v43 = vld [vmem:[%s1078_s0 + $0xe0] ss:$8 sps:$4 sm:$0xff]   ;;  %v776_v45 = vld [vmem:[%s1078_s0 + $0xf4] ss:$8 sps:$4 sm:$0xff]   ;;  %v779_v47 = vld [vmem:[%s1078_s0 + $0xf0] ss:$8 sps:$4 sm:$0xff]  }
  0x11   :  { %v947_v50 = vld [vmem:[%s1079_s2] ss:$0 sm:$0xff] }
  0x13   :  { %597 = vmatpush3.bf16.msra.mxu0 %v725_v9  ;;  %712 = vmatpush3.bf16.msra.mxu1 %v725_v9 }
  0x14   :  { %598 = vmatprep.subr.bf16.mxu0 %v726_v10  ;;  %705 = vmatprep.subr.bf16.mxu1 %v726_v10 }
  0x17   :  { %599 = vmatpush3.bf16.msra.mxu0 %v727_v13  ;;  %713 = vmatpush3.bf16.msra.mxu1 %v727_v13 }
  0x18   :  { %600 = vmatprep.subr.bf16.mxu0 %v728_v14  ;;  %706 = vmatprep.subr.bf16.mxu1 %v728_v14 }
  0x1b   :  { %601 = vmatpush3.bf16.msra.mxu0 %v729_v15  ;;  %714 = vmatpush3.bf16.msra.mxu1 %v729_v15 }
  0x1c   :  { %602 = vmatprep.subr.bf16.mxu0 %v730_v16  ;;  %707 = vmatprep.subr.bf16.mxu1 %v730_v16 }
  0x1f   :  { %603 = vmatpush3.bf16.msra.mxu0 %v731_v17  ;;  %715 = vmatpush3.bf16.msra.mxu1 %v731_v17 }
  0x22   :  { %375 = vmatmul.mubr.bf16.vlgmr.msra.gmra.mrb[0].mxu0 %v732_v18  ;;  %439 = vmatmul.mubr.bf16.vlgmr.msra.gmra.mrb[0].mxu1 %v735_v19 }
  0x23   :  { %382 = vmatprep.mubr.bf16.mxu0 %v738_v20  ;;  %446 = vmatprep.mubr.bf16.mxu1 %v740_v21 }
  0x2a   :  { %383 = vmatmul.mubr.bf16.gmra.mrb[4].mxu0 %v742_v22  ;;  %447 = vmatmul.mubr.bf16.gmra.mrb[4].mxu1 %v743_v23 }
  0x2b   :  { %390 = vmatprep.mubr.bf16.mxu0 %v744_v24  ;;  %454 = vmatprep.mubr.bf16.mxu1 %v746_v25 }
  0x32   :  { %391 = vmatmul.mubr.bf16.gmra.mrb[8].mxu0 %v748_v26  ;;  %455 = vmatmul.mubr.bf16.gmra.mrb[8].mxu1 %v749_v27 }
  0x33   :  { %398 = vmatprep.mubr.bf16.mxu0 %v750_v28  ;;  %462 = vmatprep.mubr.bf16.mxu1 %v752_v29 }
  0x3a   :  { %399 = vmatmul.mubr.bf16.gmra.mrb[12].mxu0 %v754_v30  ;;  %463 = vmatmul.mubr.bf16.gmra.mrb[12].mxu1 %v755_v31 }
  0x3b   :  { %406 = vmatprep.mubr.bf16.mxu0 %v756_v32  ;;  %470 = vmatprep.mubr.bf16.mxu1 %v758_v33 }
  0x42   :  { %407 = vmatmul.mubr.bf16.gmra.mrb[16].mxu0 %v760_v34  ;;  %471 = vmatmul.mubr.bf16.gmra.mrb[16].mxu1 %v761_v35 }
  0x43   :  { %414 = vmatprep.mubr.bf16.mxu0 %v762_v36  ;;  %478 = vmatprep.mubr.bf16.mxu1 %v764_v37 }
  0x4a   :  { %415 = vmatmul.mubr.bf16.gmra.mrb[20].mxu0 %v766_v38  ;;  %479 = vmatmul.mubr.bf16.gmra.mrb[20].mxu1 %v767_v39 }
  0x4b   :  { %422 = vmatprep.mubr.bf16.mxu0 %v768_v40  ;;  %486 = vmatprep.mubr.bf16.mxu1 %v770_v41 }
  0x52   :  { %423 = vmatmul.mubr.bf16.gmra.mrb[24].mxu0 %v772_v42  ;;  %487 = vmatmul.mubr.bf16.gmra.mrb[24].mxu1 %v773_v43 }
  0x53   :  { %430 = vmatprep.mubr.bf16.mxu0 %v774_v44  ;;  %494 = vmatprep.mubr.bf16.mxu1 %v776_v45 }
  0x5a   :  { %431 = vmatmul.mubr.bf16.gmra.mrb[28].mxu0 %v778_v46  ;;  %495 = vmatmul.mubr.bf16.gmra.mrb[28].mxu1 %v779_v47 }
  0xf5   :  { %v604_v48 = vpop.f32.mrb[0].mxu0  ;;  %v652_v49 = vpop.f32.mrb[0].mxu1 }
  0xf6   :  { %v605_v51 = vpop.f32.mrb[1].mxu0  ;;  %v653_v52 = vpop.f32.mrb[1].mxu1 }
  0xf7   :  { %v606_v53 = vadd.f32 %v605_v51, %v604_v48  ;;  %v654_v54 = vadd.f32 %v653_v52, %v652_v49  ;;  %v607_v55 = vpop.f32.mrb[2].mxu0  ;;  %v655_v56 = vpop.f32.mrb[2].mxu1 }
  0xf8   :  { %v608_v57 = vpop.f32.mrb[3].mxu0  ;;  %v656_v58 = vpop.f32.mrb[3].mxu1 }
  0xf9   :  { %v377_v59 = vadd.f32 %v606_v53, %v947_v50  ;;  %v441_v60 = vadd.f32 %v654_v54, %v947_v50  ;;  %v609_v61 = vadd.f32 %v608_v57, %v607_v55  ;;  %v657_v62 = vadd.f32 %v656_v58, %v655_v56 }
  0xfb   :  { %503 = vst [vmem:[%s1080_s3] sm:$0xff] %v377_v59  ;;  %519 = vst [vmem:[%s1080_s3 + $0x80] sm:$0xff] %v441_v60  ;;  %v380_v63 = vadd.f32 %v609_v61, %v947_v50  ;;  %v444_v0 = vadd.f32 %v657_v62, %v947_v50 }
  0xfd   :  { %504 = vst [vmem:[%s1080_s3 + $0x8] sm:$0xff] %v380_v63  ;;  %520 = vst [vmem:[%s1080_s3 + $0x88] sm:$0xff] %v444_v0  ;;  %v610_v1 = vpop.f32.mrb[4].mxu0  ;;  %v658_v2 = vpop.f32.mrb[4].mxu1 }
  0xfe   :  { %v611_v3 = vpop.f32.mrb[5].mxu0  ;;  %v659_v4 = vpop.f32.mrb[5].mxu1 }
  0xff   :  { %v612_v5 = vadd.f32 %v611_v3, %v610_v1  ;;  %v660_v6 = vadd.f32 %v659_v4, %v658_v2  ;;  %v613_v7 = vpop.f32.mrb[6].mxu0  ;;  %v661_v8 = vpop.f32.mrb[6].mxu1 }
 0x100   :  { %v614_v9 = vpop.f32.mrb[7].mxu0  ;;  %v662_v10 = vpop.f32.mrb[7].mxu1 }
 0x101   :  { %v385_v11 = vadd.f32 %v612_v5, %v947_v50  ;;  %v449_v12 = vadd.f32 %v660_v6, %v947_v50  ;;  %v615_v13 = vadd.f32 %v614_v9, %v613_v7  ;;  %v663_v14 = vadd.f32 %v662_v10, %v661_v8 }
 0x103   :  { %505 = vst [vmem:[%s1080_s3 + $0x10] sm:$0xff] %v385_v11  ;;  %521 = vst [vmem:[%s1080_s3 + $0x90] sm:$0xff] %v449_v12  ;;  %v388_v15 = vadd.f32 %v615_v13, %v947_v50  ;;  %v452_v16 = vadd.f32 %v663_v14, %v947_v50 }
 0x105   :  { %506 = vst [vmem:[%s1080_s3 + $0x18] sm:$0xff] %v388_v15  ;;  %522 = vst [vmem:[%s1080_s3 + $0x98] sm:$0xff] %v452_v16  ;;  %v616_v17 = vpop.f32.mrb[8].mxu0  ;;  %v664_v18 = vpop.f32.mrb[8].mxu1 }
 0x106   :  { %v617_v19 = vpop.f32.mrb[9].mxu0  ;;  %v665_v20 = vpop.f32.mrb[9].mxu1 }
 0x107   :  { %v618_v21 = vadd.f32 %v617_v19, %v616_v17  ;;  %v666_v22 = vadd.f32 %v665_v20, %v664_v18  ;;  %v619_v23 = vpop.f32.mrb[10].mxu0  ;;  %v667_v24 = vpop.f32.mrb[10].mxu1 }
 0x108   :  { %v620_v25 = vpop.f32.mrb[11].mxu0  ;;  %v668_v26 = vpop.f32.mrb[11].mxu1 }
 0x109   :  { %v393_v27 = vadd.f32 %v618_v21, %v947_v50  ;;  %v457_v28 = vadd.f32 %v666_v22, %v947_v50  ;;  %v621_v29 = vadd.f32 %v620_v25, %v619_v23  ;;  %v669_v30 = vadd.f32 %v668_v26, %v667_v24 }
 0x10b   :  { %507 = vst [vmem:[%s1080_s3 + $0x20] sm:$0xff] %v393_v27  ;;  %523 = vst [vmem:[%s1080_s3 + $0xa0] sm:$0xff] %v457_v28  ;;  %v396_v31 = vadd.f32 %v621_v29, %v947_v50  ;;  %v460_v32 = vadd.f32 %v669_v30, %v947_v50 }
 0x10d   :  { %508 = vst [vmem:[%s1080_s3 + $0x28] sm:$0xff] %v396_v31  ;;  %524 = vst [vmem:[%s1080_s3 + $0xa8] sm:$0xff] %v460_v32  ;;  %v622_v33 = vpop.f32.mrb[12].mxu0  ;;  %v670_v34 = vpop.f32.mrb[12].mxu1 }
 0x10e   :  { %v623_v35 = vpop.f32.mrb[13].mxu0  ;;  %v671_v36 = vpop.f32.mrb[13].mxu1 }
 0x10f   :  { %v624_v37 = vadd.f32 %v623_v35, %v622_v33  ;;  %v672_v38 = vadd.f32 %v671_v36, %v670_v34  ;;  %v625_v39 = vpop.f32.mrb[14].mxu0  ;;  %v673_v40 = vpop.f32.mrb[14].mxu1 }
 0x110   :  { %v626_v41 = vpop.f32.mrb[15].mxu0  ;;  %v674_v42 = vpop.f32.mrb[15].mxu1 }
 0x111   :  { %v401_v43 = vadd.f32 %v624_v37, %v947_v50  ;;  %v465_v44 = vadd.f32 %v672_v38, %v947_v50  ;;  %v627_v45 = vadd.f32 %v626_v41, %v625_v39  ;;  %v675_v46 = vadd.f32 %v674_v42, %v673_v40 }
 0x113   :  { %509 = vst [vmem:[%s1080_s3 + $0x30] sm:$0xff] %v401_v43  ;;  %525 = vst [vmem:[%s1080_s3 + $0xb0] sm:$0xff] %v465_v44  ;;  %v404_v47 = vadd.f32 %v627_v45, %v947_v50  ;;  %v468_v48 = vadd.f32 %v675_v46, %v947_v50 }
 0x115   :  { %510 = vst [vmem:[%s1080_s3 + $0x38] sm:$0xff] %v404_v47  ;;  %526 = vst [vmem:[%s1080_s3 + $0xb8] sm:$0xff] %v468_v48  ;;  %v628_v49 = vpop.f32.mrb[16].mxu0  ;;  %v676_v51 = vpop.f32.mrb[16].mxu1 }
 0x116   :  { %v629_v52 = vpop.f32.mrb[17].mxu0  ;;  %v677_v53 = vpop.f32.mrb[17].mxu1 }
 0x117   :  { %v630_v54 = vadd.f32 %v629_v52, %v628_v49  ;;  %v678_v55 = vadd.f32 %v677_v53, %v676_v51  ;;  %v631_v56 = vpop.f32.mrb[18].mxu0  ;;  %v679_v57 = vpop.f32.mrb[18].mxu1 }
 0x118   :  { %v632_v58 = vpop.f32.mrb[19].mxu0  ;;  %v680_v59 = vpop.f32.mrb[19].mxu1 }
 0x119   :  { %v409_v60 = vadd.f32 %v630_v54, %v947_v50  ;;  %v473_v61 = vadd.f32 %v678_v55, %v947_v50  ;;  %v633_v62 = vadd.f32 %v632_v58, %v631_v56  ;;  %v681_v63 = vadd.f32 %v680_v59, %v679_v57 }
 0x11b   :  { %511 = vst [vmem:[%s1080_s3 + $0x40] sm:$0xff] %v409_v60  ;;  %527 = vst [vmem:[%s1080_s3 + $0xc0] sm:$0xff] %v473_v61  ;;  %v412_v0 = vadd.f32 %v633_v62, %v947_v50  ;;  %v476_v1 = vadd.f32 %v681_v63, %v947_v50 }
 0x11d   :  { %512 = vst [vmem:[%s1080_s3 + $0x48] sm:$0xff] %v412_v0  ;;  %528 = vst [vmem:[%s1080_s3 + $0xc8] sm:$0xff] %v476_v1  ;;  %v634_v2 = vpop.f32.mrb[20].mxu0  ;;  %v682_v3 = vpop.f32.mrb[20].mxu1 }
 0x11e   :  { %v635_v4 = vpop.f32.mrb[21].mxu0  ;;  %v683_v5 = vpop.f32.mrb[21].mxu1 }
 0x11f   :  { %v636_v6 = vadd.f32 %v635_v4, %v634_v2  ;;  %v684_v7 = vadd.f32 %v683_v5, %v682_v3  ;;  %v637_v8 = vpop.f32.mrb[22].mxu0  ;;  %v685_v9 = vpop.f32.mrb[22].mxu1 }
 0x120   :  { %v638_v10 = vpop.f32.mrb[23].mxu0  ;;  %v686_v11 = vpop.f32.mrb[23].mxu1 }
 0x121   :  { %v417_v12 = vadd.f32 %v636_v6, %v947_v50  ;;  %v481_v13 = vadd.f32 %v684_v7, %v947_v50  ;;  %v639_v14 = vadd.f32 %v638_v10, %v637_v8  ;;  %v687_v15 = vadd.f32 %v686_v11, %v685_v9 }
 0x123   :  { %513 = vst [vmem:[%s1080_s3 + $0x50] sm:$0xff] %v417_v12  ;;  %529 = vst [vmem:[%s1080_s3 + $0xd0] sm:$0xff] %v481_v13  ;;  %v420_v16 = vadd.f32 %v639_v14, %v947_v50  ;;  %v484_v17 = vadd.f32 %v687_v15, %v947_v50 }
 0x125   :  { %514 = vst [vmem:[%s1080_s3 + $0x58] sm:$0xff] %v420_v16  ;;  %530 = vst [vmem:[%s1080_s3 + $0xd8] sm:$0xff] %v484_v17  ;;  %v640_v18 = vpop.f32.mrb[24].mxu0  ;;  %v688_v19 = vpop.f32.mrb[24].mxu1 }
 0x126   :  { %v641_v20 = vpop.f32.mrb[25].mxu0  ;;  %v689_v21 = vpop.f32.mrb[25].mxu1 }
 0x127   :  { %v642_v22 = vadd.f32 %v641_v20, %v640_v18  ;;  %v690_v23 = vadd.f32 %v689_v21, %v688_v19  ;;  %v643_v24 = vpop.f32.mrb[26].mxu0  ;;  %v691_v25 = vpop.f32.mrb[26].mxu1 }
 0x128   :  { %v644_v26 = vpop.f32.mrb[27].mxu0  ;;  %v692_v27 = vpop.f32.mrb[27].mxu1 }
 0x129   :  { %v425_v28 = vadd.f32 %v642_v22, %v947_v50  ;;  %v489_v29 = vadd.f32 %v690_v23, %v947_v50  ;;  %v645_v30 = vadd.f32 %v644_v26, %v643_v24  ;;  %v693_v31 = vadd.f32 %v692_v27, %v691_v25 }
 0x12b   :  { %515 = vst [vmem:[%s1080_s3 + $0x60] sm:$0xff] %v425_v28  ;;  %531 = vst [vmem:[%s1080_s3 + $0xe0] sm:$0xff] %v489_v29  ;;  %v428_v32 = vadd.f32 %v645_v30, %v947_v50  ;;  %v492_v33 = vadd.f32 %v693_v31, %v947_v50 }
 0x12d   :  { %516 = vst [vmem:[%s1080_s3 + $0x68] sm:$0xff] %v428_v32  ;;  %532 = vst [vmem:[%s1080_s3 + $0xe8] sm:$0xff] %v492_v33  ;;  %v646_v34 = vpop.f32.mrb[28].mxu0  ;;  %v694_v35 = vpop.f32.mrb[28].mxu1 }
 0x12e   :  { %v647_v36 = vpop.f32.mrb[29].mxu0  ;;  %v695_v37 = vpop.f32.mrb[29].mxu1 }
 0x12f   :  { %v648_v38 = vadd.f32 %v647_v36, %v646_v34  ;;  %v696_v39 = vadd.f32 %v695_v37, %v694_v35  ;;  %v649_v40 = vpop.f32.mrb[30].mxu0  ;;  %v697_v41 = vpop.f32.mrb[30].mxu1 }
 0x130   :  { %v650_v42 = vpop.f32.mrb[31].mxu0  ;;  %v698_v43 = vpop.f32.mrb[31].mxu1 }
 0x131   :  { %v433_v44 = vadd.f32 %v648_v38, %v947_v50  ;;  %v497_v45 = vadd.f32 %v696_v39, %v947_v50  ;;  %v651_v46 = vadd.f32 %v650_v42, %v649_v40  ;;  %v699_v47 = vadd.f32 %v698_v43, %v697_v41 }
 0x133   :  { %517 = vst [vmem:[%s1080_s3 + $0x70] sm:$0xff] %v433_v44  ;;  %533 = vst [vmem:[%s1080_s3 + $0xf0] sm:$0xff] %v497_v45  ;;  %v436_v48 = vadd.f32 %v651_v46, %v947_v50  ;;  %v500_v49 = vadd.f32 %v699_v47, %v947_v50 }
 0x135   :  { %518 = vst [vmem:[%s1080_s3 + $0x78] sm:$0xff] %v436_v48  ;;  %534 = vst [vmem:[%s1080_s3 + $0xf8] sm:$0xff] %v500_v49 }

</bundles_post_ra>
